<compile_context>
chip_gen: v5e
topology: v5e:2x2
jax: 0.10.0
libtpu: 0.0.40
codegen_flags: <defaults>
</compile_context>

<pallas_src>
import math

import numpy as np
import jax
import jax.numpy as jnp
from jax import lax
from jax.experimental import pallas as pl
from jax.experimental.pallas import tpu as pltpu

# ----------------------- model hyper-parameters (small) ----------------------
IN_CHANNELS = 4
PATCH = 2
PD = IN_CHANNELS * PATCH * PATCH                # 16 (patch feature dim)
HIDDEN = 64
HEADS = 4
HEAD_DIM = HIDDEN // HEADS                      # 16
NUM_BLOCKS = 2
NUM_CLASSES = 10
FREQ_EMB = 256
MLP_HIDDEN = int(2 * int(HIDDEN * 4.0) / 3)     # 170
MLP_PAD = 256                                   # padded to a 128 multiple
OUT_PAD = 128                                   # lane-dense output width
EPS = 1e-6
ATTN_SCALE = 1.0 / math.sqrt(HEAD_DIM)
PER_BLOCK_ARGS = 14
MOD_ROWS = 6 * NUM_BLOCKS + 2


def _silu(x):
    return x * jax.nn.sigmoid(x)


# ============================== fused Pallas kernel ==========================
def _dit_fused_kernel(xs_ref, mods_ref, seg_ref, xw_ref, xb_ref,
                      flw_ref, flb_ref, *rest):
    """One grid step = (B / grid) batch elements; everything stays in VMEM."""
    f32 = jnp.float32
    C = HIDDEN
    blk_refs = rest[:PER_BLOCK_ARGS * NUM_BLOCKS]
    out_ref = rest[-1]

    rows = xs_ref.shape[0]
    bps = mods_ref.shape[0]              # batch elements folded into this step
    Lb = rows // bps

    def bc_batch(v):                     # (bps, C) -> broadcast against (rows, C)
        if bps == 1:
            return v
        return jnp.broadcast_to(v[:, None, :], (bps, Lb, C)).reshape(rows, C)

    def bc_tok(tbl):                     # (Lb, C) per-token table -> (rows, C)
        if bps == 1:
            return tbl
        return jnp.broadcast_to(tbl[None, :, :], (bps, Lb, C)).reshape(rows, C)

    mods = mods_ref[...].astype(f32)     # (bps, MOD_ROWS, C)
    seg = seg_ref[...]                   # (C, C) same-head averaging matrix

    # ---- patch embedding: all bps*L token rows folded into one matmul M dim
    h = jnp.dot(xs_ref[...].astype(f32), xw_ref[...],
                preferred_element_type=f32) + xb_ref[...]          # (rows, C)

    for blk in range(NUM_BLOCKS):
        (wq, wqp, wk, wkp, wv, pw_ref, pb_ref, w1, w3, w2,
         aq, bq, ak, bk) = blk_refs[PER_BLOCK_ARGS * blk:
                                    PER_BLOCK_ARGS * (blk + 1)]
        base = 6 * blk
        sh1 = bc_batch(mods[:, base + 0, :])
        sc1 = bc_batch(mods[:, base + 1, :])     # = norm1_w * (1 + scale_msa)
        g1 = bc_batch(mods[:, base + 2, :])
        sh2 = bc_batch(mods[:, base + 3, :])
        sc2 = bc_batch(mods[:, base + 4, :])     # = norm2_w * (1 + scale_mlp)
        g2 = bc_batch(mods[:, base + 5, :])

        # -------- attention branch: RMSNorm + modulate (weights pre-folded) --
        inv = lax.rsqrt(jnp.mean(h * h, axis=-1, keepdims=True) + EPS)
        xm = h * inv * sc1 + sh1

        # q/k/v as full lane-dense (rows, C) slabs; *_p are the pair-swapped
        # ("rotate-half") copies so RoPE needs no lane shuffles at all.
        q = jnp.dot(xm, wq[...], preferred_element_type=f32)
        qp = jnp.dot(xm, wqp[...], preferred_element_type=f32)
        k = jnp.dot(xm, wk[...], preferred_element_type=f32)
        kp = jnp.dot(xm, wkp[...], preferred_element_type=f32)
        v = jnp.dot(xm, wv[...], preferred_element_type=f32)

        # per-head qk-RMSNorm stats for all heads at once (segmented mean on MXU)
        invq = lax.rsqrt(jnp.dot(q * q, seg, preferred_element_type=f32) + EPS)
        invk = lax.rsqrt(jnp.dot(k * k, seg, preferred_element_type=f32) + EPS)

        # qk-norm weight + RoPE rotation + 1/sqrt(D) folded into the A/B tables
        qf = invq * (q * bc_tok(aq[...]) + qp * bc_tok(bq[...]))
        kf = invk * (k * bc_tok(ak[...]) + kp * bc_tok(bk[...]))

        pw = pw_ref[...]
        attn_parts = []
        for b in range(bps):
            r0 = b * Lb
            qb = qf[r0:r0 + Lb, :]
            kb = kf[r0:r0 + Lb, :]
            vb = v[r0:r0 + Lb, :]
            acc = None
            for hh in range(HEADS):
                c0 = hh * HEAD_DIM
                s = lax.dot_general(qb[:, c0:c0 + HEAD_DIM],
                                    kb[:, c0:c0 + HEAD_DIM],
                                    (((1,), (1,)), ((), ())),
                                    preferred_element_type=f32)     # (Lb, Lb)
                m = jnp.max(s, axis=-1, keepdims=True)
                p = jnp.exp(s - m)
                l = jnp.sum(p, axis=-1, keepdims=True)
                oh = jnp.dot(p, vb[:, c0:c0 + HEAD_DIM],
                             preferred_element_type=f32)            # (Lb, D)
                oh = oh * pl.reciprocal(l)       # exact reciprocal (approx=False)
                # accumulate each head through its slice of proj_w instead of
                # lane-concatenating head outputs
                part = jnp.dot(oh, pw[c0:c0 + HEAD_DIM, :],
                               preferred_element_type=f32)          # (Lb, C)
                acc = part if acc is None else acc + part
            attn_parts.append(acc)
        attn = attn_parts[0] if bps == 1 else jnp.concatenate(attn_parts, axis=0)
        h = h + g1 * (attn + pb_ref[...])        # gated residual

        # -------- MLP branch: RMSNorm + modulate + SwiGLU (padded 170->256) --
        inv2 = lax.rsqrt(jnp.mean(h * h, axis=-1, keepdims=True) + EPS)
        xm2 = h * inv2 * sc2 + sh2
        h1 = jnp.dot(xm2, w1[...], preferred_element_type=f32)
        hg = _silu(h1)
        h3 = jnp.dot(xm2, w3[...], preferred_element_type=f32)
        mlp = jnp.dot(hg * h3, w2[...], preferred_element_type=f32)
        h = h + g2 * mlp

    # ---- final adaLN-LayerNorm + linear; output padded to 128 lanes ---------
    fsh = bc_batch(mods[:, 6 * NUM_BLOCKS + 0, :])
    fsc = bc_batch(mods[:, 6 * NUM_BLOCKS + 1, :])   # = 1 + final scale
    mu = jnp.mean(h, axis=-1, keepdims=True)
    xc = h - mu
    hn = xc * lax.rsqrt(jnp.mean(xc * xc, axis=-1, keepdims=True) + EPS)
    hn = hn * fsc + fsh
    out = jnp.dot(hn, flw_ref[...], preferred_element_type=f32) + flb_ref[...]
    out_ref[...] = out.astype(out_ref.dtype)


# ============================== JAX glue (data movement) =====================
def unfold_patches(x, p):
    # torch.nn.functional.unfold(kernel=stride=p).transpose(1, 2)
    B, C, H, W = x.shape
    x = x.reshape(B, C, H // p, p, W // p, p)
    x = x.transpose(0, 2, 4, 1, 3, 5)            # B, H/p, W/p, C, p, p
    return x.reshape(B, (H // p) * (W // p), C * p * p)


def fold_patches(x, B, C, H, W, p):
    x = x.reshape(B, H // p, W // p, C, p, p)
    x = x.transpose(0, 3, 1, 4, 2, 5)            # B, C, H/p, p, W/p, p
    return x.reshape(B, C, H, W)


def precompute_rope_2d(dim, height, width, theta=10000.0, scale=16.0):
    # matches precompute_freqs_cis_2d: cos/sin of shape (L, dim//2)
    x_pos = jnp.linspace(0.0, scale, width)
    y_pos = jnp.linspace(0.0, scale, height)
    yy, xx = jnp.meshgrid(y_pos, x_pos, indexing='ij')
    yy = yy.reshape(-1)
    xx = xx.reshape(-1)
    freqs = 1.0 / (theta ** (jnp.arange(0, dim, 4)[: dim // 4].astype(jnp.float32) / dim))
    x_f = jnp.outer(xx, freqs)
    y_f = jnp.outer(yy, freqs)
    ang = jnp.stack([x_f, y_f], axis=-1).reshape(height * width, -1)
    return jnp.cos(ang), jnp.sin(ang)


def timestep_embedding(t, dim, max_period=10):
    half = dim // 2
    freqs = jnp.exp(-math.log(max_period) * jnp.arange(half, dtype=jnp.float32) / half)
    args = t[..., None].astype(jnp.float32) * freqs[None, :]
    return jnp.concatenate([jnp.cos(args), jnp.sin(args)], axis=-1)


# =========================== fused-parameter preparation =====================
def prepare_fused(params):
    """Split qkv into q/k/v (+ pair-swapped q/k copies for shuffle-free RoPE),
    pad+stack FFN / final-linear weights, reshape biases to (1, N)."""
    C, D = HIDDEN, HEAD_DIM
    pair16 = jnp.asarray(np.arange(D) ^ 1)                    # swap (even, odd)
    pair64 = jnp.asarray((np.arange(C) // D) * D + ((np.arange(C) % D) ^ 1))
    pad_h = MLP_PAD - MLP_HIDDEN

    fp = dict(
        x_emb_w=params['x_emb_w'], x_emb_b=params['x_emb_b'].reshape(1, -1),
        t_w1=params['t_w1'], t_b1=params['t_b1'].reshape(1, -1),
        t_w2=params['t_w2'], t_b2=params['t_b2'].reshape(1, -1),
        y_table=params['y_table'],
        f_ada_w=params['f_ada_w'], f_ada_b=params['f_ada_b'],
        flin_w_pad=jnp.pad(params['f_lin_w'], ((0, 0), (0, OUT_PAD - PD))),
        flin_b_pad=jnp.pad(params['f_lin_b'].reshape(1, -1),
                           ((0, 0), (0, OUT_PAD - PD))),
        blocks=[],
    )
    for prm in params['blocks']:
        qkv = prm['qkv_w']
        wq, wk, wv = qkv[:, 0:C], qkv[:, C:2 * C], qkv[:, 2 * C:3 * C]
        fp['blocks'].append(dict(
            ada_w=prm['ada_w'], ada_b=prm['ada_b'],
            norm1_w=prm['norm1_w'], norm2_w=prm['norm2_w'],
            q_norm_w=prm['q_norm_w'], q_norm_w_sw=prm['q_norm_w'][pair16],
            k_norm_w=prm['k_norm_w'], k_norm_w_sw=prm['k_norm_w'][pair16],
            wq=wq, wq_sw=wq[:, pair64],
            wk=wk, wk_sw=wk[:, pair64],
            wv=wv,
            proj_w=prm['proj_w'], proj_b=prm['proj_b'].reshape(1, -1),
            w1p=jnp.pad(prm['w1'], ((0, 0), (0, pad_h))),
            w3p=jnp.pad(prm['w3'], ((0, 0), (0, pad_h))),
            w2p=jnp.pad(prm['w2'], ((0, pad_h), (0, 0))),
        ))
    return fp


# ================================ fused forward ==============================
def dit_forward_pallas(fp, x, t, y):
    B, Cin, H, W = x.shape
    p = PATCH
    xs = unfold_patches(x, p)                                  # (B, L, PD)
    L = xs.shape[1]
    xs2 = xs.reshape(B * L, PD)

    grid_n = 2 if (B % 2 == 0) else 1       # v7x: 2 TCs; rest of batch folded into M
    bps = B // grid_n
    rows = bps * L

    # ---------- conditioning + all adaLN matmuls hoisted to plain JAX --------
    t_freq = timestep_embedding(t.reshape(-1), FREQ_EMB)               # (B, 256)
    t_emb = jax.nn.silu(t_freq @ fp['t_w1'] + fp['t_b1']) @ fp['t_w2'] + fp['t_b2']
    cond = jax.nn.silu(t_emb + fp['y_table'][y])                       # (B, C)

    mod_rows = []
    for blk in fp['blocks']:
        mod = cond @ blk['ada_w'] + blk['ada_b']                       # (B, 6C)
        sh1, sc1, g1, sh2, sc2, g2 = jnp.split(mod, 6, axis=-1)
        mod_rows += [sh1, blk['norm1_w'] * (1.0 + sc1), g1,
                     sh2, blk['norm2_w'] * (1.0 + sc2), g2]
    fmod = cond @ fp['f_ada_w'] + fp['f_ada_b']
    fsh, fsc = jnp.split(fmod, 2, axis=-1)
    mod_rows += [fsh, 1.0 + fsc]
    mods = jnp.stack(mod_rows, axis=1)                                 # (B, 14, C)

    # ---------- RoPE tables with qk-norm weight & attention scale folded in --
    cos8, sin8 = precompute_rope_2d(HEAD_DIM, H // p, W // p)          # (L, 8)
    cosA = jnp.repeat(cos8, 2, axis=-1)                                # (L, 16)
    sinB = jnp.stack([-sin8, sin8], axis=-1).reshape(L, HEAD_DIM)      # (L, 16)

    head_id = np.arange(HIDDEN) // HEAD_DIM
    seg = jnp.asarray((head_id[:, None] == head_id[None, :]).astype(np.float32)
                      / HEAD_DIM)                                      # (C, C)

    def wspec(a):                 # whole weight, resident across the grid
        nd = a.ndim

        def imap(i):
            return (0,) * nd
        return pl.BlockSpec(a.shape, imap)

    inputs = [xs2, mods, seg, fp['x_emb_w'], fp['x_emb_b'],
              fp['flin_w_pad'], fp['flin_b_pad']]
    in_specs = [
        pl.BlockSpec((rows, PD), lambda i: (i, 0)),
        pl.BlockSpec((bps, MOD_ROWS, HIDDEN), lambda i: (i, 0, 0)),
        wspec(seg), wspec(fp['x_emb_w']), wspec(fp['x_emb_b']),
        wspec(fp['flin_w_pad']), wspec(fp['flin_b_pad']),
    ]
    for blk in fp['blocks']:
        aq = jnp.tile(cosA * blk['q_norm_w'], (1, HEADS)) * ATTN_SCALE
        bq = jnp.tile(sinB * blk['q_norm_w_sw'], (1, HEADS)) * ATTN_SCALE
        ak = jnp.tile(cosA * blk['k_norm_w'], (1, HEADS))
        bk = jnp.tile(sinB * blk['k_norm_w_sw'], (1, HEADS))
        for a in (blk['wq'], blk['wq_sw'], blk['wk'], blk['wk_sw'], blk['wv'],
                  blk['proj_w'], blk['proj_b'], blk['w1p'], blk['w3p'], blk['w2p'],
                  aq, bq, ak, bk):
            inputs.append(a)
            in_specs.append(wspec(a))

    out = pl.pallas_call(
        _dit_fused_kernel,
        out_shape=jax.ShapeDtypeStruct((B * L, OUT_PAD), x.dtype),
        grid=(grid_n,),
        in_specs=in_specs,
        out_specs=pl.BlockSpec((rows, OUT_PAD), lambda i: (i, 0)),
        compiler_params=pltpu.CompilerParams(
            dimension_semantics=("parallel",)),
    )(*inputs)

    out = out[:, :PD].reshape(B, L, PD)
    return fold_patches(out, B, Cin, H, W, p)


# =========================== pure-JAX reference forward ======================
_HI = jax.lax.Precision.HIGHEST


def ref_linear(x, w, b=None):
    y = jnp.dot(x, w, precision=_HI)
    return y if b is None else y + b


def ref_ffn(x, w1, w3, w2):
    h1 = jnp.dot(x, w1, precision=_HI)
    h3 = jnp.dot(x, w3, precision=_HI)
    return jnp.dot(jax.nn.silu(h1) * h3, w2, precision=_HI)


def ref_attn_core(q, k, v):
    scale = 1.0 / math.sqrt(q.shape[-1])
    s = jnp.einsum('bhqd,bhkd->bhqk', q, k, precision=_HI) * scale
    p = jax.nn.softmax(s, axis=-1)
    return jnp.einsum('bhqk,bhkd->bhqd', p, v, precision=_HI)


def ref_rms_modulate(x, w, shift, scale, eps=EPS):
    xf = x.astype(jnp.float32)
    var = jnp.mean(xf * xf, axis=-1, keepdims=True)
    xn = xf * jax.lax.rsqrt(var + eps) * w
    return (xn * (1.0 + scale) + shift).astype(x.dtype)


def ref_ln_modulate(x, shift, scale, eps=EPS):
    xf = x.astype(jnp.float32)
    mu = jnp.mean(xf, axis=-1, keepdims=True)
    var = jnp.mean((xf - mu) ** 2, axis=-1, keepdims=True)
    xn = (xf - mu) * jax.lax.rsqrt(var + eps)
    return (xn * (1.0 + scale) + shift).astype(x.dtype)


def rmsnorm_lastdim(x, w, eps=EPS):
    xf = x.astype(jnp.float32)
    var = jnp.mean(xf * xf, axis=-1, keepdims=True)
    return (xf * jax.lax.rsqrt(var + eps) * w).astype(x.dtype)


def apply_rope(x, cos, sin):
    # x: (B, N, H, D); pairwise (even, odd) rotation as in apply_rotary_emb
    B, N, Hh, D = x.shape
    xr = x.reshape(B, N, Hh, D // 2, 2)
    x0, x1 = xr[..., 0], xr[..., 1]
    c = cos[None, :, None, :]
    s = sin[None, :, None, :]
    o0 = x0 * c - x1 * s
    o1 = x0 * s + x1 * c
    return jnp.stack([o0, o1], axis=-1).reshape(B, N, Hh, D)


def dit_forward_ref(params, x, t, y):
    B, Cin, H, W = x.shape
    p = PATCH
    xs = unfold_patches(x, p)
    L = xs.shape[1]
    C = HIDDEN

    h = ref_linear(xs.reshape(B * L, -1), params['x_emb_w'], params['x_emb_b']).reshape(B, L, C)
    cos, sin = precompute_rope_2d(HEAD_DIM, H // p, W // p)

    t_freq = timestep_embedding(t.reshape(-1), FREQ_EMB)
    t_h = jax.nn.silu(ref_linear(t_freq, params['t_w1'], params['t_b1']))
    t_emb = ref_linear(t_h, params['t_w2'], params['t_b2']).reshape(B, 1, C)
    y_emb = params['y_table'][y].reshape(B, 1, C)
    cond = jax.nn.silu(t_emb + y_emb)

    for prm in params['blocks']:
        mod = ref_linear(cond.reshape(B, C), prm['ada_w'], prm['ada_b']).reshape(B, 1, 6 * C)
        sh_msa, sc_msa, g_msa, sh_mlp, sc_mlp, g_mlp = jnp.split(mod, 6, axis=-1)

        xm = ref_rms_modulate(h, prm['norm1_w'], sh_msa, sc_msa)
        qkv = ref_linear(xm.reshape(B * L, C), prm['qkv_w']).reshape(B, L, 3, HEADS, HEAD_DIM)
        q, k, v = qkv[:, :, 0], qkv[:, :, 1], qkv[:, :, 2]
        q = rmsnorm_lastdim(q, prm['q_norm_w'])
        k = rmsnorm_lastdim(k, prm['k_norm_w'])
        q = apply_rope(q, cos, sin)
        k = apply_rope(k, cos, sin)
        q = q.transpose(0, 2, 1, 3)
        k = k.transpose(0, 2, 1, 3)
        v = v.transpose(0, 2, 1, 3)
        o = ref_attn_core(q, k, v).transpose(0, 2, 1, 3).reshape(B, L, C)
        attn_out = ref_linear(o.reshape(B * L, C), prm['proj_w'], prm['proj_b']).reshape(B, L, C)
        h = h + g_msa * attn_out

        xm2 = ref_rms_modulate(h, prm['norm2_w'], sh_mlp, sc_mlp)
        mlp_out = ref_ffn(xm2.reshape(B * L, C), prm['w1'], prm['w3'], prm['w2']).reshape(B, L, C)
        h = h + g_mlp * mlp_out

    mod = ref_linear(cond.reshape(B, C), params['f_ada_w'], params['f_ada_b']).reshape(B, 1, 2 * C)
    shift, scale = jnp.split(mod, 2, axis=-1)
    hn = ref_ln_modulate(h, shift, scale)
    out = ref_linear(hn.reshape(B * L, C), params['f_lin_w'], params['f_lin_b']).reshape(B, L, -1)
    return fold_patches(out, B, Cin, H, W, p)


# =============================== parameter init ==============================
def init_params(key):
    # deterministic synthetic init; shapes follow the PyTorch module's __init__
    # (weights stored transposed vs torch: (in, out) so y = x @ W + b)
    kit = iter(jax.random.split(key, 256))

    def nrm(shape, std=0.02):
        return jax.random.normal(next(kit), shape, jnp.float32) * std

    params = dict(
        x_emb_w=nrm((PD, HIDDEN)),
        x_emb_b=jnp.zeros((HIDDEN,), jnp.float32),
        t_w1=nrm((FREQ_EMB, HIDDEN)), t_b1=jnp.zeros((HIDDEN,), jnp.float32),
        t_w2=nrm((HIDDEN, HIDDEN)), t_b2=jnp.zeros((HIDDEN,), jnp.float32),
        y_table=nrm((NUM_CLASSES + 1, HIDDEN)),
        f_ada_w=nrm((HIDDEN, 2 * HIDDEN)), f_ada_b=nrm((2 * HIDDEN,)),
        f_lin_w=nrm((HIDDEN, PD)),
        f_lin_b=nrm((PD,)),
        blocks=[],
    )
    for _ in range(NUM_BLOCKS):
        params['blocks'].append(dict(
            ada_w=nrm((HIDDEN, 6 * HIDDEN)), ada_b=nrm((6 * HIDDEN,)),
            norm1_w=jnp.ones((HIDDEN,), jnp.float32),
            norm2_w=jnp.ones((HIDDEN,), jnp.float32),
            qkv_w=nrm((HIDDEN, 3 * HIDDEN)),
            q_norm_w=jnp.ones((HEAD_DIM,), jnp.float32),
            k_norm_w=jnp.ones((HEAD_DIM,), jnp.float32),
            proj_w=nrm((HIDDEN, HIDDEN)), proj_b=jnp.zeros((HIDDEN,), jnp.float32),
            w1=nrm((HIDDEN, MLP_HIDDEN)),
            w3=nrm((HIDDEN, MLP_HIDDEN)),
            w2=nrm((MLP_HIDDEN, HIDDEN)),
        ))
    return params


# ==================================== main ===================================
if __name__ == "__main__":
    key = jax.random.PRNGKey(0)
    kp, kx, kt, ky = jax.random.split(key, 4)
    params = init_params(kp)
    fused = prepare_fused(params)          # one-time weight split/pad/fold

    B, H, W = 2, 16, 16
    x = jax.random.normal(kx, (B, IN_CHANNELS, H, W), jnp.float32)
    t = jax.random.uniform(kt, (B,), jnp.float32, 0.0, 1.0)
    y = jax.random.randint(ky, (B,), 0, NUM_CLASSES)

    fwd = jax.jit(dit_forward_pallas)
    out = jax.block_until_ready(fwd(fused, x, t, y))

    ref = jax.block_until_ready(jax.jit(dit_forward_ref)(params, x, t, y))
    max_err = float(jnp.max(jnp.abs(out - ref)))

    assert out.shape == (B, IN_CHANNELS, H, W), out.shape
    assert max_err < 5e-2, f"max abs err {max_err}"
    print("KERNEL_OK")
</pallas_src>

<mosaic_0001>
module attributes {stable_mosaic.version = 11 : i64} {
  func.func @_dit_fused_kernel(%arg0: i32, %arg1: memref<64x16xf32, #tpu.memory_space<vmem>>, %arg2: memref<1x14x64xf32, #tpu.memory_space<vmem>>, %arg3: memref<64x64xf32, #tpu.memory_space<vmem>>, %arg4: memref<16x64xf32, #tpu.memory_space<vmem>>, %arg5: memref<1x64xf32, #tpu.memory_space<vmem>>, %arg6: memref<64x128xf32, #tpu.memory_space<vmem>>, %arg7: memref<1x128xf32, #tpu.memory_space<vmem>>, %arg8: memref<64x64xf32, #tpu.memory_space<vmem>>, %arg9: memref<64x64xf32, #tpu.memory_space<vmem>>, %arg10: memref<64x64xf32, #tpu.memory_space<vmem>>, %arg11: memref<64x64xf32, #tpu.memory_space<vmem>>, %arg12: memref<64x64xf32, #tpu.memory_space<vmem>>, %arg13: memref<64x64xf32, #tpu.memory_space<vmem>>, %arg14: memref<1x64xf32, #tpu.memory_space<vmem>>, %arg15: memref<64x256xf32, #tpu.memory_space<vmem>>, %arg16: memref<64x256xf32, #tpu.memory_space<vmem>>, %arg17: memref<256x64xf32, #tpu.memory_space<vmem>>, %arg18: memref<64x64xf32, #tpu.memory_space<vmem>>, %arg19: memref<64x64xf32, #tpu.memory_space<vmem>>, %arg20: memref<64x64xf32, #tpu.memory_space<vmem>>, %arg21: memref<64x64xf32, #tpu.memory_space<vmem>>, %arg22: memref<64x64xf32, #tpu.memory_space<vmem>>, %arg23: memref<64x64xf32, #tpu.memory_space<vmem>>, %arg24: memref<64x64xf32, #tpu.memory_space<vmem>>, %arg25: memref<64x64xf32, #tpu.memory_space<vmem>>, %arg26: memref<64x64xf32, #tpu.memory_space<vmem>>, %arg27: memref<64x64xf32, #tpu.memory_space<vmem>>, %arg28: memref<1x64xf32, #tpu.memory_space<vmem>>, %arg29: memref<64x256xf32, #tpu.memory_space<vmem>>, %arg30: memref<64x256xf32, #tpu.memory_space<vmem>>, %arg31: memref<256x64xf32, #tpu.memory_space<vmem>>, %arg32: memref<64x64xf32, #tpu.memory_space<vmem>>, %arg33: memref<64x64xf32, #tpu.memory_space<vmem>>, %arg34: memref<64x64xf32, #tpu.memory_space<vmem>>, %arg35: memref<64x64xf32, #tpu.memory_space<vmem>>, %arg36: memref<64x128xf32, #tpu.memory_space<vmem>>) attributes {dimension_semantics = [#tpu.dimension_semantics<parallel>], iteration_bounds = array<i64: 2>, scalar_prefetch = 0 : i64, scratch_operands = 0 : i64, tpu.core_type = #tpu.core_type<tc>, window_params = [{transform_indices = @transform_0, window_bounds = array<i64: 64, 16>}, {transform_indices = @transform_1, window_bounds = array<i64: 1, 14, 64>}, {pipeline_mode = #tpu.pipeline_mode<synchronous>, transform_indices = @transform_2, window_bounds = array<i64: 64, 64>}, {pipeline_mode = #tpu.pipeline_mode<synchronous>, transform_indices = @transform_3, window_bounds = array<i64: 16, 64>}, {pipeline_mode = #tpu.pipeline_mode<synchronous>, transform_indices = @transform_4, window_bounds = array<i64: 1, 64>}, {pipeline_mode = #tpu.pipeline_mode<synchronous>, transform_indices = @transform_5, window_bounds = array<i64: 64, 128>}, {pipeline_mode = #tpu.pipeline_mode<synchronous>, transform_indices = @transform_6, window_bounds = array<i64: 1, 128>}, {pipeline_mode = #tpu.pipeline_mode<synchronous>, transform_indices = @transform_7, window_bounds = array<i64: 64, 64>}, {pipeline_mode = #tpu.pipeline_mode<synchronous>, transform_indices = @transform_8, window_bounds = array<i64: 64, 64>}, {pipeline_mode = #tpu.pipeline_mode<synchronous>, transform_indices = @transform_9, window_bounds = array<i64: 64, 64>}, {pipeline_mode = #tpu.pipeline_mode<synchronous>, transform_indices = @transform_10, window_bounds = array<i64: 64, 64>}, {pipeline_mode = #tpu.pipeline_mode<synchronous>, transform_indices = @transform_11, window_bounds = array<i64: 64, 64>}, {pipeline_mode = #tpu.pipeline_mode<synchronous>, transform_indices = @transform_12, window_bounds = array<i64: 64, 64>}, {pipeline_mode = #tpu.pipeline_mode<synchronous>, transform_indices = @transform_13, window_bounds = array<i64: 1, 64>}, {pipeline_mode = #tpu.pipeline_mode<synchronous>, transform_indices = @transform_14, window_bounds = array<i64: 64, 256>}, {pipeline_mode = #tpu.pipeline_mode<synchronous>, transform_indices = @transform_15, window_bounds = array<i64: 64, 256>}, {pipeline_mode = #tpu.pipeline_mode<synchronous>, transform_indices = @transform_16, window_bounds = array<i64: 256, 64>}, {pipeline_mode = #tpu.pipeline_mode<synchronous>, transform_indices = @transform_17, window_bounds = array<i64: 64, 64>}, {pipeline_mode = #tpu.pipeline_mode<synchronous>, transform_indices = @transform_18, window_bounds = array<i64: 64, 64>}, {pipeline_mode = #tpu.pipeline_mode<synchronous>, transform_indices = @transform_19, window_bounds = array<i64: 64, 64>}, {pipeline_mode = #tpu.pipeline_mode<synchronous>, transform_indices = @transform_20, window_bounds = array<i64: 64, 64>}, {pipeline_mode = #tpu.pipeline_mode<synchronous>, transform_indices = @transform_21, window_bounds = array<i64: 64, 64>}, {pipeline_mode = #tpu.pipeline_mode<synchronous>, transform_indices = @transform_22, window_bounds = array<i64: 64, 64>}, {pipeline_mode = #tpu.pipeline_mode<synchronous>, transform_indices = @transform_23, window_bounds = array<i64: 64, 64>}, {pipeline_mode = #tpu.pipeline_mode<synchronous>, transform_indices = @transform_24, window_bounds = array<i64: 64, 64>}, {pipeline_mode = #tpu.pipeline_mode<synchronous>, transform_indices = @transform_25, window_bounds = array<i64: 64, 64>}, {pipeline_mode = #tpu.pipeline_mode<synchronous>, transform_indices = @transform_26, window_bounds = array<i64: 64, 64>}, {pipeline_mode = #tpu.pipeline_mode<synchronous>, transform_indices = @transform_27, window_bounds = array<i64: 1, 64>}, {pipeline_mode = #tpu.pipeline_mode<synchronous>, transform_indices = @transform_28, window_bounds = array<i64: 64, 256>}, {pipeline_mode = #tpu.pipeline_mode<synchronous>, transform_indices = @transform_29, window_bounds = array<i64: 64, 256>}, {pipeline_mode = #tpu.pipeline_mode<synchronous>, transform_indices = @transform_30, window_bounds = array<i64: 256, 64>}, {pipeline_mode = #tpu.pipeline_mode<synchronous>, transform_indices = @transform_31, window_bounds = array<i64: 64, 64>}, {pipeline_mode = #tpu.pipeline_mode<synchronous>, transform_indices = @transform_32, window_bounds = array<i64: 64, 64>}, {pipeline_mode = #tpu.pipeline_mode<synchronous>, transform_indices = @transform_33, window_bounds = array<i64: 64, 64>}, {pipeline_mode = #tpu.pipeline_mode<synchronous>, transform_indices = @transform_34, window_bounds = array<i64: 64, 64>}, {transform_indices = @transform_35, window_bounds = array<i64: 64, 128>}]} {
    %c0 = arith.constant 0 : index
    %c0_0 = arith.constant 0 : index
    %c0_1 = arith.constant 0 : index
    %0 = vector.load %arg2[%c0, %c0_0, %c0_1] : memref<1x14x64xf32, #tpu.memory_space<vmem>>, vector<1x14x64xf32>
    %c0_2 = arith.constant 0 : index
    %c0_3 = arith.constant 0 : index
    %1 = vector.load %arg3[%c0_2, %c0_3] : memref<64x64xf32, #tpu.memory_space<vmem>>, vector<64x64xf32>
    %c0_4 = arith.constant 0 : index
    %c0_5 = arith.constant 0 : index
    %2 = vector.load %arg1[%c0_4, %c0_5] : memref<64x16xf32, #tpu.memory_space<vmem>>, vector<64x16xf32>
    %c0_6 = arith.constant 0 : index
    %c0_7 = arith.constant 0 : index
    %3 = vector.load %arg4[%c0_6, %c0_7] : memref<16x64xf32, #tpu.memory_space<vmem>>, vector<16x64xf32>
    %cst = arith.constant dense<0.000000e+00> : vector<64x64xf32>
    %4 = tpu.matmul %2, %3, %cst {dimension_numbers = #tpu.dot_dimension_numbers<[1], [0], [0], [1], [0, 0, 1, 1], [], []>} : vector<64x16xf32>, vector<16x64xf32>, vector<64x64xf32> -> vector<64x64xf32>
    %c0_8 = arith.constant 0 : index
    %c0_9 = arith.constant 0 : index
    %5 = vector.load %arg5[%c0_8, %c0_9] : memref<1x64xf32, #tpu.memory_space<vmem>>, vector<1x64xf32>
    %6 = vector.broadcast %5 : vector<1x64xf32> to vector<64x64xf32>
    %7 = arith.addf %4, %6 : vector<64x64xf32>
    %8 = vector.extract_strided_slice %0 {offsets = [0, 0, 0], sizes = [1, 1, 64], strides = [1, 1, 1]} : vector<1x14x64xf32> to vector<1x1x64xf32>
    %9 = vector.shape_cast %8 : vector<1x1x64xf32> to vector<1x64xf32>
    %10 = vector.extract_strided_slice %0 {offsets = [0, 1, 0], sizes = [1, 1, 64], strides = [1, 1, 1]} : vector<1x14x64xf32> to vector<1x1x64xf32>
    %11 = vector.shape_cast %10 : vector<1x1x64xf32> to vector<1x64xf32>
    %12 = vector.extract_strided_slice %0 {offsets = [0, 2, 0], sizes = [1, 1, 64], strides = [1, 1, 1]} : vector<1x14x64xf32> to vector<1x1x64xf32>
    %13 = vector.shape_cast %12 : vector<1x1x64xf32> to vector<1x64xf32>
    %14 = vector.extract_strided_slice %0 {offsets = [0, 3, 0], sizes = [1, 1, 64], strides = [1, 1, 1]} : vector<1x14x64xf32> to vector<1x1x64xf32>
    %15 = vector.shape_cast %14 : vector<1x1x64xf32> to vector<1x64xf32>
    %16 = vector.extract_strided_slice %0 {offsets = [0, 4, 0], sizes = [1, 1, 64], strides = [1, 1, 1]} : vector<1x14x64xf32> to vector<1x1x64xf32>
    %17 = vector.shape_cast %16 : vector<1x1x64xf32> to vector<1x64xf32>
    %18 = vector.extract_strided_slice %0 {offsets = [0, 5, 0], sizes = [1, 1, 64], strides = [1, 1, 1]} : vector<1x14x64xf32> to vector<1x1x64xf32>
    %19 = vector.shape_cast %18 : vector<1x1x64xf32> to vector<1x64xf32>
    %20 = arith.mulf %7, %7 : vector<64x64xf32>
    %cst_10 = arith.constant dense<0.000000e+00> : vector<64xf32>
    %21 = vector.multi_reduction <add>, %20, %cst_10 [1] : vector<64x64xf32> to vector<64xf32>
    %22 = vector.shape_cast %21 : vector<64xf32> to vector<64x1xf32>
    %cst_11 = arith.constant 6.400000e+01 : f32
    %23 = vector.broadcast %cst_11 : f32 to vector<64x1xf32>
    %24 = arith.divf %22, %23 : vector<64x1xf32>
    %cst_12 = arith.constant 9.99999997E-7 : f32
    %25 = vector.broadcast %cst_12 : f32 to vector<64x1xf32>
    %26 = arith.addf %24, %25 : vector<64x1xf32>
    %27 = math.rsqrt %26 : vector<64x1xf32>
    %28 = vector.broadcast %27 : vector<64x1xf32> to vector<64x64xf32>
    %29 = arith.mulf %7, %28 : vector<64x64xf32>
    %30 = vector.broadcast %11 : vector<1x64xf32> to vector<64x64xf32>
    %31 = arith.mulf %29, %30 : vector<64x64xf32>
    %32 = vector.broadcast %9 : vector<1x64xf32> to vector<64x64xf32>
    %33 = arith.addf %31, %32 : vector<64x64xf32>
    %c0_13 = arith.constant 0 : index
    %c0_14 = arith.constant 0 : index
    %34 = vector.load %arg8[%c0_13, %c0_14] : memref<64x64xf32, #tpu.memory_space<vmem>>, vector<64x64xf32>
    %cst_15 = arith.constant dense<0.000000e+00> : vector<64x64xf32>
    %35 = tpu.matmul %33, %34, %cst_15 {dimension_numbers = #tpu.dot_dimension_numbers<[1], [0], [0], [1], [0, 0, 1, 1], [], []>} : vector<64x64xf32>, vector<64x64xf32>, vector<64x64xf32> -> vector<64x64xf32>
    %c0_16 = arith.constant 0 : index
    %c0_17 = arith.constant 0 : index
    %36 = vector.load %arg9[%c0_16, %c0_17] : memref<64x64xf32, #tpu.memory_space<vmem>>, vector<64x64xf32>
    %cst_18 = arith.constant dense<0.000000e+00> : vector<64x64xf32>
    %37 = tpu.matmul %33, %36, %cst_18 {dimension_numbers = #tpu.dot_dimension_numbers<[1], [0], [0], [1], [0, 0, 1, 1], [], []>} : vector<64x64xf32>, vector<64x64xf32>, vector<64x64xf32> -> vector<64x64xf32>
    %c0_19 = arith.constant 0 : index
    %c0_20 = arith.constant 0 : index
    %38 = vector.load %arg10[%c0_19, %c0_20] : memref<64x64xf32, #tpu.memory_space<vmem>>, vector<64x64xf32>
    %cst_21 = arith.constant dense<0.000000e+00> : vector<64x64xf32>
    %39 = tpu.matmul %33, %38, %cst_21 {dimension_numbers = #tpu.dot_dimension_numbers<[1], [0], [0], [1], [0, 0, 1, 1], [], []>} : vector<64x64xf32>, vector<64x64xf32>, vector<64x64xf32> -> vector<64x64xf32>
    %c0_22 = arith.constant 0 : index
    %c0_23 = arith.constant 0 : index
    %40 = vector.load %arg11[%c0_22, %c0_23] : memref<64x64xf32, #tpu.memory_space<vmem>>, vector<64x64xf32>
    %cst_24 = arith.constant dense<0.000000e+00> : vector<64x64xf32>
    %41 = tpu.matmul %33, %40, %cst_24 {dimension_numbers = #tpu.dot_dimension_numbers<[1], [0], [0], [1], [0, 0, 1, 1], [], []>} : vector<64x64xf32>, vector<64x64xf32>, vector<64x64xf32> -> vector<64x64xf32>
    %c0_25 = arith.constant 0 : index
    %c0_26 = arith.constant 0 : index
    %42 = vector.load %arg12[%c0_25, %c0_26] : memref<64x64xf32, #tpu.memory_space<vmem>>, vector<64x64xf32>
    %cst_27 = arith.constant dense<0.000000e+00> : vector<64x64xf32>
    %43 = tpu.matmul %33, %42, %cst_27 {dimension_numbers = #tpu.dot_dimension_numbers<[1], [0], [0], [1], [0, 0, 1, 1], [], []>} : vector<64x64xf32>, vector<64x64xf32>, vector<64x64xf32> -> vector<64x64xf32>
    %44 = arith.mulf %35, %35 : vector<64x64xf32>
    %cst_28 = arith.constant dense<0.000000e+00> : vector<64x64xf32>
    %45 = tpu.matmul %44, %1, %cst_28 {dimension_numbers = #tpu.dot_dimension_numbers<[1], [0], [0], [1], [0, 0, 1, 1], [], []>} : vector<64x64xf32>, vector<64x64xf32>, vector<64x64xf32> -> vector<64x64xf32>
    %cst_29 = arith.constant 9.99999997E-7 : f32
    %46 = vector.broadcast %cst_29 : f32 to vector<64x64xf32>
    %47 = arith.addf %45, %46 : vector<64x64xf32>
    %48 = math.rsqrt %47 : vector<64x64xf32>
    %49 = arith.mulf %39, %39 : vector<64x64xf32>
    %cst_30 = arith.constant dense<0.000000e+00> : vector<64x64xf32>
    %50 = tpu.matmul %49, %1, %cst_30 {dimension_numbers = #tpu.dot_dimension_numbers<[1], [0], [0], [1], [0, 0, 1, 1], [], []>} : vector<64x64xf32>, vector<64x64xf32>, vector<64x64xf32> -> vector<64x64xf32>
    %cst_31 = arith.constant 9.99999997E-7 : f32
    %51 = vector.broadcast %cst_31 : f32 to vector<64x64xf32>
    %52 = arith.addf %50, %51 : vector<64x64xf32>
    %53 = math.rsqrt %52 : vector<64x64xf32>
    %c0_32 = arith.constant 0 : index
    %c0_33 = arith.constant 0 : index
    %54 = vector.load %arg18[%c0_32, %c0_33] : memref<64x64xf32, #tpu.memory_space<vmem>>, vector<64x64xf32>
    %55 = arith.mulf %35, %54 : vector<64x64xf32>
    %c0_34 = arith.constant 0 : index
    %c0_35 = arith.constant 0 : index
    %56 = vector.load %arg19[%c0_34, %c0_35] : memref<64x64xf32, #tpu.memory_space<vmem>>, vector<64x64xf32>
    %57 = arith.mulf %37, %56 : vector<64x64xf32>
    %58 = arith.addf %55, %57 : vector<64x64xf32>
    %59 = arith.mulf %48, %58 : vector<64x64xf32>
    %c0_36 = arith.constant 0 : index
    %c0_37 = arith.constant 0 : index
    %60 = vector.load %arg20[%c0_36, %c0_37] : memref<64x64xf32, #tpu.memory_space<vmem>>, vector<64x64xf32>
    %61 = arith.mulf %39, %60 : vector<64x64xf32>
    %c0_38 = arith.constant 0 : index
    %c0_39 = arith.constant 0 : index
    %62 = vector.load %arg21[%c0_38, %c0_39] : memref<64x64xf32, #tpu.memory_space<vmem>>, vector<64x64xf32>
    %63 = arith.mulf %41, %62 : vector<64x64xf32>
    %64 = arith.addf %61, %63 : vector<64x64xf32>
    %65 = arith.mulf %53, %64 : vector<64x64xf32>
    %c0_40 = arith.constant 0 : index
    %c0_41 = arith.constant 0 : index
    %66 = vector.load %arg13[%c0_40, %c0_41] : memref<64x64xf32, #tpu.memory_space<vmem>>, vector<64x64xf32>
    %67 = vector.extract_strided_slice %59 {offsets = [0, 0], sizes = [64, 16], strides = [1, 1]} : vector<64x64xf32> to vector<64x16xf32>
    %68 = vector.extract_strided_slice %65 {offsets = [0, 0], sizes = [64, 16], strides = [1, 1]} : vector<64x64xf32> to vector<64x16xf32>
    %cst_42 = arith.constant dense<0.000000e+00> : vector<64x64xf32>
    %69 = tpu.matmul %67, %68, %cst_42 {dimension_numbers = #tpu.dot_dimension_numbers<[1], [1], [0], [0], [0, 0, 1, 0], [], []>} : vector<64x16xf32>, vector<64x16xf32>, vector<64x64xf32> -> vector<64x64xf32>
    %cst_43 = arith.constant dense<0xFF800000> : vector<64xf32>
    %70 = vector.multi_reduction <maximumf>, %69, %cst_43 [1] : vector<64x64xf32> to vector<64xf32>
    %71 = vector.shape_cast %70 : vector<64xf32> to vector<64x1xf32>
    %72 = vector.broadcast %71 : vector<64x1xf32> to vector<64x64xf32>
    %73 = arith.subf %69, %72 : vector<64x64xf32>
    %74 = math.exp %73 : vector<64x64xf32>
    %cst_44 = arith.constant dense<0.000000e+00> : vector<64xf32>
    %75 = vector.multi_reduction <add>, %74, %cst_44 [1] : vector<64x64xf32> to vector<64xf32>
    %76 = vector.shape_cast %75 : vector<64xf32> to vector<64x1xf32>
    %77 = vector.extract_strided_slice %43 {offsets = [0, 0], sizes = [64, 16], strides = [1, 1]} : vector<64x64xf32> to vector<64x16xf32>
    %cst_45 = arith.constant dense<0.000000e+00> : vector<64x16xf32>
    %78 = tpu.matmul %74, %77, %cst_45 {dimension_numbers = #tpu.dot_dimension_numbers<[1], [0], [0], [1], [0, 0, 1, 1], [], []>} : vector<64x64xf32>, vector<64x16xf32>, vector<64x16xf32> -> vector<64x16xf32>
    %79 = tpu.reciprocal %76 : vector<64x1xf32> -> vector<64x1xf32>
    %80 = vector.broadcast %79 : vector<64x1xf32> to vector<64x16xf32>
    %81 = arith.mulf %78, %80 : vector<64x16xf32>
    %82 = vector.extract_strided_slice %66 {offsets = [0, 0], sizes = [16, 64], strides = [1, 1]} : vector<64x64xf32> to vector<16x64xf32>
    %cst_46 = arith.constant dense<0.000000e+00> : vector<64x64xf32>
    %83 = tpu.matmul %81, %82, %cst_46 {dimension_numbers = #tpu.dot_dimension_numbers<[1], [0], [0], [1], [0, 0, 1, 1], [], []>} : vector<64x16xf32>, vector<16x64xf32>, vector<64x64xf32> -> vector<64x64xf32>
    %84 = vector.extract_strided_slice %59 {offsets = [0, 16], sizes = [64, 16], strides = [1, 1]} : vector<64x64xf32> to vector<64x16xf32>
    %85 = vector.extract_strided_slice %65 {offsets = [0, 16], sizes = [64, 16], strides = [1, 1]} : vector<64x64xf32> to vector<64x16xf32>
    %cst_47 = arith.constant dense<0.000000e+00> : vector<64x64xf32>
    %86 = tpu.matmul %84, %85, %cst_47 {dimension_numbers = #tpu.dot_dimension_numbers<[1], [1], [0], [0], [0, 0, 1, 0], [], []>} : vector<64x16xf32>, vector<64x16xf32>, vector<64x64xf32> -> vector<64x64xf32>
    %cst_48 = arith.constant dense<0xFF800000> : vector<64xf32>
    %87 = vector.multi_reduction <maximumf>, %86, %cst_48 [1] : vector<64x64xf32> to vector<64xf32>
    %88 = vector.shape_cast %87 : vector<64xf32> to vector<64x1xf32>
    %89 = vector.broadcast %88 : vector<64x1xf32> to vector<64x64xf32>
    %90 = arith.subf %86, %89 : vector<64x64xf32>
    %91 = math.exp %90 : vector<64x64xf32>
    %cst_49 = arith.constant dense<0.000000e+00> : vector<64xf32>
    %92 = vector.multi_reduction <add>, %91, %cst_49 [1] : vector<64x64xf32> to vector<64xf32>
    %93 = vector.shape_cast %92 : vector<64xf32> to vector<64x1xf32>
    %94 = vector.extract_strided_slice %43 {offsets = [0, 16], sizes = [64, 16], strides = [1, 1]} : vector<64x64xf32> to vector<64x16xf32>
    %cst_50 = arith.constant dense<0.000000e+00> : vector<64x16xf32>
    %95 = tpu.matmul %91, %94, %cst_50 {dimension_numbers = #tpu.dot_dimension_numbers<[1], [0], [0], [1], [0, 0, 1, 1], [], []>} : vector<64x64xf32>, vector<64x16xf32>, vector<64x16xf32> -> vector<64x16xf32>
    %96 = tpu.reciprocal %93 : vector<64x1xf32> -> vector<64x1xf32>
    %97 = vector.broadcast %96 : vector<64x1xf32> to vector<64x16xf32>
    %98 = arith.mulf %95, %97 : vector<64x16xf32>
    %99 = vector.extract_strided_slice %66 {offsets = [16, 0], sizes = [16, 64], strides = [1, 1]} : vector<64x64xf32> to vector<16x64xf32>
    %cst_51 = arith.constant dense<0.000000e+00> : vector<64x64xf32>
    %100 = tpu.matmul %98, %99, %cst_51 {dimension_numbers = #tpu.dot_dimension_numbers<[1], [0], [0], [1], [0, 0, 1, 1], [], []>} : vector<64x16xf32>, vector<16x64xf32>, vector<64x64xf32> -> vector<64x64xf32>
    %101 = arith.addf %83, %100 : vector<64x64xf32>
    %102 = vector.extract_strided_slice %59 {offsets = [0, 32], sizes = [64, 16], strides = [1, 1]} : vector<64x64xf32> to vector<64x16xf32>
    %103 = vector.extract_strided_slice %65 {offsets = [0, 32], sizes = [64, 16], strides = [1, 1]} : vector<64x64xf32> to vector<64x16xf32>
    %cst_52 = arith.constant dense<0.000000e+00> : vector<64x64xf32>
    %104 = tpu.matmul %102, %103, %cst_52 {dimension_numbers = #tpu.dot_dimension_numbers<[1], [1], [0], [0], [0, 0, 1, 0], [], []>} : vector<64x16xf32>, vector<64x16xf32>, vector<64x64xf32> -> vector<64x64xf32>
    %cst_53 = arith.constant dense<0xFF800000> : vector<64xf32>
    %105 = vector.multi_reduction <maximumf>, %104, %cst_53 [1] : vector<64x64xf32> to vector<64xf32>
    %106 = vector.shape_cast %105 : vector<64xf32> to vector<64x1xf32>
    %107 = vector.broadcast %106 : vector<64x1xf32> to vector<64x64xf32>
    %108 = arith.subf %104, %107 : vector<64x64xf32>
    %109 = math.exp %108 : vector<64x64xf32>
    %cst_54 = arith.constant dense<0.000000e+00> : vector<64xf32>
    %110 = vector.multi_reduction <add>, %109, %cst_54 [1] : vector<64x64xf32> to vector<64xf32>
    %111 = vector.shape_cast %110 : vector<64xf32> to vector<64x1xf32>
    %112 = vector.extract_strided_slice %43 {offsets = [0, 32], sizes = [64, 16], strides = [1, 1]} : vector<64x64xf32> to vector<64x16xf32>
    %cst_55 = arith.constant dense<0.000000e+00> : vector<64x16xf32>
    %113 = tpu.matmul %109, %112, %cst_55 {dimension_numbers = #tpu.dot_dimension_numbers<[1], [0], [0], [1], [0, 0, 1, 1], [], []>} : vector<64x64xf32>, vector<64x16xf32>, vector<64x16xf32> -> vector<64x16xf32>
    %114 = tpu.reciprocal %111 : vector<64x1xf32> -> vector<64x1xf32>
    %115 = vector.broadcast %114 : vector<64x1xf32> to vector<64x16xf32>
    %116 = arith.mulf %113, %115 : vector<64x16xf32>
    %117 = vector.extract_strided_slice %66 {offsets = [32, 0], sizes = [16, 64], strides = [1, 1]} : vector<64x64xf32> to vector<16x64xf32>
    %cst_56 = arith.constant dense<0.000000e+00> : vector<64x64xf32>
    %118 = tpu.matmul %116, %117, %cst_56 {dimension_numbers = #tpu.dot_dimension_numbers<[1], [0], [0], [1], [0, 0, 1, 1], [], []>} : vector<64x16xf32>, vector<16x64xf32>, vector<64x64xf32> -> vector<64x64xf32>
    %119 = arith.addf %101, %118 : vector<64x64xf32>
    %120 = vector.extract_strided_slice %59 {offsets = [0, 48], sizes = [64, 16], strides = [1, 1]} : vector<64x64xf32> to vector<64x16xf32>
    %121 = vector.extract_strided_slice %65 {offsets = [0, 48], sizes = [64, 16], strides = [1, 1]} : vector<64x64xf32> to vector<64x16xf32>
    %cst_57 = arith.constant dense<0.000000e+00> : vector<64x64xf32>
    %122 = tpu.matmul %120, %121, %cst_57 {dimension_numbers = #tpu.dot_dimension_numbers<[1], [1], [0], [0], [0, 0, 1, 0], [], []>} : vector<64x16xf32>, vector<64x16xf32>, vector<64x64xf32> -> vector<64x64xf32>
    %cst_58 = arith.constant dense<0xFF800000> : vector<64xf32>
    %123 = vector.multi_reduction <maximumf>, %122, %cst_58 [1] : vector<64x64xf32> to vector<64xf32>
    %124 = vector.shape_cast %123 : vector<64xf32> to vector<64x1xf32>
    %125 = vector.broadcast %124 : vector<64x1xf32> to vector<64x64xf32>
    %126 = arith.subf %122, %125 : vector<64x64xf32>
    %127 = math.exp %126 : vector<64x64xf32>
    %cst_59 = arith.constant dense<0.000000e+00> : vector<64xf32>
    %128 = vector.multi_reduction <add>, %127, %cst_59 [1] : vector<64x64xf32> to vector<64xf32>
    %129 = vector.shape_cast %128 : vector<64xf32> to vector<64x1xf32>
    %130 = vector.extract_strided_slice %43 {offsets = [0, 48], sizes = [64, 16], strides = [1, 1]} : vector<64x64xf32> to vector<64x16xf32>
    %cst_60 = arith.constant dense<0.000000e+00> : vector<64x16xf32>
    %131 = tpu.matmul %127, %130, %cst_60 {dimension_numbers = #tpu.dot_dimension_numbers<[1], [0], [0], [1], [0, 0, 1, 1], [], []>} : vector<64x64xf32>, vector<64x16xf32>, vector<64x16xf32> -> vector<64x16xf32>
    %132 = tpu.reciprocal %129 : vector<64x1xf32> -> vector<64x1xf32>
    %133 = vector.broadcast %132 : vector<64x1xf32> to vector<64x16xf32>
    %134 = arith.mulf %131, %133 : vector<64x16xf32>
    %135 = vector.extract_strided_slice %66 {offsets = [48, 0], sizes = [16, 64], strides = [1, 1]} : vector<64x64xf32> to vector<16x64xf32>
    %cst_61 = arith.constant dense<0.000000e+00> : vector<64x64xf32>
    %136 = tpu.matmul %134, %135, %cst_61 {dimension_numbers = #tpu.dot_dimension_numbers<[1], [0], [0], [1], [0, 0, 1, 1], [], []>} : vector<64x16xf32>, vector<16x64xf32>, vector<64x64xf32> -> vector<64x64xf32>
    %137 = arith.addf %119, %136 : vector<64x64xf32>
    %c0_62 = arith.constant 0 : index
    %c0_63 = arith.constant 0 : index
    %138 = vector.load %arg14[%c0_62, %c0_63] : memref<1x64xf32, #tpu.memory_space<vmem>>, vector<1x64xf32>
    %139 = vector.broadcast %138 : vector<1x64xf32> to vector<64x64xf32>
    %140 = arith.addf %137, %139 : vector<64x64xf32>
    %141 = vector.broadcast %13 : vector<1x64xf32> to vector<64x64xf32>
    %142 = arith.mulf %141, %140 : vector<64x64xf32>
    %143 = arith.addf %7, %142 : vector<64x64xf32>
    %144 = arith.mulf %143, %143 : vector<64x64xf32>
    %cst_64 = arith.constant dense<0.000000e+00> : vector<64xf32>
    %145 = vector.multi_reduction <add>, %144, %cst_64 [1] : vector<64x64xf32> to vector<64xf32>
    %146 = vector.shape_cast %145 : vector<64xf32> to vector<64x1xf32>
    %cst_65 = arith.constant 6.400000e+01 : f32
    %147 = vector.broadcast %cst_65 : f32 to vector<64x1xf32>
    %148 = arith.divf %146, %147 : vector<64x1xf32>
    %cst_66 = arith.constant 9.99999997E-7 : f32
    %149 = vector.broadcast %cst_66 : f32 to vector<64x1xf32>
    %150 = arith.addf %148, %149 : vector<64x1xf32>
    %151 = math.rsqrt %150 : vector<64x1xf32>
    %152 = vector.broadcast %151 : vector<64x1xf32> to vector<64x64xf32>
    %153 = arith.mulf %143, %152 : vector<64x64xf32>
    %154 = vector.broadcast %17 : vector<1x64xf32> to vector<64x64xf32>
    %155 = arith.mulf %153, %154 : vector<64x64xf32>
    %156 = vector.broadcast %15 : vector<1x64xf32> to vector<64x64xf32>
    %157 = arith.addf %155, %156 : vector<64x64xf32>
    %c0_67 = arith.constant 0 : index
    %c0_68 = arith.constant 0 : index
    %158 = vector.load %arg15[%c0_67, %c0_68] : memref<64x256xf32, #tpu.memory_space<vmem>>, vector<64x256xf32>
    %cst_69 = arith.constant dense<0.000000e+00> : vector<64x256xf32>
    %159 = tpu.matmul %157, %158, %cst_69 {dimension_numbers = #tpu.dot_dimension_numbers<[1], [0], [0], [1], [0, 0, 1, 1], [], []>} : vector<64x64xf32>, vector<64x256xf32>, vector<64x256xf32> -> vector<64x256xf32>
    %160 = arith.negf %159 : vector<64x256xf32>
    %161 = math.exp %160 : vector<64x256xf32>
    %cst_70 = arith.constant 1.000000e+00 : f32
    %162 = vector.broadcast %cst_70 : f32 to vector<64x256xf32>
    %163 = arith.addf %162, %161 : vector<64x256xf32>
    %164 = arith.divf %162, %163 : vector<64x256xf32>
    %165 = arith.mulf %159, %164 : vector<64x256xf32>
    %c0_71 = arith.constant 0 : index
    %c0_72 = arith.constant 0 : index
    %166 = vector.load %arg16[%c0_71, %c0_72] : memref<64x256xf32, #tpu.memory_space<vmem>>, vector<64x256xf32>
    %cst_73 = arith.constant dense<0.000000e+00> : vector<64x256xf32>
    %167 = tpu.matmul %157, %166, %cst_73 {dimension_numbers = #tpu.dot_dimension_numbers<[1], [0], [0], [1], [0, 0, 1, 1], [], []>} : vector<64x64xf32>, vector<64x256xf32>, vector<64x256xf32> -> vector<64x256xf32>
    %168 = arith.mulf %165, %167 : vector<64x256xf32>
    %c0_74 = arith.constant 0 : index
    %c0_75 = arith.constant 0 : index
    %169 = vector.load %arg17[%c0_74, %c0_75] : memref<256x64xf32, #tpu.memory_space<vmem>>, vector<256x64xf32>
    %cst_76 = arith.constant dense<0.000000e+00> : vector<64x64xf32>
    %170 = tpu.matmul %168, %169, %cst_76 {dimension_numbers = #tpu.dot_dimension_numbers<[1], [0], [0], [1], [0, 0, 1, 1], [], []>} : vector<64x256xf32>, vector<256x64xf32>, vector<64x64xf32> -> vector<64x64xf32>
    %171 = vector.broadcast %19 : vector<1x64xf32> to vector<64x64xf32>
    %172 = arith.mulf %171, %170 : vector<64x64xf32>
    %173 = arith.addf %143, %172 : vector<64x64xf32>
    %174 = vector.extract_strided_slice %0 {offsets = [0, 6, 0], sizes = [1, 1, 64], strides = [1, 1, 1]} : vector<1x14x64xf32> to vector<1x1x64xf32>
    %175 = vector.shape_cast %174 : vector<1x1x64xf32> to vector<1x64xf32>
    %176 = vector.extract_strided_slice %0 {offsets = [0, 7, 0], sizes = [1, 1, 64], strides = [1, 1, 1]} : vector<1x14x64xf32> to vector<1x1x64xf32>
    %177 = vector.shape_cast %176 : vector<1x1x64xf32> to vector<1x64xf32>
    %178 = vector.extract_strided_slice %0 {offsets = [0, 8, 0], sizes = [1, 1, 64], strides = [1, 1, 1]} : vector<1x14x64xf32> to vector<1x1x64xf32>
    %179 = vector.shape_cast %178 : vector<1x1x64xf32> to vector<1x64xf32>
    %180 = vector.extract_strided_slice %0 {offsets = [0, 9, 0], sizes = [1, 1, 64], strides = [1, 1, 1]} : vector<1x14x64xf32> to vector<1x1x64xf32>
    %181 = vector.shape_cast %180 : vector<1x1x64xf32> to vector<1x64xf32>
    %182 = vector.extract_strided_slice %0 {offsets = [0, 10, 0], sizes = [1, 1, 64], strides = [1, 1, 1]} : vector<1x14x64xf32> to vector<1x1x64xf32>
    %183 = vector.shape_cast %182 : vector<1x1x64xf32> to vector<1x64xf32>
    %184 = vector.extract_strided_slice %0 {offsets = [0, 11, 0], sizes = [1, 1, 64], strides = [1, 1, 1]} : vector<1x14x64xf32> to vector<1x1x64xf32>
    %185 = vector.shape_cast %184 : vector<1x1x64xf32> to vector<1x64xf32>
    %186 = arith.mulf %173, %173 : vector<64x64xf32>
    %cst_77 = arith.constant dense<0.000000e+00> : vector<64xf32>
    %187 = vector.multi_reduction <add>, %186, %cst_77 [1] : vector<64x64xf32> to vector<64xf32>
    %188 = vector.shape_cast %187 : vector<64xf32> to vector<64x1xf32>
    %cst_78 = arith.constant 6.400000e+01 : f32
    %189 = vector.broadcast %cst_78 : f32 to vector<64x1xf32>
    %190 = arith.divf %188, %189 : vector<64x1xf32>
    %cst_79 = arith.constant 9.99999997E-7 : f32
    %191 = vector.broadcast %cst_79 : f32 to vector<64x1xf32>
    %192 = arith.addf %190, %191 : vector<64x1xf32>
    %193 = math.rsqrt %192 : vector<64x1xf32>
    %194 = vector.broadcast %193 : vector<64x1xf32> to vector<64x64xf32>
    %195 = arith.mulf %173, %194 : vector<64x64xf32>
    %196 = vector.broadcast %177 : vector<1x64xf32> to vector<64x64xf32>
    %197 = arith.mulf %195, %196 : vector<64x64xf32>
    %198 = vector.broadcast %175 : vector<1x64xf32> to vector<64x64xf32>
    %199 = arith.addf %197, %198 : vector<64x64xf32>
    %c0_80 = arith.constant 0 : index
    %c0_81 = arith.constant 0 : index
    %200 = vector.load %arg22[%c0_80, %c0_81] : memref<64x64xf32, #tpu.memory_space<vmem>>, vector<64x64xf32>
    %cst_82 = arith.constant dense<0.000000e+00> : vector<64x64xf32>
    %201 = tpu.matmul %199, %200, %cst_82 {dimension_numbers = #tpu.dot_dimension_numbers<[1], [0], [0], [1], [0, 0, 1, 1], [], []>} : vector<64x64xf32>, vector<64x64xf32>, vector<64x64xf32> -> vector<64x64xf32>
    %c0_83 = arith.constant 0 : index
    %c0_84 = arith.constant 0 : index
    %202 = vector.load %arg23[%c0_83, %c0_84] : memref<64x64xf32, #tpu.memory_space<vmem>>, vector<64x64xf32>
    %cst_85 = arith.constant dense<0.000000e+00> : vector<64x64xf32>
    %203 = tpu.matmul %199, %202, %cst_85 {dimension_numbers = #tpu.dot_dimension_numbers<[1], [0], [0], [1], [0, 0, 1, 1], [], []>} : vector<64x64xf32>, vector<64x64xf32>, vector<64x64xf32> -> vector<64x64xf32>
    %c0_86 = arith.constant 0 : index
    %c0_87 = arith.constant 0 : index
    %204 = vector.load %arg24[%c0_86, %c0_87] : memref<64x64xf32, #tpu.memory_space<vmem>>, vector<64x64xf32>
    %cst_88 = arith.constant dense<0.000000e+00> : vector<64x64xf32>
    %205 = tpu.matmul %199, %204, %cst_88 {dimension_numbers = #tpu.dot_dimension_numbers<[1], [0], [0], [1], [0, 0, 1, 1], [], []>} : vector<64x64xf32>, vector<64x64xf32>, vector<64x64xf32> -> vector<64x64xf32>
    %c0_89 = arith.constant 0 : index
    %c0_90 = arith.constant 0 : index
    %206 = vector.load %arg25[%c0_89, %c0_90] : memref<64x64xf32, #tpu.memory_space<vmem>>, vector<64x64xf32>
    %cst_91 = arith.constant dense<0.000000e+00> : vector<64x64xf32>
    %207 = tpu.matmul %199, %206, %cst_91 {dimension_numbers = #tpu.dot_dimension_numbers<[1], [0], [0], [1], [0, 0, 1, 1], [], []>} : vector<64x64xf32>, vector<64x64xf32>, vector<64x64xf32> -> vector<64x64xf32>
    %c0_92 = arith.constant 0 : index
    %c0_93 = arith.constant 0 : index
    %208 = vector.load %arg26[%c0_92, %c0_93] : memref<64x64xf32, #tpu.memory_space<vmem>>, vector<64x64xf32>
    %cst_94 = arith.constant dense<0.000000e+00> : vector<64x64xf32>
    %209 = tpu.matmul %199, %208, %cst_94 {dimension_numbers = #tpu.dot_dimension_numbers<[1], [0], [0], [1], [0, 0, 1, 1], [], []>} : vector<64x64xf32>, vector<64x64xf32>, vector<64x64xf32> -> vector<64x64xf32>
    %210 = arith.mulf %201, %201 : vector<64x64xf32>
    %cst_95 = arith.constant dense<0.000000e+00> : vector<64x64xf32>
    %211 = tpu.matmul %210, %1, %cst_95 {dimension_numbers = #tpu.dot_dimension_numbers<[1], [0], [0], [1], [0, 0, 1, 1], [], []>} : vector<64x64xf32>, vector<64x64xf32>, vector<64x64xf32> -> vector<64x64xf32>
    %cst_96 = arith.constant 9.99999997E-7 : f32
    %212 = vector.broadcast %cst_96 : f32 to vector<64x64xf32>
    %213 = arith.addf %211, %212 : vector<64x64xf32>
    %214 = math.rsqrt %213 : vector<64x64xf32>
    %215 = arith.mulf %205, %205 : vector<64x64xf32>
    %cst_97 = arith.constant dense<0.000000e+00> : vector<64x64xf32>
    %216 = tpu.matmul %215, %1, %cst_97 {dimension_numbers = #tpu.dot_dimension_numbers<[1], [0], [0], [1], [0, 0, 1, 1], [], []>} : vector<64x64xf32>, vector<64x64xf32>, vector<64x64xf32> -> vector<64x64xf32>
    %cst_98 = arith.constant 9.99999997E-7 : f32
    %217 = vector.broadcast %cst_98 : f32 to vector<64x64xf32>
    %218 = arith.addf %216, %217 : vector<64x64xf32>
    %219 = math.rsqrt %218 : vector<64x64xf32>
    %c0_99 = arith.constant 0 : index
    %c0_100 = arith.constant 0 : index
    %220 = vector.load %arg32[%c0_99, %c0_100] : memref<64x64xf32, #tpu.memory_space<vmem>>, vector<64x64xf32>
    %221 = arith.mulf %201, %220 : vector<64x64xf32>
    %c0_101 = arith.constant 0 : index
    %c0_102 = arith.constant 0 : index
    %222 = vector.load %arg33[%c0_101, %c0_102] : memref<64x64xf32, #tpu.memory_space<vmem>>, vector<64x64xf32>
    %223 = arith.mulf %203, %222 : vector<64x64xf32>
    %224 = arith.addf %221, %223 : vector<64x64xf32>
    %225 = arith.mulf %214, %224 : vector<64x64xf32>
    %c0_103 = arith.constant 0 : index
    %c0_104 = arith.constant 0 : index
    %226 = vector.load %arg34[%c0_103, %c0_104] : memref<64x64xf32, #tpu.memory_space<vmem>>, vector<64x64xf32>
    %227 = arith.mulf %205, %226 : vector<64x64xf32>
    %c0_105 = arith.constant 0 : index
    %c0_106 = arith.constant 0 : index
    %228 = vector.load %arg35[%c0_105, %c0_106] : memref<64x64xf32, #tpu.memory_space<vmem>>, vector<64x64xf32>
    %229 = arith.mulf %207, %228 : vector<64x64xf32>
    %230 = arith.addf %227, %229 : vector<64x64xf32>
    %231 = arith.mulf %219, %230 : vector<64x64xf32>
    %c0_107 = arith.constant 0 : index
    %c0_108 = arith.constant 0 : index
    %232 = vector.load %arg27[%c0_107, %c0_108] : memref<64x64xf32, #tpu.memory_space<vmem>>, vector<64x64xf32>
    %233 = vector.extract_strided_slice %225 {offsets = [0, 0], sizes = [64, 16], strides = [1, 1]} : vector<64x64xf32> to vector<64x16xf32>
    %234 = vector.extract_strided_slice %231 {offsets = [0, 0], sizes = [64, 16], strides = [1, 1]} : vector<64x64xf32> to vector<64x16xf32>
    %cst_109 = arith.constant dense<0.000000e+00> : vector<64x64xf32>
    %235 = tpu.matmul %233, %234, %cst_109 {dimension_numbers = #tpu.dot_dimension_numbers<[1], [1], [0], [0], [0, 0, 1, 0], [], []>} : vector<64x16xf32>, vector<64x16xf32>, vector<64x64xf32> -> vector<64x64xf32>
    %cst_110 = arith.constant dense<0xFF800000> : vector<64xf32>
    %236 = vector.multi_reduction <maximumf>, %235, %cst_110 [1] : vector<64x64xf32> to vector<64xf32>
    %237 = vector.shape_cast %236 : vector<64xf32> to vector<64x1xf32>
    %238 = vector.broadcast %237 : vector<64x1xf32> to vector<64x64xf32>
    %239 = arith.subf %235, %238 : vector<64x64xf32>
    %240 = math.exp %239 : vector<64x64xf32>
    %cst_111 = arith.constant dense<0.000000e+00> : vector<64xf32>
    %241 = vector.multi_reduction <add>, %240, %cst_111 [1] : vector<64x64xf32> to vector<64xf32>
    %242 = vector.shape_cast %241 : vector<64xf32> to vector<64x1xf32>
    %243 = vector.extract_strided_slice %209 {offsets = [0, 0], sizes = [64, 16], strides = [1, 1]} : vector<64x64xf32> to vector<64x16xf32>
    %cst_112 = arith.constant dense<0.000000e+00> : vector<64x16xf32>
    %244 = tpu.matmul %240, %243, %cst_112 {dimension_numbers = #tpu.dot_dimension_numbers<[1], [0], [0], [1], [0, 0, 1, 1], [], []>} : vector<64x64xf32>, vector<64x16xf32>, vector<64x16xf32> -> vector<64x16xf32>
    %245 = tpu.reciprocal %242 : vector<64x1xf32> -> vector<64x1xf32>
    %246 = vector.broadcast %245 : vector<64x1xf32> to vector<64x16xf32>
    %247 = arith.mulf %244, %246 : vector<64x16xf32>
    %248 = vector.extract_strided_slice %232 {offsets = [0, 0], sizes = [16, 64], strides = [1, 1]} : vector<64x64xf32> to vector<16x64xf32>
    %cst_113 = arith.constant dense<0.000000e+00> : vector<64x64xf32>
    %249 = tpu.matmul %247, %248, %cst_113 {dimension_numbers = #tpu.dot_dimension_numbers<[1], [0], [0], [1], [0, 0, 1, 1], [], []>} : vector<64x16xf32>, vector<16x64xf32>, vector<64x64xf32> -> vector<64x64xf32>
    %250 = vector.extract_strided_slice %225 {offsets = [0, 16], sizes = [64, 16], strides = [1, 1]} : vector<64x64xf32> to vector<64x16xf32>
    %251 = vector.extract_strided_slice %231 {offsets = [0, 16], sizes = [64, 16], strides = [1, 1]} : vector<64x64xf32> to vector<64x16xf32>
    %cst_114 = arith.constant dense<0.000000e+00> : vector<64x64xf32>
    %252 = tpu.matmul %250, %251, %cst_114 {dimension_numbers = #tpu.dot_dimension_numbers<[1], [1], [0], [0], [0, 0, 1, 0], [], []>} : vector<64x16xf32>, vector<64x16xf32>, vector<64x64xf32> -> vector<64x64xf32>
    %cst_115 = arith.constant dense<0xFF800000> : vector<64xf32>
    %253 = vector.multi_reduction <maximumf>, %252, %cst_115 [1] : vector<64x64xf32> to vector<64xf32>
    %254 = vector.shape_cast %253 : vector<64xf32> to vector<64x1xf32>
    %255 = vector.broadcast %254 : vector<64x1xf32> to vector<64x64xf32>
    %256 = arith.subf %252, %255 : vector<64x64xf32>
    %257 = math.exp %256 : vector<64x64xf32>
    %cst_116 = arith.constant dense<0.000000e+00> : vector<64xf32>
    %258 = vector.multi_reduction <add>, %257, %cst_116 [1] : vector<64x64xf32> to vector<64xf32>
    %259 = vector.shape_cast %258 : vector<64xf32> to vector<64x1xf32>
    %260 = vector.extract_strided_slice %209 {offsets = [0, 16], sizes = [64, 16], strides = [1, 1]} : vector<64x64xf32> to vector<64x16xf32>
    %cst_117 = arith.constant dense<0.000000e+00> : vector<64x16xf32>
    %261 = tpu.matmul %257, %260, %cst_117 {dimension_numbers = #tpu.dot_dimension_numbers<[1], [0], [0], [1], [0, 0, 1, 1], [], []>} : vector<64x64xf32>, vector<64x16xf32>, vector<64x16xf32> -> vector<64x16xf32>
    %262 = tpu.reciprocal %259 : vector<64x1xf32> -> vector<64x1xf32>
    %263 = vector.broadcast %262 : vector<64x1xf32> to vector<64x16xf32>
    %264 = arith.mulf %261, %263 : vector<64x16xf32>
    %265 = vector.extract_strided_slice %232 {offsets = [16, 0], sizes = [16, 64], strides = [1, 1]} : vector<64x64xf32> to vector<16x64xf32>
    %cst_118 = arith.constant dense<0.000000e+00> : vector<64x64xf32>
    %266 = tpu.matmul %264, %265, %cst_118 {dimension_numbers = #tpu.dot_dimension_numbers<[1], [0], [0], [1], [0, 0, 1, 1], [], []>} : vector<64x16xf32>, vector<16x64xf32>, vector<64x64xf32> -> vector<64x64xf32>
    %267 = arith.addf %249, %266 : vector<64x64xf32>
    %268 = vector.extract_strided_slice %225 {offsets = [0, 32], sizes = [64, 16], strides = [1, 1]} : vector<64x64xf32> to vector<64x16xf32>
    %269 = vector.extract_strided_slice %231 {offsets = [0, 32], sizes = [64, 16], strides = [1, 1]} : vector<64x64xf32> to vector<64x16xf32>
    %cst_119 = arith.constant dense<0.000000e+00> : vector<64x64xf32>
    %270 = tpu.matmul %268, %269, %cst_119 {dimension_numbers = #tpu.dot_dimension_numbers<[1], [1], [0], [0], [0, 0, 1, 0], [], []>} : vector<64x16xf32>, vector<64x16xf32>, vector<64x64xf32> -> vector<64x64xf32>
    %cst_120 = arith.constant dense<0xFF800000> : vector<64xf32>
    %271 = vector.multi_reduction <maximumf>, %270, %cst_120 [1] : vector<64x64xf32> to vector<64xf32>
    %272 = vector.shape_cast %271 : vector<64xf32> to vector<64x1xf32>
    %273 = vector.broadcast %272 : vector<64x1xf32> to vector<64x64xf32>
    %274 = arith.subf %270, %273 : vector<64x64xf32>
    %275 = math.exp %274 : vector<64x64xf32>
    %cst_121 = arith.constant dense<0.000000e+00> : vector<64xf32>
    %276 = vector.multi_reduction <add>, %275, %cst_121 [1] : vector<64x64xf32> to vector<64xf32>
    %277 = vector.shape_cast %276 : vector<64xf32> to vector<64x1xf32>
    %278 = vector.extract_strided_slice %209 {offsets = [0, 32], sizes = [64, 16], strides = [1, 1]} : vector<64x64xf32> to vector<64x16xf32>
    %cst_122 = arith.constant dense<0.000000e+00> : vector<64x16xf32>
    %279 = tpu.matmul %275, %278, %cst_122 {dimension_numbers = #tpu.dot_dimension_numbers<[1], [0], [0], [1], [0, 0, 1, 1], [], []>} : vector<64x64xf32>, vector<64x16xf32>, vector<64x16xf32> -> vector<64x16xf32>
    %280 = tpu.reciprocal %277 : vector<64x1xf32> -> vector<64x1xf32>
    %281 = vector.broadcast %280 : vector<64x1xf32> to vector<64x16xf32>
    %282 = arith.mulf %279, %281 : vector<64x16xf32>
    %283 = vector.extract_strided_slice %232 {offsets = [32, 0], sizes = [16, 64], strides = [1, 1]} : vector<64x64xf32> to vector<16x64xf32>
    %cst_123 = arith.constant dense<0.000000e+00> : vector<64x64xf32>
    %284 = tpu.matmul %282, %283, %cst_123 {dimension_numbers = #tpu.dot_dimension_numbers<[1], [0], [0], [1], [0, 0, 1, 1], [], []>} : vector<64x16xf32>, vector<16x64xf32>, vector<64x64xf32> -> vector<64x64xf32>
    %285 = arith.addf %267, %284 : vector<64x64xf32>
    %286 = vector.extract_strided_slice %225 {offsets = [0, 48], sizes = [64, 16], strides = [1, 1]} : vector<64x64xf32> to vector<64x16xf32>
    %287 = vector.extract_strided_slice %231 {offsets = [0, 48], sizes = [64, 16], strides = [1, 1]} : vector<64x64xf32> to vector<64x16xf32>
    %cst_124 = arith.constant dense<0.000000e+00> : vector<64x64xf32>
    %288 = tpu.matmul %286, %287, %cst_124 {dimension_numbers = #tpu.dot_dimension_numbers<[1], [1], [0], [0], [0, 0, 1, 0], [], []>} : vector<64x16xf32>, vector<64x16xf32>, vector<64x64xf32> -> vector<64x64xf32>
    %cst_125 = arith.constant dense<0xFF800000> : vector<64xf32>
    %289 = vector.multi_reduction <maximumf>, %288, %cst_125 [1] : vector<64x64xf32> to vector<64xf32>
    %290 = vector.shape_cast %289 : vector<64xf32> to vector<64x1xf32>
    %291 = vector.broadcast %290 : vector<64x1xf32> to vector<64x64xf32>
    %292 = arith.subf %288, %291 : vector<64x64xf32>
    %293 = math.exp %292 : vector<64x64xf32>
    %cst_126 = arith.constant dense<0.000000e+00> : vector<64xf32>
    %294 = vector.multi_reduction <add>, %293, %cst_126 [1] : vector<64x64xf32> to vector<64xf32>
    %295 = vector.shape_cast %294 : vector<64xf32> to vector<64x1xf32>
    %296 = vector.extract_strided_slice %209 {offsets = [0, 48], sizes = [64, 16], strides = [1, 1]} : vector<64x64xf32> to vector<64x16xf32>
    %cst_127 = arith.constant dense<0.000000e+00> : vector<64x16xf32>
    %297 = tpu.matmul %293, %296, %cst_127 {dimension_numbers = #tpu.dot_dimension_numbers<[1], [0], [0], [1], [0, 0, 1, 1], [], []>} : vector<64x64xf32>, vector<64x16xf32>, vector<64x16xf32> -> vector<64x16xf32>
    %298 = tpu.reciprocal %295 : vector<64x1xf32> -> vector<64x1xf32>
    %299 = vector.broadcast %298 : vector<64x1xf32> to vector<64x16xf32>
    %300 = arith.mulf %297, %299 : vector<64x16xf32>
    %301 = vector.extract_strided_slice %232 {offsets = [48, 0], sizes = [16, 64], strides = [1, 1]} : vector<64x64xf32> to vector<16x64xf32>
    %cst_128 = arith.constant dense<0.000000e+00> : vector<64x64xf32>
    %302 = tpu.matmul %300, %301, %cst_128 {dimension_numbers = #tpu.dot_dimension_numbers<[1], [0], [0], [1], [0, 0, 1, 1], [], []>} : vector<64x16xf32>, vector<16x64xf32>, vector<64x64xf32> -> vector<64x64xf32>
    %303 = arith.addf %285, %302 : vector<64x64xf32>
    %c0_129 = arith.constant 0 : index
    %c0_130 = arith.constant 0 : index
    %304 = vector.load %arg28[%c0_129, %c0_130] : memref<1x64xf32, #tpu.memory_space<vmem>>, vector<1x64xf32>
    %305 = vector.broadcast %304 : vector<1x64xf32> to vector<64x64xf32>
    %306 = arith.addf %303, %305 : vector<64x64xf32>
    %307 = vector.broadcast %179 : vector<1x64xf32> to vector<64x64xf32>
    %308 = arith.mulf %307, %306 : vector<64x64xf32>
    %309 = arith.addf %173, %308 : vector<64x64xf32>
    %310 = arith.mulf %309, %309 : vector<64x64xf32>
    %cst_131 = arith.constant dense<0.000000e+00> : vector<64xf32>
    %311 = vector.multi_reduction <add>, %310, %cst_131 [1] : vector<64x64xf32> to vector<64xf32>
    %312 = vector.shape_cast %311 : vector<64xf32> to vector<64x1xf32>
    %cst_132 = arith.constant 6.400000e+01 : f32
    %313 = vector.broadcast %cst_132 : f32 to vector<64x1xf32>
    %314 = arith.divf %312, %313 : vector<64x1xf32>
    %cst_133 = arith.constant 9.99999997E-7 : f32
    %315 = vector.broadcast %cst_133 : f32 to vector<64x1xf32>
    %316 = arith.addf %314, %315 : vector<64x1xf32>
    %317 = math.rsqrt %316 : vector<64x1xf32>
    %318 = vector.broadcast %317 : vector<64x1xf32> to vector<64x64xf32>
    %319 = arith.mulf %309, %318 : vector<64x64xf32>
    %320 = vector.broadcast %183 : vector<1x64xf32> to vector<64x64xf32>
    %321 = arith.mulf %319, %320 : vector<64x64xf32>
    %322 = vector.broadcast %181 : vector<1x64xf32> to vector<64x64xf32>
    %323 = arith.addf %321, %322 : vector<64x64xf32>
    %c0_134 = arith.constant 0 : index
    %c0_135 = arith.constant 0 : index
    %324 = vector.load %arg29[%c0_134, %c0_135] : memref<64x256xf32, #tpu.memory_space<vmem>>, vector<64x256xf32>
    %cst_136 = arith.constant dense<0.000000e+00> : vector<64x256xf32>
    %325 = tpu.matmul %323, %324, %cst_136 {dimension_numbers = #tpu.dot_dimension_numbers<[1], [0], [0], [1], [0, 0, 1, 1], [], []>} : vector<64x64xf32>, vector<64x256xf32>, vector<64x256xf32> -> vector<64x256xf32>
    %326 = arith.negf %325 : vector<64x256xf32>
    %327 = math.exp %326 : vector<64x256xf32>
    %cst_137 = arith.constant 1.000000e+00 : f32
    %328 = vector.broadcast %cst_137 : f32 to vector<64x256xf32>
    %329 = arith.addf %328, %327 : vector<64x256xf32>
    %330 = arith.divf %328, %329 : vector<64x256xf32>
    %331 = arith.mulf %325, %330 : vector<64x256xf32>
    %c0_138 = arith.constant 0 : index
    %c0_139 = arith.constant 0 : index
    %332 = vector.load %arg30[%c0_138, %c0_139] : memref<64x256xf32, #tpu.memory_space<vmem>>, vector<64x256xf32>
    %cst_140 = arith.constant dense<0.000000e+00> : vector<64x256xf32>
    %333 = tpu.matmul %323, %332, %cst_140 {dimension_numbers = #tpu.dot_dimension_numbers<[1], [0], [0], [1], [0, 0, 1, 1], [], []>} : vector<64x64xf32>, vector<64x256xf32>, vector<64x256xf32> -> vector<64x256xf32>
    %334 = arith.mulf %331, %333 : vector<64x256xf32>
    %c0_141 = arith.constant 0 : index
    %c0_142 = arith.constant 0 : index
    %335 = vector.load %arg31[%c0_141, %c0_142] : memref<256x64xf32, #tpu.memory_space<vmem>>, vector<256x64xf32>
    %cst_143 = arith.constant dense<0.000000e+00> : vector<64x64xf32>
    %336 = tpu.matmul %334, %335, %cst_143 {dimension_numbers = #tpu.dot_dimension_numbers<[1], [0], [0], [1], [0, 0, 1, 1], [], []>} : vector<64x256xf32>, vector<256x64xf32>, vector<64x64xf32> -> vector<64x64xf32>
    %337 = vector.broadcast %185 : vector<1x64xf32> to vector<64x64xf32>
    %338 = arith.mulf %337, %336 : vector<64x64xf32>
    %339 = arith.addf %309, %338 : vector<64x64xf32>
    %340 = vector.extract_strided_slice %0 {offsets = [0, 12, 0], sizes = [1, 1, 64], strides = [1, 1, 1]} : vector<1x14x64xf32> to vector<1x1x64xf32>
    %341 = vector.shape_cast %340 : vector<1x1x64xf32> to vector<1x64xf32>
    %342 = vector.extract_strided_slice %0 {offsets = [0, 13, 0], sizes = [1, 1, 64], strides = [1, 1, 1]} : vector<1x14x64xf32> to vector<1x1x64xf32>
    %343 = vector.shape_cast %342 : vector<1x1x64xf32> to vector<1x64xf32>
    %cst_144 = arith.constant dense<0.000000e+00> : vector<64xf32>
    %344 = vector.multi_reduction <add>, %339, %cst_144 [1] : vector<64x64xf32> to vector<64xf32>
    %345 = vector.shape_cast %344 : vector<64xf32> to vector<64x1xf32>
    %cst_145 = arith.constant 6.400000e+01 : f32
    %346 = vector.broadcast %cst_145 : f32 to vector<64x1xf32>
    %347 = arith.divf %345, %346 : vector<64x1xf32>
    %348 = vector.broadcast %347 : vector<64x1xf32> to vector<64x64xf32>
    %349 = arith.subf %339, %348 : vector<64x64xf32>
    %350 = arith.mulf %349, %349 : vector<64x64xf32>
    %cst_146 = arith.constant dense<0.000000e+00> : vector<64xf32>
    %351 = vector.multi_reduction <add>, %350, %cst_146 [1] : vector<64x64xf32> to vector<64xf32>
    %352 = vector.shape_cast %351 : vector<64xf32> to vector<64x1xf32>
    %cst_147 = arith.constant 6.400000e+01 : f32
    %353 = vector.broadcast %cst_147 : f32 to vector<64x1xf32>
    %354 = arith.divf %352, %353 : vector<64x1xf32>
    %cst_148 = arith.constant 9.99999997E-7 : f32
    %355 = vector.broadcast %cst_148 : f32 to vector<64x1xf32>
    %356 = arith.addf %354, %355 : vector<64x1xf32>
    %357 = math.rsqrt %356 : vector<64x1xf32>
    %358 = vector.broadcast %357 : vector<64x1xf32> to vector<64x64xf32>
    %359 = arith.mulf %349, %358 : vector<64x64xf32>
    %360 = vector.broadcast %343 : vector<1x64xf32> to vector<64x64xf32>
    %361 = arith.mulf %359, %360 : vector<64x64xf32>
    %362 = vector.broadcast %341 : vector<1x64xf32> to vector<64x64xf32>
    %363 = arith.addf %361, %362 : vector<64x64xf32>
    %c0_149 = arith.constant 0 : index
    %c0_150 = arith.constant 0 : index
    %364 = vector.load %arg6[%c0_149, %c0_150] : memref<64x128xf32, #tpu.memory_space<vmem>>, vector<64x128xf32>
    %cst_151 = arith.constant dense<0.000000e+00> : vector<64x128xf32>
    %365 = tpu.matmul %363, %364, %cst_151 {dimension_numbers = #tpu.dot_dimension_numbers<[1], [0], [0], [1], [0, 0, 1, 1], [], []>} : vector<64x64xf32>, vector<64x128xf32>, vector<64x128xf32> -> vector<64x128xf32>
    %c0_152 = arith.constant 0 : index
    %c0_153 = arith.constant 0 : index
    %366 = vector.load %arg7[%c0_152, %c0_153] : memref<1x128xf32, #tpu.memory_space<vmem>>, vector<1x128xf32>
    %367 = vector.broadcast %366 : vector<1x128xf32> to vector<64x128xf32>
    %368 = arith.addf %365, %367 : vector<64x128xf32>
    %c0_154 = arith.constant 0 : index
    %c0_155 = arith.constant 0 : index
    %369 = vector.load %arg36[%c0_154, %c0_155] : memref<64x128xf32, #tpu.memory_space<vmem>>, vector<64x128xf32>
    tpu.vector_store %arg36[%c0_154, %c0_155], %368 {strides = array<i32>} : memref<64x128xf32, #tpu.memory_space<vmem>>, vector<64x128xf32>,
    return
  }
  func.func @transform_0(%arg0: i32) -> (i32, i32) {
    %c0_i32 = arith.constant 0 : i32
    %c0_i32_0 = arith.constant 0 : i32
    return %arg0, %c0_i32 : i32, i32
  }
  func.func @transform_1(%arg0: i32) -> (i32, i32, i32) {
    %c0_i32 = arith.constant 0 : i32
    %c0_i32_0 = arith.constant 0 : i32
    %c0_i32_1 = arith.constant 0 : i32
    return %arg0, %c0_i32, %c0_i32_0 : i32, i32, i32
  }
  func.func @transform_2(%arg0: i32) -> (i32, i32) {
    %c0_i32 = arith.constant 0 : i32
    %c0_i32_0 = arith.constant 0 : i32
    %c0_i32_1 = arith.constant 0 : i32
    return %c0_i32, %c0_i32_0 : i32, i32
  }
  func.func @transform_3(%arg0: i32) -> (i32, i32) {
    %c0_i32 = arith.constant 0 : i32
    %c0_i32_0 = arith.constant 0 : i32
    %c0_i32_1 = arith.constant 0 : i32
    return %c0_i32, %c0_i32_0 : i32, i32
  }
  func.func @transform_4(%arg0: i32) -> (i32, i32) {
    %c0_i32 = arith.constant 0 : i32
    %c0_i32_0 = arith.constant 0 : i32
    %c0_i32_1 = arith.constant 0 : i32
    return %c0_i32, %c0_i32_0 : i32, i32
  }
  func.func @transform_5(%arg0: i32) -> (i32, i32) {
    %c0_i32 = arith.constant 0 : i32
    %c0_i32_0 = arith.constant 0 : i32
    %c0_i32_1 = arith.constant 0 : i32
    return %c0_i32, %c0_i32_0 : i32, i32
  }
  func.func @transform_6(%arg0: i32) -> (i32, i32) {
    %c0_i32 = arith.constant 0 : i32
    %c0_i32_0 = arith.constant 0 : i32
    %c0_i32_1 = arith.constant 0 : i32
    return %c0_i32, %c0_i32_0 : i32, i32
  }
  func.func @transform_7(%arg0: i32) -> (i32, i32) {
    %c0_i32 = arith.constant 0 : i32
    %c0_i32_0 = arith.constant 0 : i32
    %c0_i32_1 = arith.constant 0 : i32
    return %c0_i32, %c0_i32_0 : i32, i32
  }
  func.func @transform_8(%arg0: i32) -> (i32, i32) {
    %c0_i32 = arith.constant 0 : i32
    %c0_i32_0 = arith.constant 0 : i32
    %c0_i32_1 = arith.constant 0 : i32
    return %c0_i32, %c0_i32_0 : i32, i32
  }
  func.func @transform_9(%arg0: i32) -> (i32, i32) {
    %c0_i32 = arith.constant 0 : i32
    %c0_i32_0 = arith.constant 0 : i32
    %c0_i32_1 = arith.constant 0 : i32
    return %c0_i32, %c0_i32_0 : i32, i32
  }
  func.func @transform_10(%arg0: i32) -> (i32, i32) {
    %c0_i32 = arith.constant 0 : i32
    %c0_i32_0 = arith.constant 0 : i32
    %c0_i32_1 = arith.constant 0 : i32
    return %c0_i32, %c0_i32_0 : i32, i32
  }
  func.func @transform_11(%arg0: i32) -> (i32, i32) {
    %c0_i32 = arith.constant 0 : i32
    %c0_i32_0 = arith.constant 0 : i32
    %c0_i32_1 = arith.constant 0 : i32
    return %c0_i32, %c0_i32_0 : i32, i32
  }
  func.func @transform_12(%arg0: i32) -> (i32, i32) {
    %c0_i32 = arith.constant 0 : i32
    %c0_i32_0 = arith.constant 0 : i32
    %c0_i32_1 = arith.constant 0 : i32
    return %c0_i32, %c0_i32_0 : i32, i32
  }
  func.func @transform_13(%arg0: i32) -> (i32, i32) {
    %c0_i32 = arith.constant 0 : i32
    %c0_i32_0 = arith.constant 0 : i32
    %c0_i32_1 = arith.constant 0 : i32
    return %c0_i32, %c0_i32_0 : i32, i32
  }
  func.func @transform_14(%arg0: i32) -> (i32, i32) {
    %c0_i32 = arith.constant 0 : i32
    %c0_i32_0 = arith.constant 0 : i32
    %c0_i32_1 = arith.constant 0 : i32
    return %c0_i32, %c0_i32_0 : i32, i32
  }
  func.func @transform_15(%arg0: i32) -> (i32, i32) {
    %c0_i32 = arith.constant 0 : i32
    %c0_i32_0 = arith.constant 0 : i32
    %c0_i32_1 = arith.constant 0 : i32
    return %c0_i32, %c0_i32_0 : i32, i32
  }
  func.func @transform_16(%arg0: i32) -> (i32, i32) {
    %c0_i32 = arith.constant 0 : i32
    %c0_i32_0 = arith.constant 0 : i32
    %c0_i32_1 = arith.constant 0 : i32
    return %c0_i32, %c0_i32_0 : i32, i32
  }
  func.func @transform_17(%arg0: i32) -> (i32, i32) {
    %c0_i32 = arith.constant 0 : i32
    %c0_i32_0 = arith.constant 0 : i32
    %c0_i32_1 = arith.constant 0 : i32
    return %c0_i32, %c0_i32_0 : i32, i32
  }
  func.func @transform_18(%arg0: i32) -> (i32, i32) {
    %c0_i32 = arith.constant 0 : i32
    %c0_i32_0 = arith.constant 0 : i32
    %c0_i32_1 = arith.constant 0 : i32
    return %c0_i32, %c0_i32_0 : i32, i32
  }
  func.func @transform_19(%arg0: i32) -> (i32, i32) {
    %c0_i32 = arith.constant 0 : i32
    %c0_i32_0 = arith.constant 0 : i32
    %c0_i32_1 = arith.constant 0 : i32
    return %c0_i32, %c0_i32_0 : i32, i32
  }
  func.func @transform_20(%arg0: i32) -> (i32, i32) {
    %c0_i32 = arith.constant 0 : i32
    %c0_i32_0 = arith.constant 0 : i32
    %c0_i32_1 = arith.constant 0 : i32
    return %c0_i32, %c0_i32_0 : i32, i32
  }
  func.func @transform_21(%arg0: i32) -> (i32, i32) {
    %c0_i32 = arith.constant 0 : i32
    %c0_i32_0 = arith.constant 0 : i32
    %c0_i32_1 = arith.constant 0 : i32
    return %c0_i32, %c0_i32_0 : i32, i32
  }
  func.func @transform_22(%arg0: i32) -> (i32, i32) {
    %c0_i32 = arith.constant 0 : i32
    %c0_i32_0 = arith.constant 0 : i32
    %c0_i32_1 = arith.constant 0 : i32
    return %c0_i32, %c0_i32_0 : i32, i32
  }
  func.func @transform_23(%arg0: i32) -> (i32, i32) {
    %c0_i32 = arith.constant 0 : i32
    %c0_i32_0 = arith.constant 0 : i32
    %c0_i32_1 = arith.constant 0 : i32
    return %c0_i32, %c0_i32_0 : i32, i32
  }
  func.func @transform_24(%arg0: i32) -> (i32, i32) {
    %c0_i32 = arith.constant 0 : i32
    %c0_i32_0 = arith.constant 0 : i32
    %c0_i32_1 = arith.constant 0 : i32
    return %c0_i32, %c0_i32_0 : i32, i32
  }
  func.func @transform_25(%arg0: i32) -> (i32, i32) {
    %c0_i32 = arith.constant 0 : i32
    %c0_i32_0 = arith.constant 0 : i32
    %c0_i32_1 = arith.constant 0 : i32
    return %c0_i32, %c0_i32_0 : i32, i32
  }
  func.func @transform_26(%arg0: i32) -> (i32, i32) {
    %c0_i32 = arith.constant 0 : i32
    %c0_i32_0 = arith.constant 0 : i32
    %c0_i32_1 = arith.constant 0 : i32
    return %c0_i32, %c0_i32_0 : i32, i32
  }
  func.func @transform_27(%arg0: i32) -> (i32, i32) {
    %c0_i32 = arith.constant 0 : i32
    %c0_i32_0 = arith.constant 0 : i32
    %c0_i32_1 = arith.constant 0 : i32
    return %c0_i32, %c0_i32_0 : i32, i32
  }
  func.func @transform_28(%arg0: i32) -> (i32, i32) {
    %c0_i32 = arith.constant 0 : i32
    %c0_i32_0 = arith.constant 0 : i32
    %c0_i32_1 = arith.constant 0 : i32
    return %c0_i32, %c0_i32_0 : i32, i32
  }
  func.func @transform_29(%arg0: i32) -> (i32, i32) {
    %c0_i32 = arith.constant 0 : i32
    %c0_i32_0 = arith.constant 0 : i32
    %c0_i32_1 = arith.constant 0 : i32
    return %c0_i32, %c0_i32_0 : i32, i32
  }
  func.func @transform_30(%arg0: i32) -> (i32, i32) {
    %c0_i32 = arith.constant 0 : i32
    %c0_i32_0 = arith.constant 0 : i32
    %c0_i32_1 = arith.constant 0 : i32
    return %c0_i32, %c0_i32_0 : i32, i32
  }
  func.func @transform_31(%arg0: i32) -> (i32, i32) {
    %c0_i32 = arith.constant 0 : i32
    %c0_i32_0 = arith.constant 0 : i32
    %c0_i32_1 = arith.constant 0 : i32
    return %c0_i32, %c0_i32_0 : i32, i32
  }
  func.func @transform_32(%arg0: i32) -> (i32, i32) {
    %c0_i32 = arith.constant 0 : i32
    %c0_i32_0 = arith.constant 0 : i32
    %c0_i32_1 = arith.constant 0 : i32
    return %c0_i32, %c0_i32_0 : i32, i32
  }
  func.func @transform_33(%arg0: i32) -> (i32, i32) {
    %c0_i32 = arith.constant 0 : i32
    %c0_i32_0 = arith.constant 0 : i32
    %c0_i32_1 = arith.constant 0 : i32
    return %c0_i32, %c0_i32_0 : i32, i32
  }
  func.func @transform_34(%arg0: i32) -> (i32, i32) {
    %c0_i32 = arith.constant 0 : i32
    %c0_i32_0 = arith.constant 0 : i32
    %c0_i32_1 = arith.constant 0 : i32
    return %c0_i32, %c0_i32_0 : i32, i32
  }
  func.func @transform_35(%arg0: i32) -> (i32, i32) {
    %c0_i32 = arith.constant 0 : i32
    %c0_i32_0 = arith.constant 0 : i32
    return %arg0, %c0_i32 : i32, i32
  }
}

</mosaic_0001>

<bundles_post_ra>
// kernel: neg.4
= control target key start
LH: loop header
LB: loop body
LE: loop exit
PB: predicated region body
PF: predicated region fallthrough
CT: control target
= control target key end

     0   :  { %s24_s0 = inlined_call_operand.vmem [shape: f32[64,8,1], index: 0, kind: input, shape index: {}]   ;;  %s25_s1 = inlined_call_operand.vmem [shape: f32[64,8,1], index: 1, kind: output, shape index: {}]  }
   0x1   :  { %v2_v0 = vld [vmem:[%s24_s0] sm:$0xff] }
   0x2   :  { %v5_v1 = vxor.u32 2147483648, %v2_v0 }
   0x4   :  { %7 = vst [vmem:[%s25_s1] sm:$0xff] %v5_v1 }

// kernel: dit_forward_pallas.1
= control target key start
LH: loop header
LB: loop body
LE: loop exit
PB: predicated region body
PF: predicated region fallthrough
CT: control target
= control target key end

     0   :  { %s9770_s6 = smov 1   ;;  %s9771_s10 = smov 2   ;;  %s13877_s0 = inlined_call_operand.smem [shape: u32[36], index: -1, kind: input, shape index: {}] }
   0x1   :  { %s9817_s5 = sld [smem:[%s13877_s0]]   ;;  %s9772_s14 = smov 3  }
   0x2   :  { %s9822_s9 = sld [smem:[%s13877_s0 + %s9770_s6]]   ;;  %s9773_s18 = smov 4  }
   0x3   :  { %s9827_s13 = sld [smem:[%s13877_s0 + %s9771_s10]]   ;;  %s9774_s22 = smov 5  }
   0x4   :  { %s9832_s17 = sld [smem:[%s13877_s0 + %s9772_s14]]   ;;  %s9775_s26 = smov 6  }
   0x5   :  { %s9837_s21 = sld [smem:[%s13877_s0 + %s9773_s18]]   ;;  %s9776_s30 = smov 7  }
   0x6   :  { %s9842_s25 = sld [smem:[%s13877_s0 + %s9774_s22]]   ;;  %s9777_s4 = smov 8  }
   0x7   :  { %13918 = sst [smem:[#allocation2_spill]] %s9817_s5  ;;  %s9778_s10 = smov 9  }
   0x8   :  { %s9847_s29 = sld [smem:[%s13877_s0 + %s9775_s26]]   ;;  %s9779_s15 = smov 10  }
   0x9   :  { %s9852_s3 = sld [smem:[%s13877_s0 + %s9776_s30]]   ;;  %s9780_s20 = smov 11  }
   0xa   :  { %s9857_s8 = sld [smem:[%s13877_s0 + %s9777_s4]]   ;;  %s9781_s26 = smov 12  }
   0xb   :  { %s9862_s14 = sld [smem:[%s13877_s0 + %s9778_s10]]   ;;  %s9782_s1 = smov 13  }
   0xc   :  { %13919 = sst [smem:[#allocation3_spill]] %s9842_s25  ;;  %s9783_s7 = smov 14  }
   0xd   :  { %s9867_s19 = sld [smem:[%s13877_s0 + %s9779_s15]]   ;;  %s9784_s15 = smov 15  }
   0xe   :  { %13920 = sst [smem:[#allocation4_spill]] %s9847_s29  ;;  %s9785_s22 = smov 16  }
   0xf   :  { %13921 = sst [smem:[#allocation5_spill]] %s9852_s3  ;;  %s9786_s28 = smov 17  }
  0x10   :  { %s9872_s24 = sld [smem:[%s13877_s0 + %s9780_s20]]  }
  0x11   :  { %s9877_s30 = sld [smem:[%s13877_s0 + %s9781_s26]]  }
  0x12   :  { %s9882_s6 = sld [smem:[%s13877_s0 + %s9782_s1]]  }
  0x13   :  { %s9887_s12 = sld [smem:[%s13877_s0 + %s9783_s7]]   ;;  %s9787_s7 = smov 18  }
  0x14   :  { %s9892_s20 = sld [smem:[%s13877_s0 + %s9784_s15]]   ;;  %s9788_s15 = smov 19  }
  0x15   :  { %s9897_s27 = sld [smem:[%s13877_s0 + %s9785_s22]]   ;;  %s9789_s22 = smov 20  }
  0x16   :  { %s9902_s4 = sld [smem:[%s13877_s0 + %s9786_s28]]   ;;  %s9790_s28 = smov 21  }
  0x17   :  { %13922 = sst [smem:[#allocation6_spill]] %s9877_s30 }
  0x18   :  { %13923 = sst [smem:[#allocation7_spill]] %s9882_s6 }
  0x19   :  { %13924 = sst [smem:[#allocation8_spill]] %s9887_s12 }
  0x1a   :  { %13925 = sst [smem:[#allocation9_spill]] %s9892_s20 }
  0x1b   :  { %13926 = sst [smem:[#allocation10_spill]] %s9897_s27 }
  0x1c   :  { %13927 = sst [smem:[#allocation11_spill]] %s9902_s4 }
  0x1d   :  { %s9907_s29 = sld [smem:[%s13877_s0 + %s9787_s7]]   ;;  %s9791_s7 = smov 22  }
  0x1e   :  { %s9912_s25 = sld [smem:[%s13877_s0 + %s9788_s15]]   ;;  %s9792_s15 = smov 23  }
  0x1f   :  { %s9917_s27 = sld [smem:[%s13877_s0 + %s9789_s22]]   ;;  %s9793_s22 = smov 24  }
  0x20   :  { %s9922_s20 = sld [smem:[%s13877_s0 + %s9790_s28]]   ;;  %s9794_s28 = smov 25  }
  0x21   :  { %s9927_s12 = sld [smem:[%s13877_s0 + %s9791_s7]]   ;;  %s9795_s7 = smov 26  }
  0x22   :  { %s9932_s6 = sld [smem:[%s13877_s0 + %s9792_s15]]   ;;  %s9796_s15 = smov 27  }
  0x23   :  { %s9937_s30 = sld [smem:[%s13877_s0 + %s9793_s22]]   ;;  %s9797_s22 = smov 28  }
  0x26   :  { %13928 = sst [smem:[#allocation12_spill]] %s9922_s20 }
  0x27   :  { %13929 = sst [smem:[#allocation13_spill]] %s9927_s12 }
  0x28   :  { %13930 = sst [smem:[#allocation14_spill]] %s9932_s6 }
  0x29   :  { %13931 = sst [smem:[#allocation15_spill]] %s9937_s30 }
  0x2a   :  { %s9942_s20 = sld [smem:[%s13877_s0 + %s9794_s28]]   ;;  %s9798_s28 = smov 29  }
  0x2b   :  { %s9947_s12 = sld [smem:[%s13877_s0 + %s9795_s7]]   ;;  %s9799_s7 = smov 30  }
  0x2c   :  { %s9952_s6 = sld [smem:[%s13877_s0 + %s9796_s15]]   ;;  %s9800_s15 = smov 31  }
  0x2d   :  { %s9957_s30 = sld [smem:[%s13877_s0 + %s9797_s22]]   ;;  %s9801_s22 = smov 32  }
  0x30   :  { %13932 = sst [smem:[#allocation16_spill]] %s9942_s20 }
  0x31   :  { %13933 = sst [smem:[#allocation17_spill]] %s9947_s12 }
  0x32   :  { %13934 = sst [smem:[#allocation18_spill]] %s9952_s6 }
  0x33   :  { %13935 = sst [smem:[#allocation19_spill]] %s9957_s30 }
  0x34   :  { %s9962_s20 = sld [smem:[%s13877_s0 + %s9798_s28]]   ;;  %s9802_s28 = smov 33  }
  0x35   :  { %s9967_s12 = sld [smem:[%s13877_s0 + %s9799_s7]]   ;;  %s9803_s7 = smov 34  }
  0x36   :  { %s9972_s6 = sld [smem:[%s13877_s0 + %s9800_s15]]   ;;  %s9804_s15 = smov 35  }
  0x37   :  { %s9977_s30 = sld [smem:[%s13877_s0 + %s9801_s22]]   ;;  %s9994_s22 = smov 0  }
  0x3a   :  { %13936 = sst [smem:[#allocation20_spill]] %s9962_s20 }
  0x3b   :  { %13937 = sst [smem:[#allocation21_spill]] %s9967_s12 }
  0x3c   :  { %13938 = sst [smem:[#allocation22_spill]] %s9972_s6 }
  0x3d   :  { %s9982_s20 = sld [smem:[%s13877_s0 + %s9802_s28]]  }
  0x3e   :  { %s9987_s12 = sld [smem:[%s13877_s0 + %s9803_s7]]  }
  0x3f   :  { %s9992_s6 = sld [smem:[%s13877_s0 + %s9804_s15]]  }
  0x40 LB: > { %s13939_s4 = sld [smem:[#allocation11_spill]]  ;;  %s10000_s23 = sadd.s32 4294967295, %s9768_s22   ;;  %s9768_s22 = sphi %s9994_s22, %s81_s22  }
  0x41   : > { %s13940_s3 = sld [smem:[#allocation5_spill]]  ;;  %p8560_p0 = scmp.ge.s32.totalorder %s9768_s22, 1 }
  0x42   : > { %p984_p1 = scmp.lt.s32.totalorder %s9768_s22, 3 }
  0x44   : > { %p985_p2 = pnand %p8560_p0, %p984_p1 }
  0x46   : > { %988 = sbr.rel (%p985_p2) target bundleno = 4923 (0x133b), region = 160 }
  0x4b   : > { %s13941_s5 = sld [smem:[#allocation2_spill]]  ;;  %v1113_v0 = vld [vmem:[%s9832_s17 + $0x8] sm:$0xff]  ;;  %v1112_v1 = vld [vmem:[%s9832_s17] sm:$0xff]  ;;  %s8561_s0 = sshll.u32 %s10000_s23, 3  ;;  %vm1118_vm0 = vcmask 130048   ;;  %vm1192_vm1 = vcmask 523264  }
  0x4c   : > { %1157 = vmatpush.msra.mxu0 %v1113_v0  ;;  %p1078_p3 = scmp.lt.s32.totalorder %s8561_s0, 15  ;;  %v9217_v10 = vld [vmem:[%s9837_s21] ss:$0 sm:$0xff]  ;;  %v9805_v43 = vmov 64.0   ;;  %v1353_v45 = vld [vmem:[%s13940_s3 + $0x38] sm:$0xff]  ;;  %v1352_v50 = vld [vmem:[%s13940_s3 + $0x30] sm:$0xff] }
  0x4d   : > { %9221 = vrcp.f32 %v9805_v43  ;;  %v1426_v46 = vld [vmem:[%s9857_s8 + $0x38] sm:$0xff]  ;;  %1386 = vmatpush.msra.mxu1 %v1353_v45  ;;  %v1425_v51 = vld [vmem:[%s9857_s8 + $0x30] sm:$0xff]  ;;  %v1351_v54 = vld [vmem:[%s13940_s3 + $0x28] sm:$0xff]  ;;  %p1083_p4 = scmp.lt.s32.totalorder %s10000_s23, 1  ;;  %s13910_s7 = smov 112  }
  0x4e   : > { %1158 = vmatpush.msra.mxu0 %v1112_v1  ;;  %s14056_s0 = smov (!%p1078_p3, %s8561_s0), 15  ;;  %v1475_v47 = vld [vmem:[%s9862_s14 + $0x38] sm:$0xff]  ;;  %1435 = vmatpush.msra.mxu2 %v1426_v46  ;;  %v1474_v52 = vld [vmem:[%s9862_s14 + $0x30] sm:$0xff]  ;;  %v1424_v55 = vld [vmem:[%s9857_s8 + $0x28] sm:$0xff]  ;;  %s13903_s10 = smov 96  }
  0x4f   : > { %s13900_s26 = sshll.u32 %s14056_s0, 3  ;;  %v1524_v49 = vld [vmem:[%s9867_s19 + $0x38] sm:$0xff]  ;;  %1484 = vmatpush.msra.mxu3 %v1475_v47  ;;  %1387 = vmatpush.msra.mxu1 %v1352_v50  ;;  %v1523_v53 = vld [vmem:[%s9867_s19 + $0x30] sm:$0xff]  ;;  %v1473_v56 = vld [vmem:[%s9862_s14 + $0x28] sm:$0xff]  ;;  %s14058_s23 = smov (!%p1083_p4, %s10000_s23), 1 }
  0x50   : > { %1533 = vmatpush.msrb.mxu0 %v1524_v49  ;;  %1436 = vmatpush.msra.mxu2 %v1425_v51  ;;  %v1522_v58 = vld [vmem:[%s9867_s19 + $0x28] sm:$0xff]  ;;  %v1350_v59 = vld [vmem:[%s13940_s3 + $0x20] sm:$0xff]  ;;  %v1349_v63 = vld [vmem:[%s13940_s3 + $0x18] sm:$0xff]  ;;  %s9049_s1 = sshll.u32 %s14058_s23, 4  ;;  %s13901_s11 = smov 80  }
  0x51   : > { %s1081_s28 = scalar_lea.vmem %s13941_s5, %s13900_s26  ;;  %1485 = vmatpush.msra.mxu3 %v1474_v52  ;;  %1388 = vmatpush.msra.mxu1 %v1351_v54  ;;  %v1423_v60 = vld [vmem:[%s9857_s8 + $0x20] sm:$0xff]  ;;  %v1422_v0 = vld [vmem:[%s9857_s8 + $0x18] sm:$0xff]  ;;  %s10108_s2 = scalar_lea.vmem %s9822_s9, %s9049_s1 }
  0x52   : > { %v1104_v2 = vld [vmem:[%s1081_s28] sm:$0xff]  ;;  %v1105_v3 = vld [vmem:[%s1081_s28 + $0x8] sm:$0xff]  ;;  %v1106_v4 = vld [vmem:[%s1081_s28 + $0x10] sm:$0xff]  ;;  %1534 = vmatpush.msrb.mxu0 %v1523_v53  ;;  %1437 = vmatpush.msra.mxu2 %v1424_v55  ;;  %s13960_s15 = sld [smem:[#allocation6_spill]] }
  0x53   : > { %8567 = vmatmul.msk.f32.vlgmr.msra.gmra.mxu0 %vm1118_vm0, %v1104_v2  ;;  %v1107_v5 = vld [vmem:[%s1081_s28 + $0x18] sm:$0xff]  ;;  %v1108_v6 = vld [vmem:[%s1081_s28 + $0x20] sm:$0xff]  ;;  %v1109_v7 = vld [vmem:[%s1081_s28 + $0x28] sm:$0xff]  ;;  %v10062_v44 = vpop.eup %9221  ;;  %1486 = vmatpush.msra.mxu3 %v1473_v56  ;;  %s13975_s16 = sld [smem:[#allocation7_spill]] }
  0x54   : > { %v1110_v8 = vld [vmem:[%s1081_s28 + $0x30] sm:$0xff]  ;;  %v1111_v9 = vld [vmem:[%s1081_s28 + $0x38] sm:$0xff]  ;;  %v1218_v48 = vmul.f32 64.0, %v10062_v44  ;;  %1535 = vmatpush.msrb.mxu0 %v1522_v58  ;;  %v1472_v61 = vld [vmem:[%s9862_s14 + $0x20] sm:$0xff]  ;;  %1389 = vmatpush.msra.mxu1 %v1350_v59  ;;  %vm1222_vm2 = vweird.f32 %v10062_v44  ;;  %s13979_s18 = sld [smem:[#allocation8_spill]] }
  0x55   : > { %1438 = vmatpush.msra.mxu2 %v1423_v60  ;;  %v1521_v62 = vld [vmem:[%s9867_s19 + $0x20] sm:$0xff]  ;;  %1487 = vmatpush.msra.mxu3 %v1472_v61  ;;  %v1471_v1 = vld [vmem:[%s9862_s14 + $0x18] sm:$0xff]  ;;  %s13980_s23 = sld [smem:[#allocation9_spill]] }
  0x56   : > { %v1219_v57 = vsub.f32 1.0, %v1218_v48  ;;  %1536 = vmatpush.msrb.mxu0 %v1521_v62  ;;  %1390 = vmatpush.msra.mxu1 %v1349_v63  ;;  %s13984_s28 = sld [smem:[#allocation10_spill]] }
  0x57   : > { %1439 = vmatpush.msra.mxu2 %v1422_v0  ;;  %1488 = vmatpush.msra.mxu3 %v1471_v1  ;;  %s13999_s1 = sld [smem:[#allocation12_spill]] }
  0x58   : > { %v1220_v2 = vmul.f32 %v10062_v44, %v1219_v57  ;;  %s14001_s26 = sld [smem:[#allocation14_spill]] }
  0x59   : > { %s14014_s5 = sld [smem:[#allocation17_spill]] }
  0x5b   : > { %8568 = vmatmul.msk.f32.gmra.mxu0 %vm1118_vm0, %v1105_v3  ;;  %v1520_v3 = vld [vmem:[%s9867_s19 + $0x18] sm:$0xff] }
  0x5c   : > { %1537 = vmatpush.msrb.mxu0 %v1520_v3 }
  0x63   : > { %8569 = vmatmul.msk.f32.gmra.mxu0 %vm1118_vm0, %v1106_v4  ;;  %v1348_v4 = vld [vmem:[%s13940_s3 + $0x10] sm:$0xff] }
  0x64   : > { %1391 = vmatpush.msra.mxu1 %v1348_v4 }
  0x6b   : > { %8570 = vmatmul.msk.f32.gmra.mxu0 %vm1118_vm0, %v1107_v5  ;;  %v1421_v5 = vld [vmem:[%s9857_s8 + $0x10] sm:$0xff] }
  0x6c   : > { %1440 = vmatpush.msra.mxu2 %v1421_v5 }
  0x73   : > { %8571 = vmatmul.msk.f32.gmra.mxu0 %vm1118_vm0, %v1108_v6  ;;  %v1470_v6 = vld [vmem:[%s9862_s14 + $0x10] sm:$0xff] }
  0x74   : > { %1489 = vmatpush.msra.mxu3 %v1470_v6 }
  0x7b   : > { %8572 = vmatmul.msk.f32.gmra.mxu0 %vm1118_vm0, %v1109_v7  ;;  %v1519_v7 = vld [vmem:[%s9867_s19 + $0x10] sm:$0xff] }
  0x7c   : > { %1538 = vmatpush.msrb.mxu0 %v1519_v7 }
  0x83   : > { %8573 = vmatmul.msk.f32.gmra.mxu0 %vm1118_vm0, %v1110_v8  ;;  %v1347_v8 = vld [vmem:[%s13940_s3 + $0x8] sm:$0xff] }
  0x84   : > { %1392 = vmatpush.msra.mxu1 %v1347_v8 }
  0x8b   : > { %8574 = vmatmul.msk.f32.gmra.mxu0 %vm1118_vm0, %v1111_v9  ;;  %v1420_v9 = vld [vmem:[%s9857_s8 + $0x8] sm:$0xff] }
  0x8c   : > { %1441 = vmatpush.msra.mxu2 %v1420_v9 }
  0xd0   : > { %v1160_v11 = vpop.f32.mrf.mxu0 }
  0xd1   : > { %v10022_v12 = vadd.f32 %v9217_v10, %v1160_v11  ;;  %v1221_v11 = vadd.f32 %v10062_v44, %v1220_v2 }
  0xd3   : > { %v1184_v13 = vmul.f32 %v10022_v12, %v10022_v12 }
  0xd5   : > { %v1193_v14 = vsel %vm1192_vm1, %v1184_v13, 0.0  ;;  %v1518_v13 = vld [vmem:[%s9867_s19 + $0x8] sm:$0xff] }
  0xd6   : > { %1194 = vadd.xlane.f32.xlu0 %v1193_v14  ;;  %1539 = vmatpush.msrb.mxu0 %v1518_v13  ;;  %v1346_v14 = vld [vmem:[%s13940_s3] sm:$0xff]  ;;  %s14012_s3 = smov 96  }
  0xd7   : > { %1393 = vmatpush.msra.mxu1 %v1346_v14 }
  0xd8   : > { %v1163_v15 = vpop.f32.mrf.mxu0 }
  0xd9   : > { %v10027_v16 = vadd.f32 %v9217_v10, %v1163_v15  ;;  %v1419_v15 = vld [vmem:[%s9857_s8] sm:$0xff] }
  0xda   : > { %1442 = vmatpush.msra.mxu2 %v1419_v15 }
  0xdb   : > { %v1185_v17 = vmul.f32 %v10027_v16, %v10027_v16 }
  0xdd   : > { %v1196_v18 = vsel %vm1192_vm1, %v1185_v17, 0.0  ;;  %v1468_v17 = vld [vmem:[%s9862_s14] sm:$0xff] }
  0xde   : > { %1197 = vadd.xlane.f32.xlu0 %v1196_v18  ;;  %v1517_v18 = vld [vmem:[%s9867_s19] sm:$0xff] }
  0xdf   : > { %1540 = vmatpush.msrb.mxu0 %v1517_v18 }
  0xe0   : > { %v1166_v19 = vpop.f32.mrf.mxu0 }
  0xe1   : > { %v10032_v20 = vadd.f32 %v9217_v10, %v1166_v19  ;;  %v10101_v19 = vsel %vm1222_vm2, %v10062_v44, %v1221_v11 }
  0xe2   : > { %13947 = vst [vmem:[#allocation28_spill] sm:$0xff] %v10101_v19 }
  0xe3   : > { %v1186_v21 = vmul.f32 %v10032_v20, %v10032_v20 }
  0xe5   : > { %v1199_v22 = vsel %vm1192_vm1, %v1186_v21, 0.0 }
  0xe6   : > { %1200 = vadd.xlane.f32.xlu1 %v1199_v22 }
  0xe8   : > { %v1169_v23 = vpop.f32.mrf.mxu0 }
  0xe9   : > { %v10037_v24 = vadd.f32 %v9217_v10, %v1169_v23 }
  0xeb   : > { %13942 = vst [vmem:[#allocation23_spill] sm:$0xff] %v10037_v24  ;;  %v1187_v25 = vmul.f32 %v10037_v24, %v10037_v24 }
  0xed   : > { %v1202_v26 = vsel %vm1192_vm1, %v1187_v25, 0.0 }
  0xee   : > { %1203 = vadd.xlane.f32.xlu1 %v1202_v26 }
  0xf0   : > { %v1172_v27 = vpop.f32.mrf.mxu0 }
  0xf1   : > { %v10042_v28 = vadd.f32 %v9217_v10, %v1172_v27 }
  0xf3   : > { %13943 = vst [vmem:[#allocation24_spill] sm:$0xff] %v10042_v28  ;;  %v1188_v29 = vmul.f32 %v10042_v28, %v10042_v28 }
  0xf5   : > { %v1205_v30 = vsel %vm1192_vm1, %v1188_v29, 0.0 }
  0xf6   : > { %1206 = vadd.xlane.f32.xlu2 %v1205_v30 }
  0xf8   : > { %v1175_v31 = vpop.f32.mrf.mxu0 }
  0xf9   : > { %v10047_v32 = vadd.f32 %v9217_v10, %v1175_v31 }
  0xfb   : > { %13944 = vst [vmem:[#allocation25_spill] sm:$0xff] %v10047_v32  ;;  %v1189_v33 = vmul.f32 %v10047_v32, %v10047_v32 }
  0xfd   : > { %v1208_v34 = vsel %vm1192_vm1, %v1189_v33, 0.0 }
  0xfe   : > { %1209 = vadd.xlane.f32.xlu2 %v1208_v34 }
 0x100   : > { %v1178_v35 = vpop.f32.mrf.mxu0 }
 0x101   : > { %v10052_v36 = vadd.f32 %v9217_v10, %v1178_v35 }
 0x103   : > { %13945 = vst [vmem:[#allocation26_spill] sm:$0xff] %v10052_v36  ;;  %v1190_v37 = vmul.f32 %v10052_v36, %v10052_v36 }
 0x105   : > { %v1211_v38 = vsel %vm1192_vm1, %v1190_v37, 0.0  ;;  %v1094_v37 = vld [vmem:[%s10108_s2] sm:$0xff] }
 0x106   : > { %1212 = vadd.xlane.f32.xlu0 %v1211_v38  ;;  %v10112_v44 = vperm.slane %v1094_v37, 1  ;;  %v10115_v48 = vperm.slane %v1094_v37, 0 }
 0x108   : > { %v1181_v39 = vpop.f32.mrf.mxu0 }
 0x109   : > { %v10057_v40 = vadd.f32 %v9217_v10, %v1181_v39  ;;  %v1469_v10 = vld [vmem:[%s9862_s14 + $0x8] sm:$0xff] }
 0x10a   : > { %1490 = vmatpush.msra.mxu3 %v1469_v10 }
 0x10b   : > { %13946 = vst [vmem:[#allocation27_spill] sm:$0xff] %v10057_v40  ;;  %v1191_v41 = vmul.f32 %v10057_v40, %v10057_v40 }
 0x10c   : > { %1491 = vmatpush.msra.mxu3 %v1468_v17 }
 0x10d   : > { %v1214_v42 = vsel %vm1192_vm1, %v1191_v41, 0.0 }
 0x10e   : > { %1215 = vadd.xlane.f32.xlu1 %v1214_v42 }
 0x149   : > { %v1195_v21 = vpop.xlane.xlu0 %1194 }
 0x14a   : > { %v1224_v22 = vmul.f32 %v10101_v19, %v1195_v21 }
 0x14c   : > { %v1232_v23 = vadd.f32 1e-06, %v1224_v22 }
 0x14e   : > { %9223 = vrsqrt.f32 %v1232_v23  ;;  %vm1246_vm4 = vweird.f32 %v1232_v23 }
 0x151   : > { %v1198_v25 = vpop.xlane.xlu0 %1197 }
 0x152   : > { %v1225_v26 = vmul.f32 %v10101_v19, %v1198_v25 }
 0x154   : > { %v9224_v27 = vpop.eup %9223  ;;  %v1233_v29 = vadd.f32 1e-06, %v1225_v26 }
 0x155   : > { %v1241_v30 = vmul.f32 %v9224_v27, %v1232_v23  ;;  %vm1247_vm3 = vweird.f32 %v9224_v27 }
 0x156   : > { %9225 = vrsqrt.f32 %v1233_v29  ;;  %vm1248_vm5 = vmor %vm1246_vm4, %vm1247_vm3  ;;  %vm1256_vm7 = vweird.f32 %v1233_v29 }
 0x157   : > { %v1242_v31 = vmul.f32 %v9224_v27, %v1241_v30 }
 0x159   : > { %v1243_v33 = vmul.f32 0.5, %v1242_v31  ;;  %v1201_v34 = vpop.xlane.xlu1 %1200 }
 0x15a   : > { %v1226_v35 = vmul.f32 %v10101_v19, %v1201_v34  ;;  %v1572_v34 = vld [vmem:[%s9872_s24 + $0x30] sm:$0xff] }
 0x15b   : > { %v1244_v38 = vsub.f32 1.5, %v1243_v33 }
 0x15c   : > { %v9226_v39 = vpop.eup %9225  ;;  %v1234_v41 = vadd.f32 1e-06, %v1226_v35 }
 0x15d   : > { %v1245_v42 = vmul.f32 %v9224_v27, %v1244_v38  ;;  %v1251_v43 = vmul.f32 %v9226_v39, %v1233_v29  ;;  %vm1257_vm6 = vweird.f32 %v9226_v39  ;;  %v1573_v29 = vld [vmem:[%s9872_s24 + $0x38] sm:$0xff]  ;;  %v1571_v38 = vld [vmem:[%s9872_s24 + $0x28] sm:$0xff] }
 0x15e   : > { %9227 = vrsqrt.f32 %v1234_v41  ;;  %vm1258_vm8 = vmor %vm1256_vm7, %vm1257_vm6  ;;  %vm1266_vm10 = vweird.f32 %v1234_v41  ;;  %1582 = vmatpush.msrb.mxu1 %v1573_v29 }
 0x15f   : > { %v1249_v45 = vsel %vm1248_vm5, %v9224_v27, %v1245_v42  ;;  %v1252_v46 = vmul.f32 %v9226_v39, %v1251_v43 }
 0x160   : > { %v1320_v47 = vmul.f32 %v1249_v45, %v10022_v12  ;;  %1583 = vmatpush.msrb.mxu1 %v1572_v34  ;;  %v1103_v34 = vld [vmem:[%s9827_s13 + $0x38] sm:$0xff] }
 0x161   : > { %v1253_v49 = vmul.f32 0.5, %v1252_v46  ;;  %v1204_v50 = vpop.xlane.xlu1 %1203  ;;  %1808 = vmatpush.msrb.mxu3 %v1103_v34  ;;  %1655 = vmatpush.msrb.mxu2 %v1103_v34 }
 0x162   : > { %v1329_v51 = vmul.f32 %v10112_v44, %v1320_v47  ;;  %v1227_v52 = vmul.f32 %v10101_v19, %v1204_v50  ;;  %1584 = vmatpush.msrb.mxu1 %v1571_v38  ;;  %v1570_v47 = vld [vmem:[%s9872_s24 + $0x20] sm:$0xff] }
 0x163   : > { %v1254_v53 = vsub.f32 1.5, %v1253_v49 }
 0x164   : > { %v9228_v54 = vpop.eup %9227  ;;  %v1235_v55 = vadd.f32 1e-06, %v1227_v52  ;;  %v10120_v56 = vadd.f32 %v10115_v48, %v1329_v51  ;;  %v1569_v51 = vld [vmem:[%s9872_s24 + $0x18] sm:$0xff]  ;;  %1585 = vmatpush.msrb.mxu1 %v1570_v47 }
 0x165   : > { %v1255_v57 = vmul.f32 %v9226_v39, %v1254_v53  ;;  %v1261_v58 = vmul.f32 %v9228_v54, %v1234_v41  ;;  %vm1267_vm9 = vweird.f32 %v9228_v54 }
 0x166   : > { %9229 = vrsqrt.f32 %v1235_v55  ;;  %8575 = vmatmul.msk.f32.vlgmr.msra.gmra.mxu1 %vm1192_vm1, %v10120_v56  ;;  %8583 = vmatmul.msk.f32.vlgmr.msra.gmra.mxu2 %vm1192_vm1, %v10120_v56  ;;  %vm1268_vm11 = vmor %vm1266_vm10, %vm1267_vm9  ;;  %vm1276_vm13 = vweird.f32 %v1235_v55 }
 0x167   : > { %v1259_v59 = vsel %vm1258_vm8, %v9226_v39, %v1255_v57  ;;  %v1262_v60 = vmul.f32 %v9228_v54, %v1261_v58  ;;  %8591 = vmatmul.msk.f32.vlgmr.msra.gmra.mxu3 %vm1192_vm1, %v10120_v56  ;;  %8599 = vmatmul.msk.f32.vlgmr.msrb.gmra.mxu0 %vm1192_vm1, %v10120_v56 }
 0x168   : > { %v1321_v61 = vmul.f32 %v1259_v59, %v10027_v16  ;;  %1586 = vmatpush.msrb.mxu1 %v1569_v51 }
 0x169   : > { %v1263_v62 = vmul.f32 0.5, %v1262_v60  ;;  %v1207_v63 = vpop.xlane.xlu2 %1206 }
 0x16a   : > { %v1330_v0 = vmul.f32 %v10112_v44, %v1321_v61  ;;  %v1228_v1 = vmul.f32 %v10101_v19, %v1207_v63 }
 0x16b   : > { %v1264_v2 = vsub.f32 1.5, %v1263_v62 }
 0x16c   : > { %v9230_v3 = vpop.eup %9229  ;;  %v1236_v4 = vadd.f32 1e-06, %v1228_v1  ;;  %v10134_v5 = vadd.f32 %v10115_v48, %v1330_v0  ;;  %v1567_v1 = vld [vmem:[%s9872_s24 + $0x8] sm:$0xff] }
 0x16d   : > { %v1265_v6 = vmul.f32 %v9228_v54, %v1264_v2  ;;  %v1271_v7 = vmul.f32 %v9230_v3, %v1235_v55  ;;  %vm1277_vm12 = vweird.f32 %v9230_v3  ;;  %v1568_v55 = vld [vmem:[%s9872_s24 + $0x10] sm:$0xff] }
 0x16e   : > { %9231 = vrsqrt.f32 %v1236_v4  ;;  %8576 = vmatmul.msk.f32.gmra.mxu1 %vm1192_vm1, %v10134_v5  ;;  %8584 = vmatmul.msk.f32.gmra.mxu2 %vm1192_vm1, %v10134_v5  ;;  %vm1278_vm14 = vmor %vm1276_vm13, %vm1277_vm12  ;;  %vm1286_vm2 = vweird.f32 %v1236_v4 }
 0x16f   : > { %v1269_v8 = vsel %vm1268_vm11, %v9228_v54, %v1265_v6  ;;  %v1272_v9 = vmul.f32 %v9230_v3, %v1271_v7  ;;  %8592 = vmatmul.msk.f32.gmra.mxu3 %vm1192_vm1, %v10134_v5  ;;  %8600 = vmatmul.msk.f32.gmra.mxu0 %vm1192_vm1, %v10134_v5 }
 0x170   : > { %v1322_v10 = vmul.f32 %v1269_v8, %v10032_v20  ;;  %1587 = vmatpush.msrb.mxu1 %v1568_v55 }
 0x171   : > { %v1273_v11 = vmul.f32 0.5, %v1272_v9  ;;  %v1210_v13 = vpop.xlane.xlu2 %1209 }
 0x172   : > { %v1331_v14 = vmul.f32 %v10112_v44, %v1322_v10  ;;  %v1229_v15 = vmul.f32 %v10101_v19, %v1210_v13  ;;  %1588 = vmatpush.msrb.mxu1 %v1567_v1 }
 0x173   : > { %v1274_v17 = vsub.f32 1.5, %v1273_v11 }
 0x174   : > { %v9232_v18 = vpop.eup %9231  ;;  %v1237_v21 = vadd.f32 1e-06, %v1229_v15  ;;  %v10148_v22 = vadd.f32 %v10115_v48, %v1331_v14 }
 0x175   : > { %v1275_v23 = vmul.f32 %v9230_v3, %v1274_v17  ;;  %v1281_v25 = vmul.f32 %v9232_v18, %v1236_v4  ;;  %vm1287_vm15 = vweird.f32 %v9232_v18  ;;  %v1566_v4 = vld [vmem:[%s9872_s24] sm:$0xff] }
 0x176   : > { %9233 = vrsqrt.f32 %v1237_v21  ;;  %8577 = vmatmul.msk.f32.gmra.mxu1 %vm1192_vm1, %v10148_v22  ;;  %8585 = vmatmul.msk.f32.gmra.mxu2 %vm1192_vm1, %v10148_v22  ;;  %vm1288_vm3 = vmor %vm1286_vm2, %vm1287_vm15  ;;  %vm1296_vm5 = vweird.f32 %v1237_v21 }
 0x177   : > { %v1279_v26 = vsel %vm1278_vm14, %v9230_v3, %v1275_v23  ;;  %v1282_v27 = vmul.f32 %v9232_v18, %v1281_v25  ;;  %8593 = vmatmul.msk.f32.gmra.mxu3 %vm1192_vm1, %v10148_v22  ;;  %8601 = vmatmul.msk.f32.gmra.mxu0 %vm1192_vm1, %v10148_v22 }
 0x178   : > { %v1323_v30 = vmul.f32 %v1279_v26, %v10037_v24  ;;  %1589 = vmatpush.msrb.mxu1 %v1566_v4 }
 0x179   : > { %v1283_v31 = vmul.f32 0.5, %v1282_v27  ;;  %v1213_v33 = vpop.xlane.xlu0 %1212 }
 0x17a   : > { %v1332_v35 = vmul.f32 %v10112_v44, %v1323_v30  ;;  %v1230_v37 = vmul.f32 %v10101_v19, %v1213_v33 }
 0x17b   : > { %v1284_v39 = vsub.f32 1.5, %v1283_v31 }
 0x17c   : > { %v9234_v41 = vpop.eup %9233  ;;  %v1238_v42 = vadd.f32 1e-06, %v1230_v37  ;;  %v10165_v43 = vadd.f32 %v10115_v48, %v1332_v35  ;;  %v1100_v35 = vld [vmem:[%s9827_s13 + $0x20] sm:$0xff]  ;;  %v1098_v37 = vld [vmem:[%s9827_s13 + $0x10] sm:$0xff] }
 0x17d   : > { %v1285_v45 = vmul.f32 %v9232_v18, %v1284_v39  ;;  %v1291_v46 = vmul.f32 %v9234_v41, %v1237_v21  ;;  %vm1297_vm4 = vweird.f32 %v9234_v41 }
 0x17e   : > { %9235 = vrsqrt.f32 %v1238_v42  ;;  %8578 = vmatmul.msk.f32.gmra.mxu1 %vm1192_vm1, %v10165_v43  ;;  %8586 = vmatmul.msk.f32.gmra.mxu2 %vm1192_vm1, %v10165_v43  ;;  %vm1298_vm6 = vmor %vm1296_vm5, %vm1297_vm4  ;;  %vm1306_vm8 = vweird.f32 %v1238_v42 }
 0x17f   : > { %v1289_v49 = vsel %vm1288_vm3, %v9232_v18, %v1285_v45  ;;  %v1292_v50 = vmul.f32 %v9234_v41, %v1291_v46  ;;  %8594 = vmatmul.msk.f32.gmra.mxu3 %vm1192_vm1, %v10165_v43  ;;  %8602 = vmatmul.msk.f32.gmra.mxu0 %vm1192_vm1, %v10165_v43 }
 0x180   : > { %v1324_v52 = vmul.f32 %v1289_v49, %v10042_v28 }
 0x181   : > { %v1293_v53 = vmul.f32 0.5, %v1292_v50  ;;  %v1216_v54 = vpop.xlane.xlu1 %1215 }
 0x182   : > { %v1333_v57 = vmul.f32 %v10112_v44, %v1324_v52  ;;  %v1231_v58 = vmul.f32 %v10101_v19, %v1216_v54 }
 0x183   : > { %v1294_v59 = vsub.f32 1.5, %v1293_v53 }
 0x184   : > { %v9236_v60 = vpop.eup %9235  ;;  %v1239_v61 = vadd.f32 1e-06, %v1231_v58  ;;  %v10182_v62 = vadd.f32 %v10115_v48, %v1333_v57 }
 0x185   : > { %v1295_v63 = vmul.f32 %v9234_v41, %v1294_v59  ;;  %v1301_v0 = vmul.f32 %v9236_v60, %v1238_v42  ;;  %vm1307_vm7 = vweird.f32 %v9236_v60 }
 0x186   : > { %9237 = vrsqrt.f32 %v1239_v61  ;;  %8579 = vmatmul.msk.f32.gmra.mxu1 %vm1192_vm1, %v10182_v62  ;;  %8587 = vmatmul.msk.f32.gmra.mxu2 %vm1192_vm1, %v10182_v62  ;;  %vm1308_vm9 = vmor %vm1306_vm8, %vm1307_vm7  ;;  %vm1316_vm11 = vweird.f32 %v1239_v61 }
 0x187   : > { %v1299_v2 = vsel %vm1298_vm6, %v9234_v41, %v1295_v63  ;;  %v1302_v3 = vmul.f32 %v9236_v60, %v1301_v0  ;;  %8595 = vmatmul.msk.f32.gmra.mxu3 %vm1192_vm1, %v10182_v62  ;;  %8603 = vmatmul.msk.f32.gmra.mxu0 %vm1192_vm1, %v10182_v62 }
 0x188   : > { %v1325_v6 = vmul.f32 %v1299_v2, %v10047_v32 }
 0x189   : > { %v1303_v7 = vmul.f32 0.5, %v1302_v3 }
 0x18a   : > { %v1334_v8 = vmul.f32 %v10112_v44, %v1325_v6 }
 0x18b   : > { %v1304_v9 = vsub.f32 1.5, %v1303_v7 }
 0x18c   : > { %v9238_v10 = vpop.eup %9237  ;;  %v1343_v11 = vadd.f32 %v10115_v48, %v1334_v8 }
 0x18d   : > { %v1305_v13 = vmul.f32 %v9236_v60, %v1304_v9  ;;  %v1311_v14 = vmul.f32 %v9238_v10, %v1239_v61  ;;  %vm1317_vm10 = vweird.f32 %v9238_v10 }
 0x18e   : > { %8580 = vmatmul.msk.f32.gmra.mxu1 %vm1192_vm1, %v1343_v11  ;;  %8588 = vmatmul.msk.f32.gmra.mxu2 %vm1192_vm1, %v1343_v11  ;;  %vm1318_vm12 = vmor %vm1316_vm11, %vm1317_vm10 }
 0x18f   : > { %v1309_v15 = vsel %vm1308_vm9, %v9236_v60, %v1305_v13  ;;  %v1312_v17 = vmul.f32 %v9238_v10, %v1311_v14  ;;  %8596 = vmatmul.msk.f32.gmra.mxu3 %vm1192_vm1, %v1343_v11  ;;  %8604 = vmatmul.msk.f32.gmra.mxu0 %vm1192_vm1, %v1343_v11 }
 0x190   : > { %v1326_v18 = vmul.f32 %v1309_v15, %v10052_v36 }
 0x191   : > { %v1313_v21 = vmul.f32 0.5, %v1312_v17 }
 0x192   : > { %v1335_v23 = vmul.f32 %v10112_v44, %v1326_v18 }
 0x193   : > { %v1314_v25 = vsub.f32 1.5, %v1313_v21 }
 0x194   : > { %v1344_v26 = vadd.f32 %v10115_v48, %v1335_v23 }
 0x195   : > { %v1315_v27 = vmul.f32 %v9238_v10, %v1314_v25 }
 0x196   : > { %8581 = vmatmul.msk.f32.gmra.mxu1 %vm1192_vm1, %v1344_v26  ;;  %8589 = vmatmul.msk.f32.gmra.mxu2 %vm1192_vm1, %v1344_v26 }
 0x197   : > { %v1319_v29 = vsel %vm1318_vm12, %v9238_v10, %v1315_v27  ;;  %8597 = vmatmul.msk.f32.gmra.mxu3 %vm1192_vm1, %v1344_v26  ;;  %8605 = vmatmul.msk.f32.gmra.mxu0 %vm1192_vm1, %v1344_v26 }
 0x198   : > { %v1327_v30 = vmul.f32 %v1319_v29, %v10057_v40 }
 0x19a   : > { %v1336_v31 = vmul.f32 %v10112_v44, %v1327_v30  ;;  %v1102_v44 = vld [vmem:[%s9827_s13 + $0x30] sm:$0xff] }
 0x19b   : > { %1809 = vmatpush.msrb.mxu3 %v1102_v44  ;;  %1656 = vmatpush.msrb.mxu2 %v1102_v44 }
 0x19c   : > { %v1345_v33 = vadd.f32 %v10115_v48, %v1336_v31  ;;  %v1101_v48 = vld [vmem:[%s9827_s13 + $0x28] sm:$0xff] }
 0x19d   : > { %1657 = vmatpush.msrb.mxu2 %v1101_v48  ;;  %1810 = vmatpush.msrb.mxu3 %v1101_v48 }
 0x19e   : > { %8582 = vmatmul.msk.f32.gmra.mxu1 %vm1192_vm1, %v1345_v33  ;;  %8590 = vmatmul.msk.f32.gmra.mxu2 %vm1192_vm1, %v1345_v33 }
 0x19f   : > { %8598 = vmatmul.msk.f32.gmra.mxu3 %vm1192_vm1, %v1345_v33  ;;  %8606 = vmatmul.msk.f32.gmra.mxu0 %vm1192_vm1, %v1345_v33 }
 0x1a0   : > { %1658 = vmatpush.msrb.mxu2 %v1100_v35  ;;  %1811 = vmatpush.msrb.mxu3 %v1100_v35 }
 0x1a6   : > { %8607 = vmatmul.msk.f32.vlgmr.msrb.gmra.mxu1 %vm1192_vm1, %v10120_v56  ;;  %v1099_v56 = vld [vmem:[%s9827_s13 + $0x18] sm:$0xff] }
 0x1a7   : > { %1659 = vmatpush.msrb.mxu2 %v1099_v56  ;;  %1812 = vmatpush.msrb.mxu3 %v1099_v56 }
 0x1a9   : > { %1660 = vmatpush.msrb.mxu2 %v1098_v37  ;;  %1813 = vmatpush.msrb.mxu3 %v1098_v37 }
 0x1ae   : > { %8608 = vmatmul.msk.f32.gmra.mxu1 %vm1192_vm1, %v10134_v5  ;;  %v1097_v5 = vld [vmem:[%s9827_s13 + $0x8] sm:$0xff] }
 0x1af   : > { %1661 = vmatpush.msrb.mxu2 %v1097_v5  ;;  %1814 = vmatpush.msrb.mxu3 %v1097_v5 }
 0x1b6   : > { %8609 = vmatmul.msk.f32.gmra.mxu1 %vm1192_vm1, %v10148_v22  ;;  %v1096_v22 = vld [vmem:[%s9827_s13] sm:$0xff] }
 0x1b7   : > { %1662 = vmatpush.msrb.mxu2 %v1096_v22  ;;  %1815 = vmatpush.msrb.mxu3 %v1096_v22 }
 0x1be   : > { %8610 = vmatmul.msk.f32.gmra.mxu1 %vm1192_vm1, %v10165_v43 }
 0x1c6   : > { %8611 = vmatmul.msk.f32.gmra.mxu1 %vm1192_vm1, %v10182_v62 }
 0x1ce   : > { %8612 = vmatmul.msk.f32.gmra.mxu1 %vm1192_vm1, %v1343_v11 }
 0x1d6   : > { %8613 = vmatmul.msk.f32.gmra.mxu1 %vm1192_vm1, %v1344_v26 }
 0x1de   : > { %8614 = vmatmul.msk.f32.gmra.mxu1 %vm1192_vm1, %v1345_v33 }
 0x1e3   : > { %v10236_v38 = vpop.f32.mrf.mxu1 }
 0x1e4   : > { %v1615_v39 = vmul.f32 %v10236_v38, %v10236_v38  ;;  %v1542_v35 = vpop.f32.mrf.mxu0 }
 0x1e6   : > { %8615 = vmatmul.msk.f32.vlgmr.msrb.gmra.mxu2 %vm1192_vm1, %v1615_v39 }
 0x1e9   : > { %v1444_v6 = vpop.f32.mrf.mxu2 }
 0x1ea   : > { %v10241_v41 = vpop.f32.mrf.mxu3 }
 0x1eb   : > { %v1768_v42 = vmul.f32 %v10241_v41, %v10241_v41  ;;  %v10245_v43 = vpop.f32.mrf.mxu1 }
 0x1ec   : > { %v1616_v45 = vmul.f32 %v10245_v43, %v10245_v43 }
 0x1ed   : > { %8623 = vmatmul.msk.f32.vlgmr.msrb.gmra.mxu3 %vm1192_vm1, %v1768_v42 }
 0x1ee   : > { %8616 = vmatmul.msk.f32.gmra.mxu2 %vm1192_vm1, %v1616_v45  ;;  %v1937_v45 = vld [vmem:[%s9907_s29] sm:$0xff] }
 0x1f1   : > { %v10317_v14 = vpop.f32.mrf.mxu2 }
 0x1f2   : > { %v10251_v46 = vpop.f32.mrf.mxu3 }
 0x1f3   : > { %v1769_v47 = vmul.f32 %v10251_v46, %v10251_v46  ;;  %v10255_v49 = vpop.f32.mrf.mxu1 }
 0x1f4   : > { %v1617_v50 = vmul.f32 %v10255_v49, %v10255_v49 }
 0x1f5   : > { %8624 = vmatmul.msk.f32.gmra.mxu3 %vm1192_vm1, %v1769_v47 }
 0x1f6   : > { %8617 = vmatmul.msk.f32.gmra.mxu2 %vm1192_vm1, %v1617_v50  ;;  %v1921_v50 = vld [vmem:[%s13939_s4] sm:$0xff] }
 0x1f9   : > { %v10322_v17 = vpop.f32.mrf.mxu2 }
 0x1fa   : > { %v10261_v51 = vpop.f32.mrf.mxu3 }
 0x1fb   : > { %v1770_v52 = vmul.f32 %v10261_v51, %v10261_v51  ;;  %v10265_v53 = vpop.f32.mrf.mxu1 }
 0x1fc   : > { %v1618_v54 = vmul.f32 %v10265_v53, %v10265_v53 }
 0x1fd   : > { %8625 = vmatmul.msk.f32.gmra.mxu3 %vm1192_vm1, %v1770_v52 }
 0x1fe   : > { %8618 = vmatmul.msk.f32.gmra.mxu2 %vm1192_vm1, %v1618_v54  ;;  %v1945_v54 = vmul.f32 %v1937_v45, %v1444_v6 }
 0x201   : > { %v10326_v21 = vpop.f32.mrf.mxu2 }
 0x202   : > { %v10271_v55 = vpop.f32.mrf.mxu3 }
 0x203   : > { %v1771_v57 = vmul.f32 %v10271_v55, %v10271_v55  ;;  %v10275_v58 = vpop.f32.mrf.mxu1 }
 0x204   : > { %v1619_v59 = vmul.f32 %v10275_v58, %v10275_v58 }
 0x205   : > { %8626 = vmatmul.msk.f32.gmra.mxu3 %vm1192_vm1, %v1771_v57 }
 0x206   : > { %8619 = vmatmul.msk.f32.gmra.mxu2 %vm1192_vm1, %v1619_v59 }
 0x209   : > { %v10330_v25 = vpop.f32.mrf.mxu2 }
 0x20a   : > { %v10281_v60 = vpop.f32.mrf.mxu3 }
 0x20b   : > { %v1772_v61 = vmul.f32 %v10281_v60, %v10281_v60  ;;  %v10285_v62 = vpop.f32.mrf.mxu1 }
 0x20c   : > { %v1620_v63 = vmul.f32 %v10285_v62, %v10285_v62 }
 0x20d   : > { %8627 = vmatmul.msk.f32.gmra.mxu3 %vm1192_vm1, %v1772_v61 }
 0x20e   : > { %8620 = vmatmul.msk.f32.gmra.mxu2 %vm1192_vm1, %v1620_v63 }
 0x211   : > { %v10336_v29 = vpop.f32.mrf.mxu2 }
 0x212   : > { %v10291_v0 = vpop.f32.mrf.mxu3 }
 0x213   : > { %v1773_v1 = vmul.f32 %v10291_v0, %v10291_v0  ;;  %v10295_v2 = vpop.f32.mrf.mxu1 }
 0x214   : > { %v1621_v3 = vmul.f32 %v10295_v2, %v10295_v2 }
 0x215   : > { %8628 = vmatmul.msk.f32.gmra.mxu3 %vm1192_vm1, %v1773_v1 }
 0x216   : > { %8621 = vmatmul.msk.f32.gmra.mxu2 %vm1192_vm1, %v1621_v3 }
 0x219   : > { %v10340_v31 = vpop.f32.mrf.mxu2 }
 0x21a   : > { %v10301_v4 = vpop.f32.mrf.mxu3 }
 0x21b   : > { %v1774_v7 = vmul.f32 %v10301_v4, %v10301_v4  ;;  %v10305_v8 = vpop.f32.mrf.mxu1 }
 0x21c   : > { %v1622_v9 = vmul.f32 %v10305_v8, %v10305_v8 }
 0x21d   : > { %8629 = vmatmul.msk.f32.gmra.mxu3 %vm1192_vm1, %v1774_v7  ;;  %v1929_v7 = vmul.f32 %v1921_v50, %v10236_v38  ;;  %v1969_v38 = vld [vmem:[%s9912_s25] sm:$0xff] }
 0x21e   : > { %8622 = vmatmul.msk.f32.gmra.mxu2 %vm1192_vm1, %v1622_v9  ;;  %v10364_v9 = vpop.f32.mrf.mxu0  ;;  %v1977_v40 = vmul.f32 %v1969_v38, %v10241_v41 }
 0x221   : > { %v10347_v34 = vpop.f32.mrf.mxu2 }
 0x222   : > { %v10311_v10 = vpop.f32.mrf.mxu3 }
 0x223   : > { %v1775_v11 = vmul.f32 %v10311_v10, %v10311_v10  ;;  %v10315_v13 = vpop.f32.mrf.mxu1 }
 0x225   : > { %8630 = vmatmul.msk.f32.gmra.mxu3 %vm1192_vm1, %v1775_v11 }
 0x22b   : > { %v10320_v15 = vpop.f32.mrf.mxu1 }
 0x233   : > { %v10324_v18 = vpop.f32.mrf.mxu1 }
 0x23b   : > { %v10328_v23 = vpop.f32.mrf.mxu1 }
 0x243   : > { %v10332_v26 = vpop.f32.mrf.mxu1 }
 0x24b   : > { %v10334_v27 = vpop.f32.mrf.mxu1 }
 0x253   : > { %v10338_v30 = vpop.f32.mrf.mxu1 }
 0x25b   : > { %v10342_v33 = vpop.f32.mrf.mxu1 }
 0x25c   : > { %2218 = vmatpush.msra.mxu1 %v10342_v33 }
 0x25e   : > { %2219 = vmatpush.msra.mxu1 %v10338_v30 }
 0x260   : > { %2220 = vmatpush.msra.mxu1 %v10334_v27 }
 0x262   : > { %2221 = vmatpush.msra.mxu1 %v10332_v26 }
 0x264   : > { %2222 = vmatpush.msra.mxu1 %v10328_v23 }
 0x266   : > { %2223 = vmatpush.msra.mxu1 %v10324_v18 }
 0x268   : > { %2224 = vmatpush.msra.mxu1 %v10320_v15 }
 0x269   : > { %v1664_v44 = vpop.f32.mrf.mxu2 }
 0x26a   : > { %v1665_v48 = vadd.f32 1e-06, %v1664_v44  ;;  %2225 = vmatpush.msra.mxu1 %v10315_v13 }
 0x26c   : > { %9239 = vrsqrt.f32 %v1665_v48  ;;  %vm1694_vm14 = vweird.f32 %v1665_v48 }
 0x270   : > { %v1817_v56 = vpop.f32.mrf.mxu3 }
 0x271   : > { %v1818_v37 = vadd.f32 1e-06, %v1817_v56  ;;  %v1667_v5 = vpop.f32.mrf.mxu2 }
 0x272   : > { %v9240_v22 = vpop.eup %9239  ;;  %v10354_v39 = vadd.f32 1e-06, %v1667_v5  ;;  %v1985_v5 = vld [vmem:[%s9917_s27] sm:$0xff] }
 0x273   : > { %v1689_v42 = vmul.f32 %v9240_v22, %v1665_v48  ;;  %9241 = vrsqrt.f32 %v1818_v37  ;;  %vm1695_vm13 = vweird.f32 %v9240_v22  ;;  %v1993_v48 = vmul.f32 %v1985_v5, %v1542_v35 }
 0x274   : > { %9243 = vrsqrt.f32 %v10354_v39  ;;  %vm1696_vm15 = vmor %vm1694_vm14, %vm1695_vm13  ;;  %vm1847_vm4 = vweird.f32 %v1818_v37  ;;  %vm1704_vm6 = vweird.f32 %v10354_v39 }
 0x275   : > { %v1690_v47 = vmul.f32 %v9240_v22, %v1689_v42  ;;  %v1953_v42 = vadd.f32 %v1945_v54, %v1929_v7 }
 0x277   : > { %v1691_v52 = vmul.f32 0.5, %v1690_v47  ;;  %v1938_v47 = vld [vmem:[%s9907_s29 + $0x8] sm:$0xff] }
 0x278   : > { %v1820_v57 = vpop.f32.mrf.mxu3  ;;  %v1946_v36 = vmul.f32 %v1938_v47, %v10317_v14 }
 0x279   : > { %v10359_v59 = vpop.eup %9241  ;;  %v1692_v61 = vsub.f32 1.5, %v1691_v52  ;;  %v10361_v63 = vadd.f32 1e-06, %v1820_v57  ;;  %v1670_v1 = vpop.f32.mrf.mxu2  ;;  %v1922_v57 = vld [vmem:[%s13939_s4 + $0x8] sm:$0xff] }
 0x27a   : > { %v9244_v3 = vpop.eup %9243  ;;  %v1842_v11 = vmul.f32 %v10359_v59, %v1818_v37  ;;  %v10367_v6 = vadd.f32 1e-06, %v1670_v1  ;;  %vm1848_vm2 = vweird.f32 %v10359_v59  ;;  %v2001_v37 = vadd.f32 %v1993_v48, %v1977_v40 }
 0x27b   : > { %v1693_v44 = vmul.f32 %v9240_v22, %v1692_v61  ;;  %v1699_v56 = vmul.f32 %v9244_v3, %v10354_v39  ;;  %9245 = vrsqrt.f32 %v10361_v63  ;;  %vm1705_vm3 = vweird.f32 %v9244_v3  ;;  %vm10395_vm5 = vmor %vm1847_vm4, %vm1848_vm2 }
 0x27c   : > { %v1843_v45 = vmul.f32 %v10359_v59, %v1842_v11  ;;  %9247 = vrsqrt.f32 %v10367_v6  ;;  %vm1706_vm7 = vmor %vm1704_vm6, %vm1705_vm3  ;;  %vm1857_vm9 = vweird.f32 %v10361_v63  ;;  %vm1714_vm12 = vweird.f32 %v10367_v6 }
 0x27d   : > { %v1700_v50 = vmul.f32 %v9244_v3, %v1699_v56  ;;  %v1697_v52 = vsel %vm1696_vm15, %v9240_v22, %v1693_v44  ;;  %v1930_v22 = vmul.f32 %v1922_v57, %v10245_v43  ;;  %v1970_v57 = vld [vmem:[%s9912_s25 + $0x8] sm:$0xff] }
 0x27e   : > { %v1844_v1 = vmul.f32 0.5, %v1843_v45  ;;  %v10377_v19 = vmul.f32 %v1953_v42, %v1697_v52  ;;  %v1978_v48 = vmul.f32 %v1970_v57, %v10251_v46 }
 0x27f   : > { %v1701_v61 = vmul.f32 0.5, %v1700_v50  ;;  %v1954_v47 = vadd.f32 %v1946_v36, %v1930_v22  ;;  %v10403_v50 = vpop.f32.mrf.mxu0 }
 0x280   : > { %v1845_v54 = vsub.f32 1.5, %v1844_v1  ;;  %v1823_v7 = vpop.f32.mrf.mxu3  ;;  %2371 = vrot.lane.b32.xlu1 %v10377_v19, %s13910_s7 }
 0x281   : > { %v9246_v11 = vpop.eup %9245  ;;  %v1702_v44 = vsub.f32 1.5, %v1701_v61  ;;  %v10385_v56 = vadd.f32 1e-06, %v1823_v7  ;;  %v1673_v35 = vpop.f32.mrf.mxu2 }
 0x282   : > { %v10387_v41 = vpop.eup %9247  ;;  %v1846_v14 = vmul.f32 %v10359_v59, %v1845_v54  ;;  %v1852_v5 = vmul.f32 %v9246_v11, %v10361_v63  ;;  %v10391_v42 = vadd.f32 1e-06, %v1673_v35  ;;  %v1986_v54 = vld [vmem:[%s9917_s27 + $0x8] sm:$0xff]  ;;  %vm1858_vm8 = vweird.f32 %v9246_v11  ;;  %v1923_v63 = vld [vmem:[%s13939_s4 + $0x10] sm:$0xff] }
 0x283   : > { %v1703_v45 = vmul.f32 %v9244_v3, %v1702_v44  ;;  %v1709_v38 = vmul.f32 %v10387_v41, %v10367_v6  ;;  %9249 = vrsqrt.f32 %v10385_v56  ;;  %vm1859_vm10 = vmor %vm1857_vm9, %vm1858_vm8  ;;  %vm1715_vm11 = vweird.f32 %v10387_v41 }
 0x284   : > { %v1853_v52 = vmul.f32 %v9246_v11, %v1852_v5  ;;  %9251 = vrsqrt.f32 %v10391_v42  ;;  %v1850_v39 = vsel %vm10395_vm5, %v10359_v59, %v1846_v14  ;;  %v1994_v59 = vmul.f32 %v1986_v54, %v10364_v9  ;;  %vm10449_vm13 = vmor %vm1714_vm12, %vm1715_vm11 }
 0x285   : > { %v1710_v1 = vmul.f32 %v10387_v41, %v1709_v38  ;;  %v1707_v61 = vsel %vm1706_vm7, %v9244_v3, %v1703_v45  ;;  %v10413_v44 = vmul.f32 %v2001_v37, %v1850_v39  ;;  %vm1867_vm15 = vweird.f32 %v10385_v56 }
 0x286   : > { %v1854_v7 = vmul.f32 0.5, %v1853_v52  ;;  %v10415_v36 = vmul.f32 %v1954_v47, %v1707_v61  ;;  %v2002_v47 = vadd.f32 %v1994_v59, %v1978_v48  ;;  %v1939_v52 = vld [vmem:[%s9907_s29 + $0x10] sm:$0xff]  ;;  %vm1724_vm8 = vweird.f32 %v10391_v42 }
 0x287   : > { %v1711_v40 = vmul.f32 0.5, %v1710_v1  ;;  %2387 = vrot.lane.b32.xlu2 %v10413_v44, %s13910_s7  ;;  %v1551_v1 = vpop.f32.mrf.mxu0 }
 0x288   : > { %v1855_v22 = vsub.f32 1.5, %v1854_v7  ;;  %v1826_v35 = vpop.f32.mrf.mxu3  ;;  %2373 = vrot.lane.b32.xlu0 %v10415_v36, %s13910_s7 }
 0x289   : > { %v10422_v5 = vpop.eup %9249  ;;  %v10425_v3 = vadd.f32 1e-06, %v1826_v35  ;;  %v1676_v14 = vpop.f32.mrf.mxu2  ;;  %v1712_v45 = vsub.f32 1.5, %v1711_v40  ;;  %v1947_v40 = vmul.f32 %v1939_v52, %v10322_v17  ;;  %v1931_v17 = vmul.f32 %v1923_v63, %v10255_v49  ;;  %v1971_v49 = vld [vmem:[%s9912_s25 + $0x10] sm:$0xff]  ;;  %v1972_v63 = vld [vmem:[%s9912_s25 + $0x18] sm:$0xff] }
 0x28a   : > { %v1856_v43 = vmul.f32 %v9246_v11, %v1855_v22  ;;  %v1862_v46 = vmul.f32 %v10422_v5, %v10385_v56  ;;  %v10429_v38 = vadd.f32 1e-06, %v1676_v14  ;;  %v10431_v37 = vpop.eup %9251  ;;  %v1988_v22 = vld [vmem:[%s9917_s27 + $0x18] sm:$0xff]  ;;  %vm1868_vm14 = vweird.f32 %v10422_v5 }
 0x28b   : > { %9253 = vrsqrt.f32 %v10425_v3  ;;  %v1713_v39 = vmul.f32 %v10387_v41, %v1712_v45  ;;  %v1719_v61 = vmul.f32 %v10431_v37, %v10391_v42  ;;  %v1955_v52 = vadd.f32 %v1947_v40, %v1931_v17  ;;  %vm10492_vm3 = vmor %vm1867_vm15, %vm1868_vm14 }
 0x28c   : > { %v1863_v9 = vmul.f32 %v10422_v5, %v1862_v46  ;;  %9255 = vrsqrt.f32 %v10429_v38  ;;  %v1860_v57 = vsel %vm1859_vm10, %v9246_v11, %v1856_v43  ;;  %v1980_v40 = vmul.f32 %v1972_v63, %v10271_v55 }
 0x28d   : > { %v10442_v54 = vmul.f32 %v2002_v47, %v1860_v57  ;;  %v1720_v6 = vmul.f32 %v10431_v37, %v1719_v61  ;;  %v1717_v45 = vsel %vm10449_vm13, %v10387_v41, %v1713_v39  ;;  %v1996_v55 = vmul.f32 %v1988_v22, %v1551_v1 }
 0x28e   : > { %v1864_v7 = vmul.f32 0.5, %v1863_v9  ;;  %v10472_v28 = vmul.f32 %v1955_v52, %v1717_v45  ;;  %vm1877_vm4 = vweird.f32 %v10425_v3  ;;  %vm1725_vm6 = vweird.f32 %v10431_v37 }
 0x28f   : > { %2389 = vrot.lane.b32.xlu2 %v10442_v54, %s13910_s7  ;;  %v1721_v39 = vmul.f32 0.5, %v1720_v6  ;;  %v2004_v63 = vadd.f32 %v1996_v55, %v1980_v40  ;;  %v1925_v40 = vld [vmem:[%s13939_s4 + $0x20] sm:$0xff]  ;;  %vm10537_vm9 = vmor %vm1724_vm8, %vm1725_vm6  ;;  %vm1734_vm10 = vweird.f32 %v10429_v38 }
 0x290   : > { %v1829_v11 = vpop.f32.mrf.mxu3  ;;  %v1865_v46 = vsub.f32 1.5, %v1864_v7  ;;  %v1979_v7 = vmul.f32 %v1971_v49, %v10261_v51  ;;  %v1933_v42 = vmul.f32 %v1925_v40, %v10275_v58  ;;  %v1990_v40 = vld [vmem:[%s9917_s27 + $0x28] sm:$0xff] }
 0x291   : > { %v9254_v48 = vpop.eup %9253  ;;  %v10453_v35 = vadd.f32 1e-06, %v1829_v11  ;;  %v1679_v59 = vpop.f32.mrf.mxu2  ;;  %v1987_v11 = vld [vmem:[%s9917_s27 + $0x10] sm:$0xff]  ;;  %v1722_v56 = vsub.f32 1.5, %v1721_v39 }
 0x292   : > { %v10455_v14 = vpop.eup %9255  ;;  %v1872_v43 = vmul.f32 %v9254_v48, %v10425_v3  ;;  %v10466_v9 = vadd.f32 1e-06, %v1679_v59  ;;  %v1866_v41 = vmul.f32 %v10422_v5, %v1865_v46  ;;  %v10480_v59 = vpop.f32.mrf.mxu0  ;;  %v1995_v46 = vmul.f32 %v1987_v11, %v10403_v50 }
 0x293   : > { %v1729_v47 = vmul.f32 %v10455_v14, %v10429_v38  ;;  %9257 = vrsqrt.f32 %v10453_v35  ;;  %vm1878_vm2 = vweird.f32 %v9254_v48  ;;  %vm1735_vm7 = vweird.f32 %v10455_v14 }
 0x294   : > { %v1873_v57 = vmul.f32 %v9254_v48, %v1872_v43  ;;  %9259 = vrsqrt.f32 %v10466_v9  ;;  %v1870_v1 = vsel %vm10492_vm3, %v10422_v5, %v1866_v41  ;;  %v2003_v49 = vadd.f32 %v1995_v46, %v1979_v7  ;;  %vm1879_vm5 = vmor %vm1877_vm4, %vm1878_vm2 }
 0x295   : > { %v1730_v61 = vmul.f32 %v10455_v14, %v1729_v47  ;;  %v1723_v5 = vmul.f32 %v10431_v37, %v1722_v56  ;;  %vm10547_vm11 = vmor %vm1734_vm10, %vm1735_vm7  ;;  %vm1887_vm14 = vweird.f32 %v10453_v35 }
 0x296   : > { %v1874_v32 = vmul.f32 0.5, %v1873_v57  ;;  %v10511_v3 = vmul.f32 %v2003_v49, %v1870_v1  ;;  %v1974_v49 = vld [vmem:[%s9912_s25 + $0x28] sm:$0xff]  ;;  %v1989_v1 = vld [vmem:[%s9917_s27 + $0x20] sm:$0xff] }
 0x297   : > { %v1731_v43 = vmul.f32 0.5, %v1730_v61  ;;  %2375 = vrot.lane.b32.xlu2 %v10472_v28, %s13910_s7 }
 0x298   : > { %v1875_v17 = vsub.f32 1.5, %v1874_v32  ;;  %v1832_v45 = vpop.f32.mrf.mxu3  ;;  %v1924_v32 = vld [vmem:[%s13939_s4 + $0x18] sm:$0xff] }
 0x299   : > { %v10484_v47 = vpop.eup %9257  ;;  %v10488_v6 = vadd.f32 1e-06, %v1832_v45  ;;  %v1682_v51 = vpop.f32.mrf.mxu2  ;;  %v1732_v61 = vsub.f32 1.5, %v1731_v43  ;;  %v1941_v45 = vld [vmem:[%s9907_s29 + $0x20] sm:$0xff] }
 0x29a   : > { %v1876_v52 = vmul.f32 %v9254_v48, %v1875_v17  ;;  %v1882_v57 = vmul.f32 %v10484_v47, %v10453_v35  ;;  %v10498_v50 = vadd.f32 1e-06, %v1682_v51  ;;  %v10506_v22 = vpop.eup %9259  ;;  %v1940_v17 = vld [vmem:[%s9907_s29 + $0x18] sm:$0xff]  ;;  %v1557_v56 = vpop.f32.mrf.mxu0  ;;  %vm1888_vm12 = vweird.f32 %v10484_v47 }
 0x29b   : > { %9261 = vrsqrt.f32 %v10488_v6  ;;  %v1948_v7 = vmul.f32 %v1940_v17, %v10326_v21  ;;  %v1733_v43 = vmul.f32 %v10455_v14, %v1732_v61  ;;  %v1727_v61 = vsel %vm10537_vm9, %v10431_v37, %v1723_v5  ;;  %vm10588_vm15 = vmor %vm1887_vm14, %vm1888_vm12 }
 0x29c   : > { %v1883_v11 = vmul.f32 %v10484_v47, %v1882_v57  ;;  %v1880_v39 = vsel %vm1879_vm5, %v9254_v48, %v1876_v52  ;;  %9263 = vrsqrt.f32 %v10498_v50  ;;  %v1739_v48 = vmul.f32 %v10506_v22, %v10466_v9 }
 0x29d   : > { %v10513_v51 = vmul.f32 %v2004_v63, %v1880_v39  ;;  %v1949_v52 = vmul.f32 %v1941_v45, %v10330_v25  ;;  %v1932_v57 = vmul.f32 %v1924_v32, %v10265_v53  ;;  %v1737_v39 = vsel %vm10547_vm11, %v10455_v14, %v1733_v43  ;;  %v1973_v32 = vld [vmem:[%s9912_s25 + $0x20] sm:$0xff] }
 0x29e   : > { %v1884_v41 = vmul.f32 0.5, %v1883_v11  ;;  %v1740_v58 = vmul.f32 %v10506_v22, %v1739_v48  ;;  %v1981_v14 = vmul.f32 %v1973_v32, %v10281_v60  ;;  %vm1897_vm2 = vweird.f32 %v10488_v6 }
 0x29f   : > { %2391 = vrot.lane.b32.xlu2 %v10511_v3, %s13910_s7  ;;  %2393 = vrot.lane.b32.xlu0 %v10513_v51, %s13910_s7  ;;  %v1956_v11 = vadd.f32 %v1948_v7, %v1932_v57  ;;  %v1957_v45 = vadd.f32 %v1949_v52, %v1933_v42  ;;  %v1998_v57 = vmul.f32 %v1990_v40, %v1557_v56  ;;  %v1926_v40 = vld [vmem:[%s13939_s4 + $0x28] sm:$0xff]  ;;  %vm1745_vm4 = vweird.f32 %v10506_v22  ;;  %v1992_v42 = vld [vmem:[%s9917_s27 + $0x38] sm:$0xff] }
 0x2a0   : > { %v1835_v46 = vpop.f32.mrf.mxu3  ;;  %2917 = vrot.lane.b32.xlu1 %v10513_v51, %s13903_s10  ;;  %v1885_v63 = vsub.f32 1.5, %v1884_v41  ;;  %v1982_v41 = vmul.f32 %v1974_v49, %v10291_v0  ;;  %v1741_v43 = vmul.f32 0.5, %v1740_v58  ;;  %vm1744_vm5 = vweird.f32 %v10466_v9 }
 0x2a1   : > { %v9262_v55 = vpop.eup %9261  ;;  %v10532_v21 = vadd.f32 1e-06, %v1835_v46  ;;  %v10564_v24 = vmul.f32 %v1956_v11, %v1727_v61  ;;  %v10571_v7 = vmul.f32 %v1957_v45, %v1737_v39  ;;  %vm1746_vm6 = vmor %vm1744_vm5, %vm1745_vm4  ;;  %vm1754_vm9 = vweird.f32 %v10498_v50 }
 0x2a2   : > { %v1892_v25 = vmul.f32 %v9262_v55, %v10488_v6  ;;  %v10555_v38 = vpop.eup %9263  ;;  %v1886_v37 = vmul.f32 %v10484_v47, %v1885_v63  ;;  %vm1898_vm13 = vweird.f32 %v9262_v55  ;;  %v2006_v56 = vadd.f32 %v1998_v57, %v1982_v41  ;;  %v1560_v61 = vpop.f32.mrf.mxu0  ;;  %v1943_v57 = vld [vmem:[%s9907_s29 + $0x30] sm:$0xff] }
 0x2a3   : > { %9265 = vrsqrt.f32 %v10532_v21  ;;  %v1749_v5 = vmul.f32 %v10555_v38, %v10498_v50  ;;  %vm1899_vm3 = vmor %vm1897_vm2, %vm1898_vm13  ;;  %v1742_v11 = vsub.f32 1.5, %v1741_v43  ;;  %vm1755_vm7 = vweird.f32 %v10555_v38 }
 0x2a4   : > { %v1893_v17 = vmul.f32 %v9262_v55, %v1892_v25  ;;  %v1997_v25 = vmul.f32 %v1989_v1, %v10480_v59  ;;  %v1890_v59 = vsel %vm10588_vm15, %v10484_v47, %v1886_v37  ;;  %v1934_v37 = vmul.f32 %v1926_v40, %v10285_v62  ;;  %vm1756_vm10 = vmor %vm1754_vm9, %vm1755_vm7 }
 0x2a5   : > { %v1750_v53 = vmul.f32 %v10555_v38, %v1749_v5  ;;  %v1743_v41 = vmul.f32 %v10506_v22, %v1742_v11  ;;  %vm1907_vm14 = vweird.f32 %v10532_v21 }
 0x2a6   : > { %v1894_v46 = vmul.f32 0.5, %v1893_v17  ;;  %v2005_v63 = vadd.f32 %v1997_v25, %v1981_v14  ;;  %v1942_v17 = vld [vmem:[%s9907_s29 + $0x28] sm:$0xff]  ;;  %v1976_v14 = vld [vmem:[%s9912_s25 + $0x38] sm:$0xff] }
 0x2a7   : > { %2377 = vrot.lane.b32.xlu2 %v10564_v24, %s13910_s7  ;;  %3376 = vrot.lane.b32.xlu0 %v10513_v51, %s13901_s11  ;;  %v1751_v32 = vmul.f32 0.5, %v1750_v53  ;;  %v1951_v53 = vmul.f32 %v1943_v57, %v10340_v31 }
 0x2a8   : > { %v1895_v48 = vsub.f32 1.5, %v1894_v46  ;;  %v1838_v0 = vpop.f32.mrf.mxu3  ;;  %2379 = vrot.lane.b32.xlu1 %v10571_v7, %s13910_s7  ;;  %v10605_v45 = vmul.f32 %v2005_v63, %v1890_v59  ;;  %v1975_v59 = vld [vmem:[%s9912_s25 + $0x30] sm:$0xff] }
 0x2a9   : > { %v10578_v52 = vpop.eup %9265  ;;  %v10583_v60 = vadd.f32 1e-06, %v1838_v0  ;;  %v1752_v5 = vsub.f32 1.5, %v1751_v32 }
 0x2aa   : > { %v1896_v49 = vmul.f32 %v9262_v55, %v1895_v48  ;;  %v1902_v35 = vmul.f32 %v10578_v52, %v10532_v21  ;;  %v1747_v48 = vsel %vm1746_vm6, %v10506_v22, %v1743_v41  ;;  %v1563_v25 = vpop.f32.mrf.mxu0  ;;  %vm1908_vm11 = vweird.f32 %v10578_v52 }
 0x2ab   : > { %9267 = vrsqrt.f32 %v10583_v60  ;;  %v2000_v11 = vmul.f32 %v1992_v42, %v1563_v25  ;;  %vm1917_vm12 = vweird.f32 %v10583_v60  ;;  %vm1909_vm15 = vmor %vm1907_vm14, %vm1908_vm11 }
 0x2ac   : > { %v1900_v58 = vsel %vm1899_vm3, %v9262_v55, %v1896_v49  ;;  %v1903_v39 = vmul.f32 %v10578_v52, %v1902_v35  ;;  %v1950_v55 = vmul.f32 %v1942_v17, %v10336_v29  ;;  %v1927_v29 = vld [vmem:[%s13939_s4 + $0x30] sm:$0xff]  ;;  %v1984_v35 = vmul.f32 %v1976_v14, %v10311_v10  ;;  %v1928_v14 = vld [vmem:[%s13939_s4 + $0x38] sm:$0xff]  ;;  %s14013_s4 = smov 80  }
 0x2ad   : > { %v10601_v6 = vmul.f32 %v2006_v56, %v1900_v58  ;;  %v1753_v56 = vmul.f32 %v10555_v38, %v1752_v5  ;;  %v1935_v63 = vmul.f32 %v1927_v29, %v10295_v2  ;;  %v1991_v10 = vld [vmem:[%s9917_s27 + $0x30] sm:$0xff]  ;;  %v1983_v17 = vmul.f32 %v1975_v59, %v10301_v4 }
 0x2ae   : > { %v1904_v46 = vmul.f32 0.5, %v1903_v39  ;;  %v1958_v0 = vadd.f32 %v1950_v55, %v1934_v37  ;;  %v2008_v39 = vadd.f32 %v2000_v11, %v1984_v35  ;;  %v1999_v40 = vmul.f32 %v1991_v10, %v1560_v61  ;;  %v1944_v37 = vld [vmem:[%s9907_s29 + $0x38] sm:$0xff] }
 0x2af   : > { %2395 = vrot.lane.b32.xlu2 %v10605_v45, %s13910_s7  ;;  %2397 = vrot.lane.b32.xlu0 %v10601_v6, %s13910_s7  ;;  %v1757_v2 = vsel %vm1756_vm10, %v10555_v38, %v1753_v56  ;;  %v1959_v32 = vadd.f32 %v1951_v53, %v1935_v63 }
 0x2b0   : > { %3378 = vrot.lane.b32.xlu1 %v10605_v45, %s13901_s11  ;;  %v1905_v49 = vsub.f32 1.5, %v1904_v46  ;;  %v10628_v62 = vmul.f32 %v1958_v0, %v1747_v48  ;;  %v1952_v48 = vmul.f32 %v1944_v37, %v10347_v34  ;;  %v1936_v0 = vmul.f32 %v1928_v14, %v10305_v8  ;;  %v2017_v14 = vld [vmem:[%s13960_s15] sm:$0xff] }
 0x2b1   : > { %v9268_v47 = vpop.eup %9267  ;;  %v10645_v55 = vmul.f32 %v1959_v32, %v1757_v2 }
 0x2b2   : > { %v1912_v1 = vmul.f32 %v9268_v47, %v10583_v60  ;;  %vm1918_vm8 = vweird.f32 %v9268_v47  ;;  %v1906_v58 = vmul.f32 %v10578_v52, %v1905_v49  ;;  %v1960_v29 = vadd.f32 %v1952_v48, %v1936_v0 }
 0x2b3   : > { %vm1919_vm13 = vmor %vm1917_vm12, %vm1918_vm8 }
 0x2b4   : > { %v1913_v43 = vmul.f32 %v9268_v47, %v1912_v1  ;;  %v1910_v46 = vsel %vm1909_vm15, %v10578_v52, %v1906_v58  ;;  %v2007_v1 = vadd.f32 %v1999_v40, %v1983_v17 }
 0x2b6   : > { %v1914_v9 = vmul.f32 0.5, %v1913_v43  ;;  %v2015_v4 = vmul.f32 %v2007_v1, %v1910_v46 }
 0x2b7   : > { %2919 = vrot.lane.b32.xlu2 %v10605_v45, %s13903_s10 }
 0x2b8   : > { %v1915_v22 = vsub.f32 1.5, %v1914_v9  ;;  %2381 = vrot.lane.b32.xlu1 %v10628_v62, %s13910_s7 }
 0x2ba   : > { %v1916_v31 = vmul.f32 %v9268_v47, %v1915_v22 }
 0x2bc   : > { %v1920_v50 = vsel %vm1919_vm13, %v9268_v47, %v1916_v31 }
 0x2bd   : > { %v2016_v41 = vmul.f32 %v2008_v39, %v1920_v50 }
 0x2bf   : > { %8631 = vmatpush.xpose.msk.msra.mxu0 %vm1118_vm0, %v2016_v41  ;;  %2925 = vrot.lane.b32.xlu0 %v2016_v41, %s13903_s10 }
 0x2c0   : > { %2383 = vrot.lane.b32.xlu2 %v10645_v55, %s13910_s7  ;;  %2921 = vrot.lane.b32.xlu1 %v10601_v6, %s13903_s10 }
 0x2c3   : > { %8632 = vmatpush.xpose.msk.msra.mxu0 %vm1118_vm0, %v2015_v4 }
 0x2c7   : > { %8633 = vmatpush.xpose.msk.msra.mxu0 %vm1118_vm0, %v10601_v6 }
 0x2c8   : > { %2399 = vrot.lane.b32.xlu2 %v2015_v4, %s13910_s7  ;;  %3380 = vrot.lane.b32.xlu1 %v10601_v6, %s13901_s11 }
 0x2cb   : > { %8634 = vmatpush.xpose.msk.msra.mxu0 %vm1118_vm0, %v10605_v45 }
 0x2cf   : > { %8635 = vmatpush.xpose.msk.msra.mxu0 %vm1118_vm0, %v10513_v51  ;;  %v1685_v51 = vpop.f32.mrf.mxu2 }
 0x2d0   : > { %3382 = vrot.lane.b32.xlu2 %v2015_v4, %s13901_s11  ;;  %2923 = vrot.lane.b32.xlu1 %v2015_v4, %s13903_s10  ;;  %v1686_v21 = vadd.f32 1e-06, %v1685_v51 }
 0x2d2   : > { %9269 = vrsqrt.f32 %v1686_v21  ;;  %vm1764_vm3 = vweird.f32 %v1686_v21 }
 0x2d3   : > { %8636 = vmatpush.xpose.msk.msra.mxu0 %vm1118_vm0, %v10511_v3 }
 0x2d7   : > { %8637 = vmatpush.xpose.msk.msra.mxu0 %vm1118_vm0, %v10442_v54 }
 0x2d8   : > { %2401 = vrot.lane.b32.xlu1 %v2016_v41, %s13910_s7  ;;  %v9270_v38 = vpop.eup %9269 }
 0x2d9   : > { %v1759_v52 = vmul.f32 %v9270_v38, %v1686_v21  ;;  %vm1765_vm2 = vweird.f32 %v9270_v38 }
 0x2da   : > { %vm1766_vm4 = vmor %vm1764_vm3, %vm1765_vm2 }
 0x2db   : > { %8638 = vmatpush.xpose.msk.msra.mxu0 %vm1118_vm0, %v10413_v44  ;;  %v1760_v61 = vmul.f32 %v9270_v38, %v1759_v52 }
 0x2dd   : > { %v1761_v6 = vmul.f32 0.5, %v1760_v61 }
 0x2de   : > { %8639 = vmatmul.msk.f32.vlgmr.msra.gmra.mxu0 %vm1118_vm0, %v10377_v19 }
 0x2df   : > { %v1762_v45 = vsub.f32 1.5, %v1761_v6 }
 0x2e0   : > { %3384 = vrot.lane.b32.xlu1 %v2016_v41, %s13901_s11 }
 0x2e1   : > { %v2388_v60 = vpop.permute.xlu2 %2387  ;;  %v1763_v43 = vmul.f32 %v9270_v38, %v1762_v45 }
 0x2e3   : > { %v1767_v57 = vsel %vm1766_vm4, %v9270_v38, %v1763_v43 }
 0x2e4   : > { %v10694_v49 = vmul.f32 %v1960_v29, %v1767_v57 }
 0x2e6   : > { %8640 = vmatmul.msk.f32.gmra.mxu0 %vm1118_vm0, %v10415_v36 }
 0x2e8   : > { %3374 = vrot.lane.b32.xlu1 %v10511_v3, %s13901_s11 }
 0x2e9   : > { %v2390_v47 = vpop.permute.xlu2 %2389 }
 0x2ee   : > { %8641 = vmatmul.msk.f32.gmra.mxu0 %vm1118_vm0, %v10472_v28 }
 0x2f1   : > { %v2376_v25 = vpop.permute.xlu2 %2375 }
 0x2f2   : > { %v2372_v5 = vpop.permute.xlu1 %2371 }
 0x2f6   : > { %8642 = vmatmul.msk.f32.gmra.mxu0 %vm1118_vm0, %v10564_v24 }
 0x2f9   : > { %v2392_v35 = vpop.permute.xlu2 %2391 }
 0x2fa   : > { %v2374_v63 = vpop.permute.xlu0 %2373 }
 0x2fe   : > { %8643 = vmatmul.msk.f32.gmra.mxu0 %vm1118_vm0, %v10571_v7 }
 0x301   : > { %v2378_v34 = vpop.permute.xlu2 %2377 }
 0x306   : > { %8644 = vmatmul.msk.f32.gmra.mxu0 %vm1118_vm0, %v10628_v62 }
 0x309   : > { %v2396_v59 = vpop.permute.xlu2 %2395 }
 0x30e   : > { %8645 = vmatmul.msk.f32.gmra.mxu0 %vm1118_vm0, %v10645_v55 }
 0x311   : > { %v2920_v8 = vpop.permute.xlu2 %2919  ;;  %v2394_v10 = vpop.permute.xlu0 %2393 }
 0x312   : > { %v2918_v42 = vpop.permute.xlu1 %2917 }
 0x316   : > { %8646 = vmatmul.msk.f32.gmra.mxu0 %vm1118_vm0, %v10694_v49 }
 0x319   : > { %v10702_v17 = vpop.permute.xlu0 %3376 }
 0x31a   : > { %v2380_v9 = vpop.permute.xlu1 %2379  ;;  %v2384_v31 = vpop.permute.xlu2 %2383 }
 0x321   : > { %v2398_v32 = vpop.permute.xlu0 %2397 }
 0x322   : > { %v10698_v56 = vpop.permute.xlu1 %3378  ;;  %v2400_v2 = vpop.permute.xlu2 %2399 }
 0x32a   : > { %v2382_v53 = vpop.permute.xlu1 %2381  ;;  %v3383_v43 = vpop.permute.xlu2 %3382 }
 0x331   : > { %v2926_v1 = vpop.permute.xlu0 %2925 }
 0x332   : > { %v2922_v22 = vpop.permute.xlu1 %2921 }
 0x33a   : > { %v10700_v11 = vpop.permute.xlu1 %3380 }
 0x342   : > { %v2924_v58 = vpop.permute.xlu1 %2923 }
 0x34a   : > { %v2402_v39 = vpop.permute.xlu1 %2401 }
 0x34b   : > { %8655 = vmatpush.xpose.msk.msra.mxu2 %vm1118_vm0, %v2402_v39 }
 0x34f   : > { %8656 = vmatpush.xpose.msk.msra.mxu2 %vm1118_vm0, %v2400_v2 }
 0x352   : > { %v3385_v48 = vpop.permute.xlu1 %3384 }
 0x353   : > { %8657 = vmatpush.xpose.msk.msra.mxu2 %vm1118_vm0, %v2398_v32 }
 0x357   : > { %8658 = vmatpush.xpose.msk.msra.mxu2 %vm1118_vm0, %v2396_v59 }
 0x35b   : > { %v2090_v50 = vpop.f32.mrf.mxu0  ;;  %8659 = vmatpush.xpose.msk.msra.mxu2 %vm1118_vm0, %v2394_v10 }
 0x35c   : > { %v2114_v40 = vsel %vm1192_vm1, %v2090_v50, -inf }
 0x35d   : > { %2115 = vmax.xlane.f32.xlu2 %v2114_v40 }
 0x35f   : > { %8660 = vmatpush.xpose.msk.msra.mxu2 %vm1118_vm0, %v2392_v35 }
 0x363   : > { %v2093_v41 = vpop.f32.mrf.mxu0  ;;  %8661 = vmatpush.xpose.msk.msra.mxu2 %vm1118_vm0, %v2390_v47 }
 0x364   : > { %v2117_v46 = vsel %vm1192_vm1, %v2093_v41, -inf }
 0x365   : > { %2118 = vmax.xlane.f32.xlu0 %v2117_v46 }
 0x367   : > { %8662 = vmatpush.xpose.msk.msra.mxu2 %vm1118_vm0, %v2388_v60 }
 0x36a   : > { %8663 = vmatmul.msk.f32.vlgmr.msra.gmra.mxu2 %vm1118_vm0, %v2372_v5  ;;  %v2018_v5 = vld [vmem:[%s13960_s15 + $0x8] sm:$0xff] }
 0x36b   : > { %8695 = vmatpush.xpose.msk.msrb.mxu2 %vm1118_vm0, %v2926_v1  ;;  %v2096_v4 = vpop.f32.mrf.mxu0  ;;  %2868 = vmatpush.msrb.mxu1 %v2018_v5 }
 0x36c   : > { %v2120_v51 = vsel %vm1192_vm1, %v2096_v4, -inf }
 0x36d   : > { %2121 = vmax.xlane.f32.xlu1 %v2120_v51  ;;  %2869 = vmatpush.msrb.mxu1 %v2017_v14 }
 0x36f   : > { %8696 = vmatpush.xpose.msk.msrb.mxu2 %vm1118_vm0, %v2924_v58 }
 0x372   : > { %8664 = vmatmul.msk.f32.gmra.mxu2 %vm1118_vm0, %v2374_v63 }
 0x373   : > { %8697 = vmatpush.xpose.msk.msrb.mxu2 %vm1118_vm0, %v2922_v22  ;;  %v10720_v21 = vpop.f32.mrf.mxu0 }
 0x374   : > { %v2123_v47 = vsel %vm1192_vm1, %v10720_v21, -inf }
 0x375   : > { %2915 = vrot.lane.b32.xlu2 %v10511_v3, %s13903_s10 }
 0x377   : > { %8698 = vmatpush.xpose.msk.msrb.mxu2 %vm1118_vm0, %v2920_v8 }
 0x37a   : > { %8665 = vmatmul.msk.f32.gmra.mxu2 %vm1118_vm0, %v2376_v25  ;;  %v3375_v25 = vpop.permute.xlu1 %3374 }
 0x37b   : > { %8699 = vmatpush.xpose.msk.msrb.mxu2 %vm1118_vm0, %v2918_v42  ;;  %v10727_v38 = vpop.f32.mrf.mxu0 }
 0x37c   : > { %v2126_v52 = vsel %vm1192_vm1, %v10727_v38, -inf }
 0x37d   : > { %2127 = vmax.xlane.f32.xlu0 %v2126_v52 }
 0x382   : > { %8666 = vmatmul.msk.f32.gmra.mxu2 %vm1118_vm0, %v2378_v34 }
 0x383   : > { %v10732_v60 = vpop.f32.mrf.mxu0 }
 0x384   : > { %v2129_v61 = vsel %vm1192_vm1, %v10732_v60, -inf }
 0x385   : > { %2130 = vmax.xlane.f32.xlu1 %v2129_v61 }
 0x38a   : > { %8667 = vmatmul.msk.f32.gmra.mxu2 %vm1118_vm0, %v2380_v9 }
 0x38b   : > { %v10737_v3 = vpop.f32.mrf.mxu0 }
 0x38c   : > { %v2132_v37 = vsel %vm1192_vm1, %v10737_v3, -inf }
 0x392   : > { %8668 = vmatmul.msk.f32.gmra.mxu2 %vm1118_vm0, %v2382_v53 }
 0x393   : > { %v10740_v6 = vpop.f32.mrf.mxu0 }
 0x394   : > { %v2135_v45 = vsel %vm1192_vm1, %v10740_v6, -inf }
 0x395   : > { %2136 = vmax.xlane.f32.xlu0 %v2135_v45 }
 0x39a   : > { %8669 = vmatmul.msk.f32.gmra.mxu2 %vm1118_vm0, %v2384_v31 }
 0x39e   : > { %2913 = vrot.lane.b32.xlu1 %v10442_v54, %s13903_s10  ;;  %2124 = vmax.xlane.f32.xlu2 %v2123_v47 }
 0x3a6   : > { %2133 = vmax.xlane.f32.xlu2 %v2132_v37 }
 0x3be   : > { %2385 = vrot.lane.b32.xlu2 %v10694_v49, %s13910_s7 }
 0x3d0   : > { %v2116_v0 = vpop.xlane.xlu2 %2115 }
 0x3d1   : > { %v2138_v57 = vsub.f32 %v2090_v50, %v2116_v0 }
 0x3d3   : > { %v2146_v29 = vmul.f32 1.442695, %v2138_v57 }
 0x3d5   : > { %9271 = vpow2.f32 %v2146_v29 }
 0x3d8   : > { %v2119_v42 = vpop.xlane.xlu0 %2118  ;;  %v2916_v9 = vpop.permute.xlu2 %2915 }
 0x3d9   : > { %v2139_v35 = vsub.f32 %v2093_v41, %v2119_v42  ;;  %8700 = vmatpush.xpose.msk.msrb.mxu2 %vm1118_vm0, %v2916_v9 }
 0x3db   : > { %v9272_v34 = vpop.eup %9271  ;;  %v2148_v53 = vmul.f32 1.442695, %v2139_v35 }
 0x3dc   : > { %8647 = vmatmul.msk.f32.vlgmr.msra.gmra.mxu1 %vm1192_vm1, %v9272_v34  ;;  %v2162_v59 = vsel %vm1192_vm1, %v9272_v34, 0.0 }
 0x3dd   : > { %9273 = vpow2.f32 %v2148_v53  ;;  %8727 = vmatpush.xpose.msk.msra.mxu1 %vm1118_vm0, %v3385_v48  ;;  %2163 = vadd.xlane.f32.xlu1 %v2162_v59 }
 0x3e0   : > { %v2122_v22 = vpop.xlane.xlu1 %2121 }
 0x3e1   : > { %v2140_v63 = vsub.f32 %v2096_v4, %v2122_v22  ;;  %8728 = vmatpush.xpose.msk.msra.mxu1 %vm1118_vm0, %v3383_v43 }
 0x3e3   : > { %v9274_v8 = vpop.eup %9273  ;;  %v2150_v10 = vmul.f32 1.442695, %v2140_v63 }
 0x3e4   : > { %8648 = vmatmul.msk.f32.gmra.mxu1 %vm1192_vm1, %v9274_v8  ;;  %v2165_v58 = vsel %vm1192_vm1, %v9274_v8, 0.0 }
 0x3e5   : > { %9275 = vpow2.f32 %v2150_v10  ;;  %8729 = vmatpush.xpose.msk.msra.mxu1 %vm1118_vm0, %v10700_v11  ;;  %2166 = vadd.xlane.f32.xlu0 %v2165_v58 }
 0x3e9   : > { %8730 = vmatpush.xpose.msk.msra.mxu1 %vm1118_vm0, %v10698_v56 }
 0x3eb   : > { %v9276_v31 = vpop.eup %9275 }
 0x3ec   : > { %8649 = vmatmul.msk.f32.gmra.mxu1 %vm1192_vm1, %v9276_v31  ;;  %v2168_v39 = vsel %vm1192_vm1, %v9276_v31, 0.0 }
 0x3ed   : > { %8731 = vmatpush.xpose.msk.msra.mxu1 %vm1118_vm0, %v10702_v17  ;;  %2169 = vadd.xlane.f32.xlu2 %v2168_v39 }
 0x3f0   : > { %v2128_v11 = vpop.xlane.xlu0 %2127 }
 0x3f1   : > { %8732 = vmatpush.xpose.msk.msra.mxu1 %vm1118_vm0, %v3375_v25  ;;  %v2142_v2 = vsub.f32 %v10727_v38, %v2128_v11 }
 0x3f3   : > { %v2154_v50 = vmul.f32 1.442695, %v2142_v2 }
 0x3f5   : > { %9277 = vpow2.f32 %v2154_v50 }
 0x3f6   : > { %3370 = vrot.lane.b32.xlu1 %v10413_v44, %s13901_s11 }
 0x3f8   : > { %v2131_v56 = vpop.xlane.xlu1 %2130 }
 0x3f9   : > { %2911 = vrot.lane.b32.xlu0 %v10413_v44, %s13903_s10  ;;  %v2143_v46 = vsub.f32 %v10732_v60, %v2131_v56 }
 0x3fb   : > { %v9278_v1 = vpop.eup %9277  ;;  %v2156_v51 = vmul.f32 1.442695, %v2143_v46 }
 0x3fc   : > { %v2174_v38 = vsel %vm1192_vm1, %v9278_v1, 0.0 }
 0x405   : > { %3372 = vrot.lane.b32.xlu2 %v10442_v54, %s13901_s11 }
 0x408   : > { %v2137_v47 = vpop.xlane.xlu0 %2136 }
 0x409   : > { %v2145_v5 = vsub.f32 %v10740_v6, %v2137_v47  ;;  %v10838_v47 = vpack.i.bf16 %v10332_v26, %v10334_v27 }
 0x40b   : > { %v2160_v14 = vmul.f32 1.442695, %v2145_v5 }
 0x410   : > { %v2914_v32 = vpop.permute.xlu1 %2913 }
 0x411   : > { %8701 = vmatpush.xpose.msk.msrb.mxu2 %vm1118_vm0, %v2914_v32  ;;  %v2125_v17 = vpop.xlane.xlu2 %2124 }
 0x412   : > { %v2141_v40 = vsub.f32 %v10720_v21, %v2125_v17 }
 0x414   : > { %v2152_v41 = vmul.f32 1.442695, %v2141_v40 }
 0x416   : > { %9279 = vpow2.f32 %v2152_v41 }
 0x417   : > { %9281 = vpow2.f32 %v2156_v51 }
 0x419   : > { %v2134_v44 = vpop.xlane.xlu2 %2133 }
 0x41a   : > { %v2144_v54 = vsub.f32 %v10737_v3, %v2134_v44 }
 0x41c   : > { %v9280_v4 = vpop.eup %9279  ;;  %v2158_v52 = vmul.f32 1.442695, %v2144_v54 }
 0x41d   : > { %8650 = vmatmul.msk.f32.gmra.mxu1 %vm1192_vm1, %v9280_v4  ;;  %v2171_v21 = vsel %vm1192_vm1, %v9280_v4, 0.0  ;;  %v9282_v60 = vpop.eup %9281 }
 0x41e   : > { %9283 = vpow2.f32 %v2158_v52  ;;  %v2177_v3 = vsel %vm1192_vm1, %v9282_v60, 0.0 }
 0x41f   : > { %9285 = vpow2.f32 %v2160_v14 }
 0x420   : > { %2175 = vadd.xlane.f32.xlu1 %v2174_v38 }
 0x421   : > { %v2386_v61 = vpop.permute.xlu2 %2385 }
 0x422   : > { %8670 = vmatmul.msk.f32.gmra.mxu2 %vm1118_vm0, %v2386_v61 }
 0x423   : > { %2172 = vadd.xlane.f32.xlu0 %v2171_v21 }
 0x424   : > { %v9284_v45 = vpop.eup %9283 }
 0x425   : > { %8651 = vmatmul.msk.f32.gmra.mxu1 %vm1192_vm1, %v9278_v1  ;;  %v2180_v37 = vsel %vm1192_vm1, %v9284_v45, 0.0  ;;  %v10794_v43 = vpop.eup %9285 }
 0x42b   : > { %2178 = vadd.xlane.f32.xlu0 %v2177_v3 }
 0x42d   : > { %8652 = vmatmul.msk.f32.gmra.mxu1 %vm1192_vm1, %v9282_v60 }
 0x42e   : > { %2181 = vadd.xlane.f32.xlu2 %v2180_v37 }
 0x435   : > { %8653 = vmatmul.msk.f32.gmra.mxu1 %vm1192_vm1, %v9284_v45 }
 0x439   : > { %2897 = vrot.lane.b32.xlu1 %v10415_v36, %s13903_s10 }
 0x43d   : > { %8654 = vmatmul.msk.f32.gmra.mxu1 %vm1192_vm1, %v10794_v43 }
 0x43f   : > { %3354 = vrot.lane.b32.xlu0 %v10377_v19, %s13901_s11 }
 0x441   : > { %3358 = vrot.lane.b32.xlu1 %v10472_v28, %s13901_s11 }
 0x446   : > { %2895 = vrot.lane.b32.xlu2 %v10377_v19, %s13903_s10 }
 0x447   : > { %2899 = vrot.lane.b32.xlu0 %v10472_v28, %s13903_s10 }
 0x449   : > { %2903 = vrot.lane.b32.xlu1 %v10571_v7, %s13903_s10 }
 0x44e   : > { %3356 = vrot.lane.b32.xlu2 %v10415_v36, %s13901_s11  ;;  %v10818_v36 = vpop.f32.mrf.mxu2 }
 0x44f   : > { %3360 = vrot.lane.b32.xlu0 %v10564_v24, %s13901_s11  ;;  %v2476_v5 = vsel %vm1192_vm1, %v10818_v36, -inf }
 0x450   : > { %v2164_v6 = vpop.xlane.xlu1 %2163 }
 0x451   : > { %9287 = vrcp.f32 %v2164_v6  ;;  %3364 = vrot.lane.b32.xlu1 %v10628_v62, %s13901_s11  ;;  %v2262_v57 = vand.u32 2147483648, %v2164_v6  ;;  %v2260_v25 = vand.u32 2147483647, %v2164_v6  ;;  %vm2256_vm6 = vweird.f32 %v2164_v6 }
 0x453   : > { %v2263_v35 = vor.u32 1.1754944e-38, %v2262_v57  ;;  %vm2261_vm8 = vcmp.eq.f32.partialorder %v2260_v25, 8.507059e+37 }
 0x456   : > { %2901 = vrot.lane.b32.xlu2 %v10564_v24, %s13903_s10  ;;  %v10823_v39 = vpop.f32.mrf.mxu2 }
 0x457   : > { %v9288_v19 = vpop.eup %9287 }
 0x458   : > { %v2252_v48 = vmul.f32 %v9288_v19, %v2164_v6  ;;  %v2167_v28 = vpop.xlane.xlu0 %2166  ;;  %vm2257_vm5 = vweird.f32 %v9288_v19 }
 0x459   : > { %9289 = vrcp.f32 %v2167_v28  ;;  %2909 = vrot.lane.b32.xlu1 %v10694_v49, %s13903_s10  ;;  %v2227_v42 = vpop.f32.mrf.mxu1  ;;  %vm2258_vm7 = vmor %vm2256_vm6, %vm2257_vm5  ;;  %v2276_v10 = vand.u32 2147483648, %v2167_v28  ;;  %v2274_v31 = vand.u32 2147483647, %v2167_v28  ;;  %vm2270_vm10 = vweird.f32 %v2167_v28 }
 0x45a   : > { %v2253_v0 = vsub.f32 1.0, %v2252_v48 }
 0x45b   : > { %v2277_v2 = vor.u32 1.1754944e-38, %v2276_v10  ;;  %vm2275_vm12 = vcmp.eq.f32.partialorder %v2274_v31, 8.507059e+37 }
 0x45c   : > { %v2254_v29 = vmul.f32 %v9288_v19, %v2253_v0 }
 0x45e   : > { %v2255_v9 = vadd.f32 %v9288_v19, %v2254_v29  ;;  %3362 = vrot.lane.b32.xlu2 %v10571_v7, %s13901_s11  ;;  %v10833_v52 = vpop.f32.mrf.mxu2 }
 0x45f   : > { %v9290_v24 = vpop.eup %9289 }
 0x460   : > { %v2266_v34 = vmul.f32 %v9290_v24, %v2167_v28  ;;  %v2259_v53 = vsel %vm2258_vm7, %v9288_v19, %v2255_v9  ;;  %v2170_v59 = vpop.xlane.xlu2 %2169  ;;  %vm2271_vm9 = vweird.f32 %v9290_v24  ;;  %v2479_v9 = vsel %vm1192_vm1, %v10823_v39, -inf }
 0x461   : > { %v2264_v22 = vsel %vm2261_vm8, %v2263_v35, %v2259_v53  ;;  %9291 = vrcp.f32 %v2170_v59  ;;  %v2230_v11 = vpop.f32.mrf.mxu1  ;;  %vm2272_vm11 = vmor %vm2270_vm10, %vm2271_vm9  ;;  %v2290_v44 = vand.u32 2147483648, %v2170_v59  ;;  %v2288_v51 = vand.u32 2147483647, %v2170_v59 }
 0x462   : > { %v2267_v63 = vsub.f32 1.0, %v2266_v34  ;;  %v2363_v8 = vmul.f32 %v2264_v22, %v2227_v42  ;;  %vm2284_vm14 = vweird.f32 %v2170_v59  ;;  %v10880_v22 = vpack.i.bf16 %v10324_v18, %v10328_v23 }
 0x463   : > { %v2291_v61 = vor.u32 1.1754944e-38, %v2290_v44  ;;  %vm2289_vm2 = vcmp.eq.f32.partialorder %v2288_v51, 8.507059e+37 }
 0x464   : > { %v2268_v58 = vmul.f32 %v9290_v24, %v2267_v63  ;;  %8687 = vmatmul.msk.f32.vlgmr.msrb.gmra.mxu1 %vm1118_vm0, %v2363_v8 }
 0x466   : > { %v2269_v7 = vadd.f32 %v9290_v24, %v2268_v58  ;;  %2907 = vrot.lane.b32.xlu2 %v10645_v55, %s13903_s10  ;;  %v10844_v37 = vpop.f32.mrf.mxu2 }
 0x467   : > { %v9292_v56 = vpop.eup %9291  ;;  %v2485_v6 = vsel %vm1192_vm1, %v10844_v37, -inf }
 0x468   : > { %v2280_v32 = vmul.f32 %v9292_v56, %v2170_v59  ;;  %v2273_v50 = vsel %vm2272_vm11, %v9290_v24, %v2269_v7  ;;  %v3373_v17 = vpop.permute.xlu2 %3372  ;;  %v3371_v4 = vpop.permute.xlu1 %3370  ;;  %vm2285_vm13 = vweird.f32 %v9292_v56 }
 0x469   : > { %v2278_v40 = vsel %vm2275_vm12, %v2277_v2, %v2273_v50  ;;  %8733 = vmatpush.xpose.msk.msra.mxu1 %vm1118_vm0, %v3373_v17  ;;  %vm2286_vm15 = vmor %vm2284_vm14, %vm2285_vm13  ;;  %v2233_v60 = vpop.f32.mrf.mxu1 }
 0x46a   : > { %v2281_v41 = vsub.f32 1.0, %v2280_v32  ;;  %v2364_v46 = vmul.f32 %v2278_v40, %v2230_v11 }
 0x46b   : > { %v2912_v1 = vpop.permute.xlu0 %2911 }
 0x46c   : > { %v2282_v54 = vmul.f32 %v9292_v56, %v2281_v41  ;;  %8688 = vmatmul.msk.f32.gmra.mxu1 %vm1118_vm0, %v2364_v46  ;;  %8702 = vmatpush.xpose.msk.msrb.mxu2 %vm1118_vm0, %v2912_v1 }
 0x46d   : > { %8734 = vmatpush.xpose.msk.msra.mxu1 %vm1118_vm0, %v3371_v4 }
 0x46e   : > { %v2283_v38 = vadd.f32 %v9292_v56, %v2282_v54  ;;  %3368 = vrot.lane.b32.xlu2 %v10694_v49, %s13901_s11  ;;  %v2183_v49 = vsel %vm1192_vm1, %v10794_v43, 0.0  ;;  %v10848_v14 = vpop.f32.mrf.mxu2  ;;  %v10894_v54 = vpack.i.bf16 %v10315_v13, %v10320_v15 }
 0x46f   : > { %v2488_v27 = vsel %vm1192_vm1, %v10848_v14, -inf }
 0x470   : > { %v2287_v21 = vsel %vm2286_vm15, %v9292_v56, %v2283_v38 }
 0x471   : > { %v2292_v45 = vsel %vm2289_vm2, %v2291_v61, %v2287_v21 }
 0x472   : > { %v2365_v3 = vmul.f32 %v2292_v45, %v2233_v60 }
 0x474   : > { %8689 = vmatmul.msk.f32.gmra.mxu1 %vm1118_vm0, %v2365_v3 }
 0x476   : > { %9103 = vrot.lane.b32.xlu2 %v10838_v47, %s13910_s7  ;;  %v10852_v26 = vpop.f32.mrf.mxu2 }
 0x477   : > { %v2491_v58 = vsel %vm1192_vm1, %v10852_v26, -inf }
 0x479   : > { %2184 = vadd.xlane.f32.xlu0 %v2183_v49 }
 0x47e   : > { %v10860_v48 = vpop.f32.mrf.mxu2 }
 0x47f   : > { %v2494_v0 = vsel %vm1192_vm1, %v10860_v48, -inf }
 0x483   : > { %2477 = vmax.xlane.f32.xlu1 %v2476_v5 }
 0x48b   : > { %2486 = vmax.xlane.f32.xlu1 %v2485_v6 }
 0x48d   : > { %2905 = vrot.lane.b32.xlu0 %v10628_v62, %s13903_s10  ;;  %v10866_v62 = vpack.i.bf16 %v10338_v30, %v10342_v33 }
 0x493   : > { %v2176_v43 = vpop.xlane.xlu1 %2175  ;;  %2489 = vmax.xlane.f32.xlu1 %v2488_v27 }
 0x494   : > { %9293 = vrcp.f32 %v2176_v43  ;;  %v2318_v18 = vand.u32 2147483648, %v2176_v43  ;;  %vm2312_vm8 = vweird.f32 %v2176_v43  ;;  %v2316_v50 = vand.u32 2147483647, %v2176_v43 }
 0x495   : > { %3366 = vrot.lane.b32.xlu0 %v10645_v55, %s13901_s11 }
 0x496   : > { %v2173_v19 = vpop.xlane.xlu0 %2172  ;;  %v2319_v1 = vor.u32 1.1754944e-38, %v2318_v18  ;;  %vm2317_vm10 = vcmp.eq.f32.partialorder %v2316_v50, 8.507059e+37 }
 0x497   : > { %9295 = vrcp.f32 %v2173_v19  ;;  %v2302_v34 = vand.u32 2147483647, %v2173_v19  ;;  %v2304_v53 = vand.u32 2147483648, %v2173_v19  ;;  %vm2298_vm4 = vweird.f32 %v2173_v19 }
 0x499   : > { %vm2303_vm6 = vcmp.eq.f32.partialorder %v2302_v34, 8.507059e+37  ;;  %v2305_v10 = vor.u32 1.1754944e-38, %v2304_v53 }
 0x49a   : > { %v9294_v28 = vpop.eup %9293  ;;  %v2236_v24 = vpop.f32.mrf.mxu1 }
 0x49b   : > { %v2308_v57 = vmul.f32 %v9294_v28, %v2176_v43  ;;  %2495 = vmax.xlane.f32.xlu1 %v2494_v0  ;;  %vm2313_vm7 = vweird.f32 %v9294_v28 }
 0x49c   : > { %vm2314_vm9 = vmor %vm2312_vm8, %vm2313_vm7 }
 0x49d   : > { %v9296_v29 = vpop.eup %9295  ;;  %9098 = vrot.lane.b32.xlu0 %v10866_v62, %s13910_s7  ;;  %v2309_v25 = vsub.f32 1.0, %v2308_v57 }
 0x49e   : > { %v2294_v55 = vmul.f32 %v9296_v29, %v2173_v19  ;;  %v10870_v42 = vpop.xlane.xlu0 %2178  ;;  %vm2299_vm3 = vweird.f32 %v9296_v29 }
 0x49f   : > { %9297 = vrcp.f32 %v10870_v42  ;;  %2480 = vmax.xlane.f32.xlu2 %v2479_v9  ;;  %v2310_v59 = vmul.f32 %v9294_v28, %v2309_v25  ;;  %vm2300_vm5 = vmor %vm2298_vm4, %vm2299_vm3  ;;  %v2332_v60 = vand.u32 2147483648, %v10870_v42  ;;  %vm2326_vm12 = vweird.f32 %v10870_v42 }
 0x4a0   : > { %v2295_v35 = vsub.f32 1.0, %v2294_v55  ;;  %v2330_v13 = vand.u32 2147483647, %v10870_v42 }
 0x4a1   : > { %v10875_v30 = vpop.xlane.xlu2 %2181  ;;  %v2311_v56 = vadd.f32 %v9294_v28, %v2310_v59  ;;  %v2333_v27 = vor.u32 1.1754944e-38, %v2332_v60 }
 0x4a2   : > { %v2296_v33 = vmul.f32 %v9296_v29, %v2295_v35  ;;  %9299 = vrcp.f32 %v10875_v30  ;;  %v2239_v17 = vpop.f32.mrf.mxu1  ;;  %vm2331_vm14 = vcmp.eq.f32.partialorder %v2330_v13, 8.507059e+37  ;;  %v2346_v0 = vand.u32 2147483648, %v10875_v30 }
 0x4a3   : > { %v2315_v46 = vsel %vm2314_vm9, %v9294_v28, %v2311_v56  ;;  %vm2340_vm2 = vweird.f32 %v10875_v30 }
 0x4a4   : > { %v2297_v63 = vadd.f32 %v9296_v29, %v2296_v33  ;;  %v2320_v51 = vsel %vm2317_vm10, %v2319_v1, %v2315_v46  ;;  %v2482_v33 = vsel %vm1192_vm1, %v10833_v52, -inf }
 0x4a5   : > { %v9298_v8 = vpop.eup %9297  ;;  %9108 = vrot.lane.b32.xlu0 %v10880_v22, %s13910_s7  ;;  %v10890_v4 = vpop.f32.mrf.mxu2  ;;  %v2367_v45 = vmul.f32 %v2320_v51, %v2239_v17 }
 0x4a6   : > { %v2301_v31 = vsel %vm2300_vm5, %v9296_v29, %v2297_v63  ;;  %v2322_v7 = vmul.f32 %v9298_v8, %v10870_v42  ;;  %vm2327_vm11 = vweird.f32 %v9298_v8  ;;  %v2497_v21 = vsel %vm1192_vm1, %v10890_v4, -inf }
 0x4a7   : > { %v2306_v11 = vsel %vm2303_vm6, %v2305_v10, %v2301_v31  ;;  %2492 = vmax.xlane.f32.xlu2 %v2491_v58  ;;  %vm2328_vm13 = vmor %vm2326_vm12, %vm2327_vm11  ;;  %v2344_v29 = vand.u32 2147483647, %v10875_v30  ;;  %v2347_v42 = vor.u32 1.1754944e-38, %v2346_v0 }
 0x4a8   : > { %v9300_v23 = vpop.eup %9299  ;;  %v2366_v2 = vmul.f32 %v2306_v11, %v2236_v24  ;;  %v2323_v32 = vsub.f32 1.0, %v2322_v7 }
 0x4a9   : > { %v2896_v40 = vpop.permute.xlu2 %2895  ;;  %v2336_v41 = vmul.f32 %v9300_v23, %v10875_v30  ;;  %vm2341_vm15 = vweird.f32 %v9300_v23  ;;  %vm2345_vm4 = vcmp.eq.f32.partialorder %v2344_v29, 8.507059e+37 }
 0x4aa   : > { %v2324_v44 = vmul.f32 %v9298_v8, %v2323_v32  ;;  %8690 = vmatmul.msk.f32.gmra.mxu1 %vm1118_vm0, %v2366_v2  ;;  %8703 = vmatmul.msk.f32.vlgmr.msrb.gmra.mxu2 %vm1118_vm0, %v2896_v40  ;;  %v2242_v6 = vpop.f32.mrf.mxu1  ;;  %vm2342_vm3 = vmor %vm2340_vm2, %vm2341_vm15 }
 0x4ab   : > { %v2337_v38 = vsub.f32 1.0, %v2336_v41  ;;  %v2898_v15 = vpop.permute.xlu1 %2897 }
 0x4ac   : > { %v2325_v61 = vadd.f32 %v9298_v8, %v2324_v44 }
 0x4ad   : > { %9113 = vrot.lane.b32.xlu0 %v10894_v54, %s13910_s7  ;;  %v2338_v5 = vmul.f32 %v9300_v23, %v2337_v38 }
 0x4ae   : > { %v2329_v49 = vsel %vm2328_vm13, %v9298_v8, %v2325_v61 }
 0x4af   : > { %2498 = vmax.xlane.f32.xlu2 %v2497_v21  ;;  %v2334_v43 = vsel %vm2331_vm14, %v2333_v27, %v2329_v49  ;;  %v2339_v19 = vadd.f32 %v9300_v23, %v2338_v5 }
 0x4b0   : > { %v2368_v57 = vmul.f32 %v2334_v43, %v2242_v6 }
 0x4b1   : > { %v10903_v3 = vpop.permute.xlu0 %3354  ;;  %v10909_v28 = vpop.permute.xlu2 %3356  ;;  %v2343_v55 = vsel %vm2342_vm3, %v9300_v23, %v2339_v19 }
 0x4b2   : > { %8691 = vmatmul.msk.f32.gmra.mxu1 %vm1118_vm0, %v2367_v45  ;;  %8704 = vmatmul.msk.f32.gmra.mxu2 %vm1118_vm0, %v2898_v15  ;;  %v2245_v9 = vpop.f32.mrf.mxu1  ;;  %v2348_v24 = vsel %vm2345_vm4, %v2347_v42, %v2343_v55 }
 0x4b3   : > { %v3359_v35 = vpop.permute.xlu1 %3358  ;;  %v2369_v34 = vmul.f32 %v2348_v24, %v2245_v9 }
 0x4b4   : > { %9128 = vrot.lane.b32.xlu1 %v10838_v47, %s13901_s11 }
 0x4b9   : > { %v2900_v25 = vpop.permute.xlu0 %2899  ;;  %v2902_v53 = vpop.permute.xlu2 %2901 }
 0x4ba   : > { %8692 = vmatmul.msk.f32.gmra.mxu1 %vm1118_vm0, %v2368_v57  ;;  %8705 = vmatmul.msk.f32.gmra.mxu2 %vm1118_vm0, %v2900_v25  ;;  %v2248_v32 = vpop.f32.mrf.mxu1 }
 0x4bb   : > { %v2904_v30 = vpop.permute.xlu1 %2903 }
 0x4bc   : > { %9138 = vrot.lane.b32.xlu1 %v10880_v22, %s13901_s11 }
 0x4c1   : > { %v3361_v59 = vpop.permute.xlu0 %3360  ;;  %v10931_v63 = vpop.permute.xlu2 %3362 }
 0x4c2   : > { %8693 = vmatmul.msk.f32.gmra.mxu1 %vm1118_vm0, %v2369_v34  ;;  %8706 = vmatmul.msk.f32.gmra.mxu2 %vm1118_vm0, %v2902_v53 }
 0x4c3   : > { %v10933_v8 = vpop.permute.xlu1 %3364 }
 0x4c4   : > { %9143 = vrot.lane.b32.xlu1 %v10880_v22, %s13903_s10 }
 0x4c7   : > { %9123 = vrot.lane.b32.xlu2 %v10866_v62, %s13903_s10 }
 0x4c9   : > { %v2908_v31 = vpop.permute.xlu2 %2907 }
 0x4ca   : > { %8707 = vmatmul.msk.f32.gmra.mxu2 %vm1118_vm0, %v2904_v30 }
 0x4cf   : > { %9133 = vrot.lane.b32.xlu2 %v10838_v47, %s13903_s10  ;;  %v2910_v47 = vpop.permute.xlu1 %2909 }
 0x4d1   : > { %v10935_v41 = vpop.permute.xlu2 %3368 }
 0x4d7   : > { %2483 = vmax.xlane.f32.xlu0 %v2482_v33 }
 0x4d9   : > { %v9104_v1 = vpop.permute.xlu2 %9103 }
 0x4da   : > { %v9105_v45 = vunpack.i.l.bf16 %v9104_v1  ;;  %v9106_v15 = vunpack.i.h.bf16 %v9104_v1 }
 0x4eb   : > { %9118 = vrot.lane.b32.xlu0 %v10866_v62, %s13901_s11 }
 0x4ec   : > { %v2185_v22 = vpop.xlane.xlu0 %2184 }
 0x4ed   : > { %9301 = vrcp.f32 %v2185_v22  ;;  %v2360_v56 = vand.u32 2147483648, %v2185_v22  ;;  %v2358_v18 = vand.u32 2147483647, %v2185_v22  ;;  %vm2354_vm6 = vweird.f32 %v2185_v22 }
 0x4ef   : > { %v2361_v2 = vor.u32 1.1754944e-38, %v2360_v56  ;;  %vm2359_vm8 = vcmp.eq.f32.partialorder %v2358_v18, 8.507059e+37 }
 0x4f3   : > { %v9302_v10 = vpop.eup %9301 }
 0x4f4   : > { %v2350_v58 = vmul.f32 %v9302_v10, %v2185_v22  ;;  %vm2355_vm5 = vweird.f32 %v9302_v10 }
 0x4f5   : > { %vm2356_vm7 = vmor %vm2354_vm6, %vm2355_vm5 }
 0x4f6   : > { %v2351_v7 = vsub.f32 1.0, %v2350_v58  ;;  %v2478_v46 = vpop.xlane.xlu1 %2477 }
 0x4f8   : > { %v2352_v11 = vmul.f32 %v9302_v10, %v2351_v7 }
 0x4fa   : > { %v2353_v23 = vadd.f32 %v9302_v10, %v2352_v11 }
 0x4fc   : > { %v2357_v62 = vsel %vm2356_vm7, %v9302_v10, %v2353_v23 }
 0x4fd   : > { %v2362_v50 = vsel %vm2359_vm8, %v2361_v2, %v2357_v62 }
 0x4fe   : > { %v2370_v17 = vmul.f32 %v2362_v50, %v2248_v32  ;;  %v10942_v51 = vpop.xlane.xlu1 %2486 }
 0x4ff   : > { %v2906_v40 = vpop.permute.xlu0 %2905  ;;  %v2503_v18 = vsub.f32 %v10844_v37, %v10942_v51 }
 0x500   : > { %8694 = vmatmul.msk.f32.gmra.mxu1 %vm1118_vm0, %v2370_v17  ;;  %8708 = vmatmul.msk.f32.gmra.mxu2 %vm1118_vm0, %v2906_v40 }
 0x501   : > { %v2514_v23 = vmul.f32 1.442695, %v2503_v18 }
 0x506   : > { %v10947_v13 = vpop.xlane.xlu1 %2489 }
 0x507   : > { %v3367_v44 = vpop.permute.xlu0 %3366  ;;  %v2504_v62 = vsub.f32 %v10848_v14, %v10947_v13 }
 0x508   : > { %8709 = vmatmul.msk.f32.gmra.mxu2 %vm1118_vm0, %v2908_v31  ;;  %8735 = vmatmul.msk.f32.vlgmr.msra.gmra.mxu1 %vm1118_vm0, %v10903_v3  ;;  %v2500_v3 = vsub.f32 %v10818_v36, %v2478_v46  ;;  %v10976_v31 = vpop.f32.mrf.mxu1 }
 0x50a   : > { %v2508_v6 = vmul.f32 1.442695, %v2500_v3 }
 0x50c   : > { %9303 = vpow2.f32 %v2508_v6 }
 0x50e   : > { %v10953_v19 = vpop.xlane.xlu1 %2495 }
 0x50f   : > { %v9099_v38 = vpop.permute.xlu0 %9098 }
 0x510   : > { %v9100_v61 = vunpack.i.l.bf16 %v9099_v38  ;;  %8710 = vmatmul.msk.f32.gmra.mxu2 %vm1118_vm0, %v2910_v47  ;;  %8736 = vmatmul.msk.f32.gmra.mxu1 %vm1118_vm0, %v10909_v28  ;;  %v9101_v21 = vunpack.i.h.bf16 %v9099_v38 }
 0x512   : > { %v2481_v60 = vpop.xlane.xlu2 %2480  ;;  %2612 = vmatpush.msra.mxu3 %v9100_v61  ;;  %v10959_v55 = vpop.eup %9303 }
 0x513   : > { %v2501_v28 = vsub.f32 %v10823_v39, %v2481_v60 }
 0x514   : > { %2613 = vmatpush.msra.mxu3 %v9101_v21 }
 0x515   : > { %v2510_v36 = vmul.f32 1.442695, %v2501_v28 }
 0x516   : > { %2614 = vmatpush.msra.mxu3 %v9105_v45 }
 0x517   : > { %v9109_v49 = vpop.permute.xlu0 %9108  ;;  %9305 = vpow2.f32 %v2510_v36 }
 0x518   : > { %v9110_v5 = vunpack.i.l.bf16 %v9109_v49  ;;  %2615 = vmatpush.msra.mxu3 %v9106_v15  ;;  %8737 = vmatmul.msk.f32.gmra.mxu1 %vm1118_vm0, %v3359_v35  ;;  %v9111_v27 = vunpack.i.h.bf16 %v9109_v49 }
 0x51a   : > { %v10951_v43 = vpop.xlane.xlu2 %2492  ;;  %2616 = vmatpush.msra.mxu3 %v9110_v5 }
 0x51b   : > { %v2505_v37 = vsub.f32 %v10852_v26, %v10951_v43  ;;  %v2506_v26 = vsub.f32 %v10860_v48, %v10953_v19 }
 0x51c   : > { %2617 = vmatpush.msra.mxu3 %v9111_v27 }
 0x51d   : > { %v10965_v24 = vpop.eup %9305  ;;  %v2518_v1 = vmul.f32 1.442695, %v2505_v37  ;;  %v2520_v45 = vmul.f32 1.442695, %v2506_v26 }
 0x51f   : > { %v9114_v0 = vpop.permute.xlu0 %9113 }
 0x520   : > { %v9115_v57 = vunpack.i.l.bf16 %v9114_v0  ;;  %8738 = vmatmul.msk.f32.gmra.mxu1 %vm1118_vm0, %v3361_v59  ;;  %v9116_v29 = vunpack.i.h.bf16 %v9114_v0 }
 0x522   : > { %v10957_v25 = vpop.xlane.xlu2 %2498  ;;  %2618 = vmatpush.msra.mxu3 %v9115_v57 }
 0x523   : > { %v2507_v48 = vsub.f32 %v10890_v4, %v10957_v25 }
 0x524   : > { %2619 = vmatpush.msra.mxu3 %v9116_v29 }
 0x525   : > { %8671 = vmatmul.msk.f32.vlgmr.msra.gmra.mxu3 %vm1192_vm1, %v10959_v55  ;;  %v2522_v49 = vmul.f32 1.442695, %v2507_v48 }
 0x526   : > { %v9129_v42 = vpop.permute.xlu1 %9128 }
 0x527   : > { %v9130_v14 = vunpack.i.l.bf16 %v9129_v42  ;;  %v9131_v51 = vunpack.i.h.bf16 %v9129_v42 }
 0x528   : > { %8739 = vmatmul.msk.f32.gmra.mxu1 %vm1118_vm0, %v10931_v63 }
 0x52a   : > { %v9124_v39 = vpop.permute.xlu2 %9123 }
 0x52b   : > { %v9125_v9 = vunpack.i.l.bf16 %v9124_v39  ;;  %v9126_v34 = vunpack.i.h.bf16 %v9124_v39 }
 0x52d   : > { %8672 = vmatmul.msk.f32.gmra.mxu3 %vm1192_vm1, %v10965_v24  ;;  %v10969_v35 = vpop.f32.mrf.mxu2 }
 0x52e   : > { %3128 = vmatpush.msrb.mxu3 %v9125_v9  ;;  %v9139_v53 = vpop.permute.xlu1 %9138  ;;  %v3000_v30 = vsel %vm1192_vm1, %v10969_v35, -inf }
 0x52f   : > { %3001 = vmax.xlane.f32.xlu0 %v3000_v30  ;;  %v9140_v61 = vunpack.i.l.bf16 %v9139_v53  ;;  %v9141_v21 = vunpack.i.h.bf16 %v9139_v53 }
 0x530   : > { %3129 = vmatpush.msrb.mxu3 %v9126_v34  ;;  %8740 = vmatmul.msk.f32.gmra.mxu1 %vm1118_vm0, %v10933_v8  ;;  %v10982_v8 = vpop.f32.mrf.mxu1 }
 0x532   : > { %v9134_v33 = vpop.permute.xlu2 %9133 }
 0x533   : > { %v9135_v59 = vunpack.i.l.bf16 %v9134_v33  ;;  %v9136_v63 = vunpack.i.h.bf16 %v9134_v33 }
 0x535   : > { %3130 = vmatpush.msrb.mxu3 %v9135_v59 }
 0x536   : > { %v9144_v22 = vpop.permute.xlu1 %9143 }
 0x537   : > { %v9145_v10 = vunpack.i.l.bf16 %v9144_v22  ;;  %3131 = vmatpush.msrb.mxu3 %v9136_v63  ;;  %v9146_v58 = vunpack.i.h.bf16 %v9144_v22 }
 0x538   : > { %8741 = vmatmul.msk.f32.gmra.mxu1 %vm1118_vm0, %v3367_v44  ;;  %v10985_v11 = vpop.f32.mrf.mxu1 }
 0x539   : > { %3132 = vmatpush.msrb.mxu3 %v9145_v10 }
 0x53b   : > { %3133 = vmatpush.msrb.mxu3 %v9146_v58 }
 0x540   : > { %8742 = vmatmul.msk.f32.gmra.mxu1 %vm1118_vm0, %v10935_v41  ;;  %v10995_v32 = vpop.f32.mrf.mxu1  ;;  %v11003_v41 = vpop.f32.mrf.mxu2 }
 0x543   : > { %9153 = vrot.lane.b32.xlu0 %v10894_v54, %s13903_s10  ;;  %s14005_s10 = sld [smem:[#allocation16_spill]] }
 0x548   : > { %v11005_v44 = vpop.f32.mrf.mxu1  ;;  %v11013_v60 = vpop.f32.mrf.mxu2 }
 0x549   : > { %v3006_v15 = vsel %vm1192_vm1, %v11013_v60, -inf }
 0x54a   : > { %v2484_v7 = vpop.xlane.xlu0 %2483 }
 0x54b   : > { %v2502_v56 = vsub.f32 %v10833_v52, %v2484_v7  ;;  %v2516_v52 = vmul.f32 1.442695, %v2504_v62 }
 0x54d   : > { %v2512_v47 = vmul.f32 1.442695, %v2502_v56 }
 0x54f   : > { %9307 = vpow2.f32 %v2512_v47 }
 0x550   : > { %9309 = vpow2.f32 %v2514_v23  ;;  %v11015_v13 = vpop.f32.mrf.mxu1  ;;  %v11047_v42 = vpop.f32.mrf.mxu2 }
 0x551   : > { %9311 = vpow2.f32 %v2516_v52  ;;  %v3009_v9 = vsel %vm1192_vm1, %v11047_v42, -inf  ;;  %v2524_v52 = vsel %vm1192_vm1, %v10959_v55, 0.0 }
 0x552   : > { %9313 = vpow2.f32 %v2518_v1 }
 0x553   : > { %9315 = vpow2.f32 %v2520_v45 }
 0x554   : > { %9317 = vpow2.f32 %v2522_v49 }
 0x555   : > { %v10989_v2 = vpop.eup %9307 }
 0x556   : > { %8673 = vmatmul.msk.f32.gmra.mxu3 %vm1192_vm1, %v10989_v2  ;;  %v10997_v50 = vpop.eup %9309  ;;  %v2530_v26 = vsel %vm1192_vm1, %v10989_v2, 0.0 }
 0x557   : > { %v11007_v38 = vpop.eup %9311  ;;  %v2533_v37 = vsel %vm1192_vm1, %v10997_v50, 0.0 }
 0x558   : > { %v11019_v3 = vpop.eup %9313  ;;  %v11025_v6 = vpop.f32.mrf.mxu1 }
 0x559   : > { %v9316_v5 = vpop.eup %9315  ;;  %v11055_v34 = vpop.f32.mrf.mxu2 }
 0x55a   : > { %v9318_v27 = vpop.eup %9317  ;;  %v3012_v59 = vsel %vm1192_vm1, %v11055_v34, -inf }
 0x55d   : > { %v9119_v17 = vpop.permute.xlu0 %9118 }
 0x55e   : > { %v9120_v40 = vunpack.i.l.bf16 %v9119_v17  ;;  %8674 = vmatmul.msk.f32.gmra.mxu3 %vm1192_vm1, %v10997_v50  ;;  %v9121_v46 = vunpack.i.h.bf16 %v9119_v17  ;;  %v2527_v17 = vsel %vm1192_vm1, %v10965_v24, 0.0  ;;  %v2542_v24 = vsel %vm1192_vm1, %v9316_v5, 0.0 }
 0x560   : > { %3587 = vmatpush.msra.mxu2 %v9120_v40  ;;  %v3003_v40 = vsel %vm1192_vm1, %v11003_v41, -inf }
 0x562   : > { %3588 = vmatpush.msra.mxu2 %v9121_v46  ;;  %v2536_v46 = vsel %vm1192_vm1, %v11007_v38, 0.0 }
 0x564   : > { %3589 = vmatpush.msra.mxu2 %v9130_v14  ;;  %v2545_v14 = vsel %vm1192_vm1, %v9318_v27, 0.0 }
 0x566   : > { %8675 = vmatmul.msk.f32.gmra.mxu3 %vm1192_vm1, %v11007_v38  ;;  %3590 = vmatpush.msra.mxu2 %v9131_v51 }
 0x568   : > { %3591 = vmatpush.msra.mxu2 %v9140_v61 }
 0x56a   : > { %3592 = vmatpush.msra.mxu2 %v9141_v21  ;;  %v2539_v21 = vsel %vm1192_vm1, %v11019_v3, 0.0 }
 0x56d   : > { %3007 = vmax.xlane.f32.xlu0 %v3006_v15 }
 0x56e   : > { %8676 = vmatmul.msk.f32.gmra.mxu3 %vm1192_vm1, %v11019_v3 }
 0x576   : > { %8677 = vmatmul.msk.f32.gmra.mxu3 %vm1192_vm1, %v9316_v5 }
 0x57d   : > { %v11028_v43 = vpop.f32.mrf.mxu1 }
 0x57e   : > { %8678 = vmatmul.msk.f32.gmra.mxu3 %vm1192_vm1, %v9318_v27 }
 0x583   : > { %v11062_v22 = vpop.f32.mrf.mxu2 }
 0x584   : > { %v3015_v7 = vsel %vm1192_vm1, %v11062_v22, -inf }
 0x585   : > { %v11031_v19 = vpop.f32.mrf.mxu1 }
 0x586   : > { %v3459_v28 = vsel %vm1192_vm1, %v11031_v19, -inf }
 0x587   : > { %3460 = vmax.xlane.f32.xlu1 %v3459_v28 }
 0x58b   : > { %v11068_v47 = vpop.f32.mrf.mxu2 }
 0x58c   : > { %v3018_v23 = vsel %vm1192_vm1, %v11068_v47, -inf }
 0x58d   : > { %v11035_v0 = vpop.f32.mrf.mxu1 }
 0x58e   : > { %v3462_v4 = vsel %vm1192_vm1, %v11035_v0, -inf }
 0x58f   : > { %3463 = vmax.xlane.f32.xlu2 %v3462_v4 }
 0x593   : > { %v11096_v38 = vpop.f32.mrf.mxu2 }
 0x594   : > { %v3021_v61 = vsel %vm1192_vm1, %v11096_v38, -inf }
 0x595   : > { %v11039_v57 = vpop.f32.mrf.mxu1 }
 0x596   : > { %v3465_v36 = vsel %vm1192_vm1, %v11039_v57, -inf }
 0x597   : > { %3466 = vmax.xlane.f32.xlu2 %v3465_v36 }
 0x59d   : > { %v11043_v29 = vpop.f32.mrf.mxu1 }
 0x59e   : > { %v3468_v25 = vsel %vm1192_vm1, %v11043_v29, -inf }
 0x59f   : > { %3469 = vmax.xlane.f32.xlu2 %v3468_v25 }
 0x5a0   : > { %9148 = vrot.lane.b32.xlu1 %v10894_v54, %s13901_s11  ;;  %s14003_s11 = sld [smem:[#allocation15_spill]] }
 0x5a2   : > { %v3002_v53 = vpop.xlane.xlu0 %3001 }
 0x5a3   : > { %v3024_v30 = vsub.f32 %v10969_v35, %v3002_v53 }
 0x5a5   : > { %v11051_v39 = vpop.f32.mrf.mxu1  ;;  %v3032_v63 = vmul.f32 1.442695, %v3024_v30 }
 0x5a6   : > { %v3471_v55 = vsel %vm1192_vm1, %v11051_v39, -inf }
 0x5a7   : > { %3010 = vmax.xlane.f32.xlu2 %v3009_v9  ;;  %9319 = vpow2.f32 %v3032_v63 }
 0x5ad   : > { %v11058_v33 = vpop.f32.mrf.mxu1  ;;  %v9320_v35 = vpop.eup %9319 }
 0x5ae   : > { %v3474_v1 = vsel %vm1192_vm1, %v11058_v33, -inf  ;;  %v3048_v50 = vsel %vm1192_vm1, %v9320_v35, 0.0 }
 0x5af   : > { %3013 = vmax.xlane.f32.xlu2 %v3012_v59 }
 0x5b5   : > { %v9154_v54 = vpop.permute.xlu0 %9153  ;;  %v11064_v10 = vpop.f32.mrf.mxu1 }
 0x5b6   : > { %v9155_v58 = vunpack.i.l.bf16 %v9154_v54  ;;  %v9156_v56 = vunpack.i.h.bf16 %v9154_v54  ;;  %v3477_v51 = vsel %vm1192_vm1, %v11064_v10, -inf }
 0x5b7   : > { %3016 = vmax.xlane.f32.xlu2 %v3015_v7 }
 0x5b8   : > { %3134 = vmatpush.msrb.mxu3 %v9155_v58 }
 0x5ba   : > { %3135 = vmatpush.msrb.mxu3 %v9156_v56 }
 0x5bb   : > { %8711 = vmatmul.msk.f32.vlgmr.msrb.gmra.mxu3 %vm1192_vm1, %v9320_v35 }
 0x5bd   : > { %v11071_v18 = vpop.f32.mrf.mxu1 }
 0x5be   : > { %v3480_v62 = vsel %vm1192_vm1, %v11071_v18, -inf }
 0x5bf   : > { %3019 = vmax.xlane.f32.xlu2 %v3018_v23  ;;  %3481 = vmax.xlane.f32.xlu0 %v3480_v62 }
 0x5c7   : > { %2525 = vadd.xlane.f32.xlu2 %v2524_v52  ;;  %2528 = vadd.xlane.f32.xlu0 %v2527_v17 }
 0x5ca   : > { %3004 = vmax.xlane.f32.xlu1 %v3003_v40 }
 0x5cf   : > { %2534 = vadd.xlane.f32.xlu2 %v2533_v37  ;;  %2537 = vadd.xlane.f32.xlu0 %v2536_v46 }
 0x5d2   : > { %3472 = vmax.xlane.f32.xlu1 %v3471_v55  ;;  %v2020_v55 = vld [vmem:[%s13960_s15 + $0x18] sm:$0xff] }
 0x5d3   : > { %2803 = vmatpush.msrb.mxu0 %v2020_v55 }
 0x5d7   : > { %2543 = vadd.xlane.f32.xlu2 %v2542_v24  ;;  %2546 = vadd.xlane.f32.xlu0 %v2545_v14 }
 0x5da   : > { %3475 = vmax.xlane.f32.xlu1 %v3474_v1 }
 0x5df   : > { %3049 = vadd.xlane.f32.xlu2 %v3048_v50 }
 0x5e0   : > { %v3008_v5 = vpop.xlane.xlu0 %3007 }
 0x5e1   : > { %v3026_v36 = vsub.f32 %v11013_v60, %v3008_v5 }
 0x5e2   : > { %3478 = vmax.xlane.f32.xlu1 %v3477_v51 }
 0x5e3   : > { %v3036_v25 = vmul.f32 1.442695, %v3026_v36 }
 0x5ea   : > { %3022 = vmax.xlane.f32.xlu1 %v3021_v61 }
 0x5f2   : > { %2531 = vadd.xlane.f32.xlu1 %v2530_v26 }
 0x5fa   : > { %v3461_v45 = vpop.xlane.xlu1 %3460  ;;  %2540 = vadd.xlane.f32.xlu1 %v2539_v21 }
 0x5fb   : > { %v3483_v15 = vsub.f32 %v11031_v19, %v3461_v45 }
 0x5fd   : > { %v3491_v48 = vmul.f32 1.442695, %v3483_v15 }
 0x5ff   : > { %9321 = vpow2.f32 %v3491_v48 }
 0x602   : > { %v3464_v49 = vpop.xlane.xlu2 %3463 }
 0x603   : > { %v3484_v27 = vsub.f32 %v11035_v0, %v3464_v49 }
 0x605   : > { %v9322_v28 = vpop.eup %9321  ;;  %v3493_v4 = vmul.f32 1.442695, %v3484_v27 }
 0x606   : > { %v3507_v2 = vsel %vm1192_vm1, %v9322_v28, 0.0 }
 0x607   : > { %9323 = vpow2.f32 %v3493_v4  ;;  %3508 = vadd.xlane.f32.xlu1 %v3507_v2 }
 0x608   : > { %9325 = vpow2.f32 %v3036_v25 }
 0x60a   : > { %v3467_v3 = vpop.xlane.xlu2 %3466 }
 0x60b   : > { %v3485_v9 = vsub.f32 %v11039_v57, %v3467_v3 }
 0x60d   : > { %v9324_v53 = vpop.eup %9323  ;;  %v3495_v19 = vmul.f32 1.442695, %v3485_v9 }
 0x60e   : > { %v3510_v30 = vsel %vm1192_vm1, %v9324_v53, 0.0  ;;  %v11110_v54 = vpop.eup %9325 }
 0x60f   : > { %9327 = vpow2.f32 %v3495_v19  ;;  %3511 = vadd.xlane.f32.xlu0 %v3510_v30  ;;  %v3054_v57 = vsel %vm1192_vm1, %v11110_v54, 0.0  ;;  %v2621_v19 = vpop.f32.mrf.mxu3 }
 0x612   : > { %v9149_v0 = vpop.permute.xlu1 %9148  ;;  %v3470_v59 = vpop.xlane.xlu2 %3469 }
 0x613   : > { %v9150_v63 = vunpack.i.l.bf16 %v9149_v0  ;;  %v9151_v58 = vunpack.i.h.bf16 %v9149_v0  ;;  %v3486_v62 = vsub.f32 %v11043_v29, %v3470_v59 }
 0x615   : > { %v9328_v60 = vpop.eup %9327  ;;  %3593 = vmatpush.msra.mxu2 %v9150_v63  ;;  %v3497_v40 = vmul.f32 1.442695, %v3486_v62 }
 0x616   : > { %v3513_v7 = vsel %vm1192_vm1, %v9328_v60, 0.0 }
 0x617   : > { %3594 = vmatpush.msra.mxu2 %v9151_v58  ;;  %3514 = vadd.xlane.f32.xlu2 %v3513_v7 }
 0x618   : > { %3055 = vadd.xlane.f32.xlu0 %v3054_v57  ;;  %8743 = vmatmul.msk.f32.vlgmr.msra.gmra.mxu2 %vm1192_vm1, %v9322_v28 }
 0x61a   : > { %v3011_v56 = vpop.xlane.xlu2 %3010 }
 0x61b   : > { %v3027_v35 = vsub.f32 %v11047_v42, %v3011_v56  ;;  %v2019_v42 = vld [vmem:[%s13960_s15 + $0x10] sm:$0xff] }
 0x61c   : > { %2804 = vmatpush.msrb.mxu0 %v2019_v42 }
 0x61d   : > { %v3038_v23 = vmul.f32 1.442695, %v3027_v35 }
 0x61f   : > { %9329 = vpow2.f32 %v3038_v23 }
 0x620   : > { %8744 = vmatmul.msk.f32.gmra.mxu2 %vm1192_vm1, %v9324_v53  ;;  %9331 = vpow2.f32 %v3497_v40 }
 0x622   : > { %v3014_v52 = vpop.xlane.xlu2 %3013 }
 0x623   : > { %v3028_v9 = vsub.f32 %v11055_v34, %v3014_v52 }
 0x625   : > { %v11119_v17 = vpop.eup %9329  ;;  %v3040_v58 = vmul.f32 1.442695, %v3028_v9 }
 0x626   : > { %v3057_v37 = vsel %vm1192_vm1, %v11119_v17, 0.0  ;;  %v9332_v24 = vpop.eup %9331 }
 0x627   : > { %3058 = vadd.xlane.f32.xlu2 %v3057_v37  ;;  %v3516_v40 = vsel %vm1192_vm1, %v9332_v24, 0.0 }
 0x628   : > { %8745 = vmatmul.msk.f32.gmra.mxu2 %vm1192_vm1, %v9328_v60 }
 0x62a   : > { %v3017_v46 = vpop.xlane.xlu2 %3016 }
 0x62b   : > { %v3029_v30 = vsub.f32 %v11062_v22, %v3017_v46 }
 0x62d   : > { %v3042_v56 = vmul.f32 1.442695, %v3029_v30 }
 0x630   : > { %8746 = vmatmul.msk.f32.gmra.mxu2 %vm1192_vm1, %v9332_v24  ;;  %v2624_v24 = vpop.f32.mrf.mxu3 }
 0x632   : > { %v11127_v29 = vpop.xlane.xlu2 %3019  ;;  %v11129_v14 = vpop.xlane.xlu0 %3481 }
 0x633   : > { %v3030_v46 = vsub.f32 %v11068_v47, %v11127_v29  ;;  %v3490_v42 = vsub.f32 %v11071_v18, %v11129_v14 }
 0x635   : > { %v3505_v29 = vmul.f32 1.442695, %v3490_v42 }
 0x638   : > { %v2627_v30 = vpop.f32.mrf.mxu3 }
 0x63a   : > { %v2526_v1 = vpop.xlane.xlu2 %2525  ;;  %v2529_v50 = vpop.xlane.xlu0 %2528 }
 0x63b   : > { %9333 = vrcp.f32 %v2526_v1  ;;  %v2654_v5 = vand.u32 2147483647, %v2526_v1  ;;  %v2656_v27 = vand.u32 2147483648, %v2526_v1  ;;  %vm2650_vm10 = vweird.f32 %v2526_v1 }
 0x63c   : > { %9335 = vrcp.f32 %v2529_v50  ;;  %v2670_v34 = vand.u32 2147483648, %v2529_v50  ;;  %vm2664_vm14 = vweird.f32 %v2529_v50  ;;  %v2668_v57 = vand.u32 2147483647, %v2529_v50 }
 0x63d   : > { %v3005_v51 = vpop.xlane.xlu1 %3004  ;;  %vm2655_vm12 = vcmp.eq.f32.partialorder %v2654_v5, 8.507059e+37  ;;  %v2657_v0 = vor.u32 1.1754944e-38, %v2656_v27 }
 0x63e   : > { %v3025_v61 = vsub.f32 %v11003_v41, %v3005_v51  ;;  %v2671_v52 = vor.u32 1.1754944e-38, %v2670_v34  ;;  %vm2669_vm2 = vcmp.eq.f32.partialorder %v2668_v57, 8.507059e+37 }
 0x640   : > { %v3034_v26 = vmul.f32 1.442695, %v3025_v61 }
 0x641   : > { %v9334_v21 = vpop.eup %9333 }
 0x642   : > { %v9336_v45 = vpop.eup %9335  ;;  %v2646_v15 = vmul.f32 %v9334_v21, %v2526_v1  ;;  %9337 = vpow2.f32 %v3034_v26  ;;  %vm2651_vm9 = vweird.f32 %v9334_v21 }
 0x643   : > { %v2660_v48 = vmul.f32 %v9336_v45, %v2529_v50  ;;  %vm2652_vm11 = vmor %vm2650_vm10, %vm2651_vm9  ;;  %vm2665_vm13 = vweird.f32 %v9336_v45  ;;  %v3044_v50 = vmul.f32 1.442695, %v3030_v46  ;;  %v2630_v46 = vpop.f32.mrf.mxu3 }
 0x644   : > { %v2647_v49 = vsub.f32 1.0, %v2646_v15  ;;  %vm11137_vm15 = vmor %vm2664_vm14, %vm2665_vm13  ;;  %v11162_v15 = vpop.xlane.xlu2 %2534 }
 0x645   : > { %v2661_v28 = vsub.f32 1.0, %v2660_v48  ;;  %v3473_v4 = vpop.xlane.xlu1 %3472  ;;  %vm2692_vm8 = vweird.f32 %v11162_v15 }
 0x646   : > { %v2648_v36 = vmul.f32 %v9334_v21, %v2647_v49  ;;  %v3487_v2 = vsub.f32 %v11051_v39, %v3473_v4 }
 0x647   : > { %v2662_v25 = vmul.f32 %v9336_v45, %v2661_v28 }
 0x648   : > { %v9338_v3 = vpop.eup %9337  ;;  %v2649_v41 = vadd.f32 %v9334_v21, %v2648_v36  ;;  %v3499_v53 = vmul.f32 1.442695, %v3487_v2 }
 0x649   : > { %8712 = vmatmul.msk.f32.gmra.mxu3 %vm1192_vm1, %v9338_v3  ;;  %v3051_v59 = vsel %vm1192_vm1, %v9338_v3, 0.0  ;;  %v2663_v39 = vadd.f32 %v9336_v45, %v2662_v25 }
 0x64a   : > { %v2653_v63 = vsel %vm2652_vm11, %v9334_v21, %v2649_v41  ;;  %9339 = vpow2.f32 %v3499_v53  ;;  %3052 = vadd.xlane.f32.xlu1 %v3051_v59 }
 0x64b   : > { %v2658_v60 = vsel %vm2655_vm12, %v2657_v0, %v2653_v63  ;;  %v2667_v62 = vsel %vm11137_vm15, %v9336_v45, %v2663_v39  ;;  %9341 = vpow2.f32 %v3040_v58 }
 0x64c   : > { %v2757_v7 = vmul.f32 %v2658_v60, %v2621_v19  ;;  %9343 = vpow2.f32 %v3042_v56  ;;  %v2672_v1 = vsel %vm2669_vm2, %v2671_v52, %v2667_v62 }
 0x64d   : > { %v3476_v35 = vpop.xlane.xlu1 %3475  ;;  %v2758_v47 = vmul.f32 %v2672_v1, %v2624_v24  ;;  %v2696_v1 = vand.u32 2147483647, %v11162_v15 }
 0x64e   : > { %v3488_v23 = vsub.f32 %v11058_v33, %v3476_v35  ;;  %8679 = vmatmul.msk.f32.vlgmr.msrb.gmra.mxu0 %vm1118_vm0, %v2757_v7  ;;  %v11186_v35 = vpop.xlane.xlu2 %2543 }
 0x64f   : > { %vm2697_vm10 = vcmp.eq.f32.partialorder %v2696_v1, 8.507059e+37 }
 0x650   : > { %v9340_v37 = vpop.eup %9339  ;;  %v3501_v55 = vmul.f32 1.442695, %v3488_v23 }
 0x651   : > { %8713 = vmatmul.msk.f32.gmra.mxu3 %vm1192_vm1, %v11110_v54  ;;  %8747 = vmatmul.msk.f32.gmra.mxu2 %vm1192_vm1, %v9340_v37  ;;  %v3519_v33 = vsel %vm1192_vm1, %v9340_v37, 0.0  ;;  %v9342_v61 = vpop.eup %9341 }
 0x652   : > { %9345 = vpow2.f32 %v3501_v55  ;;  %3517 = vadd.xlane.f32.xlu1 %v3516_v40  ;;  %3520 = vadd.xlane.f32.xlu0 %v3519_v33  ;;  %v9344_v18 = vpop.eup %9343  ;;  %v3060_v45 = vsel %vm1192_vm1, %v9342_v61, 0.0  ;;  %v2698_v55 = vand.u32 2147483648, %v11162_v15 }
 0x653   : > { %9347 = vpow2.f32 %v3044_v50 }
 0x654   : > { %9349 = vpow2.f32 %v3505_v29  ;;  %v2699_v29 = vor.u32 1.1754944e-38, %v2698_v55 }
 0x655   : > { %v3479_v51 = vpop.xlane.xlu1 %3478 }
 0x656   : > { %v3489_v26 = vsub.f32 %v11064_v10, %v3479_v51  ;;  %8680 = vmatmul.msk.f32.gmra.mxu0 %vm1118_vm0, %v2758_v47  ;;  %v3063_v10 = vsel %vm1192_vm1, %v9344_v18, 0.0 }
 0x658   : > { %v9346_v54 = vpop.eup %9345  ;;  %v3503_v14 = vmul.f32 1.442695, %v3489_v26 }
 0x659   : > { %8714 = vmatmul.msk.f32.gmra.mxu3 %vm1192_vm1, %v11119_v17  ;;  %8748 = vmatmul.msk.f32.gmra.mxu2 %vm1192_vm1, %v9346_v54  ;;  %v3522_v21 = vsel %vm1192_vm1, %v9346_v54, 0.0  ;;  %v9348_v49 = vpop.eup %9347 }
 0x65a   : > { %9351 = vpow2.f32 %v3503_v14  ;;  %3523 = vadd.xlane.f32.xlu2 %v3522_v21  ;;  %3061 = vadd.xlane.f32.xlu1 %v3060_v45  ;;  %v9350_v27 = vpop.eup %9349  ;;  %v3066_v4 = vsel %vm1192_vm1, %v9348_v49, 0.0  ;;  %v2024_v45 = vld [vmem:[%s13960_s15 + $0x38] sm:$0xff] }
 0x65b   : > { %3064 = vadd.xlane.f32.xlu0 %v3063_v10  ;;  %9353 = vrcp.f32 %v11162_v15  ;;  %v3528_v2 = vsel %vm1192_vm1, %v9350_v27, 0.0  ;;  %3778 = vmatpush.msra.mxu3 %v2024_v45 }
 0x65d   : > { %v3023_v48 = vpop.xlane.xlu1 %3022 }
 0x65e   : > { %v3031_v5 = vsub.f32 %v11096_v38, %v3023_v48  ;;  %v11171_v38 = vpop.xlane.xlu0 %2537  ;;  %v2633_v48 = vpop.f32.mrf.mxu3 }
 0x65f   : > { %v2712_v21 = vand.u32 2147483648, %v11171_v38  ;;  %vm2706_vm12 = vweird.f32 %v11171_v38 }
 0x660   : > { %v9352_v17 = vpop.eup %9351  ;;  %v3046_v28 = vmul.f32 1.442695, %v3031_v5  ;;  %v2023_v5 = vld [vmem:[%s13960_s15 + $0x30] sm:$0xff] }
 0x661   : > { %8715 = vmatmul.msk.f32.gmra.mxu3 %vm1192_vm1, %v9342_v61  ;;  %8749 = vmatmul.msk.f32.gmra.mxu2 %vm1192_vm1, %v9352_v17  ;;  %v3525_v36 = vsel %vm1192_vm1, %v9352_v17, 0.0  ;;  %v9354_v3 = vpop.eup %9353 }
 0x662   : > { %9355 = vpow2.f32 %v3046_v28  ;;  %3067 = vadd.xlane.f32.xlu2 %v3066_v4  ;;  %3526 = vadd.xlane.f32.xlu1 %v3525_v36  ;;  %v2688_v41 = vmul.f32 %v9354_v3, %v11162_v15  ;;  %vm2693_vm5 = vweird.f32 %v9354_v3  ;;  %v2710_v15 = vand.u32 2147483647, %v11171_v38 }
 0x663   : > { %3529 = vadd.xlane.f32.xlu0 %v3528_v2  ;;  %vm2694_vm9 = vmor %vm2692_vm8, %vm2693_vm5  ;;  %3779 = vmatpush.msra.mxu3 %v2023_v5  ;;  %v2713_v28 = vor.u32 1.1754944e-38, %v2712_v21  ;;  %v11222_v2 = vpop.xlane.xlu2 %3049 }
 0x664   : > { %v2689_v59 = vsub.f32 1.0, %v2688_v41  ;;  %vm2711_vm14 = vcmp.eq.f32.partialorder %v2710_v15, 8.507059e+37 }
 0x665   : > { %v2532_v25 = vpop.xlane.xlu1 %2531 }
 0x666   : > { %9357 = vrcp.f32 %v2532_v25  ;;  %v2684_v58 = vand.u32 2147483648, %v2532_v25  ;;  %v2690_v7 = vmul.f32 %v9354_v3, %v2689_v59  ;;  %v2682_v56 = vand.u32 2147483647, %v2532_v25  ;;  %v11200_v51 = vpop.xlane.xlu0 %2546 }
 0x667   : > { %9359 = vrcp.f32 %v11171_v38  ;;  %vm2678_vm4 = vweird.f32 %v2532_v25 }
 0x668   : > { %v9356_v9 = vpop.eup %9355  ;;  %v2685_v23 = vor.u32 1.1754944e-38, %v2684_v58  ;;  %vm2683_vm7 = vcmp.eq.f32.partialorder %v2682_v56, 8.507059e+37  ;;  %v2691_v40 = vadd.f32 %v9354_v3, %v2690_v7  ;;  %v2636_v58 = vpop.f32.mrf.mxu3 }
 0x669   : > { %8716 = vmatmul.msk.f32.gmra.mxu3 %vm1192_vm1, %v9344_v18  ;;  %8750 = vmatmul.msk.f32.gmra.mxu2 %vm1192_vm1, %v9350_v27  ;;  %v3069_v53 = vsel %vm1192_vm1, %v9356_v9, 0.0 }
 0x66a   : > { %3070 = vadd.xlane.f32.xlu1 %v3069_v53  ;;  %v2695_v47 = vsel %vm2694_vm9, %v9354_v3, %v2691_v40  ;;  %v2022_v3 = vld [vmem:[%s13960_s15 + $0x28] sm:$0xff] }
 0x66b   : > { %v2700_v26 = vsel %vm2697_vm10, %v2699_v29, %v2695_v47  ;;  %3319 = vmatpush.msra.mxu0 %v2022_v3 }
 0x66c   : > { %v9358_v19 = vpop.eup %9357  ;;  %v2760_v10 = vmul.f32 %v2700_v26, %v2630_v46 }
 0x66d   : > { %v11178_v0 = vpop.eup %9359  ;;  %v2674_v63 = vmul.f32 %v9358_v19, %v2532_v25  ;;  %v11180_v39 = vpop.xlane.xlu1 %2540  ;;  %vm2679_vm3 = vweird.f32 %v9358_v19 }
 0x66e   : > { %v2702_v34 = vmul.f32 %v11178_v0, %v11171_v38  ;;  %9361 = vrcp.f32 %v11180_v39  ;;  %vm2680_vm6 = vmor %vm2678_vm4, %vm2679_vm3  ;;  %vm2707_vm11 = vweird.f32 %v11178_v0  ;;  %v2726_v53 = vand.u32 2147483648, %v11180_v39 }
 0x66f   : > { %v2675_v60 = vsub.f32 1.0, %v2674_v63  ;;  %9363 = vrcp.f32 %v11186_v35  ;;  %vm2708_vm13 = vmor %vm2706_vm12, %vm2707_vm11  ;;  %vm2720_vm2 = vweird.f32 %v11180_v39  ;;  %vm2748_vm11 = vweird.f32 %v11200_v51 }
 0x670   : > { %v2703_v62 = vsub.f32 1.0, %v2702_v34  ;;  %9365 = vrcp.f32 %v11200_v51  ;;  %v2727_v7 = vor.u32 1.1754944e-38, %v2726_v53  ;;  %v2639_v47 = vpop.f32.mrf.mxu3 }
 0x671   : > { %v2676_v57 = vmul.f32 %v9358_v19, %v2675_v60  ;;  %8717 = vmatmul.msk.f32.gmra.mxu3 %vm1192_vm1, %v9348_v49 }
 0x672   : > { %v2704_v24 = vmul.f32 %v11178_v0, %v2703_v62 }
 0x673   : > { %v2677_v22 = vadd.f32 %v9358_v19, %v2676_v57 }
 0x674   : > { %v11188_v37 = vpop.eup %9361  ;;  %v2705_v14 = vadd.f32 %v11178_v0, %v2704_v24 }
 0x675   : > { %v2681_v52 = vsel %vm2680_vm6, %v9358_v19, %v2677_v22  ;;  %v2716_v50 = vmul.f32 %v11188_v37, %v11180_v39  ;;  %v11204_v18 = vpop.eup %9363  ;;  %vm2721_vm15 = vweird.f32 %v11188_v37  ;;  %v2021_v19 = vld [vmem:[%s13960_s15 + $0x20] sm:$0xff]  ;;  %vm2734_vm6 = vweird.f32 %v11186_v35 }
 0x676   : > { %v2686_v42 = vsel %vm2683_vm7, %v2685_v23, %v2681_v52  ;;  %v2730_v49 = vmul.f32 %v11204_v18, %v11186_v35  ;;  %v2709_v17 = vsel %vm2708_vm13, %v11178_v0, %v2705_v14  ;;  %v11220_v4 = vpop.eup %9365  ;;  %v2724_v0 = vand.u32 2147483647, %v11180_v39  ;;  %3320 = vmatpush.msra.mxu0 %v2021_v19  ;;  %vm2722_vm3 = vmor %vm2720_vm2, %vm2721_vm15 }
 0x677   : > { %v2759_v33 = vmul.f32 %v2686_v42, %v2627_v30  ;;  %v2717_v54 = vsub.f32 1.0, %v2716_v50  ;;  %v2714_v25 = vsel %vm2711_vm14, %v2713_v28, %v2709_v17  ;;  %v2744_v63 = vmul.f32 %v11220_v4, %v11200_v51 }
 0x678   : > { %v2731_v36 = vsub.f32 1.0, %v2730_v49  ;;  %v2761_v30 = vmul.f32 %v2714_v25, %v2633_v48  ;;  %vm2735_vm4 = vweird.f32 %v11204_v18  ;;  %vm2725_vm5 = vcmp.eq.f32.partialorder %v2724_v0, 8.507059e+37  ;;  %v2642_v0 = vpop.f32.mrf.mxu3 }
 0x679   : > { %8681 = vmatmul.msk.f32.gmra.mxu0 %vm1118_vm0, %v2759_v33  ;;  %8718 = vmatmul.msk.f32.gmra.mxu3 %vm1192_vm1, %v9356_v9  ;;  %v2718_v27 = vmul.f32 %v11188_v37, %v2717_v54  ;;  %v2745_v39 = vsub.f32 1.0, %v2744_v63  ;;  %v2740_v52 = vand.u32 2147483648, %v11186_v35  ;;  %vm2736_vm7 = vmor %vm2734_vm6, %vm2735_vm4  ;;  %vm2749_vm9 = vweird.f32 %v11220_v4 }
 0x67a   : > { %v11202_v61 = vpop.xlane.xlu1 %3508  ;;  %v2732_v59 = vmul.f32 %v11204_v18, %v2731_v36  ;;  %v2754_v14 = vand.u32 2147483648, %v11200_v51  ;;  %vm11273_vm12 = vmor %vm2748_vm11, %vm2749_vm9  ;;  %v2752_v48 = vand.u32 2147483647, %v11200_v51  ;;  %vm3166_vm6 = vweird.f32 %v11222_v2 }
 0x67b   : > { %9367 = vrcp.f32 %v11202_v61  ;;  %v2719_v41 = vadd.f32 %v11188_v37, %v2718_v27  ;;  %v2746_v55 = vmul.f32 %v11220_v4, %v2745_v39  ;;  %v2741_v24 = vor.u32 1.1754944e-38, %v2740_v52 }
 0x67c   : > { %v2733_v23 = vadd.f32 %v11204_v18, %v2732_v59  ;;  %v3631_v45 = vand.u32 2147483648, %v11202_v61  ;;  %vm3625_vm13 = vweird.f32 %v11202_v61  ;;  %v3629_v15 = vand.u32 2147483647, %v11202_v61 }
 0x67d   : > { %v2723_v34 = vsel %vm2722_vm3, %v11188_v37, %v2719_v41  ;;  %v2738_v37 = vand.u32 2147483647, %v11186_v35  ;;  %v2755_v36 = vor.u32 1.1754944e-38, %v2754_v14  ;;  %vm2753_vm2 = vcmp.eq.f32.partialorder %v2752_v48, 8.507059e+37 }
 0x67e   : > { %v2728_v22 = vsel %vm2725_vm5, %v2727_v7, %v2723_v34  ;;  %v2737_v33 = vsel %vm2736_vm7, %v11204_v18, %v2733_v23  ;;  %v2747_v18 = vadd.f32 %v11220_v4, %v2746_v55  ;;  %vm3630_vm15 = vcmp.eq.f32.partialorder %v3629_v15, 8.507059e+37 }
 0x67f   : > { %v2762_v46 = vmul.f32 %v2728_v22, %v2636_v58  ;;  %vm2739_vm8 = vcmp.eq.f32.partialorder %v2738_v37, 8.507059e+37  ;;  %v3172_v59 = vand.u32 2147483648, %v11222_v2 }
 0x680   : > { %v2742_v35 = vsel %vm2739_vm8, %v2741_v24, %v2737_v33  ;;  %v2751_v17 = vsel %vm11273_vm12, %v11220_v4, %v2747_v18 }
 0x681   : > { %8682 = vmatmul.msk.f32.gmra.mxu0 %vm1118_vm0, %v2760_v10  ;;  %v11227_v9 = vpop.eup %9367  ;;  %v2763_v49 = vmul.f32 %v2742_v35, %v2639_v47  ;;  %v2756_v41 = vsel %vm2753_vm2, %v2755_v36, %v2751_v17  ;;  %v3173_v22 = vor.u32 1.1754944e-38, %v3172_v59 }
 0x682   : > { %v11224_v38 = vpop.xlane.xlu0 %3511  ;;  %v3621_v60 = vmul.f32 %v11227_v9, %v11202_v61  ;;  %vm3626_vm10 = vweird.f32 %v11227_v9  ;;  %v3632_v61 = vor.u32 1.1754944e-38, %v3631_v45  ;;  %v2764_v34 = vmul.f32 %v2756_v41, %v2642_v0 }
 0x683   : > { %9369 = vrcp.f32 %v11224_v38  ;;  %vm3627_vm14 = vmor %vm3625_vm13, %vm3626_vm10  ;;  %vm3639_vm5 = vweird.f32 %v11224_v38  ;;  %v3643_v63 = vand.u32 2147483647, %v11224_v38 }
 0x684   : > { %9371 = vrcp.f32 %v11222_v2  ;;  %v3622_v57 = vsub.f32 1.0, %v3621_v60  ;;  %v3170_v60 = vand.u32 2147483647, %v11222_v2 }
 0x685   : > { %vm3644_vm9 = vcmp.eq.f32.partialorder %v3643_v63, 8.507059e+37 }
 0x686   : > { %v3623_v1 = vmul.f32 %v11227_v9, %v3622_v57  ;;  %vm3171_vm10 = vcmp.eq.f32.partialorder %v3170_v60, 8.507059e+37 }
 0x688   : > { %v3624_v26 = vadd.f32 %v11227_v9, %v3623_v1 }
 0x689   : > { %8683 = vmatmul.msk.f32.gmra.mxu0 %vm1118_vm0, %v2761_v30  ;;  %v11248_v62 = vpop.eup %9369  ;;  %v3645_v30 = vand.u32 2147483648, %v11224_v38 }
 0x68a   : > { %v11245_v56 = vpop.xlane.xlu2 %3514  ;;  %v11251_v40 = vpop.eup %9371  ;;  %v3635_v42 = vmul.f32 %v11248_v62, %v11224_v38  ;;  %v3628_v27 = vsel %vm3627_vm14, %v11227_v9, %v3624_v26  ;;  %vm3640_vm3 = vweird.f32 %v11248_v62 }
 0x68b   : > { %9373 = vrcp.f32 %v11245_v56  ;;  %v3162_v50 = vmul.f32 %v11251_v40, %v11222_v2  ;;  %v3633_v3 = vsel %vm3630_vm15, %v3632_v61, %v3628_v27  ;;  %vm3167_vm4 = vweird.f32 %v11251_v40  ;;  %vm3641_vm7 = vmor %vm3639_vm5, %vm3640_vm3  ;;  %v3056_v35 = vpop.xlane.xlu0 %3055 }
 0x68c   : > { %v3636_v29 = vsub.f32 1.0, %v3635_v42  ;;  %vm3168_vm8 = vmor %vm3166_vm6, %vm3167_vm4  ;;  %v3646_v57 = vor.u32 1.1754944e-38, %v3645_v30  ;;  %vm3653_vm12 = vweird.f32 %v11245_v56  ;;  %9375 = vrcp.f32 %v3056_v35 }
 0x68d   : > { %v3163_v21 = vsub.f32 1.0, %v3162_v50  ;;  %vm3194_vm3 = vweird.f32 %v3056_v35  ;;  %v3198_v60 = vand.u32 2147483647, %v3056_v35 }
 0x68e   : > { %v3637_v28 = vmul.f32 %v11248_v62, %v3636_v29 }
 0x68f   : > { %v3164_v25 = vmul.f32 %v11251_v40, %v3163_v21 }
 0x690   : > { %v3638_v9 = vadd.f32 %v11248_v62, %v3637_v28 }
 0x691   : > { %8684 = vmatmul.msk.f32.gmra.mxu0 %vm1118_vm0, %v2762_v46  ;;  %v11268_v54 = vpop.eup %9373  ;;  %v3165_v4 = vadd.f32 %v11251_v40, %v3164_v25  ;;  %v3137_v46 = vpop.f32.mrf.mxu3 }
 0x692   : > { %v3649_v5 = vmul.f32 %v11268_v54, %v11245_v56  ;;  %v3642_v58 = vsel %vm3641_vm7, %v11248_v62, %v3638_v9  ;;  %vm3654_vm11 = vweird.f32 %v11268_v54  ;;  %v3659_v62 = vand.u32 2147483648, %v11245_v56  ;;  %v11313_v47 = vpop.eup %9375 }
 0x693   : > { %v3169_v39 = vsel %vm3168_vm8, %v11251_v40, %v3165_v4  ;;  %v3647_v23 = vsel %vm3644_vm9, %v3646_v57, %v3642_v58  ;;  %v3657_v40 = vand.u32 2147483647, %v11245_v56  ;;  %vm3655_vm13 = vmor %vm3653_vm12, %vm3654_vm11  ;;  %v3190_v26 = vmul.f32 %v11313_v47, %v3056_v35 }
 0x694   : > { %v3650_v53 = vsub.f32 1.0, %v3649_v5  ;;  %v3174_v52 = vsel %vm3171_vm10, %v3173_v22, %v3169_v39  ;;  %v3660_v33 = vor.u32 1.1754944e-38, %v3659_v62  ;;  %vm3195_vm5 = vweird.f32 %v11313_v47 }
 0x695   : > { %v3273_v55 = vmul.f32 %v3174_v52, %v3137_v46  ;;  %vm3658_vm14 = vcmp.eq.f32.partialorder %v3657_v40, 8.507059e+37  ;;  %vm3196_vm7 = vmor %vm3194_vm3, %vm3195_vm5  ;;  %vm3199_vm9 = vcmp.eq.f32.partialorder %v3198_v60, 8.507059e+37 }
 0x696   : > { %v3651_v7 = vmul.f32 %v11268_v54, %v3650_v53 }
 0x698   : > { %v3652_v2 = vadd.f32 %v11268_v54, %v3651_v7 }
 0x699   : > { %8685 = vmatmul.msk.f32.gmra.mxu0 %vm1118_vm0, %v2763_v49 }
 0x69a   : > { %v3656_v42 = vsel %vm3655_vm13, %v11268_v54, %v3652_v2  ;;  %v11315_v29 = vpop.xlane.xlu2 %3058  ;;  %v3191_v54 = vsub.f32 1.0, %v3190_v26 }
 0x69b   : > { %v3596_v51 = vpop.f32.mrf.mxu2  ;;  %v3661_v24 = vsel %vm3658_vm14, %v3660_v33, %v3656_v42  ;;  %vm3208_vm11 = vweird.f32 %v11315_v29 }
 0x69c   : > { %v3732_v19 = vmul.f32 %v3633_v3, %v3596_v51  ;;  %v3192_v49 = vmul.f32 %v11313_v47, %v3191_v54  ;;  %v3200_v3 = vand.u32 2147483648, %v3056_v35 }
 0x69e   : > { %8751 = vmatmul.msk.f32.vlgmr.msra.gmra.mxu3 %vm1118_vm0, %v3732_v19  ;;  %v3193_v51 = vadd.f32 %v11313_v47, %v3192_v49 }
 0x6a0   : > { %v3197_v22 = vsel %vm3196_vm7, %v11313_v47, %v3193_v51 }
 0x6a1   : > { %8686 = vmatmul.msk.f32.gmra.mxu0 %vm1118_vm0, %v2764_v34 }
 0x6a3   : > { %v3599_v38 = vpop.f32.mrf.mxu2 }
 0x6a4   : > { %v3733_v37 = vmul.f32 %v3647_v23, %v3599_v38  ;;  %v3201_v38 = vor.u32 1.1754944e-38, %v3200_v3 }
 0x6a6   : > { %8752 = vmatmul.msk.f32.gmra.mxu3 %vm1118_vm0, %v3733_v37  ;;  %v3202_v62 = vsel %vm3199_vm9, %v3201_v38, %v3197_v22 }
 0x6a9   : > { %8719 = vmatmul.msk.f32.vlgmr.msra.gmra.mxu0 %vm1118_vm0, %v3273_v55 }
 0x6ab   : > { %v3602_v1 = vpop.f32.mrf.mxu2 }
 0x6ac   : > { %v3734_v50 = vmul.f32 %v3661_v24, %v3602_v1  ;;  %v3212_v1 = vand.u32 2147483647, %v11315_v29  ;;  %v3214_v24 = vand.u32 2147483648, %v11315_v29 }
 0x6ae   : > { %8753 = vmatmul.msk.f32.gmra.mxu3 %vm1118_vm0, %v3734_v50 }
 0x6b3   : > { %v3605_v34 = vpop.f32.mrf.mxu2 }
 0x6bd   : > { %v3053_v56 = vpop.xlane.xlu1 %3052 }
 0x6be   : > { %9377 = vrcp.f32 %v3053_v56  ;;  %v3186_v48 = vand.u32 2147483648, %v3053_v56  ;;  %v3184_v17 = vand.u32 2147483647, %v3053_v56  ;;  %vm3180_vm2 = vweird.f32 %v3053_v56 }
 0x6bf   : > { %9379 = vrcp.f32 %v11315_v29 }
 0x6c0   : > { %v3187_v61 = vor.u32 1.1754944e-38, %v3186_v48  ;;  %vm3185_vm6 = vcmp.eq.f32.partialorder %v3184_v17, 8.507059e+37 }
 0x6c4   : > { %v9378_v18 = vpop.eup %9377 }
 0x6c5   : > { %v3176_v14 = vmul.f32 %v9378_v18, %v3053_v56  ;;  %v11319_v21 = vpop.xlane.xlu1 %3517  ;;  %v11321_v45 = vpop.xlane.xlu0 %3520  ;;  %vm3181_vm15 = vweird.f32 %v9378_v18 }
 0x6c6   : > { %v11323_v10 = vpop.eup %9379  ;;  %9381 = vrcp.f32 %v11319_v21  ;;  %vm3182_vm4 = vmor %vm3180_vm2, %vm3181_vm15  ;;  %v3673_v39 = vand.u32 2147483648, %v11319_v21  ;;  %v3671_v52 = vand.u32 2147483647, %v11319_v21  ;;  %vm3667_vm10 = vweird.f32 %v11319_v21 }
 0x6c7   : > { %v3177_v15 = vsub.f32 1.0, %v3176_v14  ;;  %9383 = vrcp.f32 %v11321_v45  ;;  %v3204_v5 = vmul.f32 %v11323_v10, %v11315_v29  ;;  %vm3209_vm13 = vweird.f32 %v11323_v10 }
 0x6c8   : > { %v3674_v42 = vor.u32 1.1754944e-38, %v3673_v39  ;;  %vm3672_vm14 = vcmp.eq.f32.partialorder %v3671_v52, 8.507059e+37  ;;  %v3687_v49 = vand.u32 2147483648, %v11321_v45  ;;  %vm3681_vm2 = vweird.f32 %v11321_v45  ;;  %vm11393_vm3 = vmor %vm3208_vm11, %vm3209_vm13 }
 0x6c9   : > { %v3178_v27 = vmul.f32 %v9378_v18, %v3177_v15  ;;  %v3205_v53 = vsub.f32 1.0, %v3204_v5 }
 0x6cb   : > { %v3179_v28 = vadd.f32 %v9378_v18, %v3178_v27  ;;  %v3206_v37 = vmul.f32 %v11323_v10, %v3205_v53 }
 0x6cc   : > { %v9382_v36 = vpop.eup %9381  ;;  %v3140_v25 = vpop.f32.mrf.mxu3 }
 0x6cd   : > { %v11332_v41 = vpop.eup %9383  ;;  %v3663_v19 = vmul.f32 %v9382_v36, %v11319_v21  ;;  %v3183_v9 = vsel %vm3182_vm4, %v9378_v18, %v3179_v28  ;;  %v11335_v4 = vpop.xlane.xlu2 %3523  ;;  %vm3668_vm8 = vweird.f32 %v9382_v36  ;;  %v3207_v26 = vadd.f32 %v11323_v10, %v3206_v37 }
 0x6ce   : > { %v11337_v30 = vpop.xlane.xlu1 %3061  ;;  %v3677_v0 = vmul.f32 %v11332_v41, %v11321_v45  ;;  %v3188_v59 = vsel %vm3185_vm6, %v3187_v61, %v3183_v9  ;;  %9385 = vrcp.f32 %v11335_v4  ;;  %v11342_v63 = vpop.xlane.xlu0 %3064  ;;  %vm11359_vm12 = vmor %vm3667_vm10, %vm3668_vm8  ;;  %vm3682_vm15 = vweird.f32 %v11332_v41 }
 0x6cf   : > { %v3664_v58 = vsub.f32 1.0, %v3663_v19  ;;  %v3274_v7 = vmul.f32 %v3188_v59, %v3140_v25  ;;  %9387 = vrcp.f32 %v11337_v30  ;;  %v3685_v28 = vand.u32 2147483647, %v11321_v45  ;;  %vm11399_vm4 = vmor %vm3681_vm2, %vm3682_vm15 }
 0x6d0   : > { %v3678_v57 = vsub.f32 1.0, %v3677_v0  ;;  %9389 = vrcp.f32 %v11342_v63  ;;  %v3215_v45 = vor.u32 1.1754944e-38, %v3214_v24  ;;  %v3211_v29 = vsel %vm11393_vm3, %v11323_v10, %v3207_v26  ;;  %v11456_v26 = vpop.f32.mrf.mxu0 }
 0x6d1   : > { %v3665_v23 = vmul.f32 %v9382_v36, %v3664_v58  ;;  %8720 = vmatmul.msk.f32.gmra.mxu0 %vm1118_vm0, %v3274_v7  ;;  %v3688_v9 = vor.u32 1.1754944e-38, %v3687_v49  ;;  %vm3686_vm5 = vcmp.eq.f32.partialorder %v3685_v28, 8.507059e+37  ;;  %vm3213_vm6 = vcmp.eq.f32.partialorder %v3212_v1, 8.507059e+37 }
 0x6d2   : > { %v3679_v2 = vmul.f32 %v11332_v41, %v3678_v57  ;;  %vm3695_vm7 = vweird.f32 %v11335_v4  ;;  %v3701_v7 = vand.u32 2147483648, %v11335_v4  ;;  %vm3222_vm11 = vweird.f32 %v11337_v30 }
 0x6d3   : > { %v3666_v46 = vadd.f32 %v9382_v36, %v3665_v23 }
 0x6d4   : > { %v11357_v40 = vpop.eup %9385  ;;  %v3143_v33 = vpop.f32.mrf.mxu3  ;;  %v3680_v54 = vadd.f32 %v11332_v41, %v3679_v2  ;;  %v3699_v2 = vand.u32 2147483647, %v11335_v4 }
 0x6d5   : > { %v11366_v50 = vpop.eup %9387  ;;  %v3691_v35 = vmul.f32 %v11357_v40, %v11335_v4  ;;  %v3670_v56 = vsel %vm11359_vm12, %v9382_v36, %v3666_v46  ;;  %v3275_v15 = vmul.f32 %v3202_v62, %v3143_v33  ;;  %v3608_v48 = vpop.f32.mrf.mxu2  ;;  %vm3696_vm8 = vweird.f32 %v11357_v40 }
 0x6d6   : > { %v11370_v47 = vpop.xlane.xlu1 %3526  ;;  %v3218_v18 = vmul.f32 %v11366_v50, %v11337_v30  ;;  %v3675_v14 = vsel %vm3672_vm14, %v3674_v42, %v3670_v56  ;;  %v11380_v5 = vpop.xlane.xlu2 %3067  ;;  %v3684_v3 = vsel %vm11399_vm4, %v11332_v41, %v3680_v54  ;;  %vm3223_vm9 = vweird.f32 %v11366_v50  ;;  %vm11437_vm10 = vmor %vm3695_vm7, %vm3696_vm8 }
 0x6d7   : > { %v3692_v21 = vsub.f32 1.0, %v3691_v35  ;;  %9391 = vrcp.f32 %v11370_v47  ;;  %v11383_v27 = vpop.eup %9389  ;;  %v11387_v36 = vpop.xlane.xlu0 %3529  ;;  %v3735_v25 = vmul.f32 %v3675_v14, %v3605_v34  ;;  %v3689_v60 = vsel %vm3686_vm5, %v3688_v9, %v3684_v3  ;;  %vm3224_vm12 = vmor %vm3222_vm11, %vm3223_vm9 }
 0x6d8   : > { %v3219_v17 = vsub.f32 1.0, %v3218_v18  ;;  %9393 = vrcp.f32 %v11380_v5  ;;  %v3232_v19 = vmul.f32 %v11383_v27, %v11342_v63  ;;  %v3216_v34 = vsel %vm3213_vm6, %v3215_v45, %v3211_v29 }
 0x6d9   : > { %8721 = vmatmul.msk.f32.gmra.mxu0 %vm1118_vm0, %v3275_v15  ;;  %8754 = vmatmul.msk.f32.gmra.mxu3 %vm1118_vm0, %v3735_v25  ;;  %v3693_v53 = vmul.f32 %v11357_v40, %v3692_v21  ;;  %9395 = vrcp.f32 %v11387_v36  ;;  %v3736_v52 = vmul.f32 %v3689_v60, %v3608_v48  ;;  %v3228_v62 = vand.u32 2147483648, %v11337_v30 }
 0x6da   : > { %v3220_v0 = vmul.f32 %v11366_v50, %v3219_v17  ;;  %v3233_v39 = vsub.f32 1.0, %v3232_v19  ;;  %v3226_v33 = vand.u32 2147483647, %v11337_v30  ;;  %v3702_v35 = vor.u32 1.1754944e-38, %v3701_v7 }
 0x6db   : > { %v3694_v58 = vadd.f32 %v11357_v40, %v3693_v53  ;;  %vm3700_vm13 = vcmp.eq.f32.partialorder %v3699_v2, 8.507059e+37  ;;  %v3229_v54 = vor.u32 1.1754944e-38, %v3228_v62  ;;  %v3242_v21 = vand.u32 2147483648, %v11342_v63 }
 0x6dc   : > { %v3146_v41 = vpop.f32.mrf.mxu3  ;;  %v3221_v38 = vadd.f32 %v11366_v50, %v3220_v0  ;;  %v3234_v30 = vmul.f32 %v11383_v27, %v3233_v39  ;;  %vm3227_vm14 = vcmp.eq.f32.partialorder %v3226_v33, 8.507059e+37  ;;  %vm3237_vm2 = vweird.f32 %v11383_v27 }
 0x6dd   : > { %v11417_v59 = vpop.eup %9391  ;;  %v3276_v57 = vmul.f32 %v3216_v34, %v3146_v41  ;;  %v3611_v55 = vpop.f32.mrf.mxu2  ;;  %v3698_v1 = vsel %vm11437_vm10, %v11357_v40, %v3694_v58  ;;  %vm3709_vm3 = vweird.f32 %v11370_v47  ;;  %v3713_v45 = vand.u32 2147483647, %v11370_v47 }
 0x6de   : > { %v3705_v10 = vmul.f32 %v11417_v59, %v11370_v47  ;;  %v11425_v22 = vpop.xlane.xlu1 %3070  ;;  %v11429_v23 = vpop.eup %9393  ;;  %v3225_v56 = vsel %vm3224_vm12, %v11366_v50, %v3221_v38  ;;  %v3703_v14 = vsel %vm3700_vm13, %v3702_v35, %v3698_v1  ;;  %vm3710_vm15 = vweird.f32 %v11417_v59 }
 0x6df   : > { %v11433_v46 = vpop.eup %9395  ;;  %9397 = vrcp.f32 %v11425_v22  ;;  %v3246_v24 = vmul.f32 %v11429_v23, %v11380_v5  ;;  %v3230_v15 = vsel %vm3227_vm14, %v3229_v54, %v3225_v56  ;;  %v3715_v50 = vand.u32 2147483648, %v11370_v47  ;;  %vm11470_vm4 = vmor %vm3709_vm3, %vm3710_vm15 }
 0x6e0   : > { %v3706_v37 = vsub.f32 1.0, %v3705_v10  ;;  %v3719_v40 = vmul.f32 %v11433_v46, %v11387_v36  ;;  %v3235_v28 = vadd.f32 %v11383_v27, %v3234_v30  ;;  %v3737_v51 = vmul.f32 %v3703_v14, %v3611_v55 }
 0x6e1   : > { %8722 = vmatmul.msk.f32.gmra.mxu0 %vm1118_vm0, %v3276_v57  ;;  %8755 = vmatmul.msk.f32.gmra.mxu3 %vm1118_vm0, %v3736_v52  ;;  %v3247_v49 = vsub.f32 1.0, %v3246_v24  ;;  %vm3236_vm5 = vweird.f32 %v11342_v63  ;;  %v3240_v29 = vand.u32 2147483647, %v11342_v63  ;;  %v3716_v9 = vor.u32 1.1754944e-38, %v3715_v50 }
 0x6e2   : > { %v3707_v4 = vmul.f32 %v11417_v59, %v3706_v37  ;;  %v3720_v61 = vsub.f32 1.0, %v3719_v40  ;;  %vm3238_vm6 = vmor %vm3236_vm5, %vm3237_vm2  ;;  %vm3714_vm7 = vcmp.eq.f32.partialorder %v3713_v45, 8.507059e+37  ;;  %v3243_v34 = vor.u32 1.1754944e-38, %v3242_v21  ;;  %v11519_v45 = vld [vmem:[%s13975_s16] ss:$0 sm:$0xff]  ;;  %s14000_s16 = sld [smem:[#allocation13_spill]] }
 0x6e3   : > { %v3239_v0 = vsel %vm3238_vm6, %v11383_v27, %v3235_v28  ;;  %v3248_v41 = vmul.f32 %v11429_v23, %v3247_v49  ;;  %vm3241_vm8 = vcmp.eq.f32.partialorder %v3240_v29, 8.507059e+37  ;;  %vm3251_vm9 = vweird.f32 %v11429_v23 }
 0x6e4   : > { %v3149_v18 = vpop.f32.mrf.mxu3  ;;  %v3708_v48 = vadd.f32 %v11417_v59, %v3707_v4  ;;  %v3721_v63 = vmul.f32 %v11433_v46, %v3720_v61  ;;  %v3244_v58 = vsel %vm3241_vm8, %v3243_v34, %v3239_v0  ;;  %vm3724_vm10 = vweird.f32 %v11433_v46 }
 0x6e5   : > { %v3277_v17 = vmul.f32 %v3230_v15, %v3149_v18  ;;  %v11466_v25 = vpop.eup %9397  ;;  %v3614_v19 = vpop.f32.mrf.mxu2  ;;  %v3249_v57 = vadd.f32 %v11429_v23, %v3248_v41  ;;  %v3256_v52 = vand.u32 2147483648, %v11380_v5  ;;  %v3729_v37 = vand.u32 2147483648, %v11387_v36 }
 0x6e6   : > { %v3712_v53 = vsel %vm11470_vm4, %v11417_v59, %v3708_v48  ;;  %v3260_v47 = vmul.f32 %v11466_v25, %v11425_v22  ;;  %v11486_v59 = vpop.f32.mrf.mxu0  ;;  %v3722_v27 = vadd.f32 %v11433_v46, %v3721_v63  ;;  %vm3250_vm11 = vweird.f32 %v11380_v5 }
 0x6e7   : > { %v3717_v10 = vsel %vm3714_vm7, %v3716_v9, %v3712_v53  ;;  %v3254_v2 = vand.u32 2147483647, %v11380_v5  ;;  %vm3723_vm12 = vweird.f32 %v11387_v36  ;;  %v3727_v62 = vand.u32 2147483647, %v11387_v36  ;;  %vm3252_vm13 = vmor %vm3250_vm11, %vm3251_vm9  ;;  %v11522_v53 = vld [vmem:[%s10108_s2] sm:$0xff] }
 0x6e8   : > { %v3261_v7 = vsub.f32 1.0, %v3260_v47  ;;  %v3738_v38 = vmul.f32 %v3717_v10, %v3614_v19  ;;  %vm3725_vm14 = vmor %vm3723_vm12, %vm3724_vm10  ;;  %v3253_v55 = vsel %vm3252_vm13, %v11429_v23, %v3249_v57  ;;  %v3257_v4 = vor.u32 1.1754944e-38, %v3256_v52 }
 0x6e9   : > { %8723 = vmatmul.msk.f32.gmra.mxu0 %vm1118_vm0, %v3277_v17  ;;  %8756 = vmatmul.msk.f32.gmra.mxu3 %vm1118_vm0, %v3737_v51  ;;  %v3726_v33 = vsel %vm3725_vm14, %v11433_v46, %v3722_v27  ;;  %v3730_v35 = vor.u32 1.1754944e-38, %v3729_v37  ;;  %vm3255_vm15 = vcmp.eq.f32.partialorder %v3254_v2, 8.507059e+37  ;;  %vm3728_vm2 = vcmp.eq.f32.partialorder %v3727_v62, 8.507059e+37 }
 0x6ea   : > { %v3262_v42 = vmul.f32 %v11466_v25, %v3261_v7  ;;  %v3258_v5 = vsel %vm3255_vm15, %v3257_v4, %v3253_v55  ;;  %vm3265_vm3 = vweird.f32 %v11466_v25  ;;  %v3270_v23 = vand.u32 2147483648, %v11425_v22 }
 0x6eb   : > { %v3731_v30 = vsel %vm3728_vm2, %v3730_v35, %v3726_v33  ;;  %vm3264_vm4 = vweird.f32 %v11425_v22  ;;  %v3268_v46 = vand.u32 2147483647, %v11425_v22  ;;  %v2872_v61 = vadd.f32 %v10976_v31, %v11456_v26 }
 0x6ec   : > { %v3152_v60 = vpop.f32.mrf.mxu3  ;;  %v3263_v40 = vadd.f32 %v11466_v25, %v3262_v42  ;;  %vm3266_vm5 = vmor %vm3264_vm4, %vm3265_vm3  ;;  %v3271_v21 = vor.u32 1.1754944e-38, %v3270_v23  ;;  %v11525_v47 = vperm.slane %v11522_v53, 2 }
 0x6ed   : > { %v3278_v39 = vmul.f32 %v3244_v58, %v3152_v60  ;;  %v3617_v24 = vpop.f32.mrf.mxu2  ;;  %vm3269_vm6 = vcmp.eq.f32.partialorder %v3268_v46, 8.507059e+37  ;;  %v2875_v60 = vadd.f32 %v10982_v8, %v11486_v59 }
 0x6ee   : > { %v3739_v18 = vmul.f32 %v3731_v30, %v3617_v24  ;;  %v3267_v54 = vsel %vm3266_vm5, %v11466_v25, %v3263_v40 }
 0x6ef   : > { %v3272_v15 = vsel %vm3269_vm6, %v3271_v21, %v3267_v54 }
 0x6f1   : > { %8724 = vmatmul.msk.f32.gmra.mxu0 %vm1118_vm0, %v3278_v39  ;;  %8757 = vmatmul.msk.f32.gmra.mxu3 %vm1118_vm0, %v3738_v38 }
 0x6f4   : > { %v3155_v1 = vpop.f32.mrf.mxu3 }
 0x6f5   : > { %v3279_v36 = vmul.f32 %v3258_v5, %v3155_v1 }
 0x6f6   : > { %v2812_v56 = vpop.f32.mrf.mxu0 }
 0x6f7   : > { %v2878_v7 = vadd.f32 %v10985_v11, %v2812_v56 }
 0x6f9   : > { %8725 = vmatmul.msk.f32.gmra.mxu0 %vm1118_vm0, %v3279_v36  ;;  %8758 = vmatmul.msk.f32.gmra.mxu3 %vm1118_vm0, %v3739_v18  ;;  %v13976_v36 = vld [vmem:[#allocation23_spill] sm:$0xff] }
 0x6fc   : > { %v3158_v14 = vpop.f32.mrf.mxu3 }
 0x6fd   : > { %v3280_v50 = vmul.f32 %v3272_v15, %v3158_v14 }
 0x6fe   : > { %v2815_v48 = vpop.f32.mrf.mxu0 }
 0x6ff   : > { %v2881_v2 = vadd.f32 %v10995_v32, %v2815_v48  ;;  %v13977_v48 = vld [vmem:[#allocation24_spill] sm:$0xff] }
 0x701   : > { %8726 = vmatmul.msk.f32.gmra.mxu0 %vm1118_vm0, %v3280_v50 }
 0x706   : > { %v2818_v49 = vpop.f32.mrf.mxu0 }
 0x707   : > { %v2884_v35 = vadd.f32 %v11005_v44, %v2818_v49 }
 0x70e   : > { %v2821_v17 = vpop.f32.mrf.mxu0 }
 0x70f   : > { %v2887_v54 = vadd.f32 %v11015_v13, %v2821_v17 }
 0x716   : > { %v11512_v28 = vpop.f32.mrf.mxu0 }
 0x717   : > { %v2890_v13 = vadd.f32 %v11025_v6, %v11512_v28 }
 0x71e   : > { %v11514_v22 = vpop.f32.mrf.mxu0 }
 0x71f   : > { %v2893_v6 = vadd.f32 %v11028_v43, %v11514_v22 }
 0x721   : > { %v3781_v3 = vpop.f32.mrf.mxu3 }
 0x726   : > { %v3322_v51 = vpop.f32.mrf.mxu0 }
 0x727   : > { %v3346_v25 = vadd.f32 %v3322_v51, %v2872_v61 }
 0x729   : > { %v3805_v29 = vadd.f32 %v3781_v3, %v3346_v25  ;;  %v3784_v41 = vpop.f32.mrf.mxu3 }
 0x72b   : > { %v3817_v19 = vadd.f32 %v11519_v45, %v3805_v29 }
 0x72d   : > { %v3826_v9 = vmul.f32 %v11525_v47, %v3817_v19 }
 0x72f   : > { %v11530_v0 = vadd.f32 %v3826_v9, %v10022_v12  ;;  %v13978_v9 = vld [vmem:[#allocation25_spill] sm:$0xff] }
 0x731   : > { %v3842_v31 = vmul.f32 %v11530_v0, %v11530_v0  ;;  %v3787_v39 = vpop.f32.mrf.mxu3 }
 0x733   : > { %v3850_v26 = vsel %vm1192_vm1, %v3842_v31, 0.0 }
 0x734   : > { %3851 = vadd.xlane.f32.xlu2 %v3850_v26 }
 0x74e   : > { %v3325_v34 = vpop.f32.mrf.mxu0 }
 0x74f   : > { %v3347_v63 = vadd.f32 %v3325_v34, %v2875_v60 }
 0x751   : > { %v3806_v10 = vadd.f32 %v3784_v41, %v3347_v63 }
 0x753   : > { %v3818_v58 = vadd.f32 %v11519_v45, %v3806_v10 }
 0x755   : > { %v3827_v12 = vmul.f32 %v11525_v47, %v3818_v58  ;;  %v13981_v58 = vld [vmem:[#allocation26_spill] sm:$0xff] }
 0x756   : > { %v3328_v57 = vpop.f32.mrf.mxu0 }
 0x757   : > { %v3348_v38 = vadd.f32 %v3328_v57, %v2878_v7  ;;  %v11541_v27 = vadd.f32 %v3827_v12, %v10027_v16 }
 0x759   : > { %v3807_v52 = vadd.f32 %v3787_v39, %v3348_v38  ;;  %v3843_v37 = vmul.f32 %v11541_v27, %v11541_v27 }
 0x75b   : > { %v3819_v8 = vadd.f32 %v11519_v45, %v3807_v52  ;;  %v3853_v59 = vsel %vm1192_vm1, %v3843_v37, 0.0  ;;  %v13982_v52 = vld [vmem:[#allocation27_spill] sm:$0xff] }
 0x75c   : > { %3854 = vadd.xlane.f32.xlu0 %v3853_v59  ;;  %v3790_v62 = vpop.f32.mrf.mxu3 }
 0x75d   : > { %v3828_v11 = vmul.f32 %v11525_v47, %v3819_v8 }
 0x75e   : > { %v3331_v55 = vpop.f32.mrf.mxu0 }
 0x75f   : > { %v3349_v42 = vadd.f32 %v3331_v55, %v2881_v2  ;;  %v11550_v33 = vadd.f32 %v3828_v11, %v10032_v20  ;;  %v4010_v2 = vld [vmem:[%s13979_s18 + $0x70] sm:$0xff]  ;;  %v4009_v55 = vld [vmem:[%s13979_s18 + $0x68] sm:$0xff] }
 0x760   : > { %v4452_v11 = vld [vmem:[%s13980_s23 + $0x70] sm:$0xff]  ;;  %4044 = vmatpush.msrb.mxu0 %v4010_v2 }
 0x761   : > { %v3808_v16 = vadd.f32 %v3790_v62, %v3349_v42  ;;  %v3844_v1 = vmul.f32 %v11550_v33, %v11550_v33  ;;  %v4008_v62 = vld [vmem:[%s13979_s18 + $0x60] sm:$0xff]  ;;  %4462 = vmatpush.msrb.mxu2 %v4452_v11 }
 0x762   : > { %v4450_v42 = vld [vmem:[%s13980_s23 + $0x60] sm:$0xff]  ;;  %4045 = vmatpush.msrb.mxu0 %v4008_v62 }
 0x763   : > { %v3820_v4 = vadd.f32 %v11519_v45, %v3808_v16  ;;  %v3856_v24 = vsel %vm1192_vm1, %v3844_v1, 0.0  ;;  %v4451_v16 = vld [vmem:[%s13980_s23 + $0x68] sm:$0xff]  ;;  %v4006_v1 = vld [vmem:[%s13979_s18 + $0x50] sm:$0xff]  ;;  %4463 = vmatpush.msrb.mxu2 %v4450_v42 }
 0x764   : > { %3857 = vadd.xlane.f32.xlu1 %v3856_v24  ;;  %v3793_v5 = vpop.f32.mrf.mxu3  ;;  %v4448_v24 = vld [vmem:[%s13980_s23 + $0x50] sm:$0xff]  ;;  %4046 = vmatpush.msrb.mxu0 %v4006_v1 }
 0x765   : > { %v3829_v32 = vmul.f32 %v11525_v47, %v3820_v4  ;;  %v4007_v4 = vld [vmem:[%s13979_s18 + $0x58] sm:$0xff]  ;;  %4464 = vmatpush.msrb.mxu2 %v4448_v24 }
 0x766   : > { %v3334_v56 = vpop.f32.mrf.mxu0 }
 0x767   : > { %v3350_v30 = vadd.f32 %v3334_v56, %v2884_v35  ;;  %v11559_v40 = vadd.f32 %v3829_v32, %v13976_v36  ;;  %v4449_v35 = vld [vmem:[%s13980_s23 + $0x58] sm:$0xff]  ;;  %v4004_v32 = vld [vmem:[%s13979_s18 + $0x40] sm:$0xff]  ;;  %v4447_v36 = vld [vmem:[%s13980_s23 + $0x48] sm:$0xff] }
 0x768   : > { %4047 = vmatpush.msrb.mxu0 %v4004_v32 }
 0x769   : > { %v3809_v20 = vadd.f32 %v3793_v5, %v3350_v30  ;;  %v3845_v18 = vmul.f32 %v11559_v40, %v11559_v40  ;;  %v4005_v5 = vld [vmem:[%s13979_s18 + $0x48] sm:$0xff]  ;;  %v4446_v30 = vld [vmem:[%s13980_s23 + $0x40] sm:$0xff] }
 0x76a   : > { %4465 = vmatpush.msrb.mxu2 %v4446_v30 }
 0x76b   : > { %v3821_v23 = vadd.f32 %v11519_v45, %v3809_v20  ;;  %v3859_v46 = vsel %vm1192_vm1, %v3845_v18, 0.0  ;;  %v13983_v20 = vld [vmem:[#allocation28_spill] sm:$0xff] }
 0x76c   : > { %3860 = vadd.xlane.f32.xlu2 %v3859_v46  ;;  %v3796_v14 = vpop.f32.mrf.mxu3  ;;  %v4003_v46 = vld [vmem:[%s13979_s18 + $0x38] sm:$0xff] }
 0x76d   : > { %v3830_v44 = vmul.f32 %v11525_v47, %v3821_v23  ;;  %v4002_v23 = vld [vmem:[%s13979_s18 + $0x30] sm:$0xff] }
 0x76e   : > { %v3337_v21 = vpop.f32.mrf.mxu0  ;;  %4048 = vmatpush.msrb.mxu0 %v4002_v23 }
 0x76f   : > { %v3351_v15 = vadd.f32 %v3337_v21, %v2887_v54  ;;  %v11568_v50 = vadd.f32 %v3830_v44, %v13977_v48  ;;  %v4444_v54 = vld [vmem:[%s13980_s23 + $0x30] sm:$0xff]  ;;  %v4445_v44 = vld [vmem:[%s13980_s23 + $0x38] sm:$0xff]  ;;  %v4000_v21 = vld [vmem:[%s13979_s18 + $0x20] sm:$0xff] }
 0x770   : > { %v4442_v48 = vld [vmem:[%s13980_s23 + $0x20] sm:$0xff]  ;;  %4466 = vmatpush.msrb.mxu2 %v4444_v54  ;;  %4049 = vmatpush.msrb.mxu0 %v4000_v21 }
 0x771   : > { %v3810_v49 = vadd.f32 %v3796_v14, %v3351_v15  ;;  %v3846_v61 = vmul.f32 %v11568_v50, %v11568_v50  ;;  %v4001_v15 = vld [vmem:[%s13979_s18 + $0x28] sm:$0xff] }
 0x772   : > { %4467 = vmatpush.msrb.mxu2 %v4442_v48 }
 0x773   : > { %v3822_v51 = vadd.f32 %v11519_v45, %v3810_v49  ;;  %v3862_v25 = vsel %vm1192_vm1, %v3846_v61, 0.0  ;;  %v4443_v49 = vld [vmem:[%s13980_s23 + $0x28] sm:$0xff]  ;;  %v3998_v61 = vld [vmem:[%s13979_s18 + $0x10] sm:$0xff] }
 0x774   : > { %3863 = vadd.xlane.f32.xlu0 %v3862_v25  ;;  %v3799_v3 = vpop.f32.mrf.mxu3  ;;  %v4440_v25 = vld [vmem:[%s13980_s23 + $0x10] sm:$0xff]  ;;  %4050 = vmatpush.msrb.mxu0 %v3998_v61 }
 0x775   : > { %v3831_v17 = vmul.f32 %v11525_v47, %v3822_v51  ;;  %v3999_v51 = vld [vmem:[%s13979_s18 + $0x18] sm:$0xff]  ;;  %4468 = vmatpush.msrb.mxu2 %v4440_v25 }
 0x776   : > { %v3340_v29 = vpop.f32.mrf.mxu0 }
 0x777   : > { %v3352_v19 = vadd.f32 %v3340_v29, %v2890_v13  ;;  %v11578_v31 = vadd.f32 %v3831_v17, %v13978_v9  ;;  %v4441_v13 = vld [vmem:[%s13980_s23 + $0x18] sm:$0xff]  ;;  %v3996_v17 = vld [vmem:[%s13979_s18] sm:$0xff] }
 0x778   : > { %v4438_v29 = vld [vmem:[%s13980_s23] sm:$0xff]  ;;  %4051 = vmatpush.msrb.mxu0 %v3996_v17 }
 0x779   : > { %v3811_v26 = vadd.f32 %v3799_v3, %v3352_v19  ;;  %v3847_v41 = vmul.f32 %v11578_v31, %v11578_v31  ;;  %v3997_v3 = vld [vmem:[%s13979_s18 + $0x8] sm:$0xff]  ;;  %4469 = vmatpush.msrb.mxu2 %v4438_v29 }
 0x77a   : > { %v4439_v19 = vld [vmem:[%s13980_s23 + $0x8] sm:$0xff] }
 0x77b   : > { %v3823_v60 = vadd.f32 %v11519_v45, %v3811_v26  ;;  %v3865_v34 = vsel %vm1192_vm1, %v3847_v41, 0.0 }
 0x77c   : > { %3866 = vadd.xlane.f32.xlu1 %v3865_v34  ;;  %v3802_v39 = vpop.f32.mrf.mxu3 }
 0x77d   : > { %v3832_v28 = vmul.f32 %v11525_v47, %v3823_v60 }
 0x77e   : > { %v3343_v63 = vpop.f32.mrf.mxu0 }
 0x77f   : > { %v3353_v10 = vadd.f32 %v3343_v63, %v2893_v6  ;;  %v11588_v7 = vadd.f32 %v3832_v28, %v13981_v58  ;;  %v11635_v28 = vperm.slane %v11522_v53, 4 }
 0x781   : > { %v3812_v12 = vadd.f32 %v3802_v39, %v3353_v10  ;;  %v3848_v57 = vmul.f32 %v11588_v7, %v11588_v7  ;;  %v11638_v10 = vperm.slane %v11522_v53, 3 }
 0x783   : > { %v3824_v43 = vadd.f32 %v11519_v45, %v3812_v12  ;;  %v3868_v22 = vsel %vm1192_vm1, %v3848_v57, 0.0  ;;  %v4011_v45 = vld [vmem:[%s13979_s18 + $0x78] sm:$0xff] }
 0x784   : > { %3869 = vadd.xlane.f32.xlu2 %v3868_v22  ;;  %4085 = vmatpush.msrb.mxu1 %v4011_v45 }
 0x785   : > { %v3833_v38 = vmul.f32 %v11525_v47, %v3824_v43  ;;  %v4453_v47 = vld [vmem:[%s13980_s23 + $0x78] sm:$0xff] }
 0x786   : > { %4503 = vmatpush.msrb.mxu3 %v4453_v47  ;;  %4086 = vmatpush.msrb.mxu1 %v4009_v55 }
 0x787   : > { %v11596_v37 = vadd.f32 %v3833_v38, %v13982_v52 }
 0x788   : > { %4504 = vmatpush.msrb.mxu3 %v4451_v16  ;;  %4087 = vmatpush.msrb.mxu1 %v4007_v4 }
 0x789   : > { %v3849_v8 = vmul.f32 %v11596_v37, %v11596_v37 }
 0x78a   : > { %4505 = vmatpush.msrb.mxu3 %v4449_v35  ;;  %4088 = vmatpush.msrb.mxu1 %v4005_v5 }
 0x78b   : > { %v3871_v59 = vsel %vm1192_vm1, %v3849_v8, 0.0 }
 0x78c   : > { %3872 = vadd.xlane.f32.xlu0 %v3871_v59  ;;  %4506 = vmatpush.msrb.mxu3 %v4447_v36 }
 0x78d   : > { %4089 = vmatpush.msrb.mxu1 %v4003_v46 }
 0x78e   : > { %4507 = vmatpush.msrb.mxu3 %v4445_v44 }
 0x78f   : > { %4090 = vmatpush.msrb.mxu1 %v4001_v15 }
 0x790   : > { %4508 = vmatpush.msrb.mxu3 %v4443_v49 }
 0x791   : > { %4091 = vmatpush.msrb.mxu1 %v3999_v51 }
 0x792   : > { %4509 = vmatpush.msrb.mxu3 %v4441_v13 }
 0x793   : > { %4092 = vmatpush.msrb.mxu1 %v3997_v3 }
 0x794   : > { %4510 = vmatpush.msrb.mxu3 %v4439_v19 }
 0x7a7   : > { %v3852_v56 = vpop.xlane.xlu2 %3851 }
 0x7a8   : > { %v3874_v18 = vmul.f32 %v3852_v56, %v13983_v20 }
 0x7aa   : > { %v3882_v14 = vadd.f32 1e-06, %v3874_v18 }
 0x7ac   : > { %9399 = vrsqrt.f32 %v3882_v14  ;;  %vm3896_vm8 = vweird.f32 %v3882_v14 }
 0x7b2   : > { %v9400_v9 = vpop.eup %9399 }
 0x7b3   : > { %v3891_v26 = vmul.f32 %v9400_v9, %v3882_v14  ;;  %vm3897_vm7 = vweird.f32 %v9400_v9 }
 0x7b4   : > { %vm3898_vm9 = vmor %vm3896_vm8, %vm3897_vm7 }
 0x7b5   : > { %v3892_v41 = vmul.f32 %v9400_v9, %v3891_v26 }
 0x7b7   : > { %v3893_v60 = vmul.f32 0.5, %v3892_v41 }
 0x7b9   : > { %v3894_v34 = vsub.f32 1.5, %v3893_v60 }
 0x7bb   : > { %v3895_v6 = vmul.f32 %v9400_v9, %v3894_v34 }
 0x7bd   : > { %v3899_v63 = vsel %vm3898_vm9, %v9400_v9, %v3895_v6 }
 0x7be   : > { %v3970_v58 = vmul.f32 %v3899_v63, %v11530_v0 }
 0x7c0   : > { %v3979_v39 = vmul.f32 %v11635_v28, %v3970_v58 }
 0x7c2   : > { %v3988_v12 = vadd.f32 %v11638_v10, %v3979_v39 }
 0x7c4   : > { %8759 = vmatmul.msk.f32.vlgmr.msrb.gmra.mxu0 %vm1192_vm1, %v3988_v12  ;;  %8767 = vmatmul.msk.f32.vlgmr.msrb.gmra.mxu1 %vm1192_vm1, %v3988_v12 }
 0x7c5   : > { %8791 = vmatmul.msk.f32.vlgmr.msrb.gmra.mxu2 %vm1192_vm1, %v3988_v12  ;;  %8799 = vmatmul.msk.f32.vlgmr.msrb.gmra.mxu3 %vm1192_vm1, %v3988_v12 }
 0x7cf   : > { %v3855_v57 = vpop.xlane.xlu0 %3854 }
 0x7d0   : > { %v3875_v43 = vmul.f32 %v3855_v57, %v13983_v20 }
 0x7d2   : > { %v3883_v22 = vadd.f32 1e-06, %v3875_v43 }
 0x7d4   : > { %9401 = vrsqrt.f32 %v3883_v22  ;;  %vm3906_vm11 = vweird.f32 %v3883_v22 }
 0x7d7   : > { %v3858_v53 = vpop.xlane.xlu1 %3857 }
 0x7d8   : > { %v3876_v38 = vmul.f32 %v3858_v53, %v13983_v20 }
 0x7da   : > { %v9402_v52 = vpop.eup %9401  ;;  %v3884_v8 = vadd.f32 1e-06, %v3876_v38 }
 0x7db   : > { %v3901_v59 = vmul.f32 %v9402_v52, %v3883_v22  ;;  %vm3907_vm10 = vweird.f32 %v9402_v52 }
 0x7dc   : > { %9403 = vrsqrt.f32 %v3884_v8  ;;  %vm3908_vm12 = vmor %vm3906_vm11, %vm3907_vm10  ;;  %vm3916_vm14 = vweird.f32 %v3884_v8 }
 0x7dd   : > { %v3902_v2 = vmul.f32 %v9402_v52, %v3901_v59 }
 0x7df   : > { %v3903_v45 = vmul.f32 0.5, %v3902_v2  ;;  %v3861_v11 = vpop.xlane.xlu2 %3860 }
 0x7e0   : > { %v3877_v47 = vmul.f32 %v3861_v11, %v13983_v20 }
 0x7e1   : > { %v3904_v62 = vsub.f32 1.5, %v3903_v45 }
 0x7e2   : > { %v9404_v55 = vpop.eup %9403  ;;  %v3885_v42 = vadd.f32 1e-06, %v3877_v47 }
 0x7e3   : > { %v3905_v16 = vmul.f32 %v9402_v52, %v3904_v62  ;;  %v3911_v1 = vmul.f32 %v9404_v55, %v3884_v8  ;;  %vm3917_vm13 = vweird.f32 %v9404_v55 }
 0x7e4   : > { %9405 = vrsqrt.f32 %v3885_v42  ;;  %vm3918_vm15 = vmor %vm3916_vm14, %vm3917_vm13  ;;  %vm3926_vm3 = vweird.f32 %v3885_v42 }
 0x7e5   : > { %v3909_v4 = vsel %vm3908_vm12, %v9402_v52, %v3905_v16  ;;  %v3912_v24 = vmul.f32 %v9404_v55, %v3911_v1 }
 0x7e6   : > { %v3971_v35 = vmul.f32 %v3909_v4, %v11541_v27 }
 0x7e7   : > { %v3913_v32 = vmul.f32 0.5, %v3912_v24  ;;  %v3864_v5 = vpop.xlane.xlu0 %3863 }
 0x7e8   : > { %v3878_v56 = vmul.f32 %v3864_v5, %v13983_v20  ;;  %v3980_v30 = vmul.f32 %v11635_v28, %v3971_v35 }
 0x7e9   : > { %v3914_v36 = vsub.f32 1.5, %v3913_v32 }
 0x7ea   : > { %v9406_v18 = vpop.eup %9405  ;;  %v3886_v23 = vadd.f32 1e-06, %v3878_v56  ;;  %v3989_v46 = vadd.f32 %v11638_v10, %v3980_v30 }
 0x7eb   : > { %v3915_v54 = vmul.f32 %v9404_v55, %v3914_v36  ;;  %v3921_v44 = vmul.f32 %v9406_v18, %v3885_v42  ;;  %vm3927_vm2 = vweird.f32 %v9406_v18 }
 0x7ec   : > { %9407 = vrsqrt.f32 %v3886_v23  ;;  %8760 = vmatmul.msk.f32.gmra.mxu0 %vm1192_vm1, %v3989_v46  ;;  %8768 = vmatmul.msk.f32.gmra.mxu1 %vm1192_vm1, %v3989_v46  ;;  %vm3928_vm4 = vmor %vm3926_vm3, %vm3927_vm2  ;;  %vm3936_vm6 = vweird.f32 %v3886_v23 }
 0x7ed   : > { %v3919_v14 = vsel %vm3918_vm15, %v9404_v55, %v3915_v54  ;;  %v3922_v21 = vmul.f32 %v9406_v18, %v3921_v44  ;;  %8792 = vmatmul.msk.f32.gmra.mxu2 %vm1192_vm1, %v3989_v46  ;;  %8800 = vmatmul.msk.f32.gmra.mxu3 %vm1192_vm1, %v3989_v46 }
 0x7ee   : > { %v3972_v15 = vmul.f32 %v3919_v14, %v11550_v33 }
 0x7ef   : > { %v3923_v48 = vmul.f32 0.5, %v3922_v21  ;;  %v3867_v49 = vpop.xlane.xlu1 %3866 }
 0x7f0   : > { %v3879_v61 = vmul.f32 %v3867_v49, %v13983_v20  ;;  %v3981_v51 = vmul.f32 %v11635_v28, %v3972_v15 }
 0x7f1   : > { %v3924_v25 = vsub.f32 1.5, %v3923_v48 }
 0x7f2   : > { %v9408_v13 = vpop.eup %9407  ;;  %v3887_v17 = vadd.f32 1e-06, %v3879_v61  ;;  %v3990_v3 = vadd.f32 %v11638_v10, %v3981_v51 }
 0x7f3   : > { %v3925_v29 = vmul.f32 %v9406_v18, %v3924_v25  ;;  %v3931_v19 = vmul.f32 %v9408_v13, %v3886_v23  ;;  %vm3937_vm5 = vweird.f32 %v9408_v13 }
 0x7f4   : > { %9409 = vrsqrt.f32 %v3887_v17  ;;  %8761 = vmatmul.msk.f32.gmra.mxu0 %vm1192_vm1, %v3990_v3  ;;  %8769 = vmatmul.msk.f32.gmra.mxu1 %vm1192_vm1, %v3990_v3  ;;  %vm3938_vm7 = vmor %vm3936_vm6, %vm3937_vm5  ;;  %vm3946_vm9 = vweird.f32 %v3887_v17 }
 0x7f5   : > { %v3929_v9 = vsel %vm3928_vm4, %v9406_v18, %v3925_v29  ;;  %v3932_v26 = vmul.f32 %v9408_v13, %v3931_v19  ;;  %8793 = vmatmul.msk.f32.gmra.mxu2 %vm1192_vm1, %v3990_v3  ;;  %8801 = vmatmul.msk.f32.gmra.mxu3 %vm1192_vm1, %v3990_v3  ;;  %v4566_v3 = vld [vmem:[%s13984_s28 + $0x70] sm:$0xff]  ;;  %v4581_v29 = vld [vmem:[%s13984_s28 + $0xe8] sm:$0xff]  ;;  %v4564_v19 = vld [vmem:[%s13984_s28 + $0x60] sm:$0xff] }
 0x7f6   : > { %v3973_v41 = vmul.f32 %v3929_v9, %v11559_v40  ;;  %v4580_v9 = vld [vmem:[%s13984_s28 + $0xe0] sm:$0xff] }
 0x7f7   : > { %v3933_v60 = vmul.f32 0.5, %v3932_v26  ;;  %v3870_v34 = vpop.xlane.xlu2 %3869  ;;  %v4563_v26 = vld [vmem:[%s13984_s28 + $0x58] sm:$0xff] }
 0x7f8   : > { %v3880_v6 = vmul.f32 %v3870_v34, %v13983_v20  ;;  %v3982_v63 = vmul.f32 %v11635_v28, %v3973_v41  ;;  %v4579_v41 = vld [vmem:[%s13984_s28 + $0xd8] sm:$0xff]  ;;  %v4578_v34 = vld [vmem:[%s13984_s28 + $0xd0] sm:$0xff] }
 0x7f9   : > { %v3934_v58 = vsub.f32 1.5, %v3933_v60  ;;  %v4562_v60 = vld [vmem:[%s13984_s28 + $0x50] sm:$0xff] }
 0x7fa   : > { %v9410_v39 = vpop.eup %9409  ;;  %v3888_v12 = vadd.f32 1e-06, %v3880_v6  ;;  %v3991_v57 = vadd.f32 %v11638_v10, %v3982_v63  ;;  %v4561_v6 = vld [vmem:[%s13984_s28 + $0x48] sm:$0xff] }
 0x7fb   : > { %v3935_v43 = vmul.f32 %v9408_v13, %v3934_v58  ;;  %v3941_v22 = vmul.f32 %v9410_v39, %v3887_v17  ;;  %vm3947_vm8 = vweird.f32 %v9410_v39  ;;  %v4583_v17 = vld [vmem:[%s13984_s28 + $0xf8] sm:$0xff]  ;;  %v4577_v63 = vld [vmem:[%s13984_s28 + $0xc8] sm:$0xff]  ;;  %v4560_v58 = vld [vmem:[%s13984_s28 + $0x40] sm:$0xff] }
 0x7fc   : > { %9411 = vrsqrt.f32 %v3888_v12  ;;  %8762 = vmatmul.msk.f32.gmra.mxu0 %vm1192_vm1, %v3991_v57  ;;  %8770 = vmatmul.msk.f32.gmra.mxu1 %vm1192_vm1, %v3991_v57  ;;  %vm3948_vm10 = vmor %vm3946_vm9, %vm3947_vm8  ;;  %vm3956_vm12 = vweird.f32 %v3888_v12 }
 0x7fd   : > { %v3939_v53 = vsel %vm3938_vm7, %v9408_v13, %v3935_v43  ;;  %v3942_v38 = vmul.f32 %v9410_v39, %v3941_v22  ;;  %8794 = vmatmul.msk.f32.gmra.mxu2 %vm1192_vm1, %v3991_v57  ;;  %8802 = vmatmul.msk.f32.gmra.mxu3 %vm1192_vm1, %v3991_v57  ;;  %v4567_v13 = vld [vmem:[%s13984_s28 + $0x78] sm:$0xff] }
 0x7fe   : > { %v3974_v52 = vmul.f32 %v3939_v53, %v11568_v50  ;;  %4584 = vmatpush.msra.mxu0 %v4567_v13  ;;  %4625 = vmatpush.msra.mxu1 %v4583_v17  ;;  %v4575_v57 = vld [vmem:[%s13984_s28 + $0xb8] sm:$0xff]  ;;  %v4558_v53 = vld [vmem:[%s13984_s28 + $0x30] sm:$0xff] }
 0x7ff   : > { %v3943_v8 = vmul.f32 0.5, %v3942_v38  ;;  %v3873_v59 = vpop.xlane.xlu0 %3872  ;;  %v4574_v38 = vld [vmem:[%s13984_s28 + $0xb0] sm:$0xff] }
 0x800   : > { %v3881_v2 = vmul.f32 %v3873_v59, %v13983_v20  ;;  %v3983_v45 = vmul.f32 %v11635_v28, %v3974_v52  ;;  %4585 = vmatpush.msra.mxu0 %v4566_v3  ;;  %v4557_v59 = vld [vmem:[%s13984_s28 + $0x28] sm:$0xff] }
 0x801   : > { %v3944_v11 = vsub.f32 1.5, %v3943_v8 }
 0x802   : > { %v9412_v47 = vpop.eup %9411  ;;  %v3889_v62 = vadd.f32 1e-06, %v3881_v2  ;;  %v3992_v55 = vadd.f32 %v11638_v10, %v3983_v45  ;;  %v4573_v2 = vld [vmem:[%s13984_s28 + $0xa8] sm:$0xff]  ;;  %v4556_v45 = vld [vmem:[%s13984_s28 + $0x20] sm:$0xff] }
 0x803   : > { %v3945_v42 = vmul.f32 %v9410_v39, %v3944_v11  ;;  %v3951_v16 = vmul.f32 %v9412_v47, %v3888_v12  ;;  %vm3957_vm11 = vweird.f32 %v9412_v47  ;;  %v4559_v12 = vld [vmem:[%s13984_s28 + $0x38] sm:$0xff]  ;;  %v4572_v11 = vld [vmem:[%s13984_s28 + $0xa0] sm:$0xff] }
 0x804   : > { %9413 = vrsqrt.f32 %v3889_v62  ;;  %8763 = vmatmul.msk.f32.gmra.mxu0 %vm1192_vm1, %v3992_v55  ;;  %8771 = vmatmul.msk.f32.gmra.mxu1 %vm1192_vm1, %v3992_v55  ;;  %vm3958_vm13 = vmor %vm3956_vm12, %vm3957_vm11  ;;  %vm3966_vm15 = vweird.f32 %v3889_v62 }
 0x805   : > { %v3949_v1 = vsel %vm3948_vm10, %v9410_v39, %v3945_v42  ;;  %v3952_v4 = vmul.f32 %v9412_v47, %v3951_v16  ;;  %8795 = vmatmul.msk.f32.gmra.mxu2 %vm1192_vm1, %v3992_v55  ;;  %8803 = vmatmul.msk.f32.gmra.mxu3 %vm1192_vm1, %v3992_v55  ;;  %v4576_v39 = vld [vmem:[%s13984_s28 + $0xc0] sm:$0xff]  ;;  %v4554_v55 = vld [vmem:[%s13984_s28 + $0x10] sm:$0xff] }
 0x806   : > { %v3975_v24 = vmul.f32 %v3949_v1, %v11578_v31  ;;  %v4570_v42 = vld [vmem:[%s13984_s28 + $0x90] sm:$0xff]  ;;  %v4553_v1 = vld [vmem:[%s13984_s28 + $0x8] sm:$0xff] }
 0x807   : > { %v3953_v35 = vmul.f32 0.5, %v3952_v4  ;;  %v4569_v4 = vld [vmem:[%s13984_s28 + $0x88] sm:$0xff] }
 0x808   : > { %v3984_v32 = vmul.f32 %v11635_v28, %v3975_v24 }
 0x809   : > { %v3954_v5 = vsub.f32 1.5, %v3953_v35 }
 0x80a   : > { %v9414_v56 = vpop.eup %9413  ;;  %v3993_v30 = vadd.f32 %v11638_v10, %v3984_v32 }
 0x80b   : > { %v3955_v36 = vmul.f32 %v9412_v47, %v3954_v5  ;;  %v3961_v18 = vmul.f32 %v9414_v56, %v3889_v62  ;;  %vm3967_vm14 = vweird.f32 %v9414_v56  ;;  %v4571_v62 = vld [vmem:[%s13984_s28 + $0x98] sm:$0xff]  ;;  %v4552_v5 = vld [vmem:[%s13984_s28] sm:$0xff] }
 0x80c   : > { %8764 = vmatmul.msk.f32.gmra.mxu0 %vm1192_vm1, %v3993_v30  ;;  %8772 = vmatmul.msk.f32.gmra.mxu1 %vm1192_vm1, %v3993_v30  ;;  %vm3968_vm2 = vmor %vm3966_vm15, %vm3967_vm14 }
 0x80d   : > { %v3959_v23 = vsel %vm3958_vm13, %v9412_v47, %v3955_v36  ;;  %v3962_v46 = vmul.f32 %v9414_v56, %v3961_v18  ;;  %8796 = vmatmul.msk.f32.gmra.mxu2 %vm1192_vm1, %v3993_v30  ;;  %8804 = vmatmul.msk.f32.gmra.mxu3 %vm1192_vm1, %v3993_v30  ;;  %v4555_v47 = vld [vmem:[%s13984_s28 + $0x18] sm:$0xff] }
 0x80e   : > { %v3976_v54 = vmul.f32 %v3959_v23, %v11588_v7 }
 0x80f   : > { %v3963_v44 = vmul.f32 0.5, %v3962_v46 }
 0x810   : > { %v3985_v14 = vmul.f32 %v11635_v28, %v3976_v54 }
 0x811   : > { %v3964_v21 = vsub.f32 1.5, %v3963_v44 }
 0x812   : > { %v3994_v15 = vadd.f32 %v11638_v10, %v3985_v14 }
 0x813   : > { %v3965_v48 = vmul.f32 %v9414_v56, %v3964_v21 }
 0x814   : > { %8765 = vmatmul.msk.f32.gmra.mxu0 %vm1192_vm1, %v3994_v15  ;;  %8773 = vmatmul.msk.f32.gmra.mxu1 %vm1192_vm1, %v3994_v15 }
 0x815   : > { %v3969_v49 = vsel %vm3968_vm2, %v9414_v56, %v3965_v48  ;;  %8797 = vmatmul.msk.f32.gmra.mxu2 %vm1192_vm1, %v3994_v15  ;;  %8805 = vmatmul.msk.f32.gmra.mxu3 %vm1192_vm1, %v3994_v15  ;;  %v4568_v56 = vld [vmem:[%s13984_s28 + $0x80] sm:$0xff] }
 0x816   : > { %v3977_v61 = vmul.f32 %v3969_v49, %v11596_v37 }
 0x818   : > { %v3986_v51 = vmul.f32 %v11635_v28, %v3977_v61  ;;  %v4582_v28 = vld [vmem:[%s13984_s28 + $0xf0] sm:$0xff] }
 0x819   : > { %4626 = vmatpush.msra.mxu1 %v4582_v28 }
 0x81a   : > { %v3995_v25 = vadd.f32 %v11638_v10, %v3986_v51  ;;  %v4565_v10 = vld [vmem:[%s13984_s28 + $0x68] sm:$0xff] }
 0x81b   : > { %4586 = vmatpush.msra.mxu0 %v4565_v10  ;;  %4627 = vmatpush.msra.mxu1 %v4581_v29 }
 0x81c   : > { %8766 = vmatmul.msk.f32.gmra.mxu0 %vm1192_vm1, %v3995_v25  ;;  %8774 = vmatmul.msk.f32.gmra.mxu1 %vm1192_vm1, %v3995_v25 }
 0x81d   : > { %8798 = vmatmul.msk.f32.gmra.mxu2 %vm1192_vm1, %v3995_v25  ;;  %8806 = vmatmul.msk.f32.gmra.mxu3 %vm1192_vm1, %v3995_v25 }
 0x81e   : > { %4587 = vmatpush.msra.mxu0 %v4564_v19  ;;  %4628 = vmatpush.msra.mxu1 %v4580_v9 }
 0x820   : > { %4588 = vmatpush.msra.mxu0 %v4563_v26  ;;  %4629 = vmatpush.msra.mxu1 %v4579_v41 }
 0x822   : > { %4589 = vmatpush.msra.mxu0 %v4562_v60  ;;  %4630 = vmatpush.msra.mxu1 %v4578_v34 }
 0x824   : > { %4590 = vmatpush.msra.mxu0 %v4561_v6  ;;  %4631 = vmatpush.msra.mxu1 %v4577_v63 }
 0x826   : > { %4591 = vmatpush.msra.mxu0 %v4560_v58  ;;  %4632 = vmatpush.msra.mxu1 %v4576_v39 }
 0x828   : > { %4592 = vmatpush.msra.mxu0 %v4559_v12  ;;  %4633 = vmatpush.msra.mxu1 %v4575_v57 }
 0x82a   : > { %4593 = vmatpush.msra.mxu0 %v4558_v53  ;;  %4634 = vmatpush.msra.mxu1 %v4574_v38 }
 0x82c   : > { %4594 = vmatpush.msra.mxu0 %v4557_v59  ;;  %4635 = vmatpush.msra.mxu1 %v4573_v2 }
 0x82e   : > { %4595 = vmatpush.msra.mxu0 %v4556_v45  ;;  %4636 = vmatpush.msra.mxu1 %v4572_v11 }
 0x830   : > { %4596 = vmatpush.msra.mxu0 %v4555_v47  ;;  %4637 = vmatpush.msra.mxu1 %v4571_v62 }
 0x832   : > { %4597 = vmatpush.msra.mxu0 %v4554_v55  ;;  %4638 = vmatpush.msra.mxu1 %v4570_v42 }
 0x834   : > { %4598 = vmatpush.msra.mxu0 %v4553_v1  ;;  %4639 = vmatpush.msra.mxu1 %v4569_v4 }
 0x836   : > { %4599 = vmatpush.msra.mxu0 %v4552_v5  ;;  %4640 = vmatpush.msra.mxu1 %v4568_v56 }
 0x841   : > { %v11721_v43 = vpop.f32.mrf.mxu0  ;;  %v11723_v22 = vpop.f32.mrf.mxu1 }
 0x842   : > { %v8775_v52 = vmul.f32 -1.442695, %v11721_v43  ;;  %v8776_v8 = vmul.f32 -1.442695, %v11723_v22 }
 0x844   : > { %9415 = vpow2.f32 %v8775_v52 }
 0x845   : > { %9417 = vpow2.f32 %v8776_v8 }
 0x848   : > { %v4471_v9 = vpop.f32.mrf.mxu2  ;;  %v4512_v41 = vpop.f32.mrf.mxu3 }
 0x84a   : > { %v9416_v16 = vpop.eup %9415 }
 0x84b   : > { %v9418_v24 = vpop.eup %9417  ;;  %v4166_v35 = vadd.f32 1.0, %v9416_v16 }
 0x84c   : > { %v4167_v32 = vadd.f32 1.0, %v9418_v24 }
 0x84d   : > { %9419 = vrcp.f32 %v4166_v35  ;;  %v4193_v54 = vand.u32 2147483648, %v4166_v35  ;;  %v4191_v21 = vand.u32 2147483647, %v4166_v35  ;;  %vm4187_vm5 = vweird.f32 %v4166_v35 }
 0x84e   : > { %9421 = vrcp.f32 %v4167_v32  ;;  %v4208_v15 = vand.u32 2147483648, %v4167_v32  ;;  %v4206_v49 = vand.u32 2147483647, %v4167_v32  ;;  %vm4202_vm7 = vweird.f32 %v4167_v32 }
 0x84f   : > { %v4194_v51 = vor.u32 1.1754944e-38, %v4193_v54  ;;  %vm4192_vm8 = vcmp.eq.f32.partialorder %v4191_v21, 8.507059e+37 }
 0x850   : > { %v4209_v17 = vor.u32 1.1754944e-38, %v4208_v15  ;;  %vm4207_vm10 = vcmp.eq.f32.partialorder %v4206_v49, 8.507059e+37 }
 0x853   : > { %v9420_v30 = vpop.eup %9419 }
 0x854   : > { %v9422_v36 = vpop.eup %9421  ;;  %v4183_v18 = vmul.f32 %v9420_v30, %v4166_v35  ;;  %vm4188_vm3 = vweird.f32 %v9420_v30 }
 0x855   : > { %v4198_v23 = vmul.f32 %v9422_v36, %v4167_v32  ;;  %vm4203_vm4 = vweird.f32 %v9422_v36  ;;  %vm4189_vm6 = vmor %vm4187_vm5, %vm4188_vm3 }
 0x856   : > { %v4184_v46 = vsub.f32 1.0, %v4183_v18  ;;  %vm4204_vm9 = vmor %vm4202_vm7, %vm4203_vm4 }
 0x857   : > { %v4199_v44 = vsub.f32 1.0, %v4198_v23 }
 0x858   : > { %v4185_v14 = vmul.f32 %v9420_v30, %v4184_v46 }
 0x859   : > { %v4200_v48 = vmul.f32 %v9422_v36, %v4199_v44 }
 0x85a   : > { %v4186_v61 = vadd.f32 %v9420_v30, %v4185_v14 }
 0x85b   : > { %v4201_v25 = vadd.f32 %v9422_v36, %v4200_v48 }
 0x85c   : > { %v4190_v13 = vsel %vm4189_vm6, %v9420_v30, %v4186_v61 }
 0x85d   : > { %v4195_v3 = vsel %vm4192_vm8, %v4194_v51, %v4190_v13  ;;  %v4205_v28 = vsel %vm4204_vm9, %v9422_v36, %v4201_v25 }
 0x85e   : > { %v4422_v10 = vmul.f32 %v4195_v3, %v11721_v43  ;;  %v4210_v29 = vsel %vm4207_vm10, %v4209_v17, %v4205_v28 }
 0x85f   : > { %v4423_v19 = vmul.f32 %v4210_v29, %v11723_v22 }
 0x860   : > { %v4536_v26 = vmul.f32 %v4471_v9, %v4422_v10 }
 0x861   : > { %v4537_v60 = vmul.f32 %v4512_v41, %v4423_v19 }
 0x862   : > { %4600 = vmatmul.f32.vlgmr.msra.gmra.mxu0 %v4536_v26 }
 0x863   : > { %4641 = vmatmul.f32.vlgmr.msra.gmra.mxu1 %v4537_v60 }
 0x869   : > { %v11743_v34 = vpop.f32.mrf.mxu0  ;;  %v11745_v6 = vpop.f32.mrf.mxu1 }
 0x86a   : > { %v8777_v63 = vmul.f32 -1.442695, %v11743_v34  ;;  %v8778_v58 = vmul.f32 -1.442695, %v11745_v6 }
 0x86c   : > { %9423 = vpow2.f32 %v8777_v63 }
 0x86d   : > { %9425 = vpow2.f32 %v8778_v58 }
 0x870   : > { %v4474_v18 = vpop.f32.mrf.mxu2  ;;  %v4515_v3 = vpop.f32.mrf.mxu3 }
 0x871   : > { %v11749_v39 = vpop.f32.mrf.mxu0  ;;  %v11751_v12 = vpop.f32.mrf.mxu1 }
 0x872   : > { %v9424_v57 = vpop.eup %9423  ;;  %v8779_v43 = vmul.f32 -1.442695, %v11749_v39  ;;  %v8780_v38 = vmul.f32 -1.442695, %v11751_v12 }
 0x873   : > { %v9426_v22 = vpop.eup %9425  ;;  %v4168_v53 = vadd.f32 1.0, %v9424_v57 }
 0x874   : > { %v4169_v52 = vadd.f32 1.0, %v9426_v22  ;;  %9427 = vpow2.f32 %v8779_v43 }
 0x875   : > { %9429 = vrcp.f32 %v4168_v53  ;;  %v4221_v24 = vand.u32 2147483647, %v4168_v53  ;;  %v4223_v35 = vand.u32 2147483648, %v4168_v53  ;;  %vm4217_vm12 = vweird.f32 %v4168_v53 }
 0x876   : > { %9431 = vrcp.f32 %v4169_v52  ;;  %v4236_v56 = vand.u32 2147483647, %v4169_v52  ;;  %v4238_v30 = vand.u32 2147483648, %v4169_v52  ;;  %vm4232_vm13 = vweird.f32 %v4169_v52 }
 0x877   : > { %9433 = vpow2.f32 %v8780_v38  ;;  %vm11771_vm15 = vcmp.eq.f32.partialorder %v4221_v24, 8.507059e+37  ;;  %v4224_v15 = vor.u32 1.1754944e-38, %v4223_v35 }
 0x878   : > { %vm11777_vm3 = vcmp.eq.f32.partialorder %v4236_v56, 8.507059e+37  ;;  %v4239_v25 = vor.u32 1.1754944e-38, %v4238_v30 }
 0x879   : > { %v11755_v8 = vpop.f32.mrf.mxu0  ;;  %v11757_v59 = vpop.f32.mrf.mxu1 }
 0x87a   : > { %v9428_v2 = vpop.eup %9427  ;;  %v8781_v45 = vmul.f32 -1.442695, %v11755_v8  ;;  %v8782_v62 = vmul.f32 -1.442695, %v11757_v59 }
 0x87b   : > { %v9430_v11 = vpop.eup %9429  ;;  %v11760_v47 = vadd.f32 1.0, %v9428_v2 }
 0x87c   : > { %v9432_v55 = vpop.eup %9431  ;;  %v4213_v42 = vmul.f32 %v9430_v11, %v4168_v53  ;;  %9435 = vpow2.f32 %v8781_v45  ;;  %vm4218_vm11 = vweird.f32 %v9430_v11 }
 0x87d   : > { %v9434_v16 = vpop.eup %9433  ;;  %v4228_v1 = vmul.f32 %v9432_v55, %v4169_v52  ;;  %9437 = vrcp.f32 %v11760_v47  ;;  %vm4233_vm14 = vweird.f32 %v9432_v55  ;;  %vm4219_vm2 = vmor %vm4217_vm12, %vm4218_vm11  ;;  %v4251_v10 = vand.u32 2147483647, %v11760_v47 }
 0x87e   : > { %v4214_v4 = vsub.f32 1.0, %v4213_v42  ;;  %v11764_v32 = vadd.f32 1.0, %v9434_v16  ;;  %9439 = vpow2.f32 %v8782_v62  ;;  %vm4234_vm4 = vmor %vm4232_vm13, %vm4233_vm14  ;;  %v4253_v57 = vand.u32 2147483648, %v11760_v47 }
 0x87f   : > { %v4229_v5 = vsub.f32 1.0, %v4228_v1  ;;  %vm4247_vm5 = vweird.f32 %v11760_v47  ;;  %vm11801_vm7 = vcmp.eq.f32.partialorder %v4251_v10, 8.507059e+37 }
 0x880   : > { %v4215_v36 = vmul.f32 %v9430_v11, %v4214_v4  ;;  %9441 = vrcp.f32 %v11764_v32  ;;  %v4266_v53 = vand.u32 2147483647, %v11764_v32  ;;  %v4254_v16 = vor.u32 1.1754944e-38, %v4253_v57  ;;  %v4477_v4 = vpop.f32.mrf.mxu2 }
 0x881   : > { %v4230_v23 = vmul.f32 %v9432_v55, %v4229_v5  ;;  %v11767_v46 = vpop.f32.mrf.mxu0  ;;  %v11769_v54 = vpop.f32.mrf.mxu1  ;;  %v4268_v1 = vand.u32 2147483648, %v11764_v32  ;;  %vm4262_vm10 = vweird.f32 %v11764_v32 }
 0x882   : > { %v9436_v44 = vpop.eup %9435  ;;  %v4216_v14 = vadd.f32 %v9430_v11, %v4215_v36  ;;  %v8783_v48 = vmul.f32 -1.442695, %v11767_v46  ;;  %v8784_v26 = vmul.f32 -1.442695, %v11769_v54  ;;  %vm11818_vm11 = vcmp.eq.f32.partialorder %v4266_v53, 8.507059e+37 }
 0x883   : > { %v9438_v49 = vpop.eup %9437  ;;  %v4231_v61 = vadd.f32 %v9432_v55, %v4230_v23  ;;  %v11781_v13 = vadd.f32 1.0, %v9436_v44  ;;  %v4269_v21 = vor.u32 1.1754944e-38, %v4268_v1 }
 0x884   : > { %v4220_v17 = vsel %vm4219_vm2, %v9430_v11, %v4216_v14  ;;  %v4243_v28 = vmul.f32 %v9438_v49, %v11760_v47  ;;  %9443 = vpow2.f32 %v8783_v48  ;;  %v9440_v29 = vpop.eup %9439  ;;  %vm4248_vm6 = vweird.f32 %v9438_v49 }
 0x885   : > { %v4225_v19 = vsel %vm11771_vm15, %v4224_v15, %v4220_v17  ;;  %v4235_v9 = vsel %vm4234_vm4, %v9432_v55, %v4231_v61  ;;  %9445 = vrcp.f32 %v11781_v13  ;;  %v11799_v2 = vadd.f32 1.0, %v9440_v29  ;;  %vm4249_vm8 = vmor %vm4247_vm5, %vm4248_vm6  ;;  %v4518_v15 = vpop.f32.mrf.mxu3 }
 0x886   : > { %v9442_v41 = vpop.eup %9441  ;;  %v4424_v60 = vmul.f32 %v4225_v19, %v11743_v34  ;;  %v4240_v63 = vsel %vm11777_vm3, %v4239_v25, %v4235_v9  ;;  %v4244_v58 = vsub.f32 1.0, %v4243_v28  ;;  %9447 = vpow2.f32 %v8784_v26 }
 0x887   : > { %v4425_v43 = vmul.f32 %v4240_v63, %v11745_v6  ;;  %v4258_v22 = vmul.f32 %v9442_v41, %v11764_v32  ;;  %9449 = vrcp.f32 %v11799_v2  ;;  %vm4263_vm9 = vweird.f32 %v9442_v41 }
 0x888   : > { %v4538_v38 = vmul.f32 %v4474_v18, %v4424_v60  ;;  %v4245_v52 = vmul.f32 %v9438_v49, %v4244_v58  ;;  %v4281_v44 = vand.u32 2147483647, %v11781_v13  ;;  %vm4264_vm12 = vmor %vm4262_vm10, %vm4263_vm9  ;;  %v4283_v48 = vand.u32 2147483648, %v11781_v13 }
 0x889   : > { %v4539_v34 = vmul.f32 %v4515_v3, %v4425_v43  ;;  %v4259_v11 = vsub.f32 1.0, %v4258_v22  ;;  %v11805_v62 = vpop.f32.mrf.mxu0  ;;  %v11807_v6 = vpop.f32.mrf.mxu1  ;;  %vm4277_vm13 = vweird.f32 %v11781_v13  ;;  %v4298_v19 = vand.u32 2147483648, %v11799_v2 }
 0x88a   : > { %v9444_v55 = vpop.eup %9443  ;;  %v4246_v42 = vadd.f32 %v9438_v49, %v4245_v52  ;;  %4603 = vmatmul.f32.gmra.mxu0 %v4538_v38  ;;  %v8785_v56 = vmul.f32 -1.442695, %v11805_v62  ;;  %v8786_v51 = vmul.f32 -1.442695, %v11807_v6  ;;  %vm11834_vm15 = vcmp.eq.f32.partialorder %v4281_v44, 8.507059e+37  ;;  %v4480_v38 = vpop.f32.mrf.mxu2 }
 0x88b   : > { %v9446_v24 = vpop.eup %9445  ;;  %v4260_v35 = vmul.f32 %v9442_v41, %v4259_v11  ;;  %v11814_v5 = vadd.f32 1.0, %v9444_v55  ;;  %4644 = vmatmul.f32.gmra.mxu1 %v4539_v34  ;;  %vm4292_vm3 = vweird.f32 %v11799_v2  ;;  %v4296_v53 = vand.u32 2147483647, %v11799_v2 }
 0x88c   : > { %v4250_v30 = vsel %vm4249_vm8, %v9438_v49, %v4246_v42  ;;  %v4273_v18 = vmul.f32 %v9446_v24, %v11781_v13  ;;  %v9448_v49 = vpop.eup %9447  ;;  %vm4278_vm14 = vweird.f32 %v9446_v24  ;;  %v4299_v11 = vor.u32 1.1754944e-38, %v4298_v19 }
 0x88d   : > { %v4255_v47 = vsel %vm11801_vm7, %v4254_v16, %v4250_v30  ;;  %v4261_v23 = vadd.f32 %v9442_v41, %v4260_v35  ;;  %9451 = vrcp.f32 %v11814_v5  ;;  %v9450_v25 = vpop.eup %9449  ;;  %v11842_v60 = vadd.f32 1.0, %v9448_v49  ;;  %vm4279_vm2 = vmor %vm4277_vm13, %vm4278_vm14  ;;  %v4521_v36 = vpop.f32.mrf.mxu3 }
 0x88e   : > { %v4426_v14 = vmul.f32 %v4255_v47, %v11749_v39  ;;  %v4274_v32 = vsub.f32 1.0, %v4273_v18  ;;  %9453 = vpow2.f32 %v8785_v56  ;;  %v4288_v29 = vmul.f32 %v9450_v25, %v11799_v2 }
 0x88f   : > { %v4265_v61 = vsel %vm4264_vm12, %v9442_v41, %v4261_v23  ;;  %v4284_v41 = vor.u32 1.1754944e-38, %v4283_v48  ;;  %9455 = vpow2.f32 %v8786_v51  ;;  %vm4293_vm4 = vweird.f32 %v9450_v25 }
 0x890   : > { %v4270_v17 = vsel %vm11818_vm11, %v4269_v21, %v4265_v61  ;;  %v4540_v3 = vmul.f32 %v4477_v4, %v4426_v14  ;;  %v4275_v28 = vmul.f32 %v9446_v24, %v4274_v32  ;;  %9457 = vrcp.f32 %v11842_v60  ;;  %vm4294_vm5 = vmor %vm4292_vm3, %vm4293_vm4 }
 0x891   : > { %v4427_v39 = vmul.f32 %v4270_v17, %v11751_v12  ;;  %v11840_v9 = vpop.f32.mrf.mxu0  ;;  %v4289_v12 = vsub.f32 1.0, %v4288_v29  ;;  %v11848_v43 = vpop.f32.mrf.mxu1  ;;  %v4313_v35 = vand.u32 2147483648, %v11814_v5  ;;  %vm4297_vm7 = vcmp.eq.f32.partialorder %v4296_v53, 8.507059e+37 }
 0x892   : > { %v4276_v26 = vadd.f32 %v9446_v24, %v4275_v28  ;;  %4606 = vmatmul.f32.gmra.mxu0 %v4540_v3  ;;  %v8787_v57 = vmul.f32 -1.442695, %v11840_v9  ;;  %v8788_v1 = vmul.f32 -1.442695, %v11848_v43  ;;  %vm4307_vm8 = vweird.f32 %v11814_v5  ;;  %v4483_v28 = vpop.f32.mrf.mxu2 }
 0x893   : > { %v9452_v63 = vpop.eup %9451  ;;  %v4541_v58 = vmul.f32 %v4518_v15, %v4427_v39  ;;  %v4290_v45 = vmul.f32 %v9450_v25, %v4289_v12  ;;  %v4314_v21 = vor.u32 1.1754944e-38, %v4313_v35  ;;  %vm4322_vm12 = vweird.f32 %v11842_v60 }
 0x894   : > { %v4280_v22 = vsel %vm4279_vm2, %v9446_v24, %v4276_v26  ;;  %v4303_v52 = vmul.f32 %v9452_v63, %v11814_v5  ;;  %v9454_v34 = vpop.eup %9453  ;;  %v4311_v24 = vand.u32 2147483647, %v11814_v5  ;;  %9459 = vpow2.f32 %v8787_v57 }
 0x895   : > { %v4285_v13 = vsel %vm11834_vm15, %v4284_v41, %v4280_v22  ;;  %4647 = vmatmul.f32.gmra.mxu1 %v4541_v58  ;;  %v11856_v16 = vadd.f32 1.0, %v9454_v34  ;;  %v4291_v4 = vadd.f32 %v9450_v25, %v4290_v45  ;;  %v9456_v56 = vpop.eup %9455  ;;  %vm4308_vm6 = vweird.f32 %v9452_v63 }
 0x896   : > { %v4428_v55 = vmul.f32 %v4285_v13, %v11755_v8  ;;  %v4304_v42 = vsub.f32 1.0, %v4303_v52  ;;  %v9458_v47 = vpop.eup %9457  ;;  %v11865_v14 = vadd.f32 1.0, %v9456_v56  ;;  %vm4309_vm9 = vmor %vm4307_vm8, %vm4308_vm6  ;;  %vm4312_vm10 = vcmp.eq.f32.partialorder %v4311_v24, 8.507059e+37 }
 0x897   : > { %9461 = vrcp.f32 %v11856_v16  ;;  %v4295_v8 = vsel %vm4294_vm5, %v9450_v25, %v4291_v4  ;;  %v4318_v15 = vmul.f32 %v9458_v47, %v11842_v60  ;;  %v4326_v25 = vand.u32 2147483647, %v11842_v60 }
 0x898   : > { %v4542_v30 = vmul.f32 %v4480_v38, %v4428_v55  ;;  %v4305_v18 = vmul.f32 %v9452_v63, %v4304_v42  ;;  %v4300_v23 = vsel %vm4297_vm7, %v4299_v11, %v4295_v8  ;;  %9463 = vpow2.f32 %v8788_v1  ;;  %v4524_v38 = vpop.f32.mrf.mxu3 }
 0x899   : > { %v4429_v2 = vmul.f32 %v4300_v23, %v11757_v59  ;;  %v11869_v32 = vpop.f32.mrf.mxu0  ;;  %9465 = vrcp.f32 %v11865_v14  ;;  %v4319_v51 = vsub.f32 1.0, %v4318_v15  ;;  %v4328_v59 = vand.u32 2147483648, %v11842_v60  ;;  %v11879_v26 = vpop.f32.mrf.mxu1 }
 0x89a   : > { %v4306_v44 = vadd.f32 %v9452_v63, %v4305_v18  ;;  %4609 = vmatmul.f32.gmra.mxu0 %v4542_v30  ;;  %v9460_v5 = vpop.eup %9459  ;;  %v8789_v10 = vmul.f32 -1.442695, %v11869_v32  ;;  %vm4323_vm11 = vweird.f32 %v9458_v47  ;;  %vm4327_vm13 = vcmp.eq.f32.partialorder %v4326_v25, 8.507059e+37  ;;  %v4486_v23 = vpop.f32.mrf.mxu2 }
 0x89b   : > { %v4543_v49 = vmul.f32 %v4521_v36, %v4429_v2  ;;  %v11875_v39 = vadd.f32 1.0, %v9460_v5  ;;  %v4320_v29 = vmul.f32 %v9458_v47, %v4319_v51  ;;  %v4343_v57 = vand.u32 2147483648, %v11856_v16  ;;  %vm4324_vm14 = vmor %vm4322_vm12, %vm4323_vm11 }
 0x89c   : > { %v4310_v48 = vsel %vm4309_vm9, %v9452_v63, %v4306_v44  ;;  %v4329_v53 = vor.u32 1.1754944e-38, %v4328_v59  ;;  %v8790_v34 = vmul.f32 -1.442695, %v11879_v26  ;;  %vm4337_vm2 = vweird.f32 %v11856_v16 }
 0x89d   : > { %v4315_v61 = vsel %vm4312_vm10, %v4314_v21, %v4310_v48  ;;  %v9462_v17 = vpop.eup %9461  ;;  %4650 = vmatmul.f32.gmra.mxu1 %v4543_v49  ;;  %9467 = vrcp.f32 %v11875_v39  ;;  %v4321_v58 = vadd.f32 %v9458_v47, %v4320_v29  ;;  %v4344_v4 = vor.u32 1.1754944e-38, %v4343_v57 }
 0x89e   : > { %v4430_v3 = vmul.f32 %v4315_v61, %v11767_v46  ;;  %v4333_v19 = vmul.f32 %v9462_v17, %v11856_v16  ;;  %v9464_v41 = vpop.eup %9463  ;;  %v4341_v46 = vand.u32 2147483647, %v11856_v16  ;;  %9469 = vpow2.f32 %v8789_v10 }
 0x89f   : > { %v9466_v22 = vpop.eup %9465  ;;  %v11885_v52 = vadd.f32 1.0, %v9464_v41  ;;  %v4325_v60 = vsel %vm4324_vm14, %v9458_v47, %v4321_v58  ;;  %vm4338_vm15 = vweird.f32 %v9462_v17  ;;  %v4356_v56 = vand.u32 2147483647, %v11865_v14 }
 0x8a0   : > { %v4544_v63 = vmul.f32 %v4483_v28, %v4430_v3  ;;  %v4334_v12 = vsub.f32 1.0, %v4333_v19  ;;  %v4348_v45 = vmul.f32 %v9466_v22, %v11865_v14  ;;  %v4330_v11 = vsel %vm4327_vm13, %v4329_v53, %v4325_v60  ;;  %vm4339_vm4 = vmor %vm4337_vm2, %vm4338_vm15  ;;  %v4527_v59 = vpop.f32.mrf.mxu3 }
 0x8a1   : > { %vm11890_vm3 = vcmp.eq.f32.partialorder %v4341_v46, 8.507059e+37  ;;  %9471 = vrcp.f32 %v11885_v52  ;;  %v4431_v42 = vmul.f32 %v4330_v11, %v11769_v54  ;;  %vm4353_vm5 = vweird.f32 %v9466_v22 }
 0x8a2   : > { %4612 = vmatmul.f32.gmra.mxu0 %v4544_v63  ;;  %v4335_v13 = vmul.f32 %v9462_v17, %v4334_v12  ;;  %v4349_v24 = vsub.f32 1.0, %v4348_v45  ;;  %v4358_v30 = vand.u32 2147483648, %v11865_v14  ;;  %9473 = vpow2.f32 %v8790_v34  ;;  %v4489_v34 = vpop.f32.mrf.mxu2 }
 0x8a3   : > { %v9468_v35 = vpop.eup %9467  ;;  %v4545_v16 = vmul.f32 %v4524_v38, %v4431_v42  ;;  %vm4352_vm6 = vweird.f32 %v11865_v14  ;;  %v4371_v44 = vand.u32 2147483647, %v11875_v39  ;;  %vm4357_vm8 = vcmp.eq.f32.partialorder %v4356_v56, 8.507059e+37 }
 0x8a4   : > { %v4336_v1 = vadd.f32 %v9462_v17, %v4335_v13  ;;  %v4350_v18 = vmul.f32 %v9466_v22, %v4349_v24  ;;  %v4363_v8 = vmul.f32 %v9468_v35, %v11875_v39  ;;  %v9470_v47 = vpop.eup %9469  ;;  %vm4354_vm7 = vmor %vm4352_vm6, %vm4353_vm5  ;;  %v4359_v49 = vor.u32 1.1754944e-38, %v4358_v30 }
 0x8a5   : > { %v11904_v48 = vadd.f32 1.0, %v9470_v47  ;;  %4653 = vmatmul.f32.gmra.mxu1 %v4545_v16  ;;  %vm4368_vm9 = vweird.f32 %v9468_v35  ;;  %v4373_v61 = vand.u32 2147483648, %v11875_v39  ;;  %vm4367_vm10 = vweird.f32 %v11875_v39 }
 0x8a6   : > { %v4340_v36 = vsel %vm4339_vm4, %v9462_v17, %v4336_v1  ;;  %v4351_v21 = vadd.f32 %v9466_v22, %v4350_v18  ;;  %v4364_v15 = vsub.f32 1.0, %v4363_v8  ;;  %vm4372_vm11 = vcmp.eq.f32.partialorder %v4371_v44, 8.507059e+37  ;;  %vm4369_vm12 = vmor %vm4367_vm10, %vm4368_vm9 }
 0x8a7   : > { %v4345_v54 = vsel %vm11890_vm3, %v4344_v4, %v4340_v36  ;;  %v9472_v5 = vpop.eup %9471  ;;  %9475 = vrcp.f32 %v11904_v48  ;;  %v4374_v19 = vor.u32 1.1754944e-38, %v4373_v61  ;;  %v4386_v41 = vand.u32 2147483647, %v11885_v52 }
 0x8a8   : > { %v4432_v2 = vmul.f32 %v4345_v54, %v11805_v62  ;;  %v4355_v51 = vsel %vm4354_vm7, %v9466_v22, %v4351_v21  ;;  %v4365_v25 = vmul.f32 %v9468_v35, %v4364_v15  ;;  %v4378_v17 = vmul.f32 %v9472_v5, %v11885_v52  ;;  %v9474_v3 = vpop.eup %9473 }
 0x8a9   : > { %v4360_v62 = vsel %vm4357_vm8, %v4359_v49, %v4355_v51  ;;  %v4388_v63 = vand.u32 2147483648, %v11885_v52  ;;  %v4181_v46 = vadd.f32 1.0, %v9474_v3  ;;  %vm4383_vm13 = vweird.f32 %v9472_v5 }
 0x8aa   : > { %v4546_v14 = vmul.f32 %v4486_v23, %v4432_v2  ;;  %v4433_v28 = vmul.f32 %v4360_v62, %v11807_v6  ;;  %v4366_v10 = vadd.f32 %v9468_v35, %v4365_v25  ;;  %v4379_v29 = vsub.f32 1.0, %v4378_v17  ;;  %v4492_v21 = vpop.f32.mrf.mxu2  ;;  %v11925_v25 = vld [vmem:[%s10108_s2] sm:$0xff] }
 0x8ab   : > { %9477 = vrcp.f32 %v4181_v46  ;;  %vm4382_vm14 = vweird.f32 %v11885_v52  ;;  %v4389_v38 = vor.u32 1.1754944e-38, %v4388_v63  ;;  %vm4387_vm2 = vcmp.eq.f32.partialorder %v4386_v41, 8.507059e+37 }
 0x8ac   : > { %4615 = vmatmul.f32.gmra.mxu0 %v4546_v14  ;;  %v4547_v58 = vmul.f32 %v4527_v59, %v4433_v28  ;;  %v4370_v12 = vsel %vm4369_vm12, %v9468_v35, %v4366_v10  ;;  %v4380_v57 = vmul.f32 %v9472_v5, %v4379_v29  ;;  %vm4384_vm15 = vmor %vm4382_vm14, %vm4383_vm13  ;;  %v4401_v4 = vand.u32 2147483647, %v11904_v48 }
 0x8ad   : > { %v4375_v39 = vsel %vm4372_vm11, %v4374_v19, %v4370_v12  ;;  %v9476_v53 = vpop.eup %9475  ;;  %v4403_v52 = vand.u32 2147483648, %v11904_v48  ;;  %vm4397_vm4 = vweird.f32 %v11904_v48  ;;  %v4418_v36 = vand.u32 2147483648, %v4181_v46 }
 0x8ae   : > { %v4434_v6 = vmul.f32 %v4375_v39, %v11840_v9  ;;  %v4381_v22 = vadd.f32 %v9472_v5, %v4380_v57  ;;  %4656 = vmatmul.f32.gmra.mxu1 %v4547_v58  ;;  %v4393_v45 = vmul.f32 %v9476_v53, %v11904_v48  ;;  %v4530_v9 = vpop.f32.mrf.mxu3  ;;  %vm4398_vm3 = vweird.f32 %v9476_v53 }
 0x8af   : > { %vm4399_vm5 = vmor %vm4397_vm4, %vm4398_vm3  ;;  %vm4402_vm6 = vcmp.eq.f32.partialorder %v4401_v4, 8.507059e+37  ;;  %v4416_v47 = vand.u32 2147483647, %v4181_v46  ;;  %vm4412_vm8 = vweird.f32 %v4181_v46  ;;  %v4419_v2 = vor.u32 1.1754944e-38, %v4418_v36 }
 0x8b0   : > { %v4385_v60 = vsel %vm4384_vm15, %v9472_v5, %v4381_v22  ;;  %v4548_v13 = vmul.f32 %v4489_v34, %v4434_v6  ;;  %v4394_v42 = vsub.f32 1.0, %v4393_v45 }
 0x8b1   : > { %v4390_v11 = vsel %vm4387_vm2, %v4389_v38, %v4385_v60  ;;  %v9478_v1 = vpop.eup %9477  ;;  %vm4417_vm10 = vcmp.eq.f32.partialorder %v4416_v47, 8.507059e+37 }
 0x8b2   : > { %v4435_v55 = vmul.f32 %v4390_v11, %v11848_v43  ;;  %v4395_v35 = vmul.f32 %v9476_v53, %v4394_v42  ;;  %v4408_v56 = vmul.f32 %v9478_v1, %v4181_v46  ;;  %v4404_v43 = vor.u32 1.1754944e-38, %v4403_v52 }
 0x8b3   : > { %vm4413_vm7 = vweird.f32 %v9478_v1 }
 0x8b4   : > { %4618 = vmatmul.f32.gmra.mxu0 %v4548_v13  ;;  %v4549_v24 = vmul.f32 %v4530_v9, %v4435_v55  ;;  %v4396_v30 = vadd.f32 %v9476_v53, %v4395_v35  ;;  %v4409_v16 = vsub.f32 1.0, %v4408_v56  ;;  %vm4414_vm9 = vmor %vm4412_vm8, %vm4413_vm7 }
 0x8b6   : > { %4659 = vmatmul.f32.gmra.mxu1 %v4549_v24  ;;  %v4400_v18 = vsel %vm4399_vm5, %v9476_v53, %v4396_v30  ;;  %v4410_v8 = vmul.f32 %v9478_v1, %v4409_v16  ;;  %v4533_v61 = vpop.f32.mrf.mxu3 }
 0x8b7   : > { %v4405_v54 = vsel %vm4402_vm6, %v4404_v43, %v4400_v18 }
 0x8b8   : > { %v4436_v23 = vmul.f32 %v4405_v54, %v11869_v32  ;;  %v4411_v44 = vadd.f32 %v9478_v1, %v4410_v8  ;;  %v4666_v32 = vperm.slane %v11925_v25, 5 }
 0x8ba   : > { %v4415_v15 = vsel %vm4414_vm9, %v9478_v1, %v4411_v44  ;;  %v4550_v48 = vmul.f32 %v4492_v21, %v4436_v23 }
 0x8bb   : > { %v4420_v5 = vsel %vm4417_vm10, %v4419_v2, %v4415_v15 }
 0x8bc   : > { %v4437_v49 = vmul.f32 %v4420_v5, %v11879_v26  ;;  %4621 = vmatmul.f32.gmra.mxu0 %v4550_v48  ;;  %v4844_v5 = vld [vmem:[%s13999_s1 + $0x38] sm:$0xff] }
 0x8bd   : > { %4877 = vmatpush.msra.mxu2 %v4844_v5 }
 0x8be   : > { %v4551_v51 = vmul.f32 %v4533_v61, %v4437_v49  ;;  %v4917_v49 = vld [vmem:[%s14000_s16 + $0x38] sm:$0xff] }
 0x8bf   : > { %v4966_v61 = vld [vmem:[%s14001_s26 + $0x38] sm:$0xff]  ;;  %4926 = vmatpush.msra.mxu3 %v4917_v49 }
 0x8c0   : > { %4662 = vmatmul.f32.gmra.mxu1 %v4551_v51  ;;  %v5015_v51 = vld [vmem:[%s14003_s11 + $0x38] sm:$0xff]  ;;  %4975 = vmatpush.msrb.mxu0 %v4966_v61 }
 0x8c1   : > { %5024 = vmatpush.msrb.mxu1 %v5015_v51 }
 0x8df   : > { %v4601_v14 = vpop.f32.mrf.mxu0 }
 0x8e0   : > { %v4642_v17 = vpop.f32.mrf.mxu1 }
 0x8e1   : > { %v4643_v3 = vadd.f32 %v4642_v17, %v4601_v14  ;;  %v4916_v14 = vld [vmem:[%s14000_s16 + $0x30] sm:$0xff] }
 0x8e2   : > { %v5014_v17 = vld [vmem:[%s14003_s11 + $0x30] sm:$0xff]  ;;  %4927 = vmatpush.msra.mxu3 %v4916_v14 }
 0x8e3   : > { %v4667_v62 = vmul.f32 %v4666_v32, %v4643_v3  ;;  %v4842_v3 = vld [vmem:[%s13999_s1 + $0x28] sm:$0xff]  ;;  %5025 = vmatpush.msrb.mxu1 %v5014_v17 }
 0x8e5   : > { %v11929_v59 = vadd.f32 %v4667_v62, %v11530_v0  ;;  %v4915_v62 = vld [vmem:[%s14000_s16 + $0x28] sm:$0xff] }
 0x8e6   : > { %4928 = vmatpush.msra.mxu3 %v4915_v62 }
 0x8e7   : > { %v4683_v28 = vmul.f32 %v11929_v59, %v11929_v59 }
 0x8e9   : > { %v4691_v26 = vsel %vm1192_vm1, %v4683_v28, 0.0  ;;  %v4964_v28 = vld [vmem:[%s14001_s26 + $0x28] sm:$0xff] }
 0x8ea   : > { %4692 = vadd.xlane.f32.xlu1 %v4691_v26  ;;  %v5013_v26 = vld [vmem:[%s14003_s11 + $0x28] sm:$0xff] }
 0x8eb   : > { %5026 = vmatpush.msrb.mxu1 %v5013_v26 }
 0x907   : > { %v4604_v10 = vpop.f32.mrf.mxu0 }
 0x908   : > { %v4645_v29 = vpop.f32.mrf.mxu1 }
 0x909   : > { %v4646_v19 = vadd.f32 %v4645_v29, %v4604_v10  ;;  %v4841_v10 = vld [vmem:[%s13999_s1 + $0x20] sm:$0xff] }
 0x90a   : > { %v4914_v29 = vld [vmem:[%s14000_s16 + $0x20] sm:$0xff] }
 0x90b   : > { %v4668_v41 = vmul.f32 %v4666_v32, %v4646_v19  ;;  %v4963_v19 = vld [vmem:[%s14001_s26 + $0x20] sm:$0xff]  ;;  %4929 = vmatpush.msra.mxu3 %v4914_v29 }
 0x90d   : > { %v11935_v63 = vadd.f32 %v4668_v41, %v11541_v27  ;;  %v5012_v41 = vld [vmem:[%s14003_s11 + $0x20] sm:$0xff] }
 0x90e   : > { %5027 = vmatpush.msrb.mxu1 %v5012_v41 }
 0x90f   : > { %v4607_v46 = vpop.f32.mrf.mxu0  ;;  %v4684_v58 = vmul.f32 %v11935_v63, %v11935_v63 }
 0x911   : > { %v4694_v0 = vsel %vm1192_vm1, %v4684_v58, 0.0  ;;  %v4840_v58 = vld [vmem:[%s13999_s1 + $0x18] sm:$0xff] }
 0x912   : > { %v4648_v12 = vpop.f32.mrf.mxu1  ;;  %4695 = vadd.xlane.f32.xlu2 %v4694_v0  ;;  %v4913_v0 = vld [vmem:[%s14000_s16 + $0x18] sm:$0xff] }
 0x913   : > { %v4649_v57 = vadd.f32 %v4648_v12, %v4607_v46  ;;  %4930 = vmatpush.msra.mxu3 %v4913_v0 }
 0x915   : > { %v4669_v39 = vmul.f32 %v4666_v32, %v4649_v57  ;;  %v4962_v57 = vld [vmem:[%s14001_s26 + $0x18] sm:$0xff] }
 0x917   : > { %v11941_v6 = vadd.f32 %v4669_v39, %v11550_v33  ;;  %v4610_v22 = vpop.f32.mrf.mxu0  ;;  %v5011_v39 = vld [vmem:[%s14003_s11 + $0x18] sm:$0xff] }
 0x918   : > { %5028 = vmatpush.msrb.mxu1 %v5011_v39 }
 0x919   : > { %v4685_v53 = vmul.f32 %v11941_v6, %v11941_v6 }
 0x91a   : > { %v4651_v38 = vpop.f32.mrf.mxu1 }
 0x91b   : > { %v4697_v27 = vsel %vm1192_vm1, %v4685_v53, 0.0  ;;  %v4652_v34 = vadd.f32 %v4651_v38, %v4610_v22  ;;  %v4839_v22 = vld [vmem:[%s13999_s1 + $0x10] sm:$0xff] }
 0x91c   : > { %4698 = vadd.xlane.f32.xlu0 %v4697_v27  ;;  %v4912_v53 = vld [vmem:[%s14000_s16 + $0x10] sm:$0xff] }
 0x91d   : > { %v4670_v60 = vmul.f32 %v4666_v32, %v4652_v34  ;;  %v4961_v38 = vld [vmem:[%s14001_s26 + $0x10] sm:$0xff]  ;;  %4931 = vmatpush.msra.mxu3 %v4912_v53 }
 0x91e   : > { %v5010_v34 = vld [vmem:[%s14003_s11 + $0x10] sm:$0xff] }
 0x91f   : > { %v4613_v13 = vpop.f32.mrf.mxu0  ;;  %v11947_v45 = vadd.f32 %v4670_v60, %v11559_v40  ;;  %v4838_v60 = vld [vmem:[%s13999_s1 + $0x8] sm:$0xff]  ;;  %5029 = vmatpush.msrb.mxu1 %v5010_v34 }
 0x921   : > { %v4686_v11 = vmul.f32 %v11947_v45, %v11947_v45 }
 0x922   : > { %v4654_v55 = vpop.f32.mrf.mxu1 }
 0x923   : > { %v4700_v33 = vsel %vm1192_vm1, %v4686_v11, 0.0  ;;  %v4655_v42 = vadd.f32 %v4654_v55, %v4613_v13  ;;  %v4911_v13 = vld [vmem:[%s14000_s16 + $0x8] sm:$0xff]  ;;  %v4837_v55 = vld [vmem:[%s13999_s1] sm:$0xff] }
 0x924   : > { %4701 = vadd.xlane.f32.xlu1 %v4700_v33  ;;  %v4960_v11 = vld [vmem:[%s14001_s26 + $0x8] sm:$0xff]  ;;  %4932 = vmatpush.msra.mxu3 %v4911_v13 }
 0x925   : > { %v4671_v1 = vmul.f32 %v4666_v32, %v4655_v42  ;;  %v5009_v33 = vld [vmem:[%s14003_s11 + $0x8] sm:$0xff]  ;;  %v4910_v42 = vld [vmem:[%s14000_s16] sm:$0xff] }
 0x926   : > { %5030 = vmatpush.msrb.mxu1 %v5009_v33  ;;  %4933 = vmatpush.msra.mxu3 %v4910_v42 }
 0x927   : > { %v11953_v4 = vadd.f32 %v4671_v1, %v11568_v50  ;;  %v4959_v1 = vld [vmem:[%s14001_s26] sm:$0xff] }
 0x929   : > { %v4616_v9 = vpop.f32.mrf.mxu0  ;;  %13997 = vst [vmem:[#allocation23_spill] sm:$0xff] %v11953_v4  ;;  %v4687_v52 = vmul.f32 %v11953_v4, %v11953_v4 }
 0x92b   : > { %v4657_v24 = vpop.f32.mrf.mxu1  ;;  %v4703_v40 = vsel %vm1192_vm1, %v4687_v52, 0.0 }
 0x92c   : > { %v4658_v35 = vadd.f32 %v4657_v24, %v4616_v9  ;;  %4704 = vadd.xlane.f32.xlu2 %v4703_v40  ;;  %v5008_v9 = vld [vmem:[%s14003_s11] sm:$0xff]  ;;  %v9753_v24 = vld [vmem:[%s9827_s13 + $0x38] sm:$0xff]  ;;  %v9754_v40 = vld [vmem:[%s9827_s13 + $0x30] sm:$0xff] }
 0x92d   : > { %5031 = vmatpush.msrb.mxu1 %v5008_v9  ;;  %5146 = vmatpush.msrb.mxu3 %v9753_v24 }
 0x92e   : > { %v4672_v56 = vmul.f32 %v4666_v32, %v4658_v35 }
 0x92f   : > { %5147 = vmatpush.msrb.mxu3 %v9754_v40 }
 0x930   : > { %v11959_v30 = vadd.f32 %v4672_v56, %v11578_v31 }
 0x931   : > { %v4619_v16 = vpop.f32.mrf.mxu0 }
 0x932   : > { %13998 = vst [vmem:[#allocation24_spill] sm:$0xff] %v11959_v30  ;;  %v4688_v43 = vmul.f32 %v11959_v30, %v11959_v30 }
 0x933   : > { %v4660_v36 = vpop.f32.mrf.mxu1 }
 0x934   : > { %v4661_v18 = vadd.f32 %v4660_v36, %v4619_v16  ;;  %v4706_v50 = vsel %vm1192_vm1, %v4688_v43, 0.0  ;;  %v9755_v16 = vld [vmem:[%s9827_s13 + $0x28] sm:$0xff]  ;;  %v9756_v36 = vld [vmem:[%s9827_s13 + $0x20] sm:$0xff] }
 0x935   : > { %4707 = vadd.xlane.f32.xlu0 %v4706_v50  ;;  %5148 = vmatpush.msrb.mxu3 %v9755_v16  ;;  %v9757_v50 = vld [vmem:[%s9827_s13 + $0x18] sm:$0xff] }
 0x936   : > { %v4673_v8 = vmul.f32 %v4666_v32, %v4661_v18 }
 0x937   : > { %5149 = vmatpush.msrb.mxu3 %v9756_v36 }
 0x938   : > { %v11965_v47 = vadd.f32 %v4673_v8, %v11588_v7 }
 0x939   : > { %v4622_v23 = vpop.f32.mrf.mxu0  ;;  %5150 = vmatpush.msrb.mxu3 %v9757_v50 }
 0x93a   : > { %14002 = vst [vmem:[#allocation25_spill] sm:$0xff] %v11965_v47  ;;  %v4689_v31 = vmul.f32 %v11965_v47, %v11965_v47 }
 0x93c   : > { %v4709_v54 = vsel %vm1192_vm1, %v4689_v31, 0.0  ;;  %v12015_v31 = vperm.slane %v11925_v25, 7 }
 0x93d   : > { %4710 = vadd.xlane.f32.xlu1 %v4709_v54  ;;  %v4663_v44 = vpop.f32.mrf.mxu1  ;;  %v9758_v54 = vld [vmem:[%s9827_s13 + $0x10] sm:$0xff] }
 0x93e   : > { %v4664_v2 = vadd.f32 %v4663_v44, %v4622_v23  ;;  %5151 = vmatpush.msrb.mxu3 %v9758_v54  ;;  %v12019_v44 = vperm.slane %v11925_v25, 6 }
 0x940   : > { %v4674_v21 = vmul.f32 %v4666_v32, %v4664_v2  ;;  %v4965_v32 = vld [vmem:[%s14001_s26 + $0x30] sm:$0xff] }
 0x941   : > { %4976 = vmatpush.msrb.mxu0 %v4965_v32 }
 0x942   : > { %v11971_v15 = vadd.f32 %v4674_v21, %v11596_v37  ;;  %v4843_v37 = vld [vmem:[%s13999_s1 + $0x30] sm:$0xff]  ;;  %v9759_v21 = vld [vmem:[%s9827_s13 + $0x8] sm:$0xff]  ;;  %s14011_s1 = smov 112  }
 0x943   : > { %4878 = vmatpush.msra.mxu2 %v4843_v37  ;;  %4977 = vmatpush.msrb.mxu0 %v4964_v28 }
 0x944   : > { %14004 = vst [vmem:[#allocation26_spill] sm:$0xff] %v11971_v15  ;;  %v4690_v7 = vmul.f32 %v11971_v15, %v11971_v15  ;;  %5152 = vmatpush.msrb.mxu3 %v9759_v21 }
 0x945   : > { %4879 = vmatpush.msra.mxu2 %v4842_v3  ;;  %4978 = vmatpush.msrb.mxu0 %v4963_v19 }
 0x946   : > { %v4712_v48 = vsel %vm1192_vm1, %v4690_v7, 0.0 }
 0x947   : > { %4713 = vadd.xlane.f32.xlu2 %v4712_v48  ;;  %4880 = vmatpush.msra.mxu2 %v4841_v10  ;;  %v9760_v48 = vld [vmem:[%s9827_s13] sm:$0xff] }
 0x948   : > { %4979 = vmatpush.msrb.mxu0 %v4962_v57  ;;  %5153 = vmatpush.msrb.mxu3 %v9760_v48 }
 0x949   : > { %4881 = vmatpush.msra.mxu2 %v4840_v58 }
 0x94a   : > { %4980 = vmatpush.msrb.mxu0 %v4961_v38 }
 0x94b   : > { %4882 = vmatpush.msra.mxu2 %v4839_v22 }
 0x94c   : > { %4981 = vmatpush.msrb.mxu0 %v4960_v11 }
 0x94d   : > { %4883 = vmatpush.msra.mxu2 %v4838_v60 }
 0x94e   : > { %4982 = vmatpush.msrb.mxu0 %v4959_v1 }
 0x94f   : > { %4884 = vmatpush.msra.mxu2 %v4837_v55 }
 0x950   : > { %5299 = vmatpush.msra.mxu0 %v9753_v24 }
 0x952   : > { %5300 = vmatpush.msra.mxu0 %v9754_v40 }
 0x954   : > { %5301 = vmatpush.msra.mxu0 %v9755_v16 }
 0x956   : > { %5302 = vmatpush.msra.mxu0 %v9756_v36 }
 0x958   : > { %5303 = vmatpush.msra.mxu0 %v9757_v50 }
 0x95a   : > { %5304 = vmatpush.msra.mxu0 %v9758_v54 }
 0x95c   : > { %5305 = vmatpush.msra.mxu0 %v9759_v21 }
 0x95d   : > { %v4693_v46 = vpop.xlane.xlu1 %4692 }
 0x95e   : > { %v4715_v12 = vmul.f32 %v4693_v46, %v13983_v20  ;;  %5306 = vmatpush.msra.mxu0 %v9760_v48 }
 0x960   : > { %v4723_v27 = vadd.f32 1e-06, %v4715_v12 }
 0x962   : > { %9479 = vrsqrt.f32 %v4723_v27  ;;  %vm4737_vm12 = vweird.f32 %v4723_v27 }
 0x968   : > { %v9480_v52 = vpop.eup %9479 }
 0x969   : > { %v4732_v35 = vmul.f32 %v9480_v52, %v4723_v27  ;;  %vm4738_vm11 = vweird.f32 %v9480_v52 }
 0x96a   : > { %vm4739_vm13 = vmor %vm4737_vm12, %vm4738_vm11 }
 0x96b   : > { %v4733_v56 = vmul.f32 %v9480_v52, %v4732_v35 }
 0x96d   : > { %v4734_v43 = vmul.f32 0.5, %v4733_v56 }
 0x96f   : > { %v4735_v18 = vsub.f32 1.5, %v4734_v43 }
 0x971   : > { %v4736_v8 = vmul.f32 %v9480_v52, %v4735_v18 }
 0x973   : > { %v4740_v23 = vsel %vm4739_vm13, %v9480_v52, %v4736_v8 }
 0x974   : > { %v4811_v2 = vmul.f32 %v4740_v23, %v11929_v59 }
 0x976   : > { %v4820_v7 = vmul.f32 %v12015_v31, %v4811_v2 }
 0x978   : > { %v12026_v5 = vadd.f32 %v12019_v44, %v4820_v7 }
 0x97a   : > { %8807 = vmatmul.msk.f32.vlgmr.msra.gmra.mxu2 %vm1192_vm1, %v12026_v5  ;;  %8815 = vmatmul.msk.f32.vlgmr.msra.gmra.mxu3 %vm1192_vm1, %v12026_v5 }
 0x97b   : > { %8823 = vmatmul.msk.f32.vlgmr.msrb.gmra.mxu0 %vm1192_vm1, %v12026_v5  ;;  %8831 = vmatmul.msk.f32.vlgmr.msrb.gmra.mxu1 %vm1192_vm1, %v12026_v5 }
 0x985   : > { %v4696_v25 = vpop.xlane.xlu2 %4695 }
 0x986   : > { %v4716_v49 = vmul.f32 %v4696_v25, %v13983_v20 }
 0x988   : > { %v4724_v61 = vadd.f32 1e-06, %v4716_v49 }
 0x98a   : > { %9481 = vrsqrt.f32 %v4724_v61  ;;  %vm4747_vm15 = vweird.f32 %v4724_v61 }
 0x98f   : > { %v4699_v51 = vpop.xlane.xlu0 %4698 }
 0x990   : > { %v9482_v37 = vpop.eup %9481  ;;  %v4717_v14 = vmul.f32 %v4699_v51, %v13983_v20 }
 0x991   : > { %v4742_v32 = vmul.f32 %v9482_v37, %v4724_v61  ;;  %vm4748_vm14 = vweird.f32 %v9482_v37 }
 0x992   : > { %v4725_v17 = vadd.f32 1e-06, %v4717_v14  ;;  %vm4749_vm2 = vmor %vm4747_vm15, %vm4748_vm14  ;;  %v5063_v14 = vld [vmem:[%s14005_s10 + $0x30] sm:$0xff] }
 0x993   : > { %v4743_v3 = vmul.f32 %v9482_v37, %v4742_v32 }
 0x994   : > { %9483 = vrsqrt.f32 %v4725_v17  ;;  %vm4757_vm4 = vweird.f32 %v4725_v17 }
 0x995   : > { %v4744_v62 = vmul.f32 0.5, %v4743_v3  ;;  %v5062_v3 = vld [vmem:[%s14005_s10 + $0x28] sm:$0xff] }
 0x997   : > { %v4745_v28 = vsub.f32 1.5, %v4744_v62  ;;  %v4702_v10 = vpop.xlane.xlu1 %4701 }
 0x998   : > { %v4718_v19 = vmul.f32 %v4702_v10, %v13983_v20 }
 0x999   : > { %v4746_v26 = vmul.f32 %v9482_v37, %v4745_v28 }
 0x99a   : > { %v9484_v29 = vpop.eup %9483  ;;  %v4726_v0 = vadd.f32 1e-06, %v4718_v19 }
 0x99b   : > { %v4750_v41 = vsel %vm4749_vm2, %v9482_v37, %v4746_v26  ;;  %v4752_v46 = vmul.f32 %v9484_v29, %v4725_v17  ;;  %vm4758_vm3 = vweird.f32 %v9484_v29  ;;  %v5064_v37 = vld [vmem:[%s14005_s10 + $0x38] sm:$0xff]  ;;  %v5061_v26 = vld [vmem:[%s14005_s10 + $0x20] sm:$0xff] }
 0x99c   : > { %v4812_v58 = vmul.f32 %v4750_v41, %v11935_v63  ;;  %9485 = vrsqrt.f32 %v4726_v0  ;;  %vm4759_vm5 = vmor %vm4757_vm4, %vm4758_vm3  ;;  %vm4767_vm7 = vweird.f32 %v4726_v0  ;;  %5073 = vmatpush.msrb.mxu2 %v5064_v37 }
 0x99d   : > { %v4753_v12 = vmul.f32 %v9484_v29, %v4752_v46 }
 0x99e   : > { %v4821_v57 = vmul.f32 %v12015_v31, %v4812_v58  ;;  %5074 = vmatpush.msrb.mxu2 %v5063_v14 }
 0x99f   : > { %v4754_v39 = vmul.f32 0.5, %v4753_v12  ;;  %v4705_v38 = vpop.xlane.xlu2 %4704  ;;  %v5060_v12 = vld [vmem:[%s14005_s10 + $0x18] sm:$0xff] }
 0x9a0   : > { %v12042_v22 = vadd.f32 %v12019_v44, %v4821_v57  ;;  %v4719_v60 = vmul.f32 %v4705_v38, %v13983_v20  ;;  %5075 = vmatpush.msrb.mxu2 %v5062_v3 }
 0x9a1   : > { %v4755_v53 = vsub.f32 1.5, %v4754_v39 }
 0x9a2   : > { %8808 = vmatmul.msk.f32.gmra.mxu2 %vm1192_vm1, %v12042_v22  ;;  %8816 = vmatmul.msk.f32.gmra.mxu3 %vm1192_vm1, %v12042_v22  ;;  %v9486_v34 = vpop.eup %9485  ;;  %v4727_v55 = vadd.f32 1e-06, %v4719_v60 }
 0x9a3   : > { %v4756_v27 = vmul.f32 %v9484_v29, %v4755_v53  ;;  %8824 = vmatmul.msk.f32.gmra.mxu0 %vm1192_vm1, %v12042_v22  ;;  %8832 = vmatmul.msk.f32.gmra.mxu1 %vm1192_vm1, %v12042_v22  ;;  %v4762_v11 = vmul.f32 %v9486_v34, %v4726_v0  ;;  %vm4768_vm6 = vweird.f32 %v9486_v34 }
 0x9a4   : > { %9487 = vrsqrt.f32 %v4727_v55  ;;  %vm4769_vm8 = vmor %vm4767_vm7, %vm4768_vm6  ;;  %vm4777_vm10 = vweird.f32 %v4727_v55  ;;  %5076 = vmatpush.msrb.mxu2 %v5061_v26 }
 0x9a5   : > { %v4760_v13 = vsel %vm4759_vm5, %v9484_v29, %v4756_v27  ;;  %v4763_v42 = vmul.f32 %v9486_v34, %v4762_v11  ;;  %v5059_v27 = vld [vmem:[%s14005_s10 + $0x10] sm:$0xff] }
 0x9a6   : > { %v4813_v33 = vmul.f32 %v4760_v13, %v11941_v6  ;;  %5077 = vmatpush.msrb.mxu2 %v5060_v12  ;;  %v5058_v13 = vld [vmem:[%s14005_s10 + $0x8] sm:$0xff] }
 0x9a7   : > { %v4764_v9 = vmul.f32 0.5, %v4763_v42 }
 0x9a8   : > { %v4822_v1 = vmul.f32 %v12015_v31, %v4813_v33  ;;  %v4708_v35 = vpop.xlane.xlu0 %4707  ;;  %5078 = vmatpush.msrb.mxu2 %v5059_v27 }
 0x9a9   : > { %v4765_v24 = vsub.f32 1.5, %v4764_v9  ;;  %v4720_v40 = vmul.f32 %v4708_v35, %v13983_v20 }
 0x9aa   : > { %v12056_v52 = vadd.f32 %v12019_v44, %v4822_v1  ;;  %v9488_v16 = vpop.eup %9487  ;;  %5079 = vmatpush.msrb.mxu2 %v5058_v13  ;;  %v5057_v1 = vld [vmem:[%s14005_s10] sm:$0xff] }
 0x9ab   : > { %v4766_v56 = vmul.f32 %v9486_v34, %v4765_v24  ;;  %v4728_v43 = vadd.f32 1e-06, %v4720_v40  ;;  %v4772_v18 = vmul.f32 %v9488_v16, %v4727_v55  ;;  %vm4778_vm9 = vweird.f32 %v9488_v16 }
 0x9ac   : > { %8809 = vmatmul.msk.f32.gmra.mxu2 %vm1192_vm1, %v12056_v52  ;;  %8817 = vmatmul.msk.f32.gmra.mxu3 %vm1192_vm1, %v12056_v52  ;;  %vm4779_vm11 = vmor %vm4777_vm10, %vm4778_vm9 }
 0x9ad   : > { %8825 = vmatmul.msk.f32.gmra.mxu0 %vm1192_vm1, %v12056_v52  ;;  %8833 = vmatmul.msk.f32.gmra.mxu1 %vm1192_vm1, %v12056_v52  ;;  %v4770_v36 = vsel %vm4769_vm8, %v9486_v34, %v4766_v56  ;;  %9489 = vrsqrt.f32 %v4728_v43  ;;  %v4773_v8 = vmul.f32 %v9488_v16, %v4772_v18  ;;  %vm4787_vm13 = vweird.f32 %v4728_v43 }
 0x9ae   : > { %v4814_v50 = vmul.f32 %v4770_v36, %v11947_v45  ;;  %5080 = vmatpush.msrb.mxu2 %v5057_v1 }
 0x9af   : > { %v4774_v23 = vmul.f32 0.5, %v4773_v8 }
 0x9b0   : > { %v4823_v54 = vmul.f32 %v12015_v31, %v4814_v50  ;;  %v4711_v2 = vpop.xlane.xlu1 %4710 }
 0x9b1   : > { %v4721_v21 = vmul.f32 %v4711_v2, %v13983_v20  ;;  %v4775_v48 = vsub.f32 1.5, %v4774_v23 }
 0x9b2   : > { %v12071_v7 = vadd.f32 %v12019_v44, %v4823_v54 }
 0x9b3   : > { %v9490_v25 = vpop.eup %9489  ;;  %v4729_v49 = vadd.f32 1e-06, %v4721_v21  ;;  %v4776_v61 = vmul.f32 %v9488_v16, %v4775_v48 }
 0x9b4   : > { %8810 = vmatmul.msk.f32.gmra.mxu2 %vm1192_vm1, %v12071_v7  ;;  %8818 = vmatmul.msk.f32.gmra.mxu3 %vm1192_vm1, %v12071_v7  ;;  %v4782_v51 = vmul.f32 %v9490_v25, %v4728_v43  ;;  %vm4788_vm12 = vweird.f32 %v9490_v25 }
 0x9b5   : > { %8826 = vmatmul.msk.f32.gmra.mxu0 %vm1192_vm1, %v12071_v7  ;;  %8834 = vmatmul.msk.f32.gmra.mxu1 %vm1192_vm1, %v12071_v7  ;;  %9491 = vrsqrt.f32 %v4729_v49  ;;  %v4780_v32 = vsel %vm4779_vm11, %v9488_v16, %v4776_v61  ;;  %vm4789_vm14 = vmor %vm4787_vm13, %vm4788_vm12  ;;  %vm4797_vm2 = vweird.f32 %v4729_v49 }
 0x9b6   : > { %v4783_v17 = vmul.f32 %v9490_v25, %v4782_v51  ;;  %v4815_v62 = vmul.f32 %v4780_v32, %v11953_v4 }
 0x9b8   : > { %v4784_v28 = vmul.f32 0.5, %v4783_v17  ;;  %v4824_v10 = vmul.f32 %v12015_v31, %v4815_v62 }
 0x9ba   : > { %v4785_v29 = vsub.f32 1.5, %v4784_v28  ;;  %v12088_v41 = vadd.f32 %v12019_v44, %v4824_v10  ;;  %v4714_v0 = vpop.xlane.xlu2 %4713 }
 0x9bb   : > { %v9492_v19 = vpop.eup %9491  ;;  %v4722_v57 = vmul.f32 %v4714_v0, %v13983_v20  ;;  %v5482_v20 = vld [vmem:[%s9987_s12 + $0x30] sm:$0xff] }
 0x9bc   : > { %v4786_v46 = vmul.f32 %v9490_v25, %v4785_v29  ;;  %v4792_v58 = vmul.f32 %v9492_v19, %v4729_v49  ;;  %8811 = vmatmul.msk.f32.gmra.mxu2 %vm1192_vm1, %v12088_v41  ;;  %8819 = vmatmul.msk.f32.gmra.mxu3 %vm1192_vm1, %v12088_v41  ;;  %vm4798_vm15 = vweird.f32 %v9492_v19 }
 0x9bd   : > { %8827 = vmatmul.msk.f32.gmra.mxu0 %vm1192_vm1, %v12088_v41  ;;  %8835 = vmatmul.msk.f32.gmra.mxu1 %vm1192_vm1, %v12088_v41  ;;  %v4730_v34 = vadd.f32 1e-06, %v4722_v57  ;;  %vm4799_vm3 = vmor %vm4797_vm2, %vm4798_vm15 }
 0x9be   : > { %v4790_v39 = vsel %vm4789_vm14, %v9490_v25, %v4786_v46  ;;  %v4793_v53 = vmul.f32 %v9492_v19, %v4792_v58 }
 0x9bf   : > { %v4816_v38 = vmul.f32 %v4790_v39, %v11959_v30  ;;  %9493 = vrsqrt.f32 %v4730_v34  ;;  %vm4807_vm5 = vweird.f32 %v4730_v34 }
 0x9c0   : > { %v4794_v60 = vmul.f32 0.5, %v4793_v53 }
 0x9c1   : > { %v4825_v11 = vmul.f32 %v12015_v31, %v4816_v38 }
 0x9c2   : > { %v4795_v33 = vsub.f32 1.5, %v4794_v60 }
 0x9c3   : > { %v4834_v55 = vadd.f32 %v12019_v44, %v4825_v11 }
 0x9c4   : > { %v4796_v42 = vmul.f32 %v9492_v19, %v4795_v33 }
 0x9c5   : > { %8812 = vmatmul.msk.f32.gmra.mxu2 %vm1192_vm1, %v4834_v55  ;;  %8820 = vmatmul.msk.f32.gmra.mxu3 %vm1192_vm1, %v4834_v55  ;;  %v9494_v24 = vpop.eup %9493 }
 0x9c6   : > { %v4800_v9 = vsel %vm4799_vm3, %v9492_v19, %v4796_v42  ;;  %8828 = vmatmul.msk.f32.gmra.mxu0 %vm1192_vm1, %v4834_v55  ;;  %8836 = vmatmul.msk.f32.gmra.mxu1 %vm1192_vm1, %v4834_v55  ;;  %v4802_v40 = vmul.f32 %v9494_v24, %v4730_v34  ;;  %vm4808_vm4 = vweird.f32 %v9494_v24 }
 0x9c7   : > { %v4817_v35 = vmul.f32 %v4800_v9, %v11965_v47  ;;  %vm4809_vm6 = vmor %vm4807_vm5, %vm4808_vm4 }
 0x9c8   : > { %v4803_v16 = vmul.f32 %v9494_v24, %v4802_v40 }
 0x9c9   : > { %v4826_v56 = vmul.f32 %v12015_v31, %v4817_v35 }
 0x9ca   : > { %v4804_v36 = vmul.f32 0.5, %v4803_v16 }
 0x9cb   : > { %v4835_v43 = vadd.f32 %v12019_v44, %v4826_v56 }
 0x9cc   : > { %v4805_v18 = vsub.f32 1.5, %v4804_v36 }
 0x9cd   : > { %8813 = vmatmul.msk.f32.gmra.mxu2 %vm1192_vm1, %v4835_v43  ;;  %8821 = vmatmul.msk.f32.gmra.mxu3 %vm1192_vm1, %v4835_v43 }
 0x9ce   : > { %8829 = vmatmul.msk.f32.gmra.mxu0 %vm1192_vm1, %v4835_v43  ;;  %8837 = vmatmul.msk.f32.gmra.mxu1 %vm1192_vm1, %v4835_v43  ;;  %v4806_v50 = vmul.f32 %v9494_v24, %v4805_v18 }
 0x9d0   : > { %v4810_v8 = vsel %vm4809_vm6, %v9494_v24, %v4806_v50 }
 0x9d1   : > { %v4818_v54 = vmul.f32 %v4810_v8, %v11971_v15 }
 0x9d3   : > { %v4827_v23 = vmul.f32 %v12015_v31, %v4818_v54 }
 0x9d5   : > { %v4836_v2 = vadd.f32 %v12019_v44, %v4827_v23 }
 0x9d7   : > { %8814 = vmatmul.msk.f32.gmra.mxu2 %vm1192_vm1, %v4836_v2  ;;  %8822 = vmatmul.msk.f32.gmra.mxu3 %vm1192_vm1, %v4836_v2 }
 0x9d8   : > { %8830 = vmatmul.msk.f32.gmra.mxu0 %vm1192_vm1, %v4836_v2  ;;  %8838 = vmatmul.msk.f32.gmra.mxu1 %vm1192_vm1, %v4836_v2 }
 0x9df   : > { %8839 = vmatmul.msk.f32.vlgmr.msrb.gmra.mxu2 %vm1192_vm1, %v12026_v5 }
 0x9e7   : > { %8840 = vmatmul.msk.f32.gmra.mxu2 %vm1192_vm1, %v12042_v22 }
 0x9ef   : > { %8841 = vmatmul.msk.f32.gmra.mxu2 %vm1192_vm1, %v12056_v52 }
 0x9f7   : > { %8842 = vmatmul.msk.f32.gmra.mxu2 %vm1192_vm1, %v12071_v7 }
 0x9f8   : > { %v12130_v31 = vpop.f32.mrf.mxu0  ;;  %v12239_v35 = vpop.f32.mrf.mxu1 }
 0x9f9   : > { %v5259_v44 = vmul.f32 %v12130_v31, %v12130_v31 }
 0x9fb   : > { %8855 = vmatmul.msk.f32.vlgmr.msra.gmra.mxu0 %vm1192_vm1, %v5259_v44 }
 0x9fd   : > { %v12137_v21 = vpop.f32.mrf.mxu2  ;;  %v12227_v33 = vpop.f32.mrf.mxu3 }
 0x9fe   : > { %v5106_v5 = vmul.f32 %v12137_v21, %v12137_v21 }
 0x9ff   : > { %8843 = vmatmul.msk.f32.gmra.mxu2 %vm1192_vm1, %v12088_v41 }
 0xa00   : > { %8847 = vmatmul.msk.f32.vlgmr.msrb.gmra.mxu3 %vm1192_vm1, %v5106_v5  ;;  %v5462_v5 = vld [vmem:[%s9982_s20 + $0x10] sm:$0xff] }
 0xa07   : > { %8844 = vmatmul.msk.f32.gmra.mxu2 %vm1192_vm1, %v4834_v55 }
 0xa0f   : > { %8845 = vmatmul.msk.f32.gmra.mxu2 %vm1192_vm1, %v4835_v43 }
 0xa17   : > { %8846 = vmatmul.msk.f32.gmra.mxu2 %vm1192_vm1, %v4836_v2 }
 0xa20   : > { %v12147_v22 = vpop.f32.mrf.mxu0  ;;  %v12249_v16 = vpop.f32.mrf.mxu1 }
 0xa21   : > { %v5260_v52 = vmul.f32 %v12147_v22, %v12147_v22 }
 0xa23   : > { %8856 = vmatmul.msk.f32.gmra.mxu0 %vm1192_vm1, %v5260_v52  ;;  %v5478_v52 = vld [vmem:[%s9987_s12 + $0x10] sm:$0xff] }
 0xa25   : > { %v12152_v7 = vpop.f32.mrf.mxu2  ;;  %v12231_v42 = vpop.f32.mrf.mxu3 }
 0xa26   : > { %v5107_v48 = vmul.f32 %v12152_v7, %v12152_v7 }
 0xa28   : > { %8848 = vmatmul.msk.f32.gmra.mxu3 %vm1192_vm1, %v5107_v48 }
 0xa2a   : > { %v12157_v25 = vpop.f32.mrf.mxu0  ;;  %v5039_v50 = vpop.f32.mrf.mxu1 }
 0xa2b   : > { %v5261_v49 = vmul.f32 %v12157_v25, %v12157_v25 }
 0xa2d   : > { %8857 = vmatmul.msk.f32.gmra.mxu0 %vm1192_vm1, %v5261_v49 }
 0xa2f   : > { %v12162_v61 = vpop.f32.mrf.mxu2  ;;  %v12244_v56 = vpop.f32.mrf.mxu3 }
 0xa30   : > { %v5108_v51 = vmul.f32 %v12162_v61, %v12162_v61 }
 0xa32   : > { %8849 = vmatmul.msk.f32.gmra.mxu3 %vm1192_vm1, %v5108_v51  ;;  %v12167_v37 = vpop.f32.mrf.mxu0  ;;  %v5470_v51 = vmul.f32 %v5462_v5, %v12157_v25 }
 0xa33   : > { %v5262_v14 = vmul.f32 %v12167_v37, %v12167_v37 }
 0xa35   : > { %8858 = vmatmul.msk.f32.gmra.mxu0 %vm1192_vm1, %v5262_v14  ;;  %v5486_v14 = vmul.f32 %v5478_v52, %v5039_v50  ;;  %v5463_v50 = vld [vmem:[%s9982_s20 + $0x18] sm:$0xff] }
 0xa37   : > { %v12172_v32 = vpop.f32.mrf.mxu2  ;;  %v12253_v36 = vpop.f32.mrf.mxu3 }
 0xa38   : > { %v5109_v17 = vmul.f32 %v12172_v32, %v12172_v32 }
 0xa3a   : > { %8850 = vmatmul.msk.f32.gmra.mxu3 %vm1192_vm1, %v5109_v17  ;;  %v12177_v3 = vpop.f32.mrf.mxu0 }
 0xa3b   : > { %v5263_v62 = vmul.f32 %v12177_v3, %v12177_v3 }
 0xa3d   : > { %8859 = vmatmul.msk.f32.gmra.mxu0 %vm1192_vm1, %v5263_v62  ;;  %v5042_v62 = vpop.f32.mrf.mxu1 }
 0xa3f   : > { %v12182_v28 = vpop.f32.mrf.mxu2  ;;  %v12257_v2 = vpop.f32.mrf.mxu3 }
 0xa40   : > { %v5110_v26 = vmul.f32 %v12182_v28, %v12182_v28 }
 0xa42   : > { %8851 = vmatmul.msk.f32.gmra.mxu3 %vm1192_vm1, %v5110_v26 }
 0xa43   : > { %v12186_v10 = vpop.f32.mrf.mxu0 }
 0xa44   : > { %v5264_v29 = vmul.f32 %v12186_v10, %v12186_v10 }
 0xa46   : > { %8860 = vmatmul.msk.f32.gmra.mxu0 %vm1192_vm1, %v5264_v29 }
 0xa48   : > { %v12192_v19 = vpop.f32.mrf.mxu2 }
 0xa49   : > { %v5111_v41 = vmul.f32 %v12192_v19, %v12192_v19 }
 0xa4b   : > { %v12196_v46 = vpop.f32.mrf.mxu0  ;;  %8852 = vmatmul.msk.f32.gmra.mxu3 %vm1192_vm1, %v5111_v41  ;;  %v5494_v41 = vadd.f32 %v5486_v14, %v5470_v51 }
 0xa4c   : > { %v5265_v58 = vmul.f32 %v12196_v46, %v12196_v46 }
 0xa4e   : > { %8861 = vmatmul.msk.f32.gmra.mxu0 %vm1192_vm1, %v5265_v58 }
 0xa50   : > { %v12202_v0 = vpop.f32.mrf.mxu2 }
 0xa51   : > { %v5112_v12 = vmul.f32 %v12202_v0, %v12202_v0 }
 0xa53   : > { %8853 = vmatmul.msk.f32.gmra.mxu3 %vm1192_vm1, %v5112_v12 }
 0xa55   : > { %v12207_v57 = vpop.f32.mrf.mxu0 }
 0xa56   : > { %v5266_v39 = vmul.f32 %v12207_v57, %v12207_v57 }
 0xa58   : > { %8862 = vmatmul.msk.f32.gmra.mxu0 %vm1192_vm1, %v5266_v39 }
 0xa5a   : > { %v12212_v53 = vpop.f32.mrf.mxu2 }
 0xa5b   : > { %v5113_v27 = vmul.f32 %v12212_v53, %v12212_v53 }
 0xa5d   : > { %8854 = vmatmul.msk.f32.gmra.mxu3 %vm1192_vm1, %v5113_v27  ;;  %v12262_v27 = vpop.f32.mrf.mxu3 }
 0xa62   : > { %v12217_v38 = vpop.f32.mrf.mxu2 }
 0xa6a   : > { %v12219_v34 = vpop.f32.mrf.mxu2 }
 0xa72   : > { %v12221_v60 = vpop.f32.mrf.mxu2 }
 0xa78   : > { %v12235_v9 = vpop.f32.mrf.mxu0 }
 0xa7a   : > { %v12223_v13 = vpop.f32.mrf.mxu2 }
 0xa82   : > { %v12225_v11 = vpop.f32.mrf.mxu2 }
 0xa8a   : > { %v12229_v55 = vpop.f32.mrf.mxu2 }
 0xa92   : > { %v12233_v1 = vpop.f32.mrf.mxu2 }
 0xa9a   : > { %v12237_v24 = vpop.f32.mrf.mxu2 }
 0xa9b   : > { %5709 = vmatpush.msra.mxu2 %v12237_v24 }
 0xa9d   : > { %5710 = vmatpush.msra.mxu2 %v12233_v1 }
 0xa9f   : > { %5711 = vmatpush.msra.mxu2 %v12229_v55 }
 0xaa0   : > { %v12242_v40 = vpop.f32.mrf.mxu0 }
 0xaa1   : > { %5712 = vmatpush.msra.mxu2 %v12225_v11 }
 0xaa3   : > { %5713 = vmatpush.msra.mxu2 %v12223_v13 }
 0xaa5   : > { %5714 = vmatpush.msra.mxu2 %v12221_v60 }
 0xaa7   : > { %5715 = vmatpush.msra.mxu2 %v12219_v34 }
 0xaa9   : > { %5716 = vmatpush.msra.mxu2 %v12217_v38 }
 0xaaa   : > { %v5314_v43 = vpop.f32.mrf.mxu0 }
 0xaab   : > { %v5315_v18 = vadd.f32 1e-06, %v5314_v43 }
 0xaad   : > { %9495 = vrsqrt.f32 %v5315_v18  ;;  %vm5358_vm8 = vweird.f32 %v5315_v18 }
 0xab2   : > { %v5317_v23 = vpop.f32.mrf.mxu0 }
 0xab3   : > { %v9496_v8 = vpop.eup %9495  ;;  %v5318_v44 = vadd.f32 1e-06, %v5317_v23  ;;  %v5479_v23 = vld [vmem:[%s9987_s12 + $0x18] sm:$0xff] }
 0xab4   : > { %v5353_v54 = vmul.f32 %v9496_v8, %v5315_v18  ;;  %vm5359_vm7 = vweird.f32 %v9496_v8  ;;  %v5471_v18 = vmul.f32 %v5463_v50, %v12167_v37  ;;  %v5487_v52 = vmul.f32 %v5479_v23, %v5042_v62  ;;  %v5480_v37 = vld [vmem:[%s9987_s12 + $0x20] sm:$0xff] }
 0xab5   : > { %9497 = vrsqrt.f32 %v5318_v44  ;;  %vm5360_vm9 = vmor %vm5358_vm8, %vm5359_vm7  ;;  %vm5368_vm11 = vweird.f32 %v5318_v44 }
 0xab6   : > { %v5354_v48 = vmul.f32 %v9496_v8, %v5353_v54 }
 0xab8   : > { %v5355_v49 = vmul.f32 0.5, %v5354_v48 }
 0xaba   : > { %v5356_v17 = vsub.f32 1.5, %v5355_v49  ;;  %v5320_v12 = vpop.f32.mrf.mxu0 }
 0xabb   : > { %v9498_v29 = vpop.eup %9497  ;;  %v5321_v43 = vadd.f32 1e-06, %v5320_v12  ;;  %v12271_v12 = vpop.f32.mrf.mxu3 }
 0xabc   : > { %v5357_v26 = vmul.f32 %v9496_v8, %v5356_v17  ;;  %v5363_v58 = vmul.f32 %v9498_v29, %v5318_v44  ;;  %vm5369_vm10 = vweird.f32 %v9498_v29 }
 0xabd   : > { %9499 = vrsqrt.f32 %v5321_v43  ;;  %vm5370_vm12 = vmor %vm5368_vm11, %vm5369_vm10  ;;  %vm5378_vm14 = vweird.f32 %v5321_v43 }
 0xabe   : > { %v5361_v39 = vsel %vm5360_vm9, %v9496_v8, %v5357_v26  ;;  %v5364_v25 = vmul.f32 %v9498_v29, %v5363_v58  ;;  %v5045_v8 = vpop.f32.mrf.mxu1  ;;  %v5495_v26 = vadd.f32 %v5487_v52, %v5471_v18 }
 0xabf   : > { %v12264_v54 = vmul.f32 %v5494_v41, %v5361_v39  ;;  %v5464_v39 = vld [vmem:[%s9982_s20 + $0x20] sm:$0xff]  ;;  %v5488_v23 = vmul.f32 %v5480_v37, %v5045_v8 }
 0xac0   : > { %v5365_v5 = vmul.f32 0.5, %v5364_v25  ;;  %v5472_v44 = vmul.f32 %v5464_v39, %v12177_v3  ;;  %v5481_v3 = vld [vmem:[%s9987_s12 + $0x28] sm:$0xff] }
 0xac1   : > { %5882 = vrot.lane.b32.xlu2 %v12264_v54, %s13910_s7 }
 0xac2   : > { %v5366_v48 = vsub.f32 1.5, %v5365_v5 }
 0xac3   : > { %v5323_v51 = vpop.f32.mrf.mxu0  ;;  %v9500_v14 = vpop.eup %9499 }
 0xac4   : > { %v5367_v49 = vmul.f32 %v9498_v29, %v5366_v48  ;;  %v5324_v17 = vadd.f32 1e-06, %v5323_v51  ;;  %v5373_v41 = vmul.f32 %v9500_v14, %v5321_v43  ;;  %vm5379_vm13 = vweird.f32 %v9500_v14  ;;  %v12282_v39 = vpop.f32.mrf.mxu3 }
 0xac5   : > { %vm5380_vm15 = vmor %vm5378_vm14, %vm5379_vm13 }
 0xac6   : > { %v5371_v58 = vsel %vm5370_vm12, %v9498_v29, %v5367_v49  ;;  %9501 = vrsqrt.f32 %v5324_v17  ;;  %v5374_v25 = vmul.f32 %v9500_v14, %v5373_v41  ;;  %v5048_v48 = vpop.f32.mrf.mxu1  ;;  %vm5388_vm3 = vweird.f32 %v5324_v17 }
 0xac7   : > { %v12275_v62 = vmul.f32 %v5495_v26, %v5371_v58  ;;  %v5496_v26 = vadd.f32 %v5488_v23, %v5472_v44 }
 0xac8   : > { %v5375_v50 = vmul.f32 0.5, %v5374_v25  ;;  %v5465_v25 = vld [vmem:[%s9982_s20 + $0x28] sm:$0xff] }
 0xac9   : > { %5884 = vrot.lane.b32.xlu2 %v12275_v62, %s13910_s7  ;;  %v5473_v43 = vmul.f32 %v5465_v25, %v12186_v10 }
 0xaca   : > { %v5376_v5 = vsub.f32 1.5, %v5375_v50  ;;  %v5489_v50 = vmul.f32 %v5481_v3, %v5048_v48 }
 0xacb   : > { %v5326_v29 = vpop.f32.mrf.mxu0 }
 0xacc   : > { %v9502_v18 = vpop.eup %9501  ;;  %v5327_v52 = vadd.f32 1e-06, %v5326_v29  ;;  %v5377_v49 = vmul.f32 %v9500_v14, %v5376_v5  ;;  %v5497_v29 = vadd.f32 %v5489_v50, %v5473_v43  ;;  %v5155_v15 = vpop.f32.mrf.mxu3  ;;  %v12297_v43 = vadd.f32 1e-06, %v12242_v40 }
 0xacd   : > { %v5383_v51 = vmul.f32 %v9502_v18, %v5324_v17  ;;  %vm5389_vm2 = vweird.f32 %v9502_v18 }
 0xace   : > { %9503 = vrsqrt.f32 %v5327_v52  ;;  %v5381_v58 = vsel %vm5380_vm15, %v9500_v14, %v5377_v49  ;;  %vm5390_vm4 = vmor %vm5388_vm3, %vm5389_vm2  ;;  %v5466_v49 = vld [vmem:[%s9982_s20 + $0x30] sm:$0xff]  ;;  %vm5398_vm6 = vweird.f32 %v5327_v52  ;;  %vm5348_vm12 = vweird.f32 %v12297_v43 }
 0xacf   : > { %v5384_v41 = vmul.f32 %v9502_v18, %v5383_v51  ;;  %v12284_v8 = vmul.f32 %v5496_v26, %v5381_v58  ;;  %v5051_v51 = vpop.f32.mrf.mxu1  ;;  %v5474_v10 = vmul.f32 %v5466_v49, %v12196_v46  ;;  %v12310_v49 = vadd.f32 1e-06, %v5155_v15 }
 0xad0   : > { %v5490_v48 = vmul.f32 %v5482_v20, %v5051_v51 }
 0xad1   : > { %v5385_v37 = vmul.f32 0.5, %v5384_v41  ;;  %5886 = vrot.lane.b32.xlu2 %v12284_v8, %s13910_s7 }
 0xad2   : > { %v5498_v3 = vadd.f32 %v5490_v48, %v5474_v10 }
 0xad3   : > { %v5386_v44 = vsub.f32 1.5, %v5385_v37 }
 0xad4   : > { %v9504_v23 = vpop.eup %9503  ;;  %v5158_v50 = vpop.f32.mrf.mxu3 }
 0xad5   : > { %v5387_v5 = vmul.f32 %v9502_v18, %v5386_v44  ;;  %v5393_v14 = vmul.f32 %v9504_v23, %v5327_v52  ;;  %v5329_v58 = vpop.f32.mrf.mxu0  ;;  %vm5399_vm5 = vweird.f32 %v9504_v23  ;;  %v12306_v52 = vadd.f32 1e-06, %v12235_v9 }
 0xad6   : > { %v5330_v47 = vadd.f32 1e-06, %v5329_v58  ;;  %vm5400_vm7 = vmor %vm5398_vm6, %vm5399_vm5 }
 0xad7   : > { %v5394_v26 = vmul.f32 %v9504_v23, %v5393_v14  ;;  %v5391_v41 = vsel %vm5390_vm4, %v9502_v18, %v5387_v5  ;;  %v5054_v44 = vpop.f32.mrf.mxu1  ;;  %v5483_v5 = vld [vmem:[%s9987_s12 + $0x38] sm:$0xff]  ;;  %vm5338_vm15 = vweird.f32 %v12306_v52  ;;  %vm5185_vm4 = vweird.f32 %v12310_v49 }
 0xad8   : > { %v12291_v4 = vmul.f32 %v5497_v29, %v5391_v41  ;;  %9505 = vrsqrt.f32 %v5330_v47  ;;  %v5491_v29 = vmul.f32 %v5483_v5, %v5054_v44  ;;  %vm5408_vm9 = vweird.f32 %v5330_v47 }
 0xad9   : > { %v5395_v30 = vmul.f32 0.5, %v5394_v26  ;;  %9507 = vrsqrt.f32 %v12297_v43 }
 0xada   : > { %5888 = vrot.lane.b32.xlu1 %v12291_v4, %s13910_s7  ;;  %9509 = vrsqrt.f32 %v12306_v52 }
 0xadb   : > { %v5396_v17 = vsub.f32 1.5, %v5395_v30  ;;  %v5467_v30 = vld [vmem:[%s9982_s20 + $0x38] sm:$0xff]  ;;  %9511 = vrsqrt.f32 %v12310_v49 }
 0xadc   : > { %v5475_v40 = vmul.f32 %v5467_v30, %v12207_v57  ;;  %v5161_v10 = vpop.f32.mrf.mxu3 }
 0xadd   : > { %v5397_v25 = vmul.f32 %v9504_v23, %v5396_v17  ;;  %v12341_v30 = vadd.f32 1e-06, %v5161_v10 }
 0xade   : > { %v9506_v37 = vpop.eup %9505  ;;  %v5499_v41 = vadd.f32 %v5491_v29, %v5475_v40  ;;  %v5461_v40 = vld [vmem:[%s9982_s20 + $0x8] sm:$0xff] }
 0xadf   : > { %v5401_v18 = vsel %vm5400_vm7, %v9504_v23, %v5397_v25  ;;  %v5403_v20 = vmul.f32 %v9506_v37, %v5330_v47  ;;  %vm5409_vm8 = vweird.f32 %v9506_v37  ;;  %v12313_v58 = vpop.eup %9507  ;;  %v12326_v47 = vadd.f32 1e-06, %v5158_v50  ;;  %v5477_v29 = vld [vmem:[%s9987_s12 + $0x8] sm:$0xff] }
 0xae0   : > { %v12299_v46 = vmul.f32 %v5498_v3, %v5401_v18  ;;  %vm5410_vm10 = vmor %vm5408_vm9, %vm5409_vm8  ;;  %v5343_v15 = vmul.f32 %v12313_v58, %v12297_v43  ;;  %v12320_v57 = vpop.eup %9509  ;;  %vm5349_vm11 = vweird.f32 %v12313_v58 }
 0xae1   : > { %v5404_v14 = vmul.f32 %v9506_v37, %v5403_v20  ;;  %v12328_v17 = vpop.eup %9511  ;;  %v5333_v25 = vmul.f32 %v12320_v57, %v12306_v52  ;;  %9513 = vrsqrt.f32 %v12326_v47  ;;  %vm12364_vm13 = vmor %vm5348_vm12, %vm5349_vm11  ;;  %vm5339_vm14 = vweird.f32 %v12320_v57 }
 0xae2   : > { %5890 = vrot.lane.b32.xlu0 %v12299_v46, %s13910_s7  ;;  %v5344_v3 = vmul.f32 %v12313_v58, %v5343_v15  ;;  %v5180_v18 = vmul.f32 %v12328_v17, %v12310_v49  ;;  %9515 = vrsqrt.f32 %v12341_v30  ;;  %v5485_v15 = vmul.f32 %v5477_v29, %v12249_v16  ;;  %v5428_v29 = vld [vmem:[%s9977_s30] sm:$0xff]  ;;  %vm12385_vm3 = vmor %vm5338_vm15, %vm5339_vm14 }
 0xae3   : > { %v5405_v23 = vmul.f32 0.5, %v5404_v14  ;;  %v5334_v50 = vmul.f32 %v12320_v57, %v5333_v25  ;;  %vm5186_vm2 = vweird.f32 %v12328_v17  ;;  %v5436_v52 = vmul.f32 %v5428_v29, %v12227_v33 }
 0xae4   : > { %v5345_v20 = vmul.f32 0.5, %v5344_v3  ;;  %v5181_v44 = vmul.f32 %v12328_v17, %v5180_v18  ;;  %v5460_v3 = vld [vmem:[%s9982_s20] sm:$0xff]  ;;  %vm5187_vm5 = vmor %vm5185_vm4, %vm5186_vm2  ;;  %vm5195_vm7 = vweird.f32 %v12326_v47 }
 0xae5   : > { %v5406_v51 = vsub.f32 1.5, %v5405_v23  ;;  %v5335_v14 = vmul.f32 0.5, %v5334_v50  ;;  %v5476_v18 = vld [vmem:[%s9987_s12] sm:$0xff]  ;;  %v5468_v43 = vmul.f32 %v5460_v3, %v12130_v31 }
 0xae6   : > { %v5346_v23 = vsub.f32 1.5, %v5345_v20 }
 0xae7   : > { %v5407_v26 = vmul.f32 %v9506_v37, %v5406_v51  ;;  %v12344_v5 = vpop.eup %9513  ;;  %v5182_v51 = vmul.f32 0.5, %v5181_v44 }
 0xae8   : > { %v5347_v10 = vmul.f32 %v12313_v58, %v5346_v23  ;;  %v12369_v16 = vpop.eup %9515  ;;  %vm5196_vm6 = vweird.f32 %v12344_v5 }
 0xae9   : > { %v5411_v9 = vsel %vm5410_vm10, %v9506_v37, %v5407_v26  ;;  %v5164_v37 = vpop.f32.mrf.mxu3  ;;  %v5190_v26 = vmul.f32 %v12344_v5, %v12326_v47  ;;  %v5183_v20 = vsub.f32 1.5, %v5182_v51  ;;  %vm5197_vm8 = vmor %vm5195_vm7, %vm5196_vm6  ;;  %vm5206_vm9 = vweird.f32 %v12369_v16 }
 0xaea   : > { %v12316_v48 = vmul.f32 %v5499_v41, %v5411_v9  ;;  %v5336_v41 = vsub.f32 1.5, %v5335_v14  ;;  %v5469_v9 = vmul.f32 %v5461_v40, %v12147_v22  ;;  %v12362_v50 = vadd.f32 1e-06, %v5164_v37 }
 0xaeb   : > { %v5191_v22 = vmul.f32 %v12344_v5, %v5190_v26  ;;  %v5351_v23 = vsel %vm12364_vm13, %v12313_v58, %v5347_v10  ;;  %v5484_v37 = vmul.f32 %v5476_v18, %v12239_v35  ;;  %v5184_v31 = vmul.f32 %v12328_v17, %v5183_v20 }
 0xaec   : > { %5892 = vrot.lane.b32.xlu2 %v12316_v48, %s13910_s7  ;;  %8863 = vmatpush.xpose.msk.msra.mxu1 %vm1118_vm0, %v12316_v48  ;;  %s14006_s7 = sld [smem:[#allocation22_spill]]  ;;  %v5337_v14 = vmul.f32 %v12320_v57, %v5336_v41  ;;  %v5493_v51 = vadd.f32 %v5485_v15, %v5469_v9  ;;  %9517 = vrsqrt.f32 %v12362_v50  ;;  %v5200_v35 = vmul.f32 %v12369_v16, %v12341_v30 }
 0xaed   : > { %v5192_v58 = vmul.f32 0.5, %v5191_v22  ;;  %v5492_v15 = vadd.f32 %v5484_v37, %v5468_v43  ;;  %v5188_v18 = vsel %vm5187_vm5, %v12328_v17, %v5184_v31  ;;  %vm5205_vm10 = vweird.f32 %v12341_v30 }
 0xaee   : > { %v12392_v41 = vmul.f32 %v5493_v51, %v5351_v23  ;;  %v5341_v9 = vsel %vm12385_vm3, %v12320_v57, %v5337_v14  ;;  %v5429_v23 = vld [vmem:[%s9977_s30 + $0x8] sm:$0xff]  ;;  %vm5207_vm11 = vmor %vm5205_vm10, %vm5206_vm9  ;;  %vm5215_vm13 = vweird.f32 %v12362_v50 }
 0xaef   : > { %v5193_v20 = vsub.f32 1.5, %v5192_v58  ;;  %v12406_v33 = vmul.f32 %v5492_v15, %v5341_v9 }
 0xaf0   : > { %8864 = vmatpush.xpose.msk.msra.mxu1 %vm1118_vm0, %v12299_v46 }
 0xaf1   : > { %v5167_v25 = vpop.f32.mrf.mxu3  ;;  %v5194_v17 = vmul.f32 %v12344_v5, %v5193_v20 }
 0xaf2   : > { %v5412_v40 = vld [vmem:[%s14006_s7] sm:$0xff]  ;;  %v12402_v3 = vadd.f32 1e-06, %v5167_v25  ;;  %v12408_v22 = vpop.eup %9517  ;;  %v5413_v14 = vld [vmem:[%s14006_s7 + $0x8] sm:$0xff] }
 0xaf3   : > { %v5420_v10 = vmul.f32 %v5412_v40, %v12137_v21  ;;  %v5201_v21 = vmul.f32 %v12369_v16, %v5200_v35  ;;  %v5210_v43 = vmul.f32 %v12408_v22, %v12362_v50  ;;  %v5421_v37 = vmul.f32 %v5413_v14, %v12152_v7  ;;  %v5430_v7 = vld [vmem:[%s9977_s30 + $0x10] sm:$0xff] }
 0xaf4   : > { %8865 = vmatpush.xpose.msk.msra.mxu1 %vm1118_vm0, %v12291_v4  ;;  %9519 = vrsqrt.f32 %v12402_v3  ;;  %v5437_v40 = vmul.f32 %v5429_v23, %v12231_v42  ;;  %v5198_v31 = vsel %vm5197_vm8, %v12344_v5, %v5194_v17  ;;  %v5415_v17 = vld [vmem:[%s14006_s7 + $0x18] sm:$0xff]  ;;  %vm5216_vm12 = vweird.f32 %v12408_v22 }
 0xaf5   : > { %v5444_v57 = vadd.f32 %v5436_v52, %v5420_v10  ;;  %v5202_v25 = vmul.f32 0.5, %v5201_v21  ;;  %v5211_v26 = vmul.f32 %v12408_v22, %v5210_v43  ;;  %v5414_v10 = vld [vmem:[%s14006_s7 + $0x10] sm:$0xff]  ;;  %vm5217_vm14 = vmor %vm5215_vm13, %vm5216_vm12  ;;  %vm5225_vm2 = vweird.f32 %v12402_v3 }
 0xaf6   : > { %v5445_v35 = vadd.f32 %v5437_v40, %v5421_v37  ;;  %v5422_v15 = vmul.f32 %v5414_v10, %v12162_v61 }
 0xaf7   : > { %v12414_v49 = vmul.f32 %v5444_v57, %v5188_v18  ;;  %v5203_v51 = vsub.f32 1.5, %v5202_v25  ;;  %v5212_v9 = vmul.f32 0.5, %v5211_v26  ;;  %v5438_v18 = vmul.f32 %v5430_v7, %v12244_v56  ;;  %v5431_v25 = vld [vmem:[%s9977_s30 + $0x18] sm:$0xff] }
 0xaf8   : > { %8866 = vmatpush.xpose.msk.msra.mxu1 %vm1118_vm0, %v12284_v8  ;;  %v12435_v42 = vmul.f32 %v5445_v35, %v5198_v31  ;;  %v5439_v40 = vmul.f32 %v5431_v25, %v12253_v36 }
 0xaf9   : > { %v5170_v44 = vpop.f32.mrf.mxu3  ;;  %v5204_v47 = vmul.f32 %v12369_v16, %v5203_v51  ;;  %v5213_v21 = vsub.f32 1.5, %v5212_v9  ;;  %v5446_v23 = vadd.f32 %v5438_v18, %v5422_v15 }
 0xafa   : > { %v12426_v29 = vadd.f32 1e-06, %v5170_v44  ;;  %v12430_v58 = vpop.eup %9519 }
 0xafb   : > { %v5220_v5 = vmul.f32 %v12430_v58, %v12402_v3  ;;  %v5208_v57 = vsel %vm5207_vm11, %v12369_v16, %v5204_v47  ;;  %v5214_v56 = vmul.f32 %v12408_v22, %v5213_v21  ;;  %v5423_v16 = vmul.f32 %v5415_v17, %v12172_v32  ;;  %v5432_v47 = vld [vmem:[%s9977_s30 + $0x20] sm:$0xff]  ;;  %v5433_v17 = vld [vmem:[%s9977_s30 + $0x28] sm:$0xff] }
 0xafc   : > { %8867 = vmatpush.xpose.msk.msra.mxu1 %vm1118_vm0, %v12275_v62  ;;  %9521 = vrsqrt.f32 %v12426_v29  ;;  %v12453_v61 = vmul.f32 %v5446_v23, %v5208_v57  ;;  %vm5226_vm15 = vweird.f32 %v12430_v58  ;;  %v5417_v23 = vld [vmem:[%s14006_s7 + $0x28] sm:$0xff]  ;;  %vm5235_vm5 = vweird.f32 %v12426_v29 }
 0xafd   : > { %v5221_v44 = vmul.f32 %v12430_v58, %v5220_v5  ;;  %v5218_v35 = vsel %vm5217_vm14, %v12408_v22, %v5214_v56  ;;  %v5447_v7 = vadd.f32 %v5439_v40, %v5423_v16  ;;  %v5440_v22 = vmul.f32 %v5432_v47, %v12257_v2  ;;  %vm5227_vm3 = vmor %vm5225_vm2, %vm5226_vm15 }
 0xafe   : > { %v5425_v3 = vmul.f32 %v5417_v23, %v12192_v19 }
 0xaff   : > { %v5222_v30 = vmul.f32 0.5, %v5221_v44  ;;  %v12469_v32 = vmul.f32 %v5447_v7, %v5218_v35 }
 0xb00   : > { %8868 = vmatpush.xpose.msk.msra.mxu1 %vm1118_vm0, %v12264_v54 }
 0xb01   : > { %v5173_v52 = vpop.f32.mrf.mxu3  ;;  %v5223_v26 = vsub.f32 1.5, %v5222_v30 }
 0xb02   : > { %v12446_v20 = vadd.f32 1e-06, %v5173_v52  ;;  %v9522_v14 = vpop.eup %9521  ;;  %v5416_v52 = vld [vmem:[%s14006_s7 + $0x20] sm:$0xff] }
 0xb03   : > { %v5230_v43 = vmul.f32 %v9522_v14, %v12426_v29  ;;  %v5224_v36 = vmul.f32 %v12430_v58, %v5223_v26  ;;  %v5424_v5 = vmul.f32 %v5416_v52, %v12182_v28  ;;  %vm5236_vm4 = vweird.f32 %v9522_v14  ;;  %v5418_v26 = vld [vmem:[%s14006_s7 + $0x30] sm:$0xff] }
 0xb04   : > { %8869 = vmatpush.xpose.msk.msra.mxu1 %vm1118_vm0, %v12392_v41  ;;  %9523 = vrsqrt.f32 %v12446_v20  ;;  %vm5237_vm6 = vmor %vm5235_vm5, %vm5236_vm4  ;;  %vm5245_vm8 = vweird.f32 %v12446_v20 }
 0xb05   : > { %v5231_v31 = vmul.f32 %v9522_v14, %v5230_v43  ;;  %v5228_v21 = vsel %vm5227_vm3, %v12430_v58, %v5224_v36  ;;  %v5448_v57 = vadd.f32 %v5440_v22, %v5424_v5  ;;  %v5441_v43 = vmul.f32 %v5433_v17, %v12262_v27 }
 0xb06   : > { %v5426_v27 = vmul.f32 %v5418_v26, %v12202_v0 }
 0xb07   : > { %v5232_v50 = vmul.f32 0.5, %v5231_v31  ;;  %v12482_v25 = vmul.f32 %v5448_v57, %v5228_v21  ;;  %v5449_v40 = vadd.f32 %v5441_v43, %v5425_v3  ;;  %v5434_v31 = vld [vmem:[%s9977_s30 + $0x30] sm:$0xff] }
 0xb08   : > { %8870 = vmatpush.xpose.msk.msra.mxu1 %vm1118_vm0, %v12406_v33  ;;  %v5442_v52 = vmul.f32 %v5434_v31, %v12271_v12 }
 0xb09   : > { %v5176_v37 = vpop.f32.mrf.mxu3  ;;  %v5233_v15 = vsub.f32 1.5, %v5232_v50  ;;  %v5419_v50 = vld [vmem:[%s14006_s7 + $0x38] sm:$0xff] }
 0xb0a   : > { %v12463_v51 = vadd.f32 1e-06, %v5176_v37  ;;  %v9524_v10 = vpop.eup %9523  ;;  %v5450_v36 = vadd.f32 %v5442_v52, %v5426_v27  ;;  %v5427_v0 = vmul.f32 %v5419_v50, %v12212_v53 }
 0xb0b   : > { %8871 = vmatmul.msk.f32.vlgmr.msra.gmra.mxu1 %vm1118_vm0, %v12414_v49  ;;  %v5240_v9 = vmul.f32 %v9524_v10, %v12446_v20  ;;  %v5234_v28 = vmul.f32 %v9522_v14, %v5233_v15  ;;  %vm5246_vm7 = vweird.f32 %v9524_v10 }
 0xb0c   : > { %9525 = vrsqrt.f32 %v12463_v51  ;;  %vm5247_vm9 = vmor %vm5245_vm8, %vm5246_vm7  ;;  %vm5255_vm11 = vweird.f32 %v12463_v51 }
 0xb0d   : > { %v5241_v18 = vmul.f32 %v9524_v10, %v5240_v9  ;;  %v5238_v16 = vsel %vm5237_vm6, %v9522_v14, %v5234_v28  ;;  %v5435_v9 = vld [vmem:[%s9977_s30 + $0x38] sm:$0xff] }
 0xb0e   : > { %v12492_v35 = vmul.f32 %v5449_v40, %v5238_v16  ;;  %v5443_v12 = vmul.f32 %v5435_v9, %v12282_v39 }
 0xb0f   : > { %v5242_v2 = vmul.f32 0.5, %v5241_v18 }
 0xb11   : > { %v5243_v58 = vsub.f32 1.5, %v5242_v2 }
 0xb12   : > { %v9526_v44 = vpop.eup %9525 }
 0xb13   : > { %8872 = vmatmul.msk.f32.gmra.mxu1 %vm1118_vm0, %v12435_v42  ;;  %v5250_v56 = vmul.f32 %v9526_v44, %v12463_v51  ;;  %v5244_v7 = vmul.f32 %v9524_v10, %v5243_v58  ;;  %vm5256_vm10 = vweird.f32 %v9526_v44 }
 0xb14   : > { %vm5257_vm12 = vmor %vm5255_vm11, %vm5256_vm10 }
 0xb15   : > { %v5251_v37 = vmul.f32 %v9526_v44, %v5250_v56  ;;  %v5248_v47 = vsel %vm5247_vm9, %v9524_v10, %v5244_v7  ;;  %v5451_v10 = vadd.f32 %v5443_v12, %v5427_v0 }
 0xb16   : > { %v12501_v5 = vmul.f32 %v5450_v36, %v5248_v47 }
 0xb17   : > { %v5252_v19 = vmul.f32 0.5, %v5251_v37 }
 0xb19   : > { %v5253_v14 = vsub.f32 1.5, %v5252_v19 }
 0xb1b   : > { %8873 = vmatmul.msk.f32.gmra.mxu1 %vm1118_vm0, %v12453_v61  ;;  %v5883_v30 = vpop.permute.xlu2 %5882  ;;  %v5254_v22 = vmul.f32 %v9526_v44, %v5253_v14 }
 0xb1d   : > { %v5258_v15 = vsel %vm5257_vm12, %v9526_v44, %v5254_v22 }
 0xb1e   : > { %v12508_v18 = vmul.f32 %v5451_v10, %v5258_v15  ;;  %v5509_v15 = vld [vmem:[%s14014_s5 + $0x8] sm:$0xff] }
 0xb1f   : > { %6359 = vmatpush.msrb.mxu2 %v5509_v15 }
 0xb23   : > { %8874 = vmatmul.msk.f32.gmra.mxu1 %vm1118_vm0, %v12469_v32  ;;  %v5885_v29 = vpop.permute.xlu2 %5884 }
 0xb2b   : > { %8875 = vmatmul.msk.f32.gmra.mxu1 %vm1118_vm0, %v12482_v25  ;;  %v5887_v20 = vpop.permute.xlu2 %5886 }
 0xb33   : > { %8876 = vmatmul.msk.f32.gmra.mxu1 %vm1118_vm0, %v12492_v35 }
 0xb3b   : > { %8877 = vmatmul.msk.f32.gmra.mxu1 %vm1118_vm0, %v12501_v5 }
 0xb43   : > { %8878 = vmatmul.msk.f32.gmra.mxu1 %vm1118_vm0, %v12508_v18 }
 0xb46   : > { %v5893_v21 = vpop.permute.xlu2 %5892 }
 0xb47   : > { %8887 = vmatpush.xpose.msk.msra.mxu3 %vm1118_vm0, %v5893_v21 }
 0xb4c   : > { %v5889_v39 = vpop.permute.xlu1 %5888 }
 0xb54   : > { %v5891_v53 = vpop.permute.xlu0 %5890 }
 0xb55   : > { %8888 = vmatpush.xpose.msk.msra.mxu3 %vm1118_vm0, %v5891_v53  ;;  %v5508_v53 = vld [vmem:[%s14014_s5] sm:$0xff] }
 0xb56   : > { %6360 = vmatpush.msrb.mxu2 %v5508_v53 }
 0xb59   : > { %8889 = vmatpush.xpose.msk.msra.mxu3 %vm1118_vm0, %v5889_v39 }
 0xb5d   : > { %8890 = vmatpush.xpose.msk.msra.mxu3 %vm1118_vm0, %v5887_v20 }
 0xb61   : > { %8891 = vmatpush.xpose.msk.msra.mxu3 %vm1118_vm0, %v5885_v29 }
 0xb65   : > { %8892 = vmatpush.xpose.msk.msra.mxu3 %vm1118_vm0, %v5883_v30 }
 0xb88   : > { %v5581_v51 = vpop.f32.mrf.mxu1 }
 0xb89   : > { %v5605_v44 = vsel %vm1192_vm1, %v5581_v51, -inf }
 0xb8a   : > { %5606 = vmax.xlane.f32.xlu0 %v5605_v44 }
 0xb90   : > { %v5584_v57 = vpop.f32.mrf.mxu1 }
 0xb91   : > { %v5608_v23 = vsel %vm1192_vm1, %v5584_v57, -inf }
 0xb92   : > { %5609 = vmax.xlane.f32.xlu1 %v5608_v23 }
 0xb98   : > { %v5587_v17 = vpop.f32.mrf.mxu1 }
 0xb99   : > { %v5611_v28 = vsel %vm1192_vm1, %v5587_v17, -inf }
 0xb9a   : > { %5612 = vmax.xlane.f32.xlu2 %v5611_v28 }
 0xba0   : > { %v5590_v2 = vpop.f32.mrf.mxu1 }
 0xba1   : > { %v5614_v56 = vsel %vm1192_vm1, %v5590_v2, -inf }
 0xba2   : > { %5615 = vmax.xlane.f32.xlu0 %v5614_v56 }
 0xba8   : > { %v5593_v3 = vpop.f32.mrf.mxu1 }
 0xba9   : > { %v5617_v43 = vsel %vm1192_vm1, %v5593_v3, -inf }
 0xbaa   : > { %5618 = vmax.xlane.f32.xlu1 %v5617_v43 }
 0xbb0   : > { %v12541_v30 = vpop.f32.mrf.mxu1 }
 0xbb1   : > { %v5620_v58 = vsel %vm1192_vm1, %v12541_v30, -inf }
 0xbb2   : > { %5880 = vrot.lane.b32.xlu2 %v12392_v41, %s14011_s1 }
 0xbb6   : > { %5862 = vrot.lane.b32.xlu0 %v12414_v49, %s14011_s1 }
 0xbbe   : > { %5864 = vrot.lane.b32.xlu0 %v12435_v42, %s14011_s1 }
 0xbc3   : > { %6416 = vrot.lane.b32.xlu1 %v12316_v48, %s14012_s3 }
 0xbc6   : > { %5866 = vrot.lane.b32.xlu0 %v12453_v61, %s14011_s1 }
 0xbcb   : > { %6869 = vrot.lane.b32.xlu1 %v12284_v8, %s14013_s4 }
 0xbce   : > { %6875 = vrot.lane.b32.xlu0 %v12316_v48, %s14013_s4  ;;  %v12553_v48 = vpop.f32.mrf.mxu1 }
 0xbcf   : > { %v5623_v47 = vsel %vm1192_vm1, %v12553_v48, -inf }
 0xbd3   : > { %5874 = vrot.lane.b32.xlu1 %v12501_v5, %s14011_s1 }
 0xbd6   : > { %5870 = vrot.lane.b32.xlu0 %v12482_v25, %s14011_s1  ;;  %v12557_v26 = vpop.f32.mrf.mxu1 }
 0xbd7   : > { %v5626_v31 = vsel %vm1192_vm1, %v12557_v26, -inf }
 0xbdb   : > { %6406 = vrot.lane.b32.xlu1 %v12264_v54, %s14012_s3  ;;  %5621 = vmax.xlane.f32.xlu2 %v5620_v58 }
 0xbde   : > { %6873 = vrot.lane.b32.xlu0 %v12299_v46, %s14013_s4 }
 0xbe6   : > { %6871 = vrot.lane.b32.xlu0 %v12291_v4, %s14013_s4 }
 0xbf3   : > { %5878 = vrot.lane.b32.xlu2 %v12406_v33, %s14011_s1 }
 0xbfb   : > { %5868 = vrot.lane.b32.xlu2 %v12469_v32, %s14011_s1 }
 0xbfd   : > { %v5607_v37 = vpop.xlane.xlu0 %5606 }
 0xbfe   : > { %v5629_v16 = vsub.f32 %v5581_v51, %v5607_v37 }
 0xc00   : > { %v5637_v40 = vmul.f32 1.442695, %v5629_v16 }
 0xc02   : > { %9527 = vpow2.f32 %v5637_v40 }
 0xc03   : > { %6414 = vrot.lane.b32.xlu2 %v12299_v46, %s14012_s3 }
 0xc05   : > { %v5610_v7 = vpop.xlane.xlu1 %5609  ;;  %5627 = vmax.xlane.f32.xlu1 %v5626_v31 }
 0xc06   : > { %v5630_v19 = vsub.f32 %v5584_v57, %v5610_v7 }
 0xc08   : > { %v9528_v27 = vpop.eup %9527  ;;  %v5639_v52 = vmul.f32 1.442695, %v5630_v19 }
 0xc09   : > { %8879 = vmatmul.msk.f32.vlgmr.msra.gmra.mxu2 %vm1192_vm1, %v9528_v27 }
 0xc0a   : > { %9529 = vpow2.f32 %v5639_v52 }
 0xc0b   : > { %5872 = vrot.lane.b32.xlu2 %v12492_v35, %s14011_s1 }
 0xc0d   : > { %v5613_v29 = vpop.xlane.xlu2 %5612 }
 0xc0e   : > { %v5631_v14 = vsub.f32 %v5587_v17, %v5613_v29 }
 0xc10   : > { %v12568_v46 = vpop.eup %9529  ;;  %v5641_v36 = vmul.f32 1.442695, %v5631_v14  ;;  %5624 = vmax.xlane.f32.xlu0 %v5623_v47 }
 0xc11   : > { %8880 = vmatmul.msk.f32.gmra.mxu2 %vm1192_vm1, %v12568_v46  ;;  %v5656_v40 = vsel %vm1192_vm1, %v12568_v46, 0.0 }
 0xc12   : > { %9531 = vpow2.f32 %v5641_v36 }
 0xc13   : > { %6410 = vrot.lane.b32.xlu2 %v12284_v8, %s14012_s3 }
 0xc15   : > { %v5881_v50 = vpop.permute.xlu2 %5880  ;;  %v5616_v9 = vpop.xlane.xlu0 %5615 }
 0xc16   : > { %v5632_v22 = vsub.f32 %v5590_v2, %v5616_v9  ;;  %8893 = vmatpush.xpose.msk.msra.mxu3 %vm1118_vm0, %v5881_v50 }
 0xc18   : > { %v9532_v0 = vpop.eup %9531  ;;  %v5643_v12 = vmul.f32 1.442695, %v5632_v22 }
 0xc19   : > { %8881 = vmatmul.msk.f32.gmra.mxu2 %vm1192_vm1, %v9532_v0  ;;  %v5659_v2 = vsel %vm1192_vm1, %v9532_v0, 0.0 }
 0xc1a   : > { %9533 = vpow2.f32 %v5643_v12 }
 0xc1b   : > { %6408 = vrot.lane.b32.xlu2 %v12275_v62, %s14012_s3 }
 0xc1d   : > { %v5619_v20 = vpop.xlane.xlu1 %5618 }
 0xc1e   : > { %v5633_v10 = vsub.f32 %v5593_v3, %v5619_v20  ;;  %6404 = vrot.lane.b32.xlu1 %v12392_v41, %s14012_s3 }
 0xc20   : > { %v9534_v8 = vpop.eup %9533  ;;  %v5645_v21 = vmul.f32 1.442695, %v5633_v10 }
 0xc21   : > { %8882 = vmatmul.msk.f32.gmra.mxu2 %vm1192_vm1, %v9534_v8  ;;  %v5662_v17 = vsel %vm1192_vm1, %v9534_v8, 0.0 }
 0xc22   : > { %9535 = vpow2.f32 %v5645_v21 }
 0xc23   : > { %6863 = vrot.lane.b32.xlu2 %v12392_v41, %s14013_s4 }
 0xc24   : > { %6412 = vrot.lane.b32.xlu0 %v12291_v4, %s14012_s3  ;;  %v5653_v4 = vsel %vm1192_vm1, %v9528_v27, 0.0 }
 0xc28   : > { %v12587_v39 = vpop.eup %9535  ;;  %v5863_v51 = vpop.permute.xlu0 %5862 }
 0xc29   : > { %8883 = vmatmul.msk.f32.gmra.mxu2 %vm1192_vm1, %v12587_v39 }
 0xc2c   : > { %6867 = vrot.lane.b32.xlu0 %v12275_v62, %s14013_s4 }
 0xc30   : > { %v5865_v44 = vpop.permute.xlu0 %5864 }
 0xc34   : > { %6865 = vrot.lane.b32.xlu0 %v12264_v54, %s14013_s4 }
 0xc35   : > { %v6417_v3 = vpop.permute.xlu1 %6416 }
 0xc38   : > { %v5867_v57 = vpop.permute.xlu0 %5866 }
 0xc3c   : > { %5876 = vrot.lane.b32.xlu0 %v12508_v18, %s14011_s1 }
 0xc40   : > { %v6876_v41 = vpop.permute.xlu0 %6875 }
 0xc41   : > { %8959 = vmatpush.xpose.msk.msra.mxu2 %vm1118_vm0, %v6876_v41 }
 0xc48   : > { %v5871_v23 = vpop.permute.xlu0 %5870  ;;  %5654 = vadd.xlane.f32.xlu1 %v5653_v4 }
 0xc4c   : > { %5663 = vadd.xlane.f32.xlu2 %v5662_v17 }
 0xc4e   : > { %v5622_v28 = vpop.xlane.xlu2 %5621 }
 0xc4f   : > { %v5634_v62 = vsub.f32 %v12541_v30, %v5622_v28  ;;  %v6870_v30 = vpop.permute.xlu1 %6869 }
 0xc50   : > { %v6874_v54 = vpop.permute.xlu0 %6873  ;;  %5660 = vadd.xlane.f32.xlu1 %v5659_v2 }
 0xc51   : > { %v5647_v56 = vmul.f32 1.442695, %v5634_v62  ;;  %8960 = vmatpush.xpose.msk.msra.mxu2 %vm1118_vm0, %v6874_v54 }
 0xc53   : > { %9537 = vpow2.f32 %v5647_v56 }
 0xc56   : > { %v5879_v43 = vpop.permute.xlu2 %5878 }
 0xc57   : > { %8894 = vmatpush.xpose.msk.msra.mxu3 %vm1118_vm0, %v5879_v43  ;;  %v5875_v7 = vpop.permute.xlu1 %5874 }
 0xc58   : > { %v6872_v58 = vpop.permute.xlu0 %6871 }
 0xc59   : > { %v9538_v37 = vpop.eup %9537  ;;  %8961 = vmatpush.xpose.msk.msra.mxu2 %vm1118_vm0, %v6872_v58 }
 0xc5a   : > { %8884 = vmatmul.msk.f32.gmra.mxu2 %vm1192_vm1, %v9538_v37  ;;  %8895 = vmatmul.msk.f32.vlgmr.msra.gmra.mxu3 %vm1118_vm0, %v5863_v51  ;;  %v5668_v9 = vsel %vm1192_vm1, %v9538_v37, 0.0 }
 0xc5b   : > { %8927 = vmatpush.xpose.msk.msrb.mxu3 %vm1118_vm0, %v6417_v3 }
 0xc5d   : > { %8962 = vmatpush.xpose.msk.msra.mxu2 %vm1118_vm0, %v6870_v30 }
 0xc5e   : > { %v5869_v16 = vpop.permute.xlu2 %5868 }
 0xc62   : > { %8896 = vmatmul.msk.f32.gmra.mxu3 %vm1118_vm0, %v5865_v44 }
 0xc64   : > { %6861 = vrot.lane.b32.xlu2 %v12406_v33, %s14013_s4 }
 0xc66   : > { %v6415_v31 = vpop.permute.xlu2 %6414  ;;  %5657 = vadd.xlane.f32.xlu0 %v5656_v40 }
 0xc67   : > { %8928 = vmatpush.xpose.msk.msrb.mxu3 %vm1118_vm0, %v6415_v31 }
 0xc69   : > { %6402 = vrot.lane.b32.xlu1 %v12406_v33, %s14012_s3  ;;  %v6407_v33 = vpop.permute.xlu1 %6406 }
 0xc6a   : > { %8897 = vmatmul.msk.f32.gmra.mxu3 %vm1118_vm0, %v5867_v57 }
 0xc6c   : > { %6386 = vrot.lane.b32.xlu2 %v12414_v49, %s14012_s3 }
 0xc6e   : > { %v5873_v19 = vpop.permute.xlu2 %5872 }
 0xc72   : > { %8898 = vmatmul.msk.f32.gmra.mxu3 %vm1118_vm0, %v5869_v16 }
 0xc74   : > { %6849 = vrot.lane.b32.xlu2 %v12453_v61, %s14013_s4 }
 0xc78   : > { %v5628_v29 = vpop.xlane.xlu1 %5627 }
 0xc7a   : > { %8899 = vmatmul.msk.f32.gmra.mxu3 %vm1118_vm0, %v5871_v23  ;;  %6845 = vrot.lane.b32.xlu0 %v12414_v49, %s14013_s4  ;;  %v5636_v49 = vsub.f32 %v12557_v26, %v5628_v29  ;;  %v12647_v26 = vpack.i.bf16 %v12233_v1, %v12237_v24  ;;  %v12658_v1 = vpack.i.bf16 %v12221_v60, %v12223_v13 }
 0xc7b   : > { %v12670_v60 = vpack.i.bf16 %v12217_v38, %v12219_v34 }
 0xc7c   : > { %6392 = vrot.lane.b32.xlu2 %v12469_v32, %s14012_s3  ;;  %v5651_v47 = vmul.f32 1.442695, %v5636_v49 }
 0xc82   : > { %8900 = vmatmul.msk.f32.gmra.mxu3 %vm1118_vm0, %v5873_v19  ;;  %6847 = vrot.lane.b32.xlu0 %v12435_v42, %s14013_s4 }
 0xc83   : > { %v5625_v27 = vpop.xlane.xlu0 %5624 }
 0xc84   : > { %v5635_v52 = vsub.f32 %v12553_v48, %v5625_v27  ;;  %6855 = vrot.lane.b32.xlu2 %v12492_v35, %s14013_s4  ;;  %v5665_v48 = vsel %vm1192_vm1, %v12587_v39, 0.0 }
 0xc86   : > { %v5649_v14 = vmul.f32 1.442695, %v5635_v52 }
 0xc88   : > { %9539 = vpow2.f32 %v5649_v14 }
 0xc89   : > { %9541 = vpow2.f32 %v5651_v47 }
 0xc8a   : > { %8901 = vmatmul.msk.f32.gmra.mxu3 %vm1118_vm0, %v5875_v7  ;;  %6390 = vrot.lane.b32.xlu0 %v12453_v61, %s14012_s3  ;;  %v6411_v61 = vpop.permute.xlu2 %6410 }
 0xc8c   : > { %6398 = vrot.lane.b32.xlu2 %v12501_v5, %s14012_s3  ;;  %v5718_v23 = vpop.f32.mrf.mxu2 }
 0xc8e   : > { %v9540_v46 = vpop.eup %9539 }
 0xc8f   : > { %8885 = vmatmul.msk.f32.gmra.mxu2 %vm1192_vm1, %v9540_v46  ;;  %v9542_v36 = vpop.eup %9541 }
 0xc90   : > { %v6405_v13 = vpop.permute.xlu1 %6404  ;;  %v5674_v20 = vsel %vm1192_vm1, %v9542_v36, 0.0 }
 0xc92   : > { %6853 = vrot.lane.b32.xlu0 %v12482_v25, %s14013_s4  ;;  %v6409_v24 = vpop.permute.xlu2 %6408 }
 0xc93   : > { %5666 = vadd.xlane.f32.xlu1 %v5665_v48 }
 0xc94   : > { %9158 = vrot.lane.b32.xlu2 %v12647_v26, %s14011_s1  ;;  %v5721_v29 = vpop.f32.mrf.mxu2 }
 0xc96   : > { %v6413_v50 = vpop.permute.xlu0 %6412 }
 0xc97   : > { %8886 = vmatmul.msk.f32.gmra.mxu2 %vm1192_vm1, %v9542_v36  ;;  %8929 = vmatpush.xpose.msk.msrb.mxu3 %vm1118_vm0, %v6413_v50 }
 0xc9a   : > { %6396 = vrot.lane.b32.xlu0 %v12492_v35, %s14012_s3  ;;  %v5671_v35 = vsel %vm1192_vm1, %v9540_v46, 0.0  ;;  %v6864_v12 = vpop.permute.xlu2 %6863 }
 0xc9b   : > { %8930 = vmatpush.xpose.msk.msrb.mxu3 %vm1118_vm0, %v6411_v61  ;;  %5669 = vadd.xlane.f32.xlu1 %v5668_v9 }
 0xc9c   : > { %9168 = vrot.lane.b32.xlu2 %v12658_v1, %s14011_s1 }
 0xc9e   : > { %v6868_v22 = vpop.permute.xlu0 %6867 }
 0xc9f   : > { %8931 = vmatpush.xpose.msk.msrb.mxu3 %vm1118_vm0, %v6409_v24  ;;  %8963 = vmatpush.xpose.msk.msra.mxu2 %vm1118_vm0, %v6868_v22 }
 0xca2   : > { %6859 = vrot.lane.b32.xlu0 %v12508_v18, %s14013_s4 }
 0xca3   : > { %8932 = vmatpush.xpose.msk.msrb.mxu3 %vm1118_vm0, %v6407_v33  ;;  %5672 = vadd.xlane.f32.xlu1 %v5671_v35 }
 0xca4   : > { %9173 = vrot.lane.b32.xlu2 %v12670_v60, %s14011_s1 }
 0xca6   : > { %v6866_v0 = vpop.permute.xlu0 %6865 }
 0xca7   : > { %8933 = vmatpush.xpose.msk.msrb.mxu3 %vm1118_vm0, %v6405_v13  ;;  %8964 = vmatpush.xpose.msk.msra.mxu2 %vm1118_vm0, %v6866_v0 }
 0xcab   : > { %5675 = vadd.xlane.f32.xlu1 %v5674_v20  ;;  %8965 = vmatpush.xpose.msk.msra.mxu2 %vm1118_vm0, %v6864_v12 }
 0xcae   : > { %v5877_v38 = vpop.permute.xlu0 %5876 }
 0xcaf   : > { %8902 = vmatmul.msk.f32.gmra.mxu3 %vm1118_vm0, %v5877_v38 }
 0xcbb   : > { %v5655_v34 = vpop.xlane.xlu1 %5654 }
 0xcbc   : > { %9543 = vrcp.f32 %v5655_v34  ;;  %v5753_v53 = vand.u32 2147483648, %v5655_v34  ;;  %v5751_v51 = vand.u32 2147483647, %v5655_v34  ;;  %vm5747_vm14 = vweird.f32 %v5655_v34 }
 0xcbe   : > { %v5754_v41 = vor.u32 1.1754944e-38, %v5753_v53  ;;  %vm5752_vm2 = vcmp.eq.f32.partialorder %v5751_v51, 8.507059e+37 }
 0xcbf   : > { %v12680_v15 = vpop.xlane.xlu2 %5663 }
 0xcc0   : > { %vm5789_vm12 = vweird.f32 %v12680_v15 }
 0xcc2   : > { %v9544_v10 = vpop.eup %9543 }
 0xcc3   : > { %v5743_v8 = vmul.f32 %v9544_v10, %v5655_v34  ;;  %vm5748_vm13 = vweird.f32 %v9544_v10  ;;  %v5661_v62 = vpop.xlane.xlu1 %5660  ;;  %v5795_v34 = vand.u32 2147483648, %v12680_v15 }
 0xcc4   : > { %6388 = vrot.lane.b32.xlu1 %v12435_v42, %s14012_s3  ;;  %vm5749_vm15 = vmor %vm5747_vm14, %vm5748_vm13  ;;  %9545 = vrcp.f32 %v5661_v62  ;;  %v5781_v36 = vand.u32 2147483648, %v5661_v62  ;;  %vm5775_vm8 = vweird.f32 %v5661_v62  ;;  %v5779_v9 = vand.u32 2147483647, %v5661_v62 }
 0xcc5   : > { %v5744_v21 = vsub.f32 1.0, %v5743_v8 }
 0xcc6   : > { %v5782_v0 = vor.u32 1.1754944e-38, %v5781_v36  ;;  %vm5780_vm10 = vcmp.eq.f32.partialorder %v5779_v9, 8.507059e+37 }
 0xcc7   : > { %v5745_v39 = vmul.f32 %v9544_v10, %v5744_v21  ;;  %v6862_v44 = vpop.permute.xlu2 %6861 }
 0xcc8   : > { %8966 = vmatpush.xpose.msk.msra.mxu2 %vm1118_vm0, %v6862_v44 }
 0xcc9   : > { %v5746_v57 = vadd.f32 %v9544_v10, %v5745_v39  ;;  %v5796_v39 = vor.u32 1.1754944e-38, %v5795_v34 }
 0xcca   : > { %v9546_v56 = vpop.eup %9545 }
 0xccb   : > { %v5750_v4 = vsel %vm5749_vm15, %v9544_v10, %v5746_v57  ;;  %vm5776_vm6 = vweird.f32 %v9546_v56  ;;  %v5793_v10 = vand.u32 2147483647, %v12680_v15 }
 0xccc   : > { %v5755_v17 = vsel %vm5752_vm2, %v5754_v41, %v5750_v4  ;;  %6851 = vrot.lane.b32.xlu1 %v12469_v32, %s14013_s4  ;;  %v5771_v32 = vmul.f32 %v9546_v56, %v5661_v62  ;;  %vm5777_vm9 = vmor %vm5775_vm8, %vm5776_vm6 }
 0xccd   : > { %v5854_v42 = vmul.f32 %v5755_v17, %v5718_v23  ;;  %vm5794_vm14 = vcmp.eq.f32.partialorder %v5793_v10, 8.507059e+37 }
 0xcce   : > { %v5772_v16 = vsub.f32 1.0, %v5771_v32 }
 0xccf   : > { %v6387_v28 = vpop.permute.xlu2 %6386  ;;  %8919 = vmatmul.msk.f32.vlgmr.msrb.gmra.mxu2 %vm1118_vm0, %v5854_v42 }
 0xcd0   : > { %v5773_v33 = vmul.f32 %v9546_v56, %v5772_v16 }
 0xcd2   : > { %v5774_v48 = vadd.f32 %v9546_v56, %v5773_v33 }
 0xcd4   : > { %6394 = vrot.lane.b32.xlu1 %v12482_v25, %s14012_s3  ;;  %v5778_v13 = vsel %vm5777_vm9, %v9546_v56, %v5774_v48 }
 0xcd5   : > { %v5783_v20 = vsel %vm5780_vm10, %v5782_v0, %v5778_v13 }
 0xcd7   : > { %v12690_v2 = vpop.permute.xlu2 %6849 }
 0xcd9   : > { %v5658_v54 = vpop.xlane.xlu0 %5657 }
 0xcda   : > { %9547 = vrcp.f32 %v5658_v54  ;;  %v5767_v7 = vand.u32 2147483648, %v5658_v54  ;;  %v5765_v27 = vand.u32 2147483647, %v5658_v54  ;;  %vm5761_vm4 = vweird.f32 %v5658_v54 }
 0xcdb   : > { %9549 = vrcp.f32 %v12680_v15  ;;  %v6403_v3 = vpop.permute.xlu1 %6402 }
 0xcdc   : > { %6857 = vrot.lane.b32.xlu1 %v12501_v5, %s14013_s4  ;;  %8934 = vmatpush.xpose.msk.msrb.mxu3 %vm1118_vm0, %v6403_v3  ;;  %v5768_v46 = vor.u32 1.1754944e-38, %v5767_v7  ;;  %vm5766_vm7 = vcmp.eq.f32.partialorder %v5765_v27, 8.507059e+37 }
 0xcdd   : > { %v12696_v43 = vpop.f32.mrf.mxu3 }
 0xcde   : > { %v5967_v58 = vsel %vm1192_vm1, %v12696_v43, -inf }
 0xcdf   : > { %v12700_v25 = vpop.permute.xlu2 %6392  ;;  %5968 = vmax.xlane.f32.xlu0 %v5967_v58  ;;  %8935 = vmatmul.msk.f32.vlgmr.msrb.gmra.mxu3 %vm1118_vm0, %v6387_v28 }
 0xce0   : > { %v9548_v37 = vpop.eup %9547 }
 0xce1   : > { %v9550_v30 = vpop.eup %9549  ;;  %v5757_v40 = vmul.f32 %v9548_v37, %v5658_v54  ;;  %vm5762_vm3 = vweird.f32 %v9548_v37 }
 0xce2   : > { %v5785_v5 = vmul.f32 %v9550_v30, %v12680_v15  ;;  %vm5763_vm5 = vmor %vm5761_vm4, %vm5762_vm3  ;;  %vm5790_vm11 = vweird.f32 %v9550_v30 }
 0xce3   : > { %v5758_v31 = vsub.f32 1.0, %v5757_v40  ;;  %vm5791_vm13 = vmor %vm5789_vm12, %vm5790_vm11 }
 0xce4   : > { %6400 = vrot.lane.b32.xlu1 %v12508_v18, %s14012_s3  ;;  %v5786_v47 = vsub.f32 1.0, %v5785_v5  ;;  %v12712_v18 = vpack.i.bf16 %v12225_v11, %v12229_v55  ;;  %v5724_v55 = vpop.f32.mrf.mxu2 }
 0xce5   : > { %v5759_v19 = vmul.f32 %v9548_v37, %v5758_v31  ;;  %v12706_v52 = vpop.f32.mrf.mxu3  ;;  %v5856_v8 = vmul.f32 %v5783_v20, %v5724_v55 }
 0xce6   : > { %v5787_v22 = vmul.f32 %v9550_v30, %v5786_v47  ;;  %v5970_v33 = vsel %vm1192_vm1, %v12706_v52, -inf }
 0xce7   : > { %v5760_v14 = vadd.f32 %v9548_v37, %v5759_v19  ;;  %v12708_v49 = vpop.permute.xlu2 %6855 }
 0xce8   : > { %v5788_v38 = vadd.f32 %v9550_v30, %v5787_v22 }
 0xce9   : > { %v5764_v61 = vsel %vm5763_vm5, %v9548_v37, %v5760_v14 }
 0xcea   : > { %v5769_v50 = vsel %vm5766_vm7, %v5768_v46, %v5764_v61  ;;  %v5792_v53 = vsel %vm5791_vm13, %v9550_v30, %v5788_v38 }
 0xceb   : > { %v5855_v24 = vmul.f32 %v5769_v50, %v5721_v29  ;;  %v5797_v41 = vsel %vm5794_vm14, %v5796_v39, %v5792_v53 }
 0xcec   : > { %9163 = vrot.lane.b32.xlu1 %v12712_v18, %s14011_s1  ;;  %v5727_v4 = vpop.f32.mrf.mxu2  ;;  %v6846_v38 = vpop.permute.xlu0 %6845  ;;  %s14039_s1 = sld [smem:[#allocation20_spill]] }
 0xced   : > { %v12716_v35 = vpop.f32.mrf.mxu3  ;;  %8920 = vmatmul.msk.f32.gmra.mxu2 %vm1118_vm0, %v5855_v24  ;;  %v5857_v15 = vmul.f32 %v5797_v41, %v5727_v4 }
 0xcee   : > { %v5973_v12 = vsel %vm1192_vm1, %v12716_v35, -inf }
 0xcef   : > { %v12721_v11 = vpop.permute.xlu2 %6398  ;;  %5974 = vmax.xlane.f32.xlu2 %v5973_v12 }
 0xcf4   : > { %v5730_v7 = vpop.f32.mrf.mxu2 }
 0xcf5   : > { %v12726_v21 = vpop.f32.mrf.mxu3  ;;  %8921 = vmatmul.msk.f32.gmra.mxu2 %vm1118_vm0, %v5856_v8 }
 0xcf6   : > { %v5976_v51 = vsel %vm1192_vm1, %v12726_v21, -inf }
 0xcf7   : > { %5977 = vmax.xlane.f32.xlu0 %v5976_v51  ;;  %v9159_v44 = vpop.permute.xlu2 %9158 }
 0xcf8   : > { %v9160_v57 = vunpack.i.l.bf16 %v9159_v44  ;;  %v9161_v23 = vunpack.i.h.bf16 %v9159_v44 }
 0xcfa   : > { %6103 = vmatpush.msrb.mxu0 %v9160_v57 }
 0xcfc   : > { %6104 = vmatpush.msrb.mxu0 %v9161_v23  ;;  %v5733_v22 = vpop.f32.mrf.mxu2 }
 0xcfd   : > { %v12731_v17 = vpop.f32.mrf.mxu3  ;;  %8922 = vmatmul.msk.f32.gmra.mxu2 %vm1118_vm0, %v5857_v15 }
 0xcfe   : > { %v5979_v42 = vsel %vm1192_vm1, %v12731_v17, -inf }
 0xcff   : > { %5980 = vmax.xlane.f32.xlu0 %v5979_v42 }
 0xd05   : > { %v12736_v28 = vpop.f32.mrf.mxu3 }
 0xd06   : > { %v5667_v62 = vpop.xlane.xlu1 %5666  ;;  %v5982_v13 = vsel %vm1192_vm1, %v12736_v28, -inf }
 0xd07   : > { %9551 = vrcp.f32 %v5667_v62  ;;  %9178 = vrot.lane.b32.xlu2 %v12647_v26, %s14013_s4  ;;  %v5809_v16 = vand.u32 2147483648, %v5667_v62  ;;  %v5807_v40 = vand.u32 2147483647, %v5667_v62  ;;  %vm5803_vm2 = vweird.f32 %v5667_v62 }
 0xd09   : > { %v5810_v19 = vor.u32 1.1754944e-38, %v5809_v16  ;;  %vm5808_vm4 = vcmp.eq.f32.partialorder %v5807_v40, 8.507059e+37 }
 0xd0d   : > { %v9552_v54 = vpop.eup %9551  ;;  %v12740_v56 = vpop.f32.mrf.mxu3 }
 0xd0e   : > { %v5799_v3 = vmul.f32 %v9552_v54, %v5667_v62  ;;  %v5670_v32 = vpop.xlane.xlu1 %5669  ;;  %v5985_v58 = vsel %vm1192_vm1, %v12740_v56, -inf  ;;  %vm5804_vm15 = vweird.f32 %v9552_v54 }
 0xd0f   : > { %9553 = vrcp.f32 %v5670_v32  ;;  %5986 = vmax.xlane.f32.xlu0 %v5985_v58  ;;  %vm5805_vm3 = vmor %vm5803_vm2, %vm5804_vm15  ;;  %v5823_v36 = vand.u32 2147483648, %v5670_v32  ;;  %v5821_v50 = vand.u32 2147483647, %v5670_v32  ;;  %vm5817_vm6 = vweird.f32 %v5670_v32 }
 0xd10   : > { %v5800_v37 = vsub.f32 1.0, %v5799_v3 }
 0xd11   : > { %v5824_v0 = vor.u32 1.1754944e-38, %v5823_v36  ;;  %vm5822_vm8 = vcmp.eq.f32.partialorder %v5821_v50, 8.507059e+37 }
 0xd12   : > { %v5801_v30 = vmul.f32 %v9552_v54, %v5800_v37  ;;  %v5736_v41 = vpop.f32.mrf.mxu2 }
 0xd14   : > { %v5802_v31 = vadd.f32 %v9552_v54, %v5801_v30 }
 0xd15   : > { %v9554_v5 = vpop.eup %9553 }
 0xd16   : > { %v5813_v27 = vmul.f32 %v9554_v5, %v5670_v32  ;;  %v5673_v29 = vpop.xlane.xlu1 %5672  ;;  %5971 = vmax.xlane.f32.xlu1 %v5970_v33  ;;  %v5806_v14 = vsel %vm5805_vm3, %v9552_v54, %v5802_v31  ;;  %vm5818_vm5 = vweird.f32 %v9554_v5  ;;  %v6848_v32 = vpop.permute.xlu0 %6847 }
 0xd17   : > { %9555 = vrcp.f32 %v5673_v29  ;;  %v5811_v46 = vsel %vm5808_vm4, %v5810_v19, %v5806_v14  ;;  %vm5819_vm7 = vmor %vm5817_vm6, %vm5818_vm5  ;;  %v5837_v8 = vand.u32 2147483648, %v5673_v29  ;;  %v5835_v51 = vand.u32 2147483647, %v5673_v29 }
 0xd18   : > { %v5814_v47 = vsub.f32 1.0, %v5813_v27  ;;  %v5858_v48 = vmul.f32 %v5811_v46, %v5730_v7  ;;  %vm5831_vm10 = vweird.f32 %v5673_v29 }
 0xd19   : > { %v5838_v4 = vor.u32 1.1754944e-38, %v5837_v8  ;;  %vm5836_vm12 = vcmp.eq.f32.partialorder %v5835_v51, 8.507059e+37 }
 0xd1a   : > { %v5815_v61 = vmul.f32 %v9554_v5, %v5814_v47  ;;  %8923 = vmatmul.msk.f32.gmra.mxu2 %vm1118_vm0, %v5858_v48  ;;  %v5739_v31 = vpop.f32.mrf.mxu2 }
 0xd1c   : > { %v5816_v9 = vadd.f32 %v9554_v5, %v5815_v61  ;;  %v9169_v61 = vpop.permute.xlu2 %9168 }
 0xd1d   : > { %v9556_v24 = vpop.eup %9555 }
 0xd1e   : > { %v5827_v12 = vmul.f32 %v9556_v24, %v5673_v29  ;;  %v5676_v55 = vpop.xlane.xlu1 %5675  ;;  %5983 = vmax.xlane.f32.xlu1 %v5982_v13  ;;  %v5820_v20 = vsel %vm5819_vm7, %v9554_v5, %v5816_v9  ;;  %vm5832_vm9 = vweird.f32 %v9556_v24  ;;  %v6391_v27 = vpop.permute.xlu0 %6390 }
 0xd1f   : > { %9557 = vrcp.f32 %v5676_v55  ;;  %v5825_v10 = vsel %vm5822_vm8, %v5824_v0, %v5820_v20  ;;  %vm5833_vm11 = vmor %vm5831_vm10, %vm5832_vm9  ;;  %v5851_v3 = vand.u32 2147483648, %v5676_v55  ;;  %v5849_v37 = vand.u32 2147483647, %v5676_v55 }
 0xd20   : > { %v5828_v34 = vsub.f32 1.0, %v5827_v12  ;;  %v5859_v53 = vmul.f32 %v5825_v10, %v5733_v22  ;;  %vm5845_vm14 = vweird.f32 %v5676_v55  ;;  %v9170_v12 = vunpack.i.l.bf16 %v9169_v61 }
 0xd21   : > { %v5852_v16 = vor.u32 1.1754944e-38, %v5851_v3  ;;  %vm5850_vm2 = vcmp.eq.f32.partialorder %v5849_v37, 8.507059e+37 }
 0xd22   : > { %v5829_v39 = vmul.f32 %v9556_v24, %v5828_v34  ;;  %8924 = vmatmul.msk.f32.gmra.mxu2 %vm1118_vm0, %v5859_v53 }
 0xd23   : > { %9188 = vrot.lane.b32.xlu0 %v12712_v18, %s14013_s4 }
 0xd24   : > { %v5830_v44 = vadd.f32 %v9556_v24, %v5829_v39 }
 0xd25   : > { %v9558_v57 = vpop.eup %9557 }
 0xd26   : > { %v5841_v23 = vmul.f32 %v9558_v57, %v5676_v55  ;;  %v5834_v15 = vsel %vm5833_vm11, %v9556_v24, %v5830_v44  ;;  %vm5846_vm13 = vweird.f32 %v9558_v57  ;;  %v6854_v14 = vpop.permute.xlu0 %6853 }
 0xd27   : > { %v5839_v42 = vsel %vm5836_vm12, %v5838_v4, %v5834_v15  ;;  %vm5847_vm15 = vmor %vm5845_vm14, %vm5846_vm13 }
 0xd28   : > { %v5842_v62 = vsub.f32 1.0, %v5841_v23  ;;  %v5860_v54 = vmul.f32 %v5839_v42, %v5736_v41 }
 0xd2a   : > { %v5843_v58 = vmul.f32 %v9558_v57, %v5842_v62  ;;  %8925 = vmatmul.msk.f32.gmra.mxu2 %vm1118_vm0, %v5860_v54 }
 0xd2b   : > { %9198 = vrot.lane.b32.xlu0 %v12658_v1, %s14013_s4 }
 0xd2c   : > { %v5844_v30 = vadd.f32 %v9558_v57, %v5843_v58 }
 0xd2e   : > { %v5848_v40 = vsel %vm5847_vm15, %v9558_v57, %v5844_v30 }
 0xd2f   : > { %v5853_v5 = vsel %vm5850_vm2, %v5852_v16, %v5848_v40 }
 0xd30   : > { %v5861_v7 = vmul.f32 %v5853_v5, %v5739_v31 }
 0xd32   : > { %v12755_v33 = vpop.f32.mrf.mxu3  ;;  %8926 = vmatmul.msk.f32.gmra.mxu2 %vm1118_vm0, %v5861_v7 }
 0xd33   : > { %9203 = vrot.lane.b32.xlu0 %v12658_v1, %s14012_s3  ;;  %v5988_v19 = vsel %vm1192_vm1, %v12755_v33, -inf  ;;  %v6397_v1 = vpop.permute.xlu0 %6396 }
 0xd34   : > { %5989 = vmax.xlane.f32.xlu1 %v5988_v19 }
 0xd36   : > { %v6389_v29 = vpop.permute.xlu1 %6388 }
 0xd37   : > { %8936 = vmatmul.msk.f32.gmra.mxu3 %vm1118_vm0, %v6389_v29 }
 0xd3a   : > { %8967 = vmatmul.msk.f32.vlgmr.msra.gmra.mxu2 %vm1118_vm0, %v6846_v38 }
 0xd3b   : > { %v6860_v36 = vpop.permute.xlu0 %6859 }
 0xd3e   : > { %v6852_v47 = vpop.permute.xlu1 %6851 }
 0xd3f   : > { %8937 = vmatmul.msk.f32.gmra.mxu3 %vm1118_vm0, %v6391_v27 }
 0xd42   : > { %8968 = vmatmul.msk.f32.gmra.mxu2 %vm1118_vm0, %v6848_v32 }
 0xd46   : > { %v6395_v46 = vpop.permute.xlu1 %6394 }
 0xd47   : > { %8938 = vmatmul.msk.f32.gmra.mxu3 %vm1118_vm0, %v12700_v25  ;;  %v9174_v25 = vpop.permute.xlu2 %9173 }
 0xd48   : > { %v9175_v20 = vunpack.i.l.bf16 %v9174_v25 }
 0xd4a   : > { %8969 = vmatmul.msk.f32.gmra.mxu2 %vm1118_vm0, %v12690_v2 }
 0xd4d   : > { %9183 = vrot.lane.b32.xlu1 %v12647_v26, %s14012_s3 }
 0xd4e   : > { %v6858_v48 = vpop.permute.xlu1 %6857 }
 0xd4f   : > { %8939 = vmatmul.msk.f32.gmra.mxu3 %vm1118_vm0, %v6395_v46 }
 0xd52   : > { %8970 = vmatmul.msk.f32.gmra.mxu2 %vm1118_vm0, %v6852_v47  ;;  %v5969_v9 = vpop.xlane.xlu0 %5968  ;;  %v12794_v8 = vpop.f32.mrf.mxu2 }
 0xd53   : > { %v5991_v2 = vsub.f32 %v12696_v43, %v5969_v9  ;;  %v9171_v43 = vunpack.i.h.bf16 %v9169_v61 }
 0xd55   : > { %9193 = vrot.lane.b32.xlu1 %v12712_v18, %s14012_s3  ;;  %v5999_v22 = vmul.f32 1.442695, %v5991_v2 }
 0xd56   : > { %v6401_v50 = vpop.permute.xlu1 %6400 }
 0xd57   : > { %8940 = vmatmul.msk.f32.gmra.mxu3 %vm1118_vm0, %v6397_v1  ;;  %9559 = vpow2.f32 %v5999_v22 }
 0xd5a   : > { %8971 = vmatmul.msk.f32.gmra.mxu2 %vm1118_vm0, %v6854_v14 }
 0xd5d   : > { %v12788_v34 = vpop.eup %9559 }
 0xd5e   : > { %v9164_v26 = vpop.permute.xlu1 %9163 }
 0xd5f   : > { %v9165_v24 = vunpack.i.l.bf16 %v9164_v26  ;;  %8941 = vmatmul.msk.f32.gmra.mxu3 %vm1118_vm0, %v12721_v11  ;;  %v9166_v13 = vunpack.i.h.bf16 %v9164_v26  ;;  %v9176_v11 = vunpack.i.h.bf16 %v9174_v25 }
 0xd61   : > { %6105 = vmatpush.msrb.mxu0 %v9165_v24 }
 0xd62   : > { %v12781_v0 = vpop.f32.mrf.mxu3  ;;  %v5975_v18 = vpop.xlane.xlu2 %5974  ;;  %8972 = vmatmul.msk.f32.gmra.mxu2 %vm1118_vm0, %v12708_v49 }
 0xd63   : > { %6106 = vmatpush.msrb.mxu0 %v9166_v13  ;;  %v6491_v55 = vsel %vm1192_vm1, %v12781_v0, -inf  ;;  %v5993_v15 = vsub.f32 %v12716_v35, %v5975_v18 }
 0xd64   : > { %6492 = vmax.xlane.f32.xlu2 %v6491_v55 }
 0xd65   : > { %6107 = vmatpush.msrb.mxu0 %v9170_v12  ;;  %v6003_v42 = vmul.f32 1.442695, %v5993_v15 }
 0xd67   : > { %6108 = vmatpush.msrb.mxu0 %v9171_v43  ;;  %8942 = vmatmul.msk.f32.gmra.mxu3 %vm1118_vm0, %v6401_v50 }
 0xd69   : > { %6109 = vmatpush.msrb.mxu0 %v9175_v20 }
 0xd6a   : > { %v9179_v38 = vpop.permute.xlu2 %9178  ;;  %8973 = vmatmul.msk.f32.gmra.mxu2 %vm1118_vm0, %v6858_v48  ;;  %v5978_v53 = vpop.xlane.xlu0 %5977 }
 0xd6b   : > { %v9180_v10 = vunpack.i.l.bf16 %v9179_v38  ;;  %6110 = vmatpush.msrb.mxu0 %v9176_v11  ;;  %v9181_v49 = vunpack.i.h.bf16 %v9179_v38  ;;  %v5994_v3 = vsub.f32 %v12726_v21, %v5978_v53 }
 0xd6c   : > { %8903 = vmatmul.msk.f32.vlgmr.msrb.gmra.mxu0 %vm1192_vm1, %v12788_v34 }
 0xd6d   : > { %7078 = vmatpush.msra.mxu3 %v9180_v10  ;;  %v6005_v37 = vmul.f32 1.442695, %v5994_v3 }
 0xd6f   : > { %7079 = vmatpush.msra.mxu3 %v9181_v49 }
 0xd70   : > { %v12798_v39 = vpop.f32.mrf.mxu2 }
 0xd72   : > { %8974 = vmatmul.msk.f32.gmra.mxu2 %vm1118_vm0, %v6860_v36  ;;  %v5981_v51 = vpop.xlane.xlu0 %5980 }
 0xd73   : > { %v5995_v16 = vsub.f32 %v12731_v17, %v5981_v51 }
 0xd75   : > { %v6007_v5 = vmul.f32 1.442695, %v5995_v16 }
 0xd78   : > { %v12801_v41 = vpop.f32.mrf.mxu2 }
 0xd7c   : > { %9213 = vrot.lane.b32.xlu2 %v12670_v60, %s14012_s3  ;;  %s14035_s3 = sld [smem:[#allocation18_spill]] }
 0xd80   : > { %v12809_v32 = vpop.f32.mrf.mxu2 }
 0xd82   : > { %v5987_v23 = vpop.xlane.xlu0 %5986 }
 0xd83   : > { %v5997_v47 = vsub.f32 %v12740_v56, %v5987_v23 }
 0xd85   : > { %v6011_v1 = vmul.f32 1.442695, %v5997_v47 }
 0xd89   : > { %v5972_v44 = vpop.xlane.xlu1 %5971 }
 0xd8a   : > { %v5992_v57 = vsub.f32 %v12706_v52, %v5972_v44 }
 0xd8c   : > { %v6001_v4 = vmul.f32 1.442695, %v5992_v57 }
 0xd8e   : > { %9561 = vpow2.f32 %v6001_v4 }
 0xd8f   : > { %9563 = vpow2.f32 %v6003_v42 }
 0xd90   : > { %9565 = vpow2.f32 %v6005_v37 }
 0xd91   : > { %v5984_v7 = vpop.xlane.xlu1 %5983  ;;  %9567 = vpow2.f32 %v6007_v5 }
 0xd92   : > { %v5996_v27 = vsub.f32 %v12736_v28, %v5984_v7 }
 0xd94   : > { %v12804_v62 = vpop.eup %9561  ;;  %v6009_v14 = vmul.f32 1.442695, %v5996_v27 }
 0xd95   : > { %v9189_v54 = vpop.permute.xlu0 %9188  ;;  %8904 = vmatmul.msk.f32.gmra.mxu0 %vm1192_vm1, %v12804_v62  ;;  %v12811_v30 = vpop.eup %9563  ;;  %v6018_v3 = vsel %vm1192_vm1, %v12804_v62, 0.0 }
 0xd96   : > { %v9190_v52 = vunpack.i.l.bf16 %v9189_v54  ;;  %v9191_v58 = vunpack.i.h.bf16 %v9189_v54  ;;  %v12818_v19 = vpop.eup %9565  ;;  %9569 = vpow2.f32 %v6009_v14 }
 0xd97   : > { %v12825_v17 = vpop.eup %9567  ;;  %9571 = vpow2.f32 %v6011_v1 }
 0xd98   : > { %7080 = vmatpush.msra.mxu3 %v9190_v52  ;;  %v6027_v16 = vsel %vm1192_vm1, %v12825_v17, 0.0 }
 0xd9a   : > { %7081 = vmatpush.msra.mxu3 %v9191_v58 }
 0xd9c   : > { %v12832_v61 = vpop.eup %9569 }
 0xd9d   : > { %v9199_v35 = vpop.permute.xlu0 %9198  ;;  %8905 = vmatmul.msk.f32.gmra.mxu0 %vm1192_vm1, %v12811_v30  ;;  %v12816_v31 = vpop.f32.mrf.mxu2 }
 0xd9e   : > { %v9200_v40 = vunpack.i.l.bf16 %v9199_v35  ;;  %v9201_v21 = vunpack.i.h.bf16 %v9199_v35  ;;  %v12839_v25 = vpop.eup %9571 }
 0xda0   : > { %7082 = vmatpush.msra.mxu3 %v9200_v40 }
 0xda2   : > { %7083 = vmatpush.msra.mxu3 %v9201_v21 }
 0xda5   : > { %8906 = vmatmul.msk.f32.gmra.mxu0 %vm1192_vm1, %v12818_v19  ;;  %v12823_v29 = vpop.f32.mrf.mxu2  ;;  %v9204_v43 = vpop.permute.xlu0 %9203 }
 0xda6   : > { %v9205_v11 = vunpack.i.l.bf16 %v9204_v43  ;;  %v9206_v10 = vunpack.i.h.bf16 %v9204_v43 }
 0xda7   : > { %v5990_v48 = vpop.xlane.xlu1 %5989 }
 0xda8   : > { %v5998_v28 = vsub.f32 %v12755_v33, %v5990_v48  ;;  %v6021_v48 = vsel %vm1192_vm1, %v12811_v30, 0.0 }
 0xdaa   : > { %v6013_v50 = vmul.f32 1.442695, %v5998_v28 }
 0xdac   : > { %9573 = vpow2.f32 %v6013_v50  ;;  %v6030_v50 = vsel %vm1192_vm1, %v12832_v61, 0.0 }
 0xdad   : > { %8907 = vmatmul.msk.f32.gmra.mxu0 %vm1192_vm1, %v12825_v17  ;;  %v12830_v46 = vpop.f32.mrf.mxu2  ;;  %v6015_v17 = vsel %vm1192_vm1, %v12788_v34, 0.0 }
 0xdb2   : > { %v9574_v22 = vpop.eup %9573 }
 0xdb3   : > { %v6036_v21 = vsel %vm1192_vm1, %v9574_v22, 0.0 }
 0xdb5   : > { %8908 = vmatmul.msk.f32.gmra.mxu0 %vm1192_vm1, %v12832_v61  ;;  %v12837_v36 = vpop.f32.mrf.mxu2 }
 0xdba   : > { %v12847_v24 = vpop.f32.mrf.mxu3 }
 0xdbb   : > { %v6494_v14 = vsel %vm1192_vm1, %v12847_v24, -inf }
 0xdbd   : > { %8909 = vmatmul.msk.f32.gmra.mxu0 %vm1192_vm1, %v12839_v25  ;;  %v12843_v56 = vpop.f32.mrf.mxu2 }
 0xdbe   : > { %v6950_v2 = vsel %vm1192_vm1, %v12843_v56, -inf }
 0xdbf   : > { %v9184_v9 = vpop.permute.xlu1 %9183  ;;  %6951 = vmax.xlane.f32.xlu0 %v6950_v2 }
 0xdc0   : > { %v9185_v26 = vunpack.i.l.bf16 %v9184_v9  ;;  %v9186_v33 = vunpack.i.h.bf16 %v9184_v9 }
 0xdc2   : > { %6619 = vmatpush.msra.mxu0 %v9185_v26  ;;  %v12854_v38 = vpop.f32.mrf.mxu3 }
 0xdc3   : > { %v6497_v4 = vsel %vm1192_vm1, %v12854_v38, -inf }
 0xdc4   : > { %6620 = vmatpush.msra.mxu0 %v9186_v33 }
 0xdc5   : > { %8910 = vmatmul.msk.f32.gmra.mxu0 %vm1192_vm1, %v9574_v22  ;;  %v12850_v13 = vpop.f32.mrf.mxu2  ;;  %v6024_v22 = vsel %vm1192_vm1, %v12818_v19, 0.0 }
 0xdc6   : > { %v6953_v12 = vsel %vm1192_vm1, %v12850_v13, -inf }
 0xdc7   : > { %v9194_v18 = vpop.permute.xlu1 %9193  ;;  %6954 = vmax.xlane.f32.xlu1 %v6953_v12 }
 0xdc8   : > { %v9195_v55 = vunpack.i.l.bf16 %v9194_v18  ;;  %v9196_v20 = vunpack.i.h.bf16 %v9194_v18 }
 0xdca   : > { %6621 = vmatpush.msra.mxu0 %v9195_v55  ;;  %v12862_v51 = vpop.f32.mrf.mxu3  ;;  %v6033_v55 = vsel %vm1192_vm1, %v12839_v25, 0.0 }
 0xdcc   : > { %6622 = vmatpush.msra.mxu0 %v9196_v20 }
 0xdcd   : > { %v12856_v49 = vpop.f32.mrf.mxu2 }
 0xdce   : > { %6623 = vmatpush.msra.mxu0 %v9205_v11  ;;  %v6956_v53 = vsel %vm1192_vm1, %v12856_v49, -inf }
 0xdcf   : > { %6957 = vmax.xlane.f32.xlu1 %v6956_v53 }
 0xdd0   : > { %6624 = vmatpush.msra.mxu0 %v9206_v10 }
 0xdd2   : > { %v12875_v52 = vpop.f32.mrf.mxu3 }
 0xdd3   : > { %9208 = vrot.lane.b32.xlu0 %v12670_v60, %s14013_s4  ;;  %v6500_v60 = vsel %vm1192_vm1, %v12862_v51, -inf  ;;  %s14036_s4 = sld [smem:[#allocation19_spill]] }
 0xdd5   : > { %v12864_v44 = vpop.f32.mrf.mxu2 }
 0xdd6   : > { %v6959_v23 = vsel %vm1192_vm1, %v12864_v44, -inf }
 0xdd7   : > { %v6493_v57 = vpop.xlane.xlu2 %6492  ;;  %6498 = vmax.xlane.f32.xlu1 %v6497_v4  ;;  %6960 = vmax.xlane.f32.xlu2 %v6959_v23 }
 0xdd8   : > { %v6515_v15 = vsub.f32 %v12781_v0, %v6493_v57  ;;  %v6503_v0 = vsel %vm1192_vm1, %v12875_v52, -inf }
 0xdda   : > { %v6523_v42 = vmul.f32 1.442695, %v6515_v15  ;;  %v12882_v62 = vpop.f32.mrf.mxu3 }
 0xddb   : > { %v6506_v40 = vsel %vm1192_vm1, %v12882_v62, -inf }
 0xddc   : > { %9575 = vpow2.f32 %v6523_v42 }
 0xddd   : > { %v12891_v27 = vpop.f32.mrf.mxu2 }
 0xdde   : > { %v6962_v47 = vsel %vm1192_vm1, %v12891_v27, -inf }
 0xddf   : > { %v9214_v54 = vpop.permute.xlu2 %9213  ;;  %6501 = vmax.xlane.f32.xlu1 %v6500_v60  ;;  %6019 = vadd.xlane.f32.xlu2 %v6018_v3 }
 0xde0   : > { %v9215_v58 = vunpack.i.l.bf16 %v9214_v54  ;;  %v9216_v37 = vunpack.i.h.bf16 %v9214_v54 }
 0xde2   : > { %6625 = vmatpush.msra.mxu0 %v9215_v58  ;;  %v9576_v35 = vpop.eup %9575  ;;  %v12887_v5 = vpop.f32.mrf.mxu3 }
 0xde3   : > { %v6509_v7 = vsel %vm1192_vm1, %v12887_v5, -inf  ;;  %v6539_v2 = vsel %vm1192_vm1, %v9576_v35, 0.0 }
 0xde4   : > { %6626 = vmatpush.msra.mxu0 %v9216_v37 }
 0xde5   : > { %8943 = vmatmul.msk.f32.vlgmr.msra.gmra.mxu0 %vm1192_vm1, %v9576_v35  ;;  %v12899_v1 = vpop.f32.mrf.mxu2 }
 0xde6   : > { %v6965_v28 = vsel %vm1192_vm1, %v12899_v1, -inf }
 0xde7   : > { %6504 = vmax.xlane.f32.xlu1 %v6503_v0  ;;  %6028 = vadd.xlane.f32.xlu2 %v6027_v16 }
 0xdea   : > { %v12916_v33 = vpop.f32.mrf.mxu3 }
 0xdeb   : > { %v6512_v61 = vsel %vm1192_vm1, %v12916_v33, -inf }
 0xded   : > { %v12907_v9 = vpop.f32.mrf.mxu2 }
 0xdee   : > { %v6968_v34 = vsel %vm1192_vm1, %v12907_v9, -inf }
 0xdef   : > { %6507 = vmax.xlane.f32.xlu1 %v6506_v40  ;;  %6037 = vadd.xlane.f32.xlu2 %v6036_v21 }
 0xdf5   : > { %v12912_v26 = vpop.f32.mrf.mxu2 }
 0xdf6   : > { %v6971_v30 = vsel %vm1192_vm1, %v12912_v26, -inf }
 0xdf7   : > { %6510 = vmax.xlane.f32.xlu1 %v6509_v7 }
 0xdfd   : > { %6495 = vmax.xlane.f32.xlu0 %v6494_v14 }
 0xdff   : > { %6016 = vadd.xlane.f32.xlu1 %v6015_v17 }
 0xe05   : > { %6963 = vmax.xlane.f32.xlu0 %v6962_v47 }
 0xe07   : > { %6022 = vadd.xlane.f32.xlu1 %v6021_v48 }
 0xe0d   : > { %6966 = vmax.xlane.f32.xlu0 %v6965_v28  ;;  %v5511_v28 = vld [vmem:[%s14014_s5 + $0x18] sm:$0xff] }
 0xe0e   : > { %6294 = vmatpush.msrb.mxu1 %v5511_v28 }
 0xe0f   : > { %6031 = vadd.xlane.f32.xlu1 %v6030_v50 }
 0xe15   : > { %6969 = vmax.xlane.f32.xlu0 %v6968_v34  ;;  %v5510_v34 = vld [vmem:[%s14014_s5 + $0x10] sm:$0xff] }
 0xe16   : > { %6295 = vmatpush.msrb.mxu1 %v5510_v34 }
 0xe17   : > { %6540 = vadd.xlane.f32.xlu1 %v6539_v2 }
 0xe1d   : > { %6972 = vmax.xlane.f32.xlu0 %v6971_v30 }
 0xe25   : > { %6513 = vmax.xlane.f32.xlu0 %v6512_v61 }
 0xe2d   : > { %6025 = vadd.xlane.f32.xlu0 %v6024_v22 }
 0xe32   : > { %v6952_v18 = vpop.xlane.xlu0 %6951 }
 0xe33   : > { %v6974_v12 = vsub.f32 %v12843_v56, %v6952_v18 }
 0xe35   : > { %v6982_v43 = vmul.f32 1.442695, %v6974_v12  ;;  %6034 = vadd.xlane.f32.xlu0 %v6033_v55 }
 0xe37   : > { %9577 = vpow2.f32 %v6982_v43 }
 0xe3a   : > { %v6955_v20 = vpop.xlane.xlu1 %6954 }
 0xe3b   : > { %v6975_v11 = vsub.f32 %v12850_v13, %v6955_v20 }
 0xe3d   : > { %v9578_v10 = vpop.eup %9577  ;;  %v6984_v53 = vmul.f32 1.442695, %v6975_v11 }
 0xe3e   : > { %v6998_v57 = vsel %vm1192_vm1, %v9578_v10, 0.0 }
 0xe3f   : > { %9579 = vpow2.f32 %v6984_v53  ;;  %6999 = vadd.xlane.f32.xlu0 %v6998_v57 }
 0xe42   : > { %v6958_v19 = vpop.xlane.xlu1 %6957 }
 0xe43   : > { %v6976_v60 = vsub.f32 %v12856_v49, %v6958_v19 }
 0xe45   : > { %v9580_v4 = vpop.eup %9579  ;;  %v9209_v23 = vpop.permute.xlu0 %9208  ;;  %v6986_v37 = vmul.f32 1.442695, %v6976_v60 }
 0xe46   : > { %v9210_v15 = vunpack.i.l.bf16 %v9209_v23  ;;  %v7001_v56 = vsel %vm1192_vm1, %v9580_v4, 0.0  ;;  %v9211_v25 = vunpack.i.h.bf16 %v9209_v23 }
 0xe47   : > { %7002 = vadd.xlane.f32.xlu1 %v7001_v56 }
 0xe48   : > { %7084 = vmatpush.msra.mxu3 %v9210_v15 }
 0xe4a   : > { %7085 = vmatpush.msra.mxu3 %v9211_v25  ;;  %v6499_v42 = vpop.xlane.xlu1 %6498  ;;  %v6961_v54 = vpop.xlane.xlu2 %6960 }
 0xe4b   : > { %v6517_v13 = vsub.f32 %v12854_v38, %v6499_v42  ;;  %8975 = vmatmul.msk.f32.vlgmr.msra.gmra.mxu3 %vm1192_vm1, %v9578_v10  ;;  %v6977_v58 = vsub.f32 %v12864_v44, %v6961_v54 }
 0xe4d   : > { %v6527_v3 = vmul.f32 1.442695, %v6517_v13  ;;  %v6988_v35 = vmul.f32 1.442695, %v6977_v58 }
 0xe4f   : > { %9581 = vpow2.f32 %v6527_v3 }
 0xe50   : > { %9583 = vpow2.f32 %v6986_v37 }
 0xe51   : > { %9585 = vpow2.f32 %v6988_v35 }
 0xe52   : > { %v6502_v0 = vpop.xlane.xlu1 %6501  ;;  %v12948_v2 = vpop.xlane.xlu2 %6019 }
 0xe53   : > { %v6518_v16 = vsub.f32 %v12862_v51, %v6502_v0  ;;  %8976 = vmatmul.msk.f32.gmra.mxu3 %vm1192_vm1, %v9580_v4  ;;  %v6112_v0 = vpop.f32.mrf.mxu0  ;;  %vm6155_vm5 = vweird.f32 %v12948_v2 }
 0xe55   : > { %v12934_v40 = vpop.eup %9581  ;;  %v6529_v38 = vmul.f32 1.442695, %v6518_v16 }
 0xe56   : > { %v6545_v49 = vsel %vm1192_vm1, %v12934_v40, 0.0  ;;  %v9584_v44 = vpop.eup %9583 }
 0xe57   : > { %9587 = vpow2.f32 %v6529_v38  ;;  %6546 = vadd.xlane.f32.xlu0 %v6545_v49  ;;  %v9586_v7 = vpop.eup %9585 }
 0xe58   : > { %v7007_v17 = vsel %vm1192_vm1, %v9586_v7, 0.0 }
 0xe5a   : > { %v6505_v21 = vpop.xlane.xlu1 %6504 }
 0xe5b   : > { %8977 = vmatmul.msk.f32.gmra.mxu3 %vm1192_vm1, %v9584_v44 }
 0xe5d   : > { %v12939_v51 = vpop.eup %9587 }
 0xe5e   : > { %v6548_v14 = vsel %vm1192_vm1, %v12939_v51, 0.0 }
 0xe5f   : > { %6549 = vadd.xlane.f32.xlu1 %v6548_v14  ;;  %7008 = vadd.xlane.f32.xlu0 %v7007_v17  ;;  %v6161_v17 = vand.u32 2147483648, %v12948_v2 }
 0xe62   : > { %v6508_v47 = vpop.xlane.xlu1 %6507 }
 0xe63   : > { %v6520_v48 = vsub.f32 %v12882_v62, %v6508_v47  ;;  %8978 = vmatmul.msk.f32.gmra.mxu3 %vm1192_vm1, %v9586_v7 }
 0xe65   : > { %v6533_v50 = vmul.f32 1.442695, %v6520_v48  ;;  %v6159_v48 = vand.u32 2147483647, %v12948_v2 }
 0xe67   : > { %9589 = vpow2.f32 %v6533_v50  ;;  %vm6160_vm10 = vcmp.eq.f32.partialorder %v6159_v48, 8.507059e+37 }
 0xe68   : > { %9591 = vrcp.f32 %v12948_v2 }
 0xe6a   : > { %v6511_v30 = vpop.xlane.xlu1 %6510 }
 0xe6b   : > { %v6521_v56 = vsub.f32 %v12887_v5, %v6511_v30  ;;  %v7004_v5 = vsel %vm1192_vm1, %v9584_v44, 0.0 }
 0xe6d   : > { %v12950_v61 = vpop.eup %9589 }
 0xe6e   : > { %v6554_v22 = vsel %vm1192_vm1, %v12950_v61, 0.0  ;;  %v12956_v55 = vpop.eup %9591 }
 0xe6f   : > { %6555 = vadd.xlane.f32.xlu0 %v6554_v22  ;;  %v6151_v20 = vmul.f32 %v12956_v55, %v12948_v2  ;;  %vm6156_vm6 = vweird.f32 %v12956_v55  ;;  %v6162_v22 = vor.u32 1.1754944e-38, %v6161_v17 }
 0xe70   : > { %v6496_v62 = vpop.xlane.xlu0 %6495  ;;  %vm6157_vm9 = vmor %vm6155_vm5, %vm6156_vm6 }
 0xe71   : > { %v6516_v18 = vsub.f32 %v12847_v24, %v6496_v62  ;;  %v6152_v57 = vsub.f32 1.0, %v6151_v20  ;;  %v6519_v24 = vsub.f32 %v12875_v52, %v6505_v21  ;;  %v6535_v52 = vmul.f32 1.442695, %v6521_v56 }
 0xe72   : > { %v6017_v12 = vpop.xlane.xlu1 %6016 }
 0xe73   : > { %v6525_v43 = vmul.f32 1.442695, %v6516_v18  ;;  %9593 = vrcp.f32 %v6017_v12  ;;  %v6147_v54 = vand.u32 2147483648, %v6017_v12  ;;  %v6145_v60 = vand.u32 2147483647, %v6017_v12  ;;  %v6115_v18 = vpop.f32.mrf.mxu0 }
 0xe74   : > { %v6531_v3 = vmul.f32 1.442695, %v6519_v24  ;;  %vm6141_vm4 = vweird.f32 %v6017_v12 }
 0xe75   : > { %9595 = vpow2.f32 %v6525_v43  ;;  %v6148_v16 = vor.u32 1.1754944e-38, %v6147_v54  ;;  %vm6146_vm8 = vcmp.eq.f32.partialorder %v6145_v60, 8.507059e+37  ;;  %v13003_v60 = vpop.xlane.xlu2 %6028 }
 0xe76   : > { %vm6197_vm6 = vweird.f32 %v13003_v60 }
 0xe78   : > { %v6964_v11 = vpop.xlane.xlu0 %6963 }
 0xe79   : > { %v9594_v10 = vpop.eup %9593  ;;  %v6978_v53 = vsub.f32 %v12891_v27, %v6964_v11  ;;  %v6153_v27 = vmul.f32 %v12956_v55, %v6152_v57 }
 0xe7a   : > { %v6137_v19 = vmul.f32 %v9594_v10, %v6017_v12  ;;  %v12961_v4 = vpop.xlane.xlu1 %6022  ;;  %vm6142_vm3 = vweird.f32 %v9594_v10 }
 0xe7b   : > { %v9596_v23 = vpop.eup %9595  ;;  %v6990_v15 = vmul.f32 1.442695, %v6978_v53  ;;  %9597 = vrcp.f32 %v12961_v4  ;;  %vm6143_vm7 = vmor %vm6141_vm4, %vm6142_vm3  ;;  %v6154_v49 = vadd.f32 %v12956_v55, %v6153_v27  ;;  %vm6169_vm12 = vweird.f32 %v12961_v4 }
 0xe7c   : > { %v6138_v25 = vsub.f32 1.0, %v6137_v19  ;;  %8944 = vmatmul.msk.f32.gmra.mxu0 %vm1192_vm1, %v9596_v23  ;;  %v6542_v42 = vsel %vm1192_vm1, %v9596_v23, 0.0  ;;  %v6173_v57 = vand.u32 2147483647, %v12961_v4 }
 0xe7d   : > { %9599 = vpow2.f32 %v6990_v15  ;;  %6543 = vadd.xlane.f32.xlu2 %v6542_v42  ;;  %v6158_v30 = vsel %vm6157_vm9, %v12956_v55, %v6154_v49  ;;  %v5515_v49 = vld [vmem:[%s14014_s5 + $0x38] sm:$0xff] }
 0xe7e   : > { %v6139_v13 = vmul.f32 %v9594_v10, %v6138_v25  ;;  %9601 = vpow2.f32 %v6531_v3  ;;  %v6163_v43 = vsel %vm6160_vm10, %v6162_v22, %v6158_v30  ;;  %vm6174_vm14 = vcmp.eq.f32.partialorder %v6173_v57, 8.507059e+37  ;;  %v6118_v25 = vpop.f32.mrf.mxu0  ;;  %7269 = vmatpush.msrb.mxu0 %v5515_v49 }
 0xe7f   : > { %9603 = vpow2.f32 %v6535_v52 }
 0xe80   : > { %v6140_v58 = vadd.f32 %v9594_v10, %v6139_v13  ;;  %v6967_v37 = vpop.xlane.xlu0 %6966 }
 0xe81   : > { %v9598_v35 = vpop.eup %9597  ;;  %v6979_v38 = vsub.f32 %v12899_v1, %v6967_v37 }
 0xe82   : > { %v6144_v21 = vsel %vm6143_vm7, %v9594_v10, %v6140_v58  ;;  %v6165_v7 = vmul.f32 %v9598_v35, %v12961_v4  ;;  %vm6170_vm11 = vweird.f32 %v9598_v35  ;;  %v6175_v10 = vand.u32 2147483648, %v12961_v4 }
 0xe83   : > { %v9600_v14 = vpop.eup %9599  ;;  %v6149_v44 = vsel %vm6146_vm8, %v6148_v16, %v6144_v21  ;;  %v6992_v47 = vmul.f32 1.442695, %v6979_v38  ;;  %vm6171_vm13 = vmor %vm6169_vm12, %vm6170_vm11  ;;  %v5513_v38 = vld [vmem:[%s14014_s5 + $0x28] sm:$0xff] }
 0xe84   : > { %v6248_v28 = vmul.f32 %v6149_v44, %v6112_v0  ;;  %v6166_v50 = vsub.f32 1.0, %v6165_v7  ;;  %8945 = vmatmul.msk.f32.gmra.mxu0 %vm1192_vm1, %v12934_v40  ;;  %8979 = vmatmul.msk.f32.gmra.mxu3 %vm1192_vm1, %v9600_v14  ;;  %v7010_v1 = vsel %vm1192_vm1, %v9600_v14, 0.0  ;;  %v9602_v62 = vpop.eup %9601  ;;  %v6176_v24 = vor.u32 1.1754944e-38, %v6175_v10 }
 0xe85   : > { %9605 = vpow2.f32 %v6992_v47  ;;  %7005 = vadd.xlane.f32.xlu2 %v7004_v5  ;;  %7011 = vadd.xlane.f32.xlu1 %v7010_v1  ;;  %v9604_v2 = vpop.eup %9603  ;;  %v6551_v55 = vsel %vm1192_vm1, %v9602_v62, 0.0 }
 0xe86   : > { %v6167_v34 = vmul.f32 %v9598_v35, %v6166_v50  ;;  %8911 = vmatmul.msk.f32.vlgmr.msrb.gmra.mxu1 %vm1118_vm0, %v6248_v28  ;;  %v6557_v19 = vsel %vm1192_vm1, %v9604_v2, 0.0  ;;  %v6121_v47 = vpop.f32.mrf.mxu0 }
 0xe87   : > { %6810 = vmatpush.msra.mxu1 %v5513_v38 }
 0xe88   : > { %v6970_v40 = vpop.xlane.xlu0 %6969  ;;  %v6168_v20 = vadd.f32 %v9598_v35, %v6167_v34 }
 0xe89   : > { %v6980_v12 = vsub.f32 %v12907_v9, %v6970_v40  ;;  %v6249_v9 = vmul.f32 %v6163_v43, %v6115_v18  ;;  %v13027_v40 = vpop.xlane.xlu2 %6037 }
 0xe8a   : > { %v6172_v23 = vsel %vm6171_vm13, %v9598_v35, %v6168_v20  ;;  %v13011_v35 = vpop.xlane.xlu1 %6031 }
 0xe8b   : > { %v9606_v11 = vpop.eup %9605  ;;  %v6994_v53 = vmul.f32 1.442695, %v6980_v12  ;;  %vm6211_vm10 = vweird.f32 %v13011_v35 }
 0xe8c   : > { %8946 = vmatmul.msk.f32.gmra.mxu0 %vm1192_vm1, %v12939_v51  ;;  %8980 = vmatmul.msk.f32.gmra.mxu3 %vm1192_vm1, %v9606_v11  ;;  %v6177_v51 = vsel %vm6174_vm14, %v6176_v24, %v6172_v23  ;;  %v7013_v54 = vsel %vm1192_vm1, %v9606_v11, 0.0  ;;  %v6203_v11 = vand.u32 2147483648, %v13003_v60 }
 0xe8d   : > { %9607 = vpow2.f32 %v6994_v53  ;;  %6552 = vadd.xlane.f32.xlu2 %v6551_v55  ;;  %6558 = vadd.xlane.f32.xlu1 %v6557_v19  ;;  %v6250_v13 = vmul.f32 %v6177_v51, %v6118_v25  ;;  %v6201_v53 = vand.u32 2147483647, %v13003_v60 }
 0xe8e   : > { %8912 = vmatmul.msk.f32.gmra.mxu1 %vm1118_vm0, %v6249_v9  ;;  %v6124_v19 = vpop.f32.mrf.mxu0 }
 0xe8f   : > { %vm6202_vm8 = vcmp.eq.f32.partialorder %v6201_v53, 8.507059e+37 }
 0xe90   : > { %v6973_v4 = vpop.xlane.xlu0 %6972 }
 0xe91   : > { %v6981_v15 = vsub.f32 %v12912_v26, %v6973_v4 }
 0xe92   : > { %v13036_v57 = vpop.xlane.xlu1 %6540 }
 0xe93   : > { %v9608_v56 = vpop.eup %9607  ;;  %v6996_v42 = vmul.f32 1.442695, %v6981_v15  ;;  %v6204_v15 = vor.u32 1.1754944e-38, %v6203_v11  ;;  %v6243_v11 = vand.u32 2147483647, %v13027_v40 }
 0xe94   : > { %8947 = vmatmul.msk.f32.gmra.mxu0 %vm1192_vm1, %v9602_v62  ;;  %8981 = vmatmul.msk.f32.gmra.mxu3 %vm1192_vm1, %v9608_v56  ;;  %v7016_v27 = vsel %vm1192_vm1, %v9608_v56, 0.0 }
 0xe95   : > { %9609 = vpow2.f32 %v6996_v42  ;;  %7014 = vadd.xlane.f32.xlu2 %v7013_v54  ;;  %7017 = vadd.xlane.f32.xlu0 %v7016_v27  ;;  %v6217_v27 = vand.u32 2147483648, %v13011_v35 }
 0xe96   : > { %8913 = vmatmul.msk.f32.gmra.mxu1 %vm1118_vm0, %v6250_v13  ;;  %9611 = vrcp.f32 %v13003_v60  ;;  %v6215_v13 = vand.u32 2147483647, %v13011_v35 }
 0xe98   : > { %v6514_v26 = vpop.xlane.xlu0 %6513  ;;  %vm6216_vm12 = vcmp.eq.f32.partialorder %v6215_v13, 8.507059e+37 }
 0xe99   : > { %v6522_v3 = vsub.f32 %v12916_v33, %v6514_v26 }
 0xe9b   : > { %v9610_v52 = vpop.eup %9609  ;;  %v6537_v58 = vmul.f32 1.442695, %v6522_v3 }
 0xe9c   : > { %8948 = vmatmul.msk.f32.gmra.mxu0 %vm1192_vm1, %v12950_v61  ;;  %8982 = vmatmul.msk.f32.gmra.mxu3 %vm1192_vm1, %v9610_v52  ;;  %v7019_v37 = vsel %vm1192_vm1, %v9610_v52, 0.0  ;;  %v9612_v5 = vpop.eup %9611  ;;  %v5512_v52 = vld [vmem:[%s14014_s5 + $0x20] sm:$0xff] }
 0xe9d   : > { %9613 = vpow2.f32 %v6537_v58  ;;  %7020 = vadd.xlane.f32.xlu1 %v7019_v37  ;;  %v6193_v16 = vmul.f32 %v9612_v5, %v13003_v60  ;;  %vm6198_vm3 = vweird.f32 %v9612_v5  ;;  %6811 = vmatpush.msra.mxu1 %v5512_v52 }
 0xe9e   : > { %vm6199_vm7 = vmor %vm6197_vm6, %vm6198_vm3  ;;  %vm6239_vm6 = vweird.f32 %v13027_v40 }
 0xe9f   : > { %v6194_v7 = vsub.f32 1.0, %v6193_v16 }
 0xea0   : > { %v6026_v0 = vpop.xlane.xlu0 %6025 }
 0xea1   : > { %9615 = vrcp.f32 %v6026_v0  ;;  %v6195_v28 = vmul.f32 %v9612_v5, %v6194_v7  ;;  %v6189_v50 = vand.u32 2147483648, %v6026_v0  ;;  %v6187_v30 = vand.u32 2147483647, %v6026_v0 }
 0xea2   : > { %9617 = vrcp.f32 %v13011_v35  ;;  %vm6183_vm2 = vweird.f32 %v6026_v0 }
 0xea3   : > { %v9614_v33 = vpop.eup %9613  ;;  %v6190_v62 = vor.u32 1.1754944e-38, %v6189_v50  ;;  %v6196_v18 = vadd.f32 %v9612_v5, %v6195_v28  ;;  %vm6188_vm5 = vcmp.eq.f32.partialorder %v6187_v30, 8.507059e+37 }
 0xea4   : > { %8949 = vmatmul.msk.f32.gmra.mxu0 %vm1192_vm1, %v9604_v2  ;;  %v6560_v61 = vsel %vm1192_vm1, %v9614_v33, 0.0  ;;  %v5514_v2 = vld [vmem:[%s14014_s5 + $0x30] sm:$0xff] }
 0xea5   : > { %6561 = vadd.xlane.f32.xlu2 %v6560_v61  ;;  %7270 = vmatpush.msrb.mxu0 %v5514_v2  ;;  %v6200_v4 = vsel %vm6199_vm7, %v9612_v5, %v6196_v18  ;;  %v6245_v2 = vand.u32 2147483648, %v13027_v40 }
 0xea6   : > { %v6205_v51 = vsel %vm6202_vm8, %v6204_v15, %v6200_v4 }
 0xea7   : > { %v9616_v21 = vpop.eup %9615  ;;  %v6252_v26 = vmul.f32 %v6205_v51, %v6124_v19  ;;  %v6246_v4 = vor.u32 1.1754944e-38, %v6245_v2 }
 0xea8   : > { %v6179_v14 = vmul.f32 %v9616_v21, %v6026_v0  ;;  %v13019_v17 = vpop.xlane.xlu0 %6034  ;;  %v13021_v44 = vpop.eup %9617  ;;  %vm6184_vm15 = vweird.f32 %v9616_v21  ;;  %v6218_v0 = vor.u32 1.1754944e-38, %v6217_v27 }
 0xea9   : > { %9619 = vrcp.f32 %v13019_v17  ;;  %v6207_v1 = vmul.f32 %v13021_v44, %v13011_v35  ;;  %vm6185_vm4 = vmor %vm6183_vm2, %vm6184_vm15  ;;  %vm6212_vm9 = vweird.f32 %v13021_v44  ;;  %v6127_v35 = vpop.f32.mrf.mxu0  ;;  %v6231_v7 = vand.u32 2147483648, %v13019_v17 }
 0xeaa   : > { %v6180_v48 = vsub.f32 1.0, %v6179_v14  ;;  %9621 = vrcp.f32 %v13027_v40  ;;  %vm6213_vm11 = vmor %vm6211_vm10, %vm6212_vm9  ;;  %vm6225_vm14 = vweird.f32 %v13019_v17  ;;  %v6229_v14 = vand.u32 2147483647, %v13019_v17 }
 0xeab   : > { %v6208_v12 = vsub.f32 1.0, %v6207_v1  ;;  %vm6244_vm10 = vcmp.eq.f32.partialorder %v6243_v11, 8.507059e+37 }
 0xeac   : > { %v6181_v34 = vmul.f32 %v9616_v21, %v6180_v48  ;;  %8950 = vmatmul.msk.f32.gmra.mxu0 %vm1192_vm1, %v9614_v33  ;;  %vm6230_vm2 = vcmp.eq.f32.partialorder %v6229_v14, 8.507059e+37 }
 0xead   : > { %v6209_v23 = vmul.f32 %v13021_v44, %v6208_v12 }
 0xeae   : > { %v6182_v22 = vadd.f32 %v9616_v21, %v6181_v34  ;;  %v6232_v34 = vor.u32 1.1754944e-38, %v6231_v7 }
 0xeaf   : > { %v13030_v20 = vpop.eup %9619  ;;  %v6210_v25 = vadd.f32 %v13021_v44, %v6209_v23 }
 0xeb0   : > { %v6186_v43 = vsel %vm6185_vm4, %v9616_v21, %v6182_v22  ;;  %v6221_v24 = vmul.f32 %v13030_v20, %v13019_v17  ;;  %v13046_v56 = vpop.eup %9621  ;;  %vm6226_vm13 = vweird.f32 %v13030_v20 }
 0xeb1   : > { %v6191_v10 = vsel %vm6188_vm5, %v6190_v62, %v6186_v43  ;;  %v6235_v58 = vmul.f32 %v13046_v56, %v13027_v40  ;;  %v6214_v5 = vsel %vm6213_vm11, %v13021_v44, %v6210_v25  ;;  %vm6227_vm15 = vmor %vm6225_vm14, %vm6226_vm13  ;;  %v6130_v30 = vpop.f32.mrf.mxu0  ;;  %vm6240_vm4 = vweird.f32 %v13046_v56 }
 0xeb2   : > { %v13038_v55 = vpop.xlane.xlu0 %6999  ;;  %v6251_v9 = vmul.f32 %v6191_v10, %v6121_v47  ;;  %v6222_v42 = vsub.f32 1.0, %v6221_v24  ;;  %v6219_v16 = vsel %vm6216_vm12, %v6218_v0, %v6214_v5  ;;  %vm6241_vm8 = vmor %vm6239_vm6, %vm6240_vm4  ;;  %vm6657_vm14 = vweird.f32 %v13036_v57 }
 0xeb3   : > { %9623 = vrcp.f32 %v13038_v55  ;;  %v6236_v38 = vsub.f32 1.0, %v6235_v58  ;;  %v6253_v44 = vmul.f32 %v6219_v16, %v6127_v35  ;;  %v7122_v43 = vand.u32 2147483648, %v13038_v55 }
 0xeb4   : > { %8914 = vmatmul.msk.f32.gmra.mxu1 %vm1118_vm0, %v6251_v9  ;;  %9625 = vrcp.f32 %v13036_v57  ;;  %v6223_v37 = vmul.f32 %v13030_v20, %v6222_v42  ;;  %vm7116_vm5 = vweird.f32 %v13038_v55 }
 0xeb5   : > { %v6237_v28 = vmul.f32 %v13046_v56, %v6236_v38  ;;  %v7123_v23 = vor.u32 1.1754944e-38, %v7122_v43 }
 0xeb6   : > { %v6224_v49 = vadd.f32 %v13030_v20, %v6223_v37 }
 0xeb7   : > { %v6238_v18 = vadd.f32 %v13046_v56, %v6237_v28 }
 0xeb8   : > { %v6228_v1 = vsel %vm6227_vm15, %v13030_v20, %v6224_v49  ;;  %v7120_v20 = vand.u32 2147483647, %v13038_v55 }
 0xeb9   : > { %v13050_v54 = vpop.eup %9623  ;;  %v6233_v22 = vsel %vm6230_vm2, %v6232_v34, %v6228_v1  ;;  %v6242_v24 = vsel %vm6241_vm8, %v13046_v56, %v6238_v18  ;;  %v6133_v27 = vpop.f32.mrf.mxu0  ;;  %v6663_v56 = vand.u32 2147483648, %v13036_v57 }
 0xeba   : > { %v13056_v60 = vpop.xlane.xlu1 %7002  ;;  %v7112_v3 = vmul.f32 %v13050_v54, %v13038_v55  ;;  %v13067_v61 = vpop.eup %9625  ;;  %vm7117_vm3 = vweird.f32 %v13050_v54  ;;  %v6254_v10 = vmul.f32 %v6233_v22, %v6130_v30  ;;  %vm7121_vm9 = vcmp.eq.f32.partialorder %v7120_v20, 8.507059e+37 }
 0xebb   : > { %9627 = vrcp.f32 %v13056_v60  ;;  %v6653_v50 = vmul.f32 %v13067_v61, %v13036_v57  ;;  %vm7118_vm7 = vmor %vm7116_vm5, %vm7117_vm3  ;;  %v6247_v51 = vsel %vm6244_vm10, %v6246_v4, %v6242_v24  ;;  %vm6658_vm12 = vweird.f32 %v13067_v61 }
 0xebc   : > { %8915 = vmatmul.msk.f32.gmra.mxu1 %vm1118_vm0, %v6252_v26  ;;  %v7113_v33 = vsub.f32 1.0, %v7112_v3  ;;  %vm7130_vm13 = vweird.f32 %v13056_v60  ;;  %v7134_v13 = vand.u32 2147483647, %v13056_v60  ;;  %v6661_v26 = vand.u32 2147483647, %v13036_v57  ;;  %vm6659_vm2 = vmor %vm6657_vm14, %vm6658_vm12 }
 0xebd   : > { %v6654_v12 = vsub.f32 1.0, %v6653_v50  ;;  %v6255_v3 = vmul.f32 %v6247_v51, %v6133_v27  ;;  %v6664_v5 = vor.u32 1.1754944e-38, %v6663_v56 }
 0xebe   : > { %v7114_v48 = vmul.f32 %v13050_v54, %v7113_v33  ;;  %vm7135_vm3 = vcmp.eq.f32.partialorder %v7134_v13, 8.507059e+37  ;;  %vm6662_vm4 = vcmp.eq.f32.partialorder %v6661_v26, 8.507059e+37 }
 0xebf   : > { %v6655_v19 = vmul.f32 %v13067_v61, %v6654_v12 }
 0xec0   : > { %v7115_v62 = vadd.f32 %v13050_v54, %v7114_v48 }
 0xec1   : > { %v13071_v21 = vpop.eup %9627  ;;  %v6656_v42 = vadd.f32 %v13067_v61, %v6655_v19  ;;  %v6628_v16 = vpop.f32.mrf.mxu0 }
 0xec2   : > { %v7126_v47 = vmul.f32 %v13071_v21, %v13056_v60  ;;  %v7119_v53 = vsel %vm7118_vm7, %v13050_v54, %v7115_v62  ;;  %vm7131_vm11 = vweird.f32 %v13071_v21  ;;  %v7136_v54 = vand.u32 2147483648, %v13056_v60 }
 0xec3   : > { %v7124_v15 = vsel %vm7121_vm9, %v7123_v23, %v7119_v53  ;;  %vm7132_vm15 = vmor %vm7130_vm13, %vm7131_vm11  ;;  %v6660_v58 = vsel %vm6659_vm2, %v13067_v61, %v6656_v42 }
 0xec4   : > { %8916 = vmatmul.msk.f32.gmra.mxu1 %vm1118_vm0, %v6253_v44  ;;  %v7127_v17 = vsub.f32 1.0, %v7126_v47  ;;  %v7137_v37 = vor.u32 1.1754944e-38, %v7136_v54  ;;  %v6665_v60 = vsel %vm6662_vm4, %v6664_v5, %v6660_v58 }
 0xec5   : > { %v6764_v57 = vmul.f32 %v6665_v60, %v6628_v16 }
 0xec6   : > { %v7128_v9 = vmul.f32 %v13071_v21, %v7127_v17 }
 0xec8   : > { %v7129_v25 = vadd.f32 %v13071_v21, %v7128_v9 }
 0xeca   : > { %v7133_v52 = vsel %vm7132_vm15, %v13071_v21, %v7129_v25  ;;  %v13115_v38 = vpop.xlane.xlu0 %6546 }
 0xecb   : > { %v7138_v0 = vsel %vm7135_vm3, %v7137_v37, %v7133_v52  ;;  %9629 = vrcp.f32 %v13115_v38  ;;  %v6689_v2 = vand.u32 2147483647, %v13115_v38  ;;  %v6691_v19 = vand.u32 2147483648, %v13115_v38 }
 0xecc   : > { %8917 = vmatmul.msk.f32.gmra.mxu1 %vm1118_vm0, %v6254_v10  ;;  %vm6685_vm9 = vweird.f32 %v13115_v38 }
 0xecd   : > { %vm13152_vm10 = vcmp.eq.f32.partialorder %v6689_v2, 8.507059e+37 }
 0xece   : > { %v7087_v55 = vpop.f32.mrf.mxu3 }
 0xecf   : > { %v7223_v40 = vmul.f32 %v7124_v15, %v7087_v55 }
 0xed1   : > { %8983 = vmatmul.msk.f32.vlgmr.msrb.gmra.mxu0 %vm1118_vm0, %v7223_v40  ;;  %v13124_v7 = vpop.eup %9629 }
 0xed2   : > { %v13118_v61 = vpop.xlane.xlu1 %6549  ;;  %v13120_v49 = vpop.xlane.xlu0 %7008  ;;  %v6681_v44 = vmul.f32 %v13124_v7, %v13115_v38  ;;  %vm6686_vm11 = vweird.f32 %v13124_v7 }
 0xed3   : > { %9631 = vrcp.f32 %v13118_v61  ;;  %vm7158_vm13 = vweird.f32 %v13120_v49  ;;  %vm13172_vm14 = vmor %vm6685_vm9, %vm6686_vm11  ;;  %vm6699_vm15 = vweird.f32 %v13118_v61  ;;  %v7162_v2 = vand.u32 2147483647, %v13120_v49 }
 0xed4   : > { %8918 = vmatmul.msk.f32.gmra.mxu1 %vm1118_vm0, %v6255_v3  ;;  %v6682_v30 = vsub.f32 1.0, %v6681_v44  ;;  %v6692_v3 = vor.u32 1.1754944e-38, %v6691_v19 }
 0xed5   : > { %vm7163_vm9 = vcmp.eq.f32.partialorder %v7162_v2, 8.507059e+37 }
 0xed6   : > { %v7090_v35 = vpop.f32.mrf.mxu3  ;;  %v6683_v11 = vmul.f32 %v13124_v7, %v6682_v30 }
 0xed7   : > { %v7224_v33 = vmul.f32 %v7138_v0, %v7090_v35  ;;  %v7164_v35 = vand.u32 2147483648, %v13120_v49 }
 0xed8   : > { %v6684_v13 = vadd.f32 %v13124_v7, %v6683_v11 }
 0xed9   : > { %8984 = vmatmul.msk.f32.gmra.mxu0 %vm1118_vm0, %v7224_v33  ;;  %v13126_v14 = vpop.eup %9631 }
 0xeda   : > { %v6695_v22 = vmul.f32 %v13126_v14, %v13118_v61  ;;  %v6688_v16 = vsel %vm13172_vm14, %v13124_v7, %v6684_v13 }
 0xedc   : > { %8951 = vmatmul.msk.f32.vlgmr.msra.gmra.mxu1 %vm1118_vm0, %v6764_v57  ;;  %v6696_v53 = vsub.f32 1.0, %v6695_v22  ;;  %v6705_v57 = vand.u32 2147483648, %v13118_v61 }
 0xede   : > { %v7093_v54 = vpop.f32.mrf.mxu3  ;;  %v6697_v52 = vmul.f32 %v13126_v14, %v6696_v53  ;;  %v6703_v53 = vand.u32 2147483647, %v13118_v61 }
 0xee2   : > { %v13145_v24 = vpop.xlane.xlu0 %6555 }
 0xef0   : > { %v6544_v21 = vpop.xlane.xlu2 %6543 }
 0xef1   : > { %9633 = vrcp.f32 %v6544_v21  ;;  %v6677_v18 = vand.u32 2147483648, %v6544_v21  ;;  %v6675_v43 = vand.u32 2147483647, %v6544_v21  ;;  %vm6671_vm6 = vweird.f32 %v6544_v21 }
 0xef2   : > { %9635 = vrcp.f32 %v13120_v49 }
 0xef3   : > { %v6678_v9 = vor.u32 1.1754944e-38, %v6677_v18  ;;  %vm6676_vm8 = vcmp.eq.f32.partialorder %v6675_v43, 8.507059e+37 }
 0xef7   : > { %v9634_v47 = vpop.eup %9633 }
 0xef8   : > { %v13130_v48 = vpop.eup %9635  ;;  %v6667_v28 = vmul.f32 %v9634_v47, %v6544_v21  ;;  %v13132_v50 = vpop.xlane.xlu2 %7005  ;;  %vm6672_vm5 = vweird.f32 %v9634_v47 }
 0xef9   : > { %9637 = vrcp.f32 %v13132_v50  ;;  %v13135_v1 = vpop.xlane.xlu1 %7011  ;;  %v6631_v34 = vpop.f32.mrf.mxu0  ;;  %v7154_v62 = vmul.f32 %v13130_v48, %v13120_v49  ;;  %vm6673_vm7 = vmor %vm6671_vm6, %vm6672_vm5  ;;  %v7150_v26 = vand.u32 2147483648, %v13132_v50  ;;  %v7148_v5 = vand.u32 2147483647, %v13132_v50 }
 0xefa   : > { %v6668_v17 = vsub.f32 1.0, %v6667_v28  ;;  %9639 = vrcp.f32 %v13135_v1  ;;  %vm7144_vm2 = vweird.f32 %v13132_v50  ;;  %vm7159_vm3 = vweird.f32 %v13130_v48 }
 0xefb   : > { %v7155_v23 = vsub.f32 1.0, %v7154_v62  ;;  %v7151_v44 = vor.u32 1.1754944e-38, %v7150_v26  ;;  %vm6700_vm5 = vweird.f32 %v13126_v14  ;;  %vm7149_vm6 = vcmp.eq.f32.partialorder %v7148_v5, 8.507059e+37 }
 0xefc   : > { %v6669_v12 = vmul.f32 %v9634_v47, %v6668_v17  ;;  %v6693_v62 = vsel %vm13152_vm10, %v6692_v3, %v6688_v16  ;;  %vm6704_vm10 = vcmp.eq.f32.partialorder %v6703_v53, 8.507059e+37  ;;  %v7178_v3 = vand.u32 2147483648, %v13135_v1 }
 0xefd   : > { %v7156_v58 = vmul.f32 %v13130_v48, %v7155_v23  ;;  %vm7172_vm14 = vweird.f32 %v13135_v1 }
 0xefe   : > { %v6670_v20 = vadd.f32 %v9634_v47, %v6669_v12 }
 0xeff   : > { %v9638_v10 = vpop.eup %9637  ;;  %v7157_v28 = vadd.f32 %v13130_v48, %v7156_v58 }
 0xf00   : > { %v7140_v4 = vmul.f32 %v9638_v10, %v13132_v50  ;;  %v6674_v55 = vsel %vm6673_vm7, %v9634_v47, %v6670_v20  ;;  %v13148_v15 = vpop.xlane.xlu2 %6552  ;;  %v13156_v42 = vpop.eup %9639  ;;  %vm7145_vm12 = vweird.f32 %v9638_v10  ;;  %v6698_v47 = vadd.f32 %v13126_v14, %v6697_v52  ;;  %vm13212_vm7 = vmor %vm6699_vm15, %vm6700_vm5 }
 0xf01   : > { %v6679_v40 = vsel %vm6676_vm8, %v6678_v9, %v6674_v55  ;;  %9641 = vrcp.f32 %v13148_v15  ;;  %v6634_v51 = vpop.f32.mrf.mxu0  ;;  %v7168_v0 = vmul.f32 %v13156_v42, %v13135_v1  ;;  %vm13185_vm4 = vmor %vm7144_vm2, %vm7145_vm12  ;;  %v13194_v50 = vpop.xlane.xlu1 %6558  ;;  %vm7173_vm12 = vweird.f32 %v13156_v42 }
 0xf02   : > { %v7141_v27 = vsub.f32 1.0, %v7140_v4  ;;  %v6765_v56 = vmul.f32 %v6679_v40, %v6631_v34  ;;  %9643 = vrcp.f32 %v13145_v24  ;;  %v6766_v11 = vmul.f32 %v6693_v62, %v6634_v51  ;;  %vm13221_vm8 = vmor %vm7158_vm13, %vm7159_vm3  ;;  %v7096_v55 = vpop.f32.mrf.mxu3 }
 0xf03   : > { %v7169_v22 = vsub.f32 1.0, %v7168_v0  ;;  %v6702_v19 = vsel %vm13212_vm7, %v13126_v14, %v6698_v47  ;;  %v7161_v61 = vsel %vm13221_vm8, %v13130_v48, %v7157_v28  ;;  %v7165_v40 = vor.u32 1.1754944e-38, %v7164_v35  ;;  %vm13267_vm2 = vmor %vm7172_vm14, %vm7173_vm12  ;;  %v13277_v28 = vpop.f32.mrf.mxu1 }
 0xf04   : > { %v7142_v37 = vmul.f32 %v9638_v10, %v7141_v27  ;;  %8952 = vmatmul.msk.f32.gmra.mxu1 %vm1118_vm0, %v6765_v56  ;;  %v6706_v51 = vor.u32 1.1754944e-38, %v6705_v57  ;;  %vm6713_vm13 = vweird.f32 %v13148_v15  ;;  %v6717_v60 = vand.u32 2147483647, %v13148_v15 }
 0xf05   : > { %v7170_v14 = vmul.f32 %v13156_v42, %v7169_v22  ;;  %v7176_v57 = vand.u32 2147483647, %v13135_v1  ;;  %vm6727_vm5 = vweird.f32 %v13145_v24 }
 0xf06   : > { %v7143_v33 = vadd.f32 %v9638_v10, %v7142_v37  ;;  %v6707_v48 = vsel %vm6704_vm10, %v6706_v51, %v6702_v19  ;;  %v6719_v37 = vand.u32 2147483648, %v13148_v15  ;;  %vm6718_vm3 = vcmp.eq.f32.partialorder %v6717_v60, 8.507059e+37 }
 0xf07   : > { %v13182_v21 = vpop.eup %9641  ;;  %v7171_v26 = vadd.f32 %v13156_v42, %v7170_v14  ;;  %v6731_v14 = vand.u32 2147483647, %v13145_v24 }
 0xf08   : > { %v6709_v7 = vmul.f32 %v13182_v21, %v13148_v15  ;;  %v13196_v34 = vpop.xlane.xlu2 %7014  ;;  %v7147_v30 = vsel %vm13185_vm4, %v9638_v10, %v7143_v33  ;;  %v13200_v17 = vpop.eup %9643  ;;  %vm6714_vm11 = vweird.f32 %v13182_v21  ;;  %v6720_v62 = vor.u32 1.1754944e-38, %v6719_v37 }
 0xf09   : > { %9645 = vrcp.f32 %v13196_v34  ;;  %v13205_v18 = vpop.xlane.xlu0 %7017  ;;  %v6637_v12 = vpop.f32.mrf.mxu0  ;;  %v7152_v43 = vsel %vm7149_vm6, %v7151_v44, %v7147_v30  ;;  %v6723_v4 = vmul.f32 %v13200_v17, %v13145_v24  ;;  %vm13261_vm15 = vmor %vm6713_vm13, %vm6714_vm11  ;;  %vm7177_vm4 = vcmp.eq.f32.partialorder %v7176_v57, 8.507059e+37 }
 0xf0a   : > { %v6710_v20 = vsub.f32 1.0, %v6709_v7  ;;  %v7225_v23 = vmul.f32 %v7152_v43, %v7093_v54  ;;  %9647 = vrcp.f32 %v13205_v18  ;;  %v7166_v54 = vsel %vm7163_vm9, %v7165_v40, %v7161_v61  ;;  %v7099_v44 = vpop.f32.mrf.mxu3 }
 0xf0b   : > { %9649 = vrcp.f32 %v13194_v50  ;;  %v6724_v27 = vsub.f32 1.0, %v6723_v4  ;;  %v6767_v0 = vmul.f32 %v6707_v48, %v6637_v12  ;;  %v7226_v16 = vmul.f32 %v7166_v54, %v7096_v55 }
 0xf0c   : > { %8953 = vmatmul.msk.f32.gmra.mxu1 %vm1118_vm0, %v6766_v11  ;;  %v6711_v49 = vmul.f32 %v13182_v21, %v6710_v20  ;;  %8985 = vmatmul.msk.f32.gmra.mxu0 %vm1118_vm0, %v7225_v23  ;;  %v7175_v7 = vsel %vm13267_vm2, %v13156_v42, %v7171_v26  ;;  %v7179_v12 = vor.u32 1.1754944e-38, %v7178_v3  ;;  %vm6728_vm6 = vweird.f32 %v13200_v17 }
 0xf0d   : > { %v6725_v1 = vmul.f32 %v13200_v17, %v6724_v27  ;;  %v7192_v19 = vand.u32 2147483648, %v13196_v34  ;;  %v6733_v4 = vand.u32 2147483648, %v13145_v24  ;;  %vm7186_vm8 = vweird.f32 %v13196_v34  ;;  %vm13304_vm9 = vmor %vm6727_vm5, %vm6728_vm6 }
 0xf0e   : > { %v6712_v13 = vadd.f32 %v13182_v21, %v6711_v49  ;;  %v7180_v2 = vsel %vm7177_vm4, %v7179_v12, %v7175_v7  ;;  %v7190_v61 = vand.u32 2147483647, %v13196_v34  ;;  %vm6732_vm12 = vcmp.eq.f32.partialorder %v6731_v14, 8.507059e+37 }
 0xf0f   : > { %v13239_v25 = vpop.eup %9645  ;;  %v6726_v42 = vadd.f32 %v13200_v17, %v6725_v1  ;;  %v7227_v55 = vmul.f32 %v7180_v2, %v7099_v44  ;;  %v7206_v60 = vand.u32 2147483648, %v13205_v18  ;;  %v7204_v47 = vand.u32 2147483647, %v13205_v18 }
 0xf10   : > { %v7182_v56 = vmul.f32 %v13239_v25, %v13196_v34  ;;  %v13248_v52 = vpop.xlane.xlu1 %7020  ;;  %v13251_v5 = vpop.eup %9647  ;;  %v6716_v15 = vsel %vm13261_vm15, %v13182_v21, %v6712_v13  ;;  %vm7187_vm7 = vweird.f32 %v13239_v25  ;;  %v6734_v13 = vor.u32 1.1754944e-38, %v6733_v4 }
 0xf11   : > { %v6640_v58 = vpop.f32.mrf.mxu0  ;;  %v13255_v33 = vpop.eup %9649  ;;  %9651 = vrcp.f32 %v13248_v52  ;;  %v7196_v30 = vmul.f32 %v13251_v5, %v13205_v18  ;;  %v6721_v43 = vsel %vm6718_vm3, %v6720_v62, %v6716_v15  ;;  %vm13309_vm10 = vmor %vm7186_vm8, %vm7187_vm7  ;;  %v6730_v27 = vsel %vm13304_vm9, %v13200_v17, %v6726_v42 }
 0xf12   : > { %v7183_v35 = vsub.f32 1.0, %v7182_v56  ;;  %v6737_v21 = vmul.f32 %v13255_v33, %v13194_v50  ;;  %v6768_v23 = vmul.f32 %v6721_v43, %v6640_v58  ;;  %v7102_v24 = vpop.f32.mrf.mxu3  ;;  %v7193_v56 = vor.u32 1.1754944e-38, %v7192_v19  ;;  %v13327_v58 = vpop.f32.mrf.mxu1 }
 0xf13   : > { %v7197_v11 = vsub.f32 1.0, %v7196_v30  ;;  %vm7191_vm11 = vcmp.eq.f32.partialorder %v7190_v61, 8.507059e+37  ;;  %vm7201_vm13 = vweird.f32 %v13251_v5  ;;  %vm6742_vm14 = vweird.f32 %v13255_v33 }
 0xf14   : > { %8954 = vmatmul.msk.f32.gmra.mxu1 %vm1118_vm0, %v6767_v0  ;;  %v7184_v22 = vmul.f32 %v13239_v25, %v7183_v35  ;;  %8986 = vmatmul.msk.f32.gmra.mxu0 %vm1118_vm0, %v7226_v16  ;;  %v6738_v9 = vsub.f32 1.0, %v6737_v21  ;;  %v6735_v35 = vsel %vm6732_vm12, %v6734_v13, %v6730_v27  ;;  %vm7200_vm15 = vweird.f32 %v13205_v18 }
 0xf15   : > { %v7198_v48 = vmul.f32 %v13251_v5, %v7197_v11  ;;  %v6747_v15 = vand.u32 2147483648, %v13194_v50  ;;  %vm13339_vm2 = vmor %vm7200_vm15, %vm7201_vm13  ;;  %vm6741_vm3 = vweird.f32 %v13194_v50  ;;  %v6745_v7 = vand.u32 2147483647, %v13194_v50 }
 0xf16   : > { %v7185_v10 = vadd.f32 %v13239_v25, %v7184_v22  ;;  %v6739_v26 = vmul.f32 %v13255_v33, %v6738_v9  ;;  %vm6743_vm4 = vmor %vm6741_vm3, %vm6742_vm14  ;;  %v7207_v21 = vor.u32 1.1754944e-38, %v7206_v60  ;;  %vm7205_vm5 = vcmp.eq.f32.partialorder %v7204_v47, 8.507059e+37 }
 0xf17   : > { %v13296_v53 = vpop.eup %9651  ;;  %v7199_v17 = vadd.f32 %v13251_v5, %v7198_v48  ;;  %v6748_v43 = vor.u32 1.1754944e-38, %v6747_v15  ;;  %vm6746_vm6 = vcmp.eq.f32.partialorder %v6745_v7, 8.507059e+37  ;;  %v7220_v19 = vand.u32 2147483648, %v13248_v52 }
 0xf18   : > { %v13288_v20 = vpop.xlane.xlu2 %6561  ;;  %v7189_v54 = vsel %vm13309_vm10, %v13239_v25, %v7185_v10  ;;  %v7210_v34 = vmul.f32 %v13296_v53, %v13248_v52  ;;  %v6740_v38 = vadd.f32 %v13255_v33, %v6739_v26  ;;  %vm7215_vm8 = vweird.f32 %v13296_v53 }
 0xf19   : > { %9653 = vrcp.f32 %v13288_v20  ;;  %v6643_v49 = vpop.f32.mrf.mxu0  ;;  %v7194_v25 = vsel %vm7191_vm11, %v7193_v56, %v7189_v54  ;;  %v7203_v22 = vsel %vm13339_vm2, %v13251_v5, %v7199_v17  ;;  %v6761_v9 = vand.u32 2147483648, %v13288_v20 }
 0xf1a   : > { %v7211_v0 = vsub.f32 1.0, %v7210_v34  ;;  %v6769_v57 = vmul.f32 %v6735_v35, %v6643_v49  ;;  %v7228_v44 = vmul.f32 %v7194_v25, %v7102_v24  ;;  %v6744_v12 = vsel %vm6743_vm4, %v13255_v33, %v6740_v38  ;;  %v7105_v50 = vpop.f32.mrf.mxu3  ;;  %v6303_v11 = vpop.f32.mrf.mxu1  ;;  %v13379_v35 = vld [vmem:[%s14035_s3] ss:$0 sm:$0xff]  ;;  %s14043_s3 = sld [smem:[#allocation21_spill]] }
 0xf1b   : > { %v7208_v2 = vsel %vm7205_vm5, %v7207_v21, %v7203_v22  ;;  %v6749_v10 = vsel %vm6746_vm6, %v6748_v43, %v6744_v12  ;;  %vm6755_vm9 = vweird.f32 %v13288_v20  ;;  %vm7214_vm10 = vweird.f32 %v13248_v52 }
 0xf1c   : > { %8955 = vmatmul.msk.f32.gmra.mxu1 %vm1118_vm0, %v6768_v23  ;;  %8987 = vmatmul.msk.f32.gmra.mxu0 %vm1118_vm0, %v7227_v55  ;;  %v7212_v18 = vmul.f32 %v13296_v53, %v7211_v0  ;;  %v6759_v23 = vand.u32 2147483647, %v13288_v20  ;;  %v7229_v4 = vmul.f32 %v7208_v2, %v7105_v50  ;;  %v7218_v55 = vand.u32 2147483647, %v13248_v52  ;;  %vm7216_vm12 = vmor %vm7214_vm10, %vm7215_vm8 }
 0xf1d   : > { %v6762_v40 = vor.u32 1.1754944e-38, %v6761_v9  ;;  %v7221_v14 = vor.u32 1.1754944e-38, %v7220_v19  ;;  %v6363_v26 = vadd.f32 %v12794_v8, %v13277_v28  ;;  %v6369_v22 = vadd.f32 %v12801_v41, %v6303_v11 }
 0xf1e   : > { %v7213_v5 = vadd.f32 %v13296_v53, %v7212_v18  ;;  %vm6760_vm13 = vcmp.eq.f32.partialorder %v6759_v23, 8.507059e+37  ;;  %vm7219_vm14 = vcmp.eq.f32.partialorder %v7218_v55, 8.507059e+37 }
 0xf1f   : > { %v13325_v3 = vpop.eup %9653 }
 0xf20   : > { %v6751_v37 = vmul.f32 %v13325_v3, %v13288_v20  ;;  %vm6756_vm7 = vweird.f32 %v13325_v3  ;;  %v7217_v49 = vsel %vm7216_vm12, %v13296_v53, %v7213_v5 }
 0xf21   : > { %v6646_v62 = vpop.f32.mrf.mxu0  ;;  %vm6757_vm11 = vmor %vm6755_vm9, %vm6756_vm7  ;;  %v7222_v54 = vsel %vm7219_vm14, %v7221_v14, %v7217_v49 }
 0xf22   : > { %v6752_v16 = vsub.f32 1.0, %v6751_v37  ;;  %v6770_v33 = vmul.f32 %v6749_v10, %v6646_v62  ;;  %v7108_v34 = vpop.f32.mrf.mxu3 }
 0xf23   : > { %v7230_v27 = vmul.f32 %v7222_v54, %v7108_v34 }
 0xf24   : > { %8956 = vmatmul.msk.f32.gmra.mxu1 %vm1118_vm0, %v6769_v57  ;;  %v6753_v30 = vmul.f32 %v13325_v3, %v6752_v16  ;;  %8988 = vmatmul.msk.f32.gmra.mxu0 %vm1118_vm0, %v7228_v44  ;;  %v6366_v44 = vadd.f32 %v12798_v39, %v13327_v58 }
 0xf26   : > { %v6754_v42 = vadd.f32 %v13325_v3, %v6753_v30 }
 0xf28   : > { %v6758_v61 = vsel %vm6757_vm11, %v13325_v3, %v6754_v42  ;;  %v13376_v3 = vld [vmem:[%s10108_s2 + $0x8] sm:$0x3f] }
 0xf29   : > { %v6649_v20 = vpop.f32.mrf.mxu0  ;;  %v6763_v51 = vsel %vm6760_vm13, %v6762_v40, %v6758_v61  ;;  %v13382_v60 = vperm.slane %v13376_v3, 0 }
 0xf2a   : > { %v6771_v48 = vmul.f32 %v6763_v51, %v6649_v20  ;;  %v7502_v51 = vld [vmem:[%s14036_s4 + $0x78] sm:$0xff] }
 0xf2b   : > { %7576 = vmatpush.msrb.mxu2 %v7502_v51  ;;  %v7492_v51 = vld [vmem:[%s14036_s4 + $0x28] sm:$0xff] }
 0xf2c   : > { %8957 = vmatmul.msk.f32.gmra.mxu1 %vm1118_vm0, %v6770_v33  ;;  %8989 = vmatmul.msk.f32.gmra.mxu0 %vm1118_vm0, %v7229_v4 }
 0xf31   : > { %v6306_v52 = vpop.f32.mrf.mxu1 }
 0xf32   : > { %v6372_v2 = vadd.f32 %v12809_v32, %v6306_v52 }
 0xf34   : > { %8958 = vmatmul.msk.f32.gmra.mxu1 %vm1118_vm0, %v6771_v48  ;;  %8990 = vmatmul.msk.f32.gmra.mxu0 %vm1118_vm0, %v7230_v27 }
 0xf39   : > { %v6309_v53 = vpop.f32.mrf.mxu1 }
 0xf3a   : > { %v6375_v32 = vadd.f32 %v12816_v31, %v6309_v53 }
 0xf41   : > { %v6312_v24 = vpop.f32.mrf.mxu1 }
 0xf42   : > { %v6378_v31 = vadd.f32 %v12823_v29, %v6312_v24 }
 0xf49   : > { %v13369_v56 = vpop.f32.mrf.mxu1 }
 0xf4a   : > { %v6381_v29 = vadd.f32 %v12830_v46, %v13369_v56 }
 0xf4e   : > { %v7272_v0 = vpop.f32.mrf.mxu0 }
 0xf51   : > { %v13371_v13 = vpop.f32.mrf.mxu1 }
 0xf52   : > { %v6384_v46 = vadd.f32 %v12837_v36, %v13371_v13 }
 0xf56   : > { %v7275_v15 = vpop.f32.mrf.mxu0 }
 0xf59   : > { %v6813_v25 = vpop.f32.mrf.mxu1 }
 0xf5a   : > { %v6837_v37 = vadd.f32 %v6813_v25, %v6363_v26 }
 0xf5c   : > { %v7296_v17 = vadd.f32 %v7272_v0, %v6837_v37 }
 0xf5e   : > { %v7308_v16 = vadd.f32 %v13379_v35, %v7296_v17  ;;  %v14038_v17 = vld [vmem:[#allocation24_spill] sm:$0xff] }
 0xf60   : > { %v7317_v57 = vmul.f32 %v13382_v60, %v7308_v16 }
 0xf62   : > { %v13387_v38 = vadd.f32 %v7317_v57, %v11929_v59 }
 0xf64   : > { %v7333_v8 = vmul.f32 %v13387_v38, %v13387_v38 }
 0xf66   : > { %v7341_v28 = vsel %vm1192_vm1, %v7333_v8, 0.0 }
 0xf67   : > { %7342 = vadd.xlane.f32.xlu0 %v7341_v28 }
 0xf81   : > { %v6816_v47 = vpop.f32.mrf.mxu1 }
 0xf82   : > { %v6838_v1 = vadd.f32 %v6816_v47, %v6366_v44 }
 0xf84   : > { %v7297_v7 = vadd.f32 %v7275_v15, %v6838_v1 }
 0xf86   : > { %v7309_v30 = vadd.f32 %v13379_v35, %v7297_v7  ;;  %v14040_v7 = vld [vmem:[#allocation25_spill] sm:$0xff] }
 0xf88   : > { %v7318_v59 = vmul.f32 %v13382_v60, %v7309_v30 }
 0xf89   : > { %v6819_v18 = vpop.f32.mrf.mxu1  ;;  %v7278_v21 = vpop.f32.mrf.mxu0 }
 0xf8a   : > { %v6839_v62 = vadd.f32 %v6819_v18, %v6369_v22  ;;  %v13398_v12 = vadd.f32 %v7318_v59, %v11935_v63 }
 0xf8c   : > { %v7298_v43 = vadd.f32 %v7278_v21, %v6839_v62  ;;  %v7334_v39 = vmul.f32 %v13398_v12, %v13398_v12 }
 0xf8e   : > { %v7310_v58 = vadd.f32 %v13379_v35, %v7298_v43  ;;  %v7344_v50 = vsel %vm1192_vm1, %v7334_v39, 0.0  ;;  %v14041_v43 = vld [vmem:[#allocation26_spill] sm:$0xff] }
 0xf8f   : > { %7345 = vadd.xlane.f32.xlu2 %v7344_v50 }
 0xf90   : > { %v7319_v41 = vmul.f32 %v13382_v60, %v7310_v58 }
 0xf91   : > { %v6822_v42 = vpop.f32.mrf.mxu1  ;;  %v7281_v63 = vpop.f32.mrf.mxu0 }
 0xf92   : > { %v13407_v11 = vadd.f32 %v7319_v41, %v11941_v6  ;;  %v6840_v5 = vadd.f32 %v6822_v42, %v6372_v2  ;;  %v7501_v2 = vld [vmem:[%s14036_s4 + $0x70] sm:$0xff]  ;;  %v7944_v41 = vld [vmem:[%s14039_s1 + $0x78] sm:$0xff]  ;;  %v7499_v42 = vld [vmem:[%s14036_s4 + $0x60] sm:$0xff] }
 0xf93   : > { %7535 = vmatpush.msrb.mxu1 %v7501_v2  ;;  %7994 = vmatpush.msra.mxu0 %v7944_v41 }
 0xf94   : > { %v7299_v10 = vadd.f32 %v7281_v63, %v6840_v5  ;;  %v7335_v9 = vmul.f32 %v13407_v11, %v13407_v11  ;;  %v7941_v5 = vld [vmem:[%s14039_s1 + $0x60] sm:$0xff]  ;;  %v7942_v63 = vld [vmem:[%s14039_s1 + $0x68] sm:$0xff] }
 0xf95   : > { %7536 = vmatpush.msrb.mxu1 %v7499_v42  ;;  %7995 = vmatpush.msra.mxu0 %v7942_v63 }
 0xf96   : > { %v7311_v19 = vadd.f32 %v13379_v35, %v7299_v10  ;;  %v7347_v33 = vsel %vm1192_vm1, %v7335_v9, 0.0  ;;  %v7498_v10 = vld [vmem:[%s14036_s4 + $0x58] sm:$0xff]  ;;  %v7497_v9 = vld [vmem:[%s14036_s4 + $0x50] sm:$0xff] }
 0xf97   : > { %7348 = vadd.xlane.f32.xlu1 %v7347_v33  ;;  %7537 = vmatpush.msrb.mxu1 %v7497_v9  ;;  %v7940_v33 = vld [vmem:[%s14039_s1 + $0x58] sm:$0xff] }
 0xf98   : > { %v7320_v23 = vmul.f32 %v13382_v60, %v7311_v19  ;;  %v7939_v19 = vld [vmem:[%s14039_s1 + $0x50] sm:$0xff]  ;;  %7996 = vmatpush.msra.mxu0 %v7940_v33 }
 0xf99   : > { %v6825_v4 = vpop.f32.mrf.mxu1  ;;  %v7284_v61 = vpop.f32.mrf.mxu0 }
 0xf9a   : > { %v13416_v6 = vadd.f32 %v7320_v23, %v11947_v45  ;;  %v6841_v55 = vadd.f32 %v6825_v4, %v6375_v32  ;;  %v14037_v45 = vld [vmem:[#allocation23_spill] sm:$0xff]  ;;  %v7496_v23 = vld [vmem:[%s14036_s4 + $0x48] sm:$0xff] }
 0xf9b   : > { %v7495_v32 = vld [vmem:[%s14036_s4 + $0x40] sm:$0xff] }
 0xf9c   : > { %v7300_v49 = vadd.f32 %v7284_v61, %v6841_v55  ;;  %v7336_v40 = vmul.f32 %v13416_v6, %v13416_v6  ;;  %v7937_v4 = vld [vmem:[%s14039_s1 + $0x40] sm:$0xff]  ;;  %7538 = vmatpush.msrb.mxu1 %v7495_v32  ;;  %v7938_v55 = vld [vmem:[%s14039_s1 + $0x48] sm:$0xff]  ;;  %v7493_v61 = vld [vmem:[%s14036_s4 + $0x30] sm:$0xff] }
 0xf9d   : > { %7997 = vmatpush.msra.mxu0 %v7938_v55 }
 0xf9e   : > { %v7312_v14 = vadd.f32 %v13379_v35, %v7300_v49  ;;  %v7350_v20 = vsel %vm1192_vm1, %v7336_v40, 0.0  ;;  %v7494_v49 = vld [vmem:[%s14036_s4 + $0x38] sm:$0xff]  ;;  %v7935_v40 = vld [vmem:[%s14039_s1 + $0x30] sm:$0xff]  ;;  %7539 = vmatpush.msrb.mxu1 %v7493_v61 }
 0xf9f   : > { %7351 = vadd.xlane.f32.xlu0 %v7350_v20  ;;  %v7491_v20 = vld [vmem:[%s14036_s4 + $0x20] sm:$0xff] }
 0xfa0   : > { %v7321_v54 = vmul.f32 %v13382_v60, %v7312_v14  ;;  %v7936_v14 = vld [vmem:[%s14039_s1 + $0x38] sm:$0xff]  ;;  %7540 = vmatpush.msrb.mxu1 %v7491_v20 }
 0xfa1   : > { %v6828_v52 = vpop.f32.mrf.mxu1  ;;  %v7287_v27 = vpop.f32.mrf.mxu0  ;;  %7998 = vmatpush.msra.mxu0 %v7936_v14 }
 0xfa2   : > { %v13426_v34 = vadd.f32 %v7321_v54, %v14037_v45  ;;  %v6842_v48 = vadd.f32 %v6828_v52, %v6378_v31  ;;  %v7933_v31 = vld [vmem:[%s14039_s1 + $0x20] sm:$0xff]  ;;  %v7934_v54 = vld [vmem:[%s14039_s1 + $0x28] sm:$0xff]  ;;  %v7489_v52 = vld [vmem:[%s14036_s4 + $0x10] sm:$0xff] }
 0xfa3   : > { %v7490_v45 = vld [vmem:[%s14036_s4 + $0x18] sm:$0xff]  ;;  %7999 = vmatpush.msra.mxu0 %v7934_v54  ;;  %7541 = vmatpush.msrb.mxu1 %v7489_v52 }
 0xfa4   : > { %v7301_v53 = vadd.f32 %v7287_v27, %v6842_v48  ;;  %v7337_v26 = vmul.f32 %v13426_v34, %v13426_v34  ;;  %v7931_v48 = vld [vmem:[%s14039_s1 + $0x10] sm:$0xff]  ;;  %v7932_v27 = vld [vmem:[%s14039_s1 + $0x18] sm:$0xff] }
 0xfa5   : > { %8000 = vmatpush.msra.mxu0 %v7932_v27 }
 0xfa6   : > { %v7313_v25 = vadd.f32 %v13379_v35, %v7301_v53  ;;  %v7353_v37 = vsel %vm1192_vm1, %v7337_v26, 0.0  ;;  %v7487_v53 = vld [vmem:[%s14036_s4] sm:$0xff]  ;;  %v7488_v26 = vld [vmem:[%s14036_s4 + $0x8] sm:$0xff] }
 0xfa7   : > { %7354 = vadd.xlane.f32.xlu2 %v7353_v37  ;;  %v7929_v37 = vld [vmem:[%s14039_s1] sm:$0xff]  ;;  %7542 = vmatpush.msrb.mxu1 %v7487_v53 }
 0xfa8   : > { %v7322_v24 = vmul.f32 %v13382_v60, %v7313_v25 }
 0xfa9   : > { %v6831_v0 = vpop.f32.mrf.mxu1  ;;  %v7290_v8 = vpop.f32.mrf.mxu0 }
 0xfaa   : > { %v13436_v16 = vadd.f32 %v7322_v24, %v14038_v17  ;;  %v6843_v57 = vadd.f32 %v6831_v0, %v6381_v29  ;;  %v7930_v29 = vld [vmem:[%s14039_s1 + $0x8] sm:$0xff] }
 0xfab   : > { %v14042_v24 = vld [vmem:[#allocation28_spill] sm:$0xff]  ;;  %8001 = vmatpush.msra.mxu0 %v7930_v29 }
 0xfac   : > { %v7302_v28 = vadd.f32 %v7290_v8, %v6843_v57  ;;  %v7338_v44 = vmul.f32 %v13436_v16, %v13436_v16 }
 0xfae   : > { %v7314_v47 = vadd.f32 %v13379_v35, %v7302_v28  ;;  %v7356_v15 = vsel %vm1192_vm1, %v7338_v44, 0.0 }
 0xfaf   : > { %7357 = vadd.xlane.f32.xlu1 %v7356_v15 }
 0xfb0   : > { %v7323_v56 = vmul.f32 %v13382_v60, %v7314_v47 }
 0xfb1   : > { %v6834_v1 = vpop.f32.mrf.mxu1  ;;  %v7293_v59 = vpop.f32.mrf.mxu0 }
 0xfb2   : > { %v13446_v30 = vadd.f32 %v7323_v56, %v14040_v7  ;;  %v6844_v22 = vadd.f32 %v6834_v1, %v6384_v46  ;;  %v13492_v46 = vperm.slane %v13376_v3, 2  ;;  %v13495_v1 = vperm.slane %v13376_v3, 1 }
 0xfb4   : > { %v7303_v18 = vadd.f32 %v7293_v59, %v6844_v22  ;;  %v7339_v62 = vmul.f32 %v13446_v30, %v13446_v30 }
 0xfb6   : > { %v7315_v21 = vadd.f32 %v13379_v35, %v7303_v18  ;;  %v7359_v36 = vsel %vm1192_vm1, %v7339_v62, 0.0  ;;  %v7943_v35 = vld [vmem:[%s14039_s1 + $0x70] sm:$0xff]  ;;  %s14053_s1 = sld [smem:[#allocation4_spill]] }
 0xfb7   : > { %7360 = vadd.xlane.f32.xlu0 %v7359_v36  ;;  %7953 = vmatpush.msrb.mxu3 %v7943_v35 }
 0xfb8   : > { %v7324_v13 = vmul.f32 %v13382_v60, %v7315_v21  ;;  %v7500_v60 = vld [vmem:[%s14036_s4 + $0x68] sm:$0xff] }
 0xfb9   : > { %7577 = vmatpush.msrb.mxu2 %v7500_v60  ;;  %7954 = vmatpush.msrb.mxu3 %v7941_v5 }
 0xfba   : > { %v13454_v39 = vadd.f32 %v7324_v13, %v14041_v43 }
 0xfbb   : > { %7578 = vmatpush.msrb.mxu2 %v7498_v10  ;;  %7955 = vmatpush.msrb.mxu3 %v7939_v19 }
 0xfbc   : > { %v7340_v58 = vmul.f32 %v13454_v39, %v13454_v39 }
 0xfbd   : > { %7579 = vmatpush.msrb.mxu2 %v7496_v23  ;;  %7956 = vmatpush.msrb.mxu3 %v7937_v4 }
 0xfbe   : > { %v7362_v50 = vsel %vm1192_vm1, %v7340_v58, 0.0 }
 0xfbf   : > { %7363 = vadd.xlane.f32.xlu2 %v7362_v50  ;;  %7580 = vmatpush.msrb.mxu2 %v7494_v49 }
 0xfc0   : > { %7957 = vmatpush.msrb.mxu3 %v7935_v40 }
 0xfc1   : > { %7581 = vmatpush.msrb.mxu2 %v7492_v51 }
 0xfc2   : > { %7958 = vmatpush.msrb.mxu3 %v7933_v31 }
 0xfc3   : > { %7582 = vmatpush.msrb.mxu2 %v7490_v45 }
 0xfc4   : > { %7959 = vmatpush.msrb.mxu3 %v7931_v48 }
 0xfc5   : > { %7583 = vmatpush.msrb.mxu2 %v7488_v26 }
 0xfc6   : > { %7960 = vmatpush.msrb.mxu3 %v7929_v37 }
 0xfda   : > { %v7343_v25 = vpop.xlane.xlu0 %7342 }
 0xfdb   : > { %v7365_v0 = vmul.f32 %v7343_v25, %v14042_v24 }
 0xfdd   : > { %v7373_v17 = vadd.f32 1e-06, %v7365_v0 }
 0xfdf   : > { %9655 = vrsqrt.f32 %v7373_v17  ;;  %vm7387_vm15 = vweird.f32 %v7373_v17 }
 0xfe5   : > { %v9656_v57 = vpop.eup %9655 }
 0xfe6   : > { %v7382_v8 = vmul.f32 %v9656_v57, %v7373_v17  ;;  %vm7388_vm0 = vweird.f32 %v9656_v57 }
 0xfe7   : > { %vm7389_vm2 = vmor %vm7387_vm15, %vm7388_vm0 }
 0xfe8   : > { %v7383_v28 = vmul.f32 %v9656_v57, %v7382_v8 }
 0xfea   : > { %v7384_v44 = vmul.f32 0.5, %v7383_v28 }
 0xfec   : > { %v7385_v47 = vsub.f32 1.5, %v7384_v44 }
 0xfee   : > { %v7386_v15 = vmul.f32 %v9656_v57, %v7385_v47 }
 0xff0   : > { %v7390_v56 = vsel %vm7389_vm2, %v9656_v57, %v7386_v15 }
 0xff1   : > { %v7461_v7 = vmul.f32 %v7390_v56, %v13387_v38 }
 0xff3   : > { %v7470_v22 = vmul.f32 %v13492_v46, %v7461_v7 }
 0xff5   : > { %v7479_v59 = vadd.f32 %v13495_v1, %v7470_v22 }
 0xff7   : > { %8991 = vmatmul.msk.f32.vlgmr.msrb.gmra.mxu1 %vm1192_vm1, %v7479_v59  ;;  %8999 = vmatmul.msk.f32.vlgmr.msrb.gmra.mxu2 %vm1192_vm1, %v7479_v59 }
 0xff8   : > { %9023 = vmatmul.msk.f32.vlgmr.msrb.gmra.mxu3 %vm1192_vm1, %v7479_v59  ;;  %9031 = vmatmul.msk.f32.vlgmr.msra.gmra.mxu0 %vm1192_vm1, %v7479_v59 }
0x1002   : > { %v7346_v18 = vpop.xlane.xlu2 %7345 }
0x1003   : > { %v7366_v62 = vmul.f32 %v7346_v18, %v14042_v24 }
0x1005   : > { %v7374_v21 = vadd.f32 1e-06, %v7366_v62 }
0x1007   : > { %9657 = vrsqrt.f32 %v7374_v21  ;;  %vm7397_vm4 = vweird.f32 %v7374_v21 }
0x100a   : > { %v7349_v3 = vpop.xlane.xlu1 %7348 }
0x100b   : > { %v7367_v36 = vmul.f32 %v7349_v3, %v14042_v24 }
0x100d   : > { %v9658_v13 = vpop.eup %9657  ;;  %v7375_v43 = vadd.f32 1e-06, %v7367_v36 }
0x100e   : > { %v7392_v58 = vmul.f32 %v9658_v13, %v7374_v21  ;;  %vm7398_vm3 = vweird.f32 %v9658_v13 }
0x100f   : > { %9659 = vrsqrt.f32 %v7375_v43  ;;  %vm7399_vm5 = vmor %vm7397_vm4, %vm7398_vm3  ;;  %vm7407_vm7 = vweird.f32 %v7375_v43 }
0x1010   : > { %v7393_v50 = vmul.f32 %v9658_v13, %v7392_v58 }
0x1012   : > { %v7394_v2 = vmul.f32 0.5, %v7393_v50  ;;  %v7352_v35 = vpop.xlane.xlu0 %7351 }
0x1013   : > { %v7368_v41 = vmul.f32 %v7352_v35, %v14042_v24 }
0x1014   : > { %v7395_v60 = vsub.f32 1.5, %v7394_v2 }
0x1015   : > { %v9660_v42 = vpop.eup %9659  ;;  %v7376_v5 = vadd.f32 1e-06, %v7368_v41 }
0x1016   : > { %v7396_v63 = vmul.f32 %v9658_v13, %v7395_v60  ;;  %v7402_v10 = vmul.f32 %v9660_v42, %v7375_v43  ;;  %vm7408_vm6 = vweird.f32 %v9660_v42 }
0x1017   : > { %9661 = vrsqrt.f32 %v7376_v5  ;;  %vm7409_vm8 = vmor %vm7407_vm7, %vm7408_vm6  ;;  %vm7417_vm10 = vweird.f32 %v7376_v5 }
0x1018   : > { %v7400_v9 = vsel %vm7399_vm5, %v9658_v13, %v7396_v63  ;;  %v7403_v19 = vmul.f32 %v9660_v42, %v7402_v10 }
0x1019   : > { %v7462_v33 = vmul.f32 %v7400_v9, %v13398_v12 }
0x101a   : > { %v7404_v32 = vmul.f32 0.5, %v7403_v19  ;;  %v7355_v23 = vpop.xlane.xlu2 %7354 }
0x101b   : > { %v7369_v4 = vmul.f32 %v7355_v23, %v14042_v24  ;;  %v7471_v55 = vmul.f32 %v13492_v46, %v7462_v33 }
0x101c   : > { %v7405_v61 = vsub.f32 1.5, %v7404_v32 }
0x101d   : > { %v9662_v49 = vpop.eup %9661  ;;  %v7377_v40 = vadd.f32 1e-06, %v7369_v4  ;;  %v7480_v14 = vadd.f32 %v13495_v1, %v7471_v55 }
0x101e   : > { %v7406_v20 = vmul.f32 %v9660_v42, %v7405_v61  ;;  %v7412_v51 = vmul.f32 %v9662_v49, %v7376_v5  ;;  %vm7418_vm9 = vweird.f32 %v9662_v49 }
0x101f   : > { %9663 = vrsqrt.f32 %v7377_v40  ;;  %8992 = vmatmul.msk.f32.gmra.mxu1 %vm1192_vm1, %v7480_v14  ;;  %9000 = vmatmul.msk.f32.gmra.mxu2 %vm1192_vm1, %v7480_v14  ;;  %vm7419_vm11 = vmor %vm7417_vm10, %vm7418_vm9  ;;  %vm7427_vm13 = vweird.f32 %v7377_v40 }
0x1020   : > { %v7410_v31 = vsel %vm7409_vm8, %v9660_v42, %v7406_v20  ;;  %v7413_v54 = vmul.f32 %v9662_v49, %v7412_v51  ;;  %9024 = vmatmul.msk.f32.gmra.mxu3 %vm1192_vm1, %v7480_v14  ;;  %9032 = vmatmul.msk.f32.gmra.mxu0 %vm1192_vm1, %v7480_v14 }
0x1021   : > { %v7463_v52 = vmul.f32 %v7410_v31, %v13407_v11 }
0x1022   : > { %v7414_v45 = vmul.f32 0.5, %v7413_v54  ;;  %v7358_v48 = vpop.xlane.xlu1 %7357 }
0x1023   : > { %v7370_v27 = vmul.f32 %v7358_v48, %v14042_v24  ;;  %v7472_v53 = vmul.f32 %v13492_v46, %v7463_v52 }
0x1024   : > { %v7415_v26 = vsub.f32 1.5, %v7414_v45 }
0x1025   : > { %v9664_v25 = vpop.eup %9663  ;;  %v7378_v37 = vadd.f32 1e-06, %v7370_v27  ;;  %v7481_v29 = vadd.f32 %v13495_v1, %v7472_v53 }
0x1026   : > { %v7416_v0 = vmul.f32 %v9662_v49, %v7415_v26  ;;  %v7422_v17 = vmul.f32 %v9664_v25, %v7377_v40  ;;  %vm7428_vm12 = vweird.f32 %v9664_v25 }
0x1027   : > { %9665 = vrsqrt.f32 %v7378_v37  ;;  %8993 = vmatmul.msk.f32.gmra.mxu1 %vm1192_vm1, %v7481_v29  ;;  %9001 = vmatmul.msk.f32.gmra.mxu2 %vm1192_vm1, %v7481_v29  ;;  %vm7429_vm14 = vmor %vm7427_vm13, %vm7428_vm12  ;;  %vm7437_vm15 = vweird.f32 %v7378_v37 }
0x1028   : > { %v7420_v57 = vsel %vm7419_vm11, %v9662_v49, %v7416_v0  ;;  %v7423_v8 = vmul.f32 %v9664_v25, %v7422_v17  ;;  %9025 = vmatmul.msk.f32.gmra.mxu3 %vm1192_vm1, %v7481_v29  ;;  %9033 = vmatmul.msk.f32.gmra.mxu0 %vm1192_vm1, %v7481_v29  ;;  %v8074_v29 = vld [vmem:[%s14043_s3 + $0xf8] sm:$0xff]  ;;  %v8073_v17 = vld [vmem:[%s14043_s3 + $0xf0] sm:$0xff] }
0x1029   : > { %v7464_v28 = vmul.f32 %v7420_v57, %v13416_v6  ;;  %8116 = vmatpush.msra.mxu2 %v8074_v29  ;;  %v8054_v0 = vld [vmem:[%s14043_s3 + $0x58] sm:$0xff]  ;;  %v8053_v57 = vld [vmem:[%s14043_s3 + $0x50] sm:$0xff] }
0x102a   : > { %v7424_v44 = vmul.f32 0.5, %v7423_v8  ;;  %v7361_v47 = vpop.xlane.xlu0 %7360  ;;  %v8072_v8 = vld [vmem:[%s14043_s3 + $0xe8] sm:$0xff] }
0x102b   : > { %v7371_v15 = vmul.f32 %v7361_v47, %v14042_v24  ;;  %v7473_v56 = vmul.f32 %v13492_v46, %v7464_v28  ;;  %8117 = vmatpush.msra.mxu2 %v8073_v17  ;;  %v8052_v28 = vld [vmem:[%s14043_s3 + $0x48] sm:$0xff]  ;;  %v8051_v47 = vld [vmem:[%s14043_s3 + $0x40] sm:$0xff] }
0x102c   : > { %v7425_v7 = vsub.f32 1.5, %v7424_v44  ;;  %v8071_v44 = vld [vmem:[%s14043_s3 + $0xe0] sm:$0xff] }
0x102d   : > { %v9666_v22 = vpop.eup %9665  ;;  %v7379_v59 = vadd.f32 1e-06, %v7371_v15  ;;  %v7482_v18 = vadd.f32 %v13495_v1, %v7473_v56  ;;  %8118 = vmatpush.msra.mxu2 %v8072_v8  ;;  %v8070_v15 = vld [vmem:[%s14043_s3 + $0xd8] sm:$0xff] }
0x102e   : > { %v7426_v62 = vmul.f32 %v9664_v25, %v7425_v7  ;;  %v7432_v21 = vmul.f32 %v9666_v22, %v7378_v37  ;;  %vm7438_vm0 = vweird.f32 %v9666_v22  ;;  %v8057_v37 = vld [vmem:[%s14043_s3 + $0x70] sm:$0xff]  ;;  %v8050_v56 = vld [vmem:[%s14043_s3 + $0x38] sm:$0xff] }
0x102f   : > { %9667 = vrsqrt.f32 %v7379_v59  ;;  %8994 = vmatmul.msk.f32.gmra.mxu1 %vm1192_vm1, %v7482_v18  ;;  %9002 = vmatmul.msk.f32.gmra.mxu2 %vm1192_vm1, %v7482_v18  ;;  %vm7439_vm2 = vmor %vm7437_vm15, %vm7438_vm0  ;;  %vm7447_vm4 = vweird.f32 %v7379_v59  ;;  %v8069_v7 = vld [vmem:[%s14043_s3 + $0xd0] sm:$0xff] }
0x1030   : > { %v7430_v3 = vsel %vm7429_vm14, %v9664_v25, %v7426_v62  ;;  %v7433_v36 = vmul.f32 %v9666_v22, %v7432_v21  ;;  %9026 = vmatmul.msk.f32.gmra.mxu3 %vm1192_vm1, %v7482_v18  ;;  %9034 = vmatmul.msk.f32.gmra.mxu0 %vm1192_vm1, %v7482_v18  ;;  %v8058_v25 = vld [vmem:[%s14043_s3 + $0x78] sm:$0xff]  ;;  %v8048_v18 = vld [vmem:[%s14043_s3 + $0x28] sm:$0xff]  ;;  %v8067_v62 = vld [vmem:[%s14043_s3 + $0xc0] sm:$0xff] }
0x1031   : > { %v7465_v13 = vmul.f32 %v7430_v3, %v13426_v34  ;;  %8075 = vmatpush.msra.mxu1 %v8058_v25  ;;  %8119 = vmatpush.msra.mxu2 %v8071_v44  ;;  %v8047_v21 = vld [vmem:[%s14043_s3 + $0x20] sm:$0xff]  ;;  %v8066_v3 = vld [vmem:[%s14043_s3 + $0xb8] sm:$0xff] }
0x1032   : > { %v7434_v43 = vmul.f32 0.5, %v7433_v36  ;;  %v7364_v58 = vpop.xlane.xlu2 %7363  ;;  %v8046_v36 = vld [vmem:[%s14043_s3 + $0x18] sm:$0xff] }
0x1033   : > { %v7372_v50 = vmul.f32 %v7364_v58, %v14042_v24  ;;  %v7474_v2 = vmul.f32 %v13492_v46, %v7465_v13  ;;  %8076 = vmatpush.msra.mxu1 %v8057_v37  ;;  %8120 = vmatpush.msra.mxu2 %v8070_v15  ;;  %v8065_v13 = vld [vmem:[%s14043_s3 + $0xb0] sm:$0xff] }
0x1034   : > { %v7435_v35 = vsub.f32 1.5, %v7434_v43 }
0x1035   : > { %v9668_v41 = vpop.eup %9667  ;;  %v7380_v60 = vadd.f32 1e-06, %v7372_v50  ;;  %v7483_v42 = vadd.f32 %v13495_v1, %v7474_v2  ;;  %8121 = vmatpush.msra.mxu2 %v8069_v7  ;;  %v8045_v50 = vld [vmem:[%s14043_s3 + $0x10] sm:$0xff]  ;;  %v8064_v2 = vld [vmem:[%s14043_s3 + $0xa8] sm:$0xff] }
0x1036   : > { %v7436_v5 = vmul.f32 %v9666_v22, %v7435_v35  ;;  %v7442_v63 = vmul.f32 %v9668_v41, %v7379_v59  ;;  %vm7448_vm3 = vweird.f32 %v9668_v41  ;;  %v8068_v59 = vld [vmem:[%s14043_s3 + $0xc8] sm:$0xff] }
0x1037   : > { %9669 = vrsqrt.f32 %v7380_v60  ;;  %8995 = vmatmul.msk.f32.gmra.mxu1 %vm1192_vm1, %v7483_v42  ;;  %9003 = vmatmul.msk.f32.gmra.mxu2 %vm1192_vm1, %v7483_v42  ;;  %vm7449_vm5 = vmor %vm7447_vm4, %vm7448_vm3  ;;  %vm7457_vm7 = vweird.f32 %v7380_v60  ;;  %v8044_v35 = vld [vmem:[%s14043_s3 + $0x8] sm:$0xff] }
0x1038   : > { %v7440_v10 = vsel %vm7439_vm2, %v9666_v22, %v7436_v5  ;;  %v7443_v9 = vmul.f32 %v9668_v41, %v7442_v63  ;;  %9027 = vmatmul.msk.f32.gmra.mxu3 %vm1192_vm1, %v7483_v42  ;;  %9035 = vmatmul.msk.f32.gmra.mxu0 %vm1192_vm1, %v7483_v42  ;;  %v8049_v22 = vld [vmem:[%s14043_s3 + $0x30] sm:$0xff]  ;;  %v8062_v42 = vld [vmem:[%s14043_s3 + $0x98] sm:$0xff] }
0x1039   : > { %v7466_v19 = vmul.f32 %v7440_v10, %v13436_v16  ;;  %8122 = vmatpush.msra.mxu2 %v8068_v59  ;;  %v8061_v5 = vld [vmem:[%s14043_s3 + $0x90] sm:$0xff] }
0x103a   : > { %v7444_v33 = vmul.f32 0.5, %v7443_v9  ;;  %v8060_v9 = vld [vmem:[%s14043_s3 + $0x88] sm:$0xff] }
0x103b   : > { %v7475_v32 = vmul.f32 %v13492_v46, %v7466_v19  ;;  %8123 = vmatpush.msra.mxu2 %v8067_v62 }
0x103c   : > { %v7445_v23 = vsub.f32 1.5, %v7444_v33  ;;  %v8059_v33 = vld [vmem:[%s14043_s3 + $0x80] sm:$0xff] }
0x103d   : > { %v9670_v4 = vpop.eup %9669  ;;  %v7484_v55 = vadd.f32 %v13495_v1, %v7475_v32  ;;  %8124 = vmatpush.msra.mxu2 %v8066_v3 }
0x103e   : > { %v7446_v61 = vmul.f32 %v9668_v41, %v7445_v23  ;;  %v7452_v49 = vmul.f32 %v9670_v4, %v7380_v60  ;;  %vm7458_vm6 = vweird.f32 %v9670_v4  ;;  %v8043_v60 = vld [vmem:[%s14043_s3] sm:$0xff] }
0x103f   : > { %8996 = vmatmul.msk.f32.gmra.mxu1 %vm1192_vm1, %v7484_v55  ;;  %9004 = vmatmul.msk.f32.gmra.mxu2 %vm1192_vm1, %v7484_v55  ;;  %vm7459_vm8 = vmor %vm7457_vm7, %vm7458_vm6 }
0x1040   : > { %v7450_v40 = vsel %vm7449_vm5, %v9668_v41, %v7446_v61  ;;  %v7453_v14 = vmul.f32 %v9670_v4, %v7452_v49  ;;  %9028 = vmatmul.msk.f32.gmra.mxu3 %vm1192_vm1, %v7484_v55  ;;  %9036 = vmatmul.msk.f32.gmra.mxu0 %vm1192_vm1, %v7484_v55  ;;  %v8063_v41 = vld [vmem:[%s14043_s3 + $0xa0] sm:$0xff] }
0x1041   : > { %v7467_v20 = vmul.f32 %v7450_v40, %v13446_v30  ;;  %8125 = vmatpush.msra.mxu2 %v8065_v13 }
0x1042   : > { %v7454_v51 = vmul.f32 0.5, %v7453_v14 }
0x1043   : > { %v7476_v31 = vmul.f32 %v13492_v46, %v7467_v20  ;;  %8126 = vmatpush.msra.mxu2 %v8064_v2 }
0x1044   : > { %v7455_v54 = vsub.f32 1.5, %v7454_v51 }
0x1045   : > { %v7485_v52 = vadd.f32 %v13495_v1, %v7476_v31  ;;  %8127 = vmatpush.msra.mxu2 %v8063_v41 }
0x1046   : > { %v7456_v45 = vmul.f32 %v9670_v4, %v7455_v54 }
0x1047   : > { %8997 = vmatmul.msk.f32.gmra.mxu1 %vm1192_vm1, %v7485_v52  ;;  %9005 = vmatmul.msk.f32.gmra.mxu2 %vm1192_vm1, %v7485_v52 }
0x1048   : > { %v7460_v48 = vsel %vm7459_vm8, %v9670_v4, %v7456_v45  ;;  %9029 = vmatmul.msk.f32.gmra.mxu3 %vm1192_vm1, %v7485_v52  ;;  %9037 = vmatmul.msk.f32.gmra.mxu0 %vm1192_vm1, %v7485_v52 }
0x1049   : > { %v7468_v27 = vmul.f32 %v7460_v48, %v13454_v39  ;;  %8128 = vmatpush.msra.mxu2 %v8062_v42 }
0x104b   : > { %v7477_v53 = vmul.f32 %v13492_v46, %v7468_v27  ;;  %v8056_v46 = vld [vmem:[%s14043_s3 + $0x68] sm:$0xff]  ;;  %8129 = vmatpush.msra.mxu2 %v8061_v5 }
0x104c   : > { %8077 = vmatpush.msra.mxu1 %v8056_v46 }
0x104d   : > { %v7486_v26 = vadd.f32 %v13495_v1, %v7477_v53  ;;  %v8055_v1 = vld [vmem:[%s14043_s3 + $0x60] sm:$0xff]  ;;  %8130 = vmatpush.msra.mxu2 %v8060_v9 }
0x104e   : > { %8078 = vmatpush.msra.mxu1 %v8055_v1 }
0x104f   : > { %8998 = vmatmul.msk.f32.gmra.mxu1 %vm1192_vm1, %v7486_v26  ;;  %9006 = vmatmul.msk.f32.gmra.mxu2 %vm1192_vm1, %v7486_v26 }
0x1050   : > { %9030 = vmatmul.msk.f32.gmra.mxu3 %vm1192_vm1, %v7486_v26  ;;  %9038 = vmatmul.msk.f32.gmra.mxu0 %vm1192_vm1, %v7486_v26 }
0x1051   : > { %8079 = vmatpush.msra.mxu1 %v8054_v0  ;;  %8131 = vmatpush.msra.mxu2 %v8059_v33 }
0x1053   : > { %8080 = vmatpush.msra.mxu1 %v8053_v57 }
0x1055   : > { %8081 = vmatpush.msra.mxu1 %v8052_v28 }
0x1057   : > { %8082 = vmatpush.msra.mxu1 %v8051_v47 }
0x1059   : > { %8083 = vmatpush.msra.mxu1 %v8050_v56 }
0x105b   : > { %8084 = vmatpush.msra.mxu1 %v8049_v22 }
0x105d   : > { %8085 = vmatpush.msra.mxu1 %v8048_v18 }
0x105f   : > { %8086 = vmatpush.msra.mxu1 %v8047_v21 }
0x1061   : > { %8087 = vmatpush.msra.mxu1 %v8046_v36 }
0x1063   : > { %8088 = vmatpush.msra.mxu1 %v8045_v50 }
0x1065   : > { %8089 = vmatpush.msra.mxu1 %v8044_v35 }
0x1067   : > { %8090 = vmatpush.msra.mxu1 %v8043_v60 }
0x1074   : > { %v7544_v43 = vpop.f32.mrf.mxu1 }
0x1075   : > { %v9007_v58 = vmul.f32 -1.442695, %v7544_v43  ;;  %v8003_v28 = vpop.f32.mrf.mxu0 }
0x1077   : > { %9671 = vpow2.f32 %v9007_v58 }
0x107a   : > { %v7585_v63 = vpop.f32.mrf.mxu2 }
0x107b   : > { %v9008_v10 = vmul.f32 -1.442695, %v7585_v63  ;;  %v7962_v46 = vpop.f32.mrf.mxu3 }
0x107d   : > { %v9672_v19 = vpop.eup %9671  ;;  %9673 = vpow2.f32 %v9008_v10 }
0x107e   : > { %v7657_v32 = vadd.f32 1.0, %v9672_v19 }
0x1080   : > { %9675 = vrcp.f32 %v7657_v32  ;;  %v7684_v40 = vand.u32 2147483648, %v7657_v32  ;;  %v7682_v20 = vand.u32 2147483647, %v7657_v32  ;;  %vm7678_vm10 = vweird.f32 %v7657_v32 }
0x1082   : > { %v7685_v52 = vor.u32 1.1754944e-38, %v7684_v40  ;;  %vm7683_vm12 = vcmp.eq.f32.partialorder %v7682_v20, 8.507059e+37 }
0x1083   : > { %v9674_v23 = vpop.eup %9673 }
0x1084   : > { %v7658_v4 = vadd.f32 1.0, %v9674_v23 }
0x1086   : > { %v9676_v55 = vpop.eup %9675  ;;  %9677 = vrcp.f32 %v7658_v4  ;;  %v7699_v53 = vand.u32 2147483648, %v7658_v4  ;;  %v7697_v37 = vand.u32 2147483647, %v7658_v4  ;;  %vm7693_vm14 = vweird.f32 %v7658_v4 }
0x1087   : > { %v7674_v61 = vmul.f32 %v9676_v55, %v7657_v32  ;;  %vm7679_vm9 = vweird.f32 %v9676_v55 }
0x1088   : > { %vm7680_vm11 = vmor %vm7678_vm10, %vm7679_vm9  ;;  %v7700_v0 = vor.u32 1.1754944e-38, %v7699_v53  ;;  %vm7698_vm15 = vcmp.eq.f32.partialorder %v7697_v37, 8.507059e+37 }
0x1089   : > { %v7675_v49 = vsub.f32 1.0, %v7674_v61 }
0x108b   : > { %v7676_v14 = vmul.f32 %v9676_v55, %v7675_v49 }
0x108c   : > { %v9678_v51 = vpop.eup %9677 }
0x108d   : > { %v7677_v31 = vadd.f32 %v9676_v55, %v7676_v14  ;;  %v7689_v54 = vmul.f32 %v9678_v51, %v7658_v4  ;;  %vm7694_vm13 = vweird.f32 %v9678_v51 }
0x108e   : > { %vm7695_vm0 = vmor %vm7693_vm14, %vm7694_vm13 }
0x108f   : > { %v7681_v45 = vsel %vm7680_vm11, %v9676_v55, %v7677_v31  ;;  %v7690_v48 = vsub.f32 1.0, %v7689_v54 }
0x1090   : > { %v7686_v27 = vsel %vm7683_vm12, %v7685_v52, %v7681_v45 }
0x1091   : > { %v7913_v26 = vmul.f32 %v7686_v27, %v7544_v43  ;;  %v7691_v25 = vmul.f32 %v9678_v51, %v7690_v48 }
0x1093   : > { %v7692_v1 = vadd.f32 %v9678_v51, %v7691_v25  ;;  %v8027_v29 = vmul.f32 %v7962_v46, %v7913_v26 }
0x1095   : > { %v7696_v17 = vsel %vm7695_vm0, %v9678_v51, %v7692_v1  ;;  %8091 = vmatmul.f32.vlgmr.msra.gmra.mxu1 %v8027_v29 }
0x1096   : > { %v7701_v57 = vsel %vm7698_vm15, %v7700_v0, %v7696_v17 }
0x1097   : > { %v7914_v8 = vmul.f32 %v7701_v57, %v7585_v63 }
0x1099   : > { %v8028_v44 = vmul.f32 %v8003_v28, %v7914_v8 }
0x109b   : > { %8132 = vmatmul.f32.vlgmr.msra.gmra.mxu2 %v8028_v44 }
0x109c   : > { %v7547_v47 = vpop.f32.mrf.mxu1 }
0x109d   : > { %v9009_v15 = vmul.f32 -1.442695, %v7547_v47  ;;  %v8006_v46 = vpop.f32.mrf.mxu0 }
0x109f   : > { %9679 = vpow2.f32 %v9009_v15 }
0x10a2   : > { %v13592_v56 = vpop.f32.mrf.mxu2 }
0x10a3   : > { %v9010_v7 = vmul.f32 -1.442695, %v13592_v56  ;;  %v7965_v20 = vpop.f32.mrf.mxu3 }
0x10a4   : > { %v13595_v22 = vpop.f32.mrf.mxu1 }
0x10a5   : > { %v9680_v59 = vpop.eup %9679  ;;  %9681 = vpow2.f32 %v9010_v7  ;;  %v9011_v18 = vmul.f32 -1.442695, %v13595_v22  ;;  %v8009_v27 = vpop.f32.mrf.mxu0 }
0x10a6   : > { %v7659_v62 = vadd.f32 1.0, %v9680_v59 }
0x10a7   : > { %9683 = vpow2.f32 %v9011_v18 }
0x10a8   : > { %9685 = vrcp.f32 %v7659_v62  ;;  %v7712_v42 = vand.u32 2147483647, %v7659_v62  ;;  %v7714_v5 = vand.u32 2147483648, %v7659_v62  ;;  %vm7708_vm3 = vweird.f32 %v7659_v62 }
0x10aa   : > { %v13598_v21 = vpop.f32.mrf.mxu2  ;;  %vm7713_vm4 = vcmp.eq.f32.partialorder %v7712_v42, 8.507059e+37  ;;  %v7715_v40 = vor.u32 1.1754944e-38, %v7714_v5 }
0x10ab   : > { %v9682_v3 = vpop.eup %9681  ;;  %v9012_v36 = vmul.f32 -1.442695, %v13598_v21 }
0x10ac   : > { %v7660_v13 = vadd.f32 1.0, %v9682_v3  ;;  %v13601_v43 = vpop.f32.mrf.mxu1 }
0x10ad   : > { %v9684_v58 = vpop.eup %9683  ;;  %9687 = vpow2.f32 %v9012_v36  ;;  %v9013_v50 = vmul.f32 -1.442695, %v13601_v43 }
0x10ae   : > { %v9686_v2 = vpop.eup %9685  ;;  %9689 = vrcp.f32 %v7660_v13  ;;  %v13604_v41 = vadd.f32 1.0, %v9684_v58  ;;  %v7727_v32 = vand.u32 2147483647, %v7660_v13  ;;  %vm7723_vm6 = vweird.f32 %v7660_v13 }
0x10af   : > { %v7704_v35 = vmul.f32 %v9686_v2, %v7659_v62  ;;  %9691 = vpow2.f32 %v9013_v50  ;;  %vm7709_vm2 = vweird.f32 %v9686_v2  ;;  %v7729_v14 = vand.u32 2147483648, %v7660_v13 }
0x10b0   : > { %9693 = vrcp.f32 %v13604_v41  ;;  %vm7710_vm5 = vmor %vm7708_vm3, %vm7709_vm2  ;;  %vm13618_vm7 = vcmp.eq.f32.partialorder %v7727_v32, 8.507059e+37  ;;  %v7742_v26 = vand.u32 2147483647, %v13604_v41  ;;  %vm7738_vm9 = vweird.f32 %v13604_v41 }
0x10b1   : > { %v7705_v60 = vsub.f32 1.0, %v7704_v35  ;;  %v7730_v1 = vor.u32 1.1754944e-38, %v7729_v14  ;;  %v7744_v0 = vand.u32 2147483648, %v13604_v41 }
0x10b2   : > { %v13607_v63 = vpop.f32.mrf.mxu2  ;;  %vm13636_vm12 = vcmp.eq.f32.partialorder %v7742_v26, 8.507059e+37 }
0x10b3   : > { %v9688_v10 = vpop.eup %9687  ;;  %v7706_v9 = vmul.f32 %v9686_v2, %v7705_v60  ;;  %v9014_v19 = vmul.f32 -1.442695, %v13607_v63  ;;  %v7745_v50 = vor.u32 1.1754944e-38, %v7744_v0 }
0x10b4   : > { %v9690_v33 = vpop.eup %9689  ;;  %v13610_v23 = vadd.f32 1.0, %v9688_v10  ;;  %v13612_v4 = vpop.f32.mrf.mxu1 }
0x10b5   : > { %v9692_v55 = vpop.eup %9691  ;;  %v7707_v61 = vadd.f32 %v9686_v2, %v7706_v9  ;;  %v7719_v49 = vmul.f32 %v9690_v33, %v7660_v13  ;;  %9695 = vpow2.f32 %v9014_v19  ;;  %v9015_v45 = vmul.f32 -1.442695, %v13612_v4  ;;  %v7968_v9 = vpop.f32.mrf.mxu3 }
0x10b6   : > { %9697 = vrcp.f32 %v13610_v23  ;;  %v9694_v51 = vpop.eup %9693  ;;  %v13615_v52 = vadd.f32 1.0, %v9692_v55  ;;  %vm7724_vm8 = vweird.f32 %v9690_v33  ;;  %v7759_v7 = vand.u32 2147483648, %v13610_v23 }
0x10b7   : > { %v7711_v31 = vsel %vm7710_vm5, %v9686_v2, %v7707_v61  ;;  %v7720_v54 = vsub.f32 1.0, %v7719_v49  ;;  %v7734_v53 = vmul.f32 %v9694_v51, %v13604_v41  ;;  %vm7725_vm10 = vmor %vm7723_vm6, %vm7724_vm8  ;;  %vm7739_vm11 = vweird.f32 %v9694_v51 }
0x10b8   : > { %v7716_v48 = vsel %vm7713_vm4, %v7715_v40, %v7711_v31  ;;  %9699 = vrcp.f32 %v13615_v52  ;;  %vm7740_vm13 = vmor %vm7738_vm9, %vm7739_vm11  ;;  %vm7753_vm14 = vweird.f32 %v13610_v23  ;;  %v7757_v42 = vand.u32 2147483647, %v13610_v23 }
0x10b9   : > { %v7915_v25 = vmul.f32 %v7716_v48, %v7547_v47  ;;  %v7721_v37 = vmul.f32 %v9690_v33, %v7720_v54  ;;  %v7735_v29 = vsub.f32 1.0, %v7734_v53  ;;  %9701 = vpow2.f32 %v9015_v45 }
0x10ba   : > { %v13627_v17 = vpop.f32.mrf.mxu2  ;;  %v7760_v10 = vor.u32 1.1754944e-38, %v7759_v7  ;;  %v7774_v40 = vand.u32 2147483648, %v13615_v52  ;;  %v7772_v54 = vand.u32 2147483647, %v13615_v52  ;;  %vm7758_vm3 = vcmp.eq.f32.partialorder %v7757_v42, 8.507059e+37 }
0x10bb   : > { %v9696_v57 = vpop.eup %9695  ;;  %v7722_v8 = vadd.f32 %v9690_v33, %v7721_v37  ;;  %v8029_v28 = vmul.f32 %v7965_v20, %v7915_v25  ;;  %v9016_v44 = vmul.f32 -1.442695, %v13627_v17  ;;  %v7736_v15 = vmul.f32 %v9694_v51, %v7735_v29 }
0x10bc   : > { %v9698_v47 = vpop.eup %9697  ;;  %v13632_v59 = vadd.f32 1.0, %v9696_v57  ;;  %v13634_v18 = vpop.f32.mrf.mxu1  ;;  %vm7768_vm4 = vweird.f32 %v13615_v52  ;;  %v7775_v29 = vor.u32 1.1754944e-38, %v7774_v40  ;;  %vm7773_vm6 = vcmp.eq.f32.partialorder %v7772_v54, 8.507059e+37 }
0x10bd   : > { %v7726_v62 = vsel %vm7725_vm10, %v9690_v33, %v7722_v8  ;;  %v7749_v36 = vmul.f32 %v9698_v47, %v13610_v23  ;;  %9703 = vpow2.f32 %v9016_v44  ;;  %8094 = vmatmul.f32.gmra.mxu1 %v8029_v28  ;;  %v7737_v58 = vadd.f32 %v9694_v51, %v7736_v15 }
0x10be   : > { %v7731_v13 = vsel %vm13618_vm7, %v7730_v1, %v7726_v62  ;;  %9705 = vrcp.f32 %v13632_v59  ;;  %v9700_v2 = vpop.eup %9699  ;;  %v9017_v33 = vmul.f32 -1.442695, %v13634_v18  ;;  %vm7754_vm0 = vweird.f32 %v9698_v47 }
0x10bf   : > { %v7916_v35 = vmul.f32 %v7731_v13, %v13592_v56  ;;  %v7750_v60 = vsub.f32 1.0, %v7749_v36  ;;  %v7741_v5 = vsel %vm7740_vm13, %v9694_v51, %v7737_v58  ;;  %v7764_v19 = vmul.f32 %v9700_v2, %v13615_v52  ;;  %v9702_v32 = vpop.eup %9701  ;;  %vm7755_vm15 = vmor %vm7753_vm14, %vm7754_vm0 }
0x10c0   : > { %v7746_v56 = vsel %vm13636_vm12, %v7745_v50, %v7741_v5  ;;  %v13656_v14 = vadd.f32 1.0, %v9702_v32  ;;  %9707 = vpow2.f32 %v9017_v33  ;;  %vm7769_vm2 = vweird.f32 %v9700_v2  ;;  %v8012_v33 = vpop.f32.mrf.mxu0 }
0x10c1   : > { %v8030_v55 = vmul.f32 %v8006_v46, %v7916_v35  ;;  %v7751_v61 = vmul.f32 %v9698_v47, %v7750_v60  ;;  %v7917_v41 = vmul.f32 %v7746_v56, %v13595_v22  ;;  %v7765_v49 = vsub.f32 1.0, %v7764_v19  ;;  %vm7770_vm5 = vmor %vm7768_vm4, %vm7769_vm2 }
0x10c2   : > { %v13658_v20 = vpop.f32.mrf.mxu2  ;;  %9709 = vrcp.f32 %v13656_v14  ;;  %v7789_v8 = vand.u32 2147483648, %v13632_v59  ;;  %v7787_v52 = vand.u32 2147483647, %v13632_v59  ;;  %vm7783_vm8 = vweird.f32 %v13632_v59 }
0x10c3   : > { %v9704_v51 = vpop.eup %9703  ;;  %v7752_v31 = vadd.f32 %v9698_v47, %v7751_v61  ;;  %v9018_v45 = vmul.f32 -1.442695, %v13658_v20  ;;  %8135 = vmatmul.f32.gmra.mxu2 %v8030_v55  ;;  %v8031_v22 = vmul.f32 %v7968_v9, %v7917_v41  ;;  %v7766_v53 = vmul.f32 %v9700_v2, %v7765_v49 }
0x10c4   : > { %v9706_v48 = vpop.eup %9705  ;;  %v13667_v37 = vpop.f32.mrf.mxu1  ;;  %v13669_v0 = vadd.f32 1.0, %v9704_v51  ;;  %v7802_v42 = vand.u32 2147483647, %v13656_v14  ;;  %vm7788_vm10 = vcmp.eq.f32.partialorder %v7787_v52, 8.507059e+37  ;;  %vm7798_vm12 = vweird.f32 %v13656_v14 }
0x10c5   : > { %v7756_v26 = vsel %vm7755_vm15, %v9698_v47, %v7752_v31  ;;  %v7779_v25 = vmul.f32 %v9706_v48, %v13632_v59  ;;  %v7767_v1 = vadd.f32 %v9700_v2, %v7766_v53  ;;  %8097 = vmatmul.f32.gmra.mxu1 %v8031_v22  ;;  %9711 = vpow2.f32 %v9018_v45 }
0x10c6   : > { %v7761_v46 = vsel %vm7758_vm3, %v7760_v10, %v7756_v26  ;;  %9713 = vrcp.f32 %v13669_v0  ;;  %v9708_v44 = vpop.eup %9707  ;;  %vm7784_vm7 = vweird.f32 %v9706_v48  ;;  %v9019_v13 = vmul.f32 -1.442695, %v13667_v37 }
0x10c7   : > { %v7918_v23 = vmul.f32 %v7761_v46, %v13598_v21  ;;  %v7780_v57 = vsub.f32 1.0, %v7779_v25  ;;  %v7771_v28 = vsel %vm7770_vm5, %v9700_v2, %v7767_v1  ;;  %v7971_v21 = vpop.f32.mrf.mxu3  ;;  %v13676_v36 = vadd.f32 1.0, %v9708_v44  ;;  %vm7785_vm9 = vmor %vm7783_vm8, %vm7784_vm7 }
0x10c8   : > { %v7776_v15 = vsel %vm7773_vm6, %v7775_v29, %v7771_v28  ;;  %v9710_v62 = vpop.eup %9709  ;;  %v7790_v2 = vor.u32 1.1754944e-38, %v7789_v8  ;;  %vm13694_vm13 = vcmp.eq.f32.partialorder %v7802_v42, 8.507059e+37  ;;  %vm7813_vm14 = vweird.f32 %v13669_v0 }
0x10c9   : > { %v8032_v47 = vmul.f32 %v8009_v27, %v7918_v23  ;;  %v7781_v7 = vmul.f32 %v9706_v48, %v7780_v57  ;;  %v7919_v3 = vmul.f32 %v7776_v15, %v13601_v43  ;;  %v7794_v35 = vmul.f32 %v9710_v62, %v13656_v14 }
0x10ca   : > { %v13679_v58 = vpop.f32.mrf.mxu2  ;;  %v7804_v43 = vand.u32 2147483648, %v13656_v14  ;;  %9715 = vrcp.f32 %v13676_v36  ;;  %vm7799_vm11 = vweird.f32 %v9710_v62  ;;  %v7819_v27 = vand.u32 2147483648, %v13669_v0 }
0x10cb   : > { %v7782_v50 = vadd.f32 %v9706_v48, %v7781_v7  ;;  %8138 = vmatmul.f32.gmra.mxu2 %v8032_v47  ;;  %v8033_v60 = vmul.f32 %v7971_v21, %v7919_v3  ;;  %v9712_v5 = vpop.eup %9711  ;;  %v7795_v9 = vsub.f32 1.0, %v7794_v35  ;;  %9717 = vpow2.f32 %v9019_v13  ;;  %vm7800_vm0 = vmor %vm7798_vm12, %vm7799_vm11 }
0x10cc   : > { %v9714_v19 = vpop.eup %9713  ;;  %v13686_v59 = vadd.f32 1.0, %v9712_v5  ;;  %v9020_v55 = vmul.f32 -1.442695, %v13679_v58  ;;  %v13691_v49 = vpop.f32.mrf.mxu1  ;;  %v7805_v51 = vor.u32 1.1754944e-38, %v7804_v43  ;;  %v7832_v23 = vand.u32 2147483647, %v13676_v36 }
0x10cd   : > { %v7786_v10 = vsel %vm7785_vm9, %v9706_v48, %v7782_v50  ;;  %8100 = vmatmul.f32.gmra.mxu1 %v8033_v60  ;;  %v7796_v61 = vmul.f32 %v9710_v62, %v7795_v9  ;;  %v7809_v41 = vmul.f32 %v9714_v19, %v13669_v0  ;;  %v7817_v48 = vand.u32 2147483647, %v13669_v0  ;;  %v8015_v50 = vpop.f32.mrf.mxu0 }
0x10ce   : > { %v7791_v32 = vsel %vm7788_vm10, %v7790_v2, %v7786_v10  ;;  %9719 = vrcp.f32 %v13686_v59  ;;  %v9021_v14 = vmul.f32 -1.442695, %v13691_v49  ;;  %vm7814_vm15 = vweird.f32 %v9714_v19 }
0x10cf   : > { %v7920_v56 = vmul.f32 %v7791_v32, %v13607_v63  ;;  %v7797_v54 = vadd.f32 %v9710_v62, %v7796_v61  ;;  %v7810_v45 = vsub.f32 1.0, %v7809_v41  ;;  %9721 = vpow2.f32 %v9020_v55  ;;  %v7974_v29 = vpop.f32.mrf.mxu3  ;;  %vm7815_vm2 = vmor %vm7813_vm14, %vm7814_vm15 }
0x10d0   : > { %v9716_v63 = vpop.eup %9715  ;;  %v7834_v57 = vand.u32 2147483648, %v13676_v36  ;;  %9723 = vpow2.f32 %v9021_v14  ;;  %vm7818_vm3 = vcmp.eq.f32.partialorder %v7817_v48, 8.507059e+37  ;;  %v7820_v15 = vor.u32 1.1754944e-38, %v7819_v27 }
0x10d1   : > { %v8034_v31 = vmul.f32 %v8012_v33, %v7920_v56  ;;  %v7801_v22 = vsel %vm7800_vm0, %v9710_v62, %v7797_v54  ;;  %v7811_v53 = vmul.f32 %v9714_v19, %v7810_v45  ;;  %v7824_v26 = vmul.f32 %v9716_v63, %v13676_v36  ;;  %v9718_v46 = vpop.eup %9717 }
0x10d2   : > { %v13704_v25 = vpop.f32.mrf.mxu2  ;;  %v7806_v1 = vsel %vm13694_vm13, %v7805_v51, %v7801_v22  ;;  %v13711_v44 = vadd.f32 1.0, %v9718_v46  ;;  %vm7829_vm4 = vweird.f32 %v9716_v63  ;;  %vm7828_vm5 = vweird.f32 %v13676_v36 }
0x10d3   : > { %8141 = vmatmul.f32.gmra.mxu2 %v8034_v31  ;;  %v7921_v8 = vmul.f32 %v7806_v1, %v13612_v4  ;;  %v7812_v28 = vadd.f32 %v9714_v19, %v7811_v53  ;;  %v7825_v52 = vsub.f32 1.0, %v7824_v26  ;;  %v9022_v7 = vmul.f32 -1.442695, %v13704_v25  ;;  %vm7830_vm7 = vmor %vm7828_vm5, %vm7829_vm4 }
0x10d4   : > { %v9720_v47 = vpop.eup %9719  ;;  %vm13719_vm6 = vcmp.eq.f32.partialorder %v7832_v23, 8.507059e+37  ;;  %9725 = vrcp.f32 %v13711_v44  ;;  %v7835_v42 = vor.u32 1.1754944e-38, %v7834_v57  ;;  %v7847_v10 = vand.u32 2147483647, %v13686_v59 }
0x10d5   : > { %v7816_v62 = vsel %vm7815_vm2, %v9714_v19, %v7812_v28  ;;  %v8035_v3 = vmul.f32 %v7974_v29, %v7921_v8  ;;  %v7826_v21 = vmul.f32 %v9716_v63, %v7825_v52  ;;  %v7839_v13 = vmul.f32 %v9720_v47, %v13686_v59  ;;  %v9722_v4 = vpop.eup %9721 }
0x10d6   : > { %v7821_v2 = vsel %vm7818_vm3, %v7820_v15, %v7816_v62  ;;  %v9724_v5 = vpop.eup %9723  ;;  %v7849_v9 = vand.u32 2147483648, %v13686_v59  ;;  %v7670_v36 = vadd.f32 1.0, %v9722_v4  ;;  %9727 = vpow2.f32 %v9022_v7 }
0x10d7   : > { %v7922_v0 = vmul.f32 %v7821_v2, %v13627_v17  ;;  %v7827_v60 = vadd.f32 %v9716_v63, %v7826_v21  ;;  %v7840_v43 = vsub.f32 1.0, %v7839_v13  ;;  %8103 = vmatmul.f32.gmra.mxu1 %v8035_v3  ;;  %vm7844_vm8 = vweird.f32 %v9720_v47  ;;  %v7977_v40 = vpop.f32.mrf.mxu3 }
0x10d8   : > { %9729 = vrcp.f32 %v7670_v36  ;;  %vm7843_vm9 = vweird.f32 %v13686_v59  ;;  %v7850_v41 = vor.u32 1.1754944e-38, %v7849_v9  ;;  %v7671_v51 = vadd.f32 1.0, %v9724_v5  ;;  %v8018_v59 = vpop.f32.mrf.mxu0 }
0x10d9   : > { %v8036_v19 = vmul.f32 %v8015_v50, %v7922_v0  ;;  %v7831_v33 = vsel %vm7830_vm7, %v9716_v63, %v7827_v60  ;;  %v7841_v32 = vmul.f32 %v9720_v47, %v7840_v43  ;;  %vm7845_vm10 = vmor %vm7843_vm9, %vm7844_vm8  ;;  %vm7848_vm11 = vcmp.eq.f32.partialorder %v7847_v10, 8.507059e+37 }
0x10da   : > { %v7836_v17 = vsel %vm13719_vm6, %v7835_v42, %v7831_v33  ;;  %v9726_v61 = vpop.eup %9725  ;;  %9731 = vrcp.f32 %v7671_v51  ;;  %v7862_v22 = vand.u32 2147483647, %v13711_v44  ;;  %v7864_v53 = vand.u32 2147483648, %v13711_v44 }
0x10db   : > { %v7923_v55 = vmul.f32 %v7836_v17, %v13634_v18  ;;  %v7842_v56 = vadd.f32 %v9720_v47, %v7841_v32  ;;  %8144 = vmatmul.f32.gmra.mxu2 %v8036_v19  ;;  %v7854_v45 = vmul.f32 %v9726_v61, %v13711_v44  ;;  %vm7859_vm12 = vweird.f32 %v9726_v61 }
0x10dc   : > { %v9728_v63 = vpop.eup %9727  ;;  %vm7858_vm13 = vweird.f32 %v13711_v44  ;;  %v7877_v57 = vand.u32 2147483647, %v7670_v36  ;;  %vm7863_vm0 = vcmp.eq.f32.partialorder %v7862_v22, 8.507059e+37  ;;  %v7865_v28 = vor.u32 1.1754944e-38, %v7864_v53 }
0x10dd   : > { %v7846_v31 = vsel %vm7845_vm10, %v9720_v47, %v7842_v56  ;;  %v8037_v54 = vmul.f32 %v7977_v40, %v7923_v55  ;;  %v7855_v18 = vsub.f32 1.0, %v7854_v45  ;;  %v13736_v26 = vadd.f32 1.0, %v9728_v63  ;;  %vm7860_vm14 = vmor %vm7858_vm13, %vm7859_vm12 }
0x10de   : > { %v7851_v48 = vsel %vm7848_vm11, %v7850_v41, %v7846_v31  ;;  %v9730_v14 = vpop.eup %9729  ;;  %v7879_v52 = vand.u32 2147483648, %v7670_v36  ;;  %vm7873_vm2 = vweird.f32 %v7670_v36  ;;  %vm7878_vm3 = vcmp.eq.f32.partialorder %v7877_v57, 8.507059e+37 }
0x10df   : > { %v7924_v27 = vmul.f32 %v7851_v48, %v13658_v20  ;;  %8106 = vmatmul.f32.gmra.mxu1 %v8037_v54  ;;  %v7856_v1 = vmul.f32 %v9726_v61, %v7855_v18  ;;  %v7869_v29 = vmul.f32 %v9730_v14, %v7670_v36  ;;  %9733 = vrcp.f32 %v13736_v26  ;;  %v7980_v3 = vpop.f32.mrf.mxu3  ;;  %v13749_v18 = vld [vmem:[%s10108_s2 + $0x8] sm:$0x3f]  ;;  %s14052_s2 = sld [smem:[#allocation3_spill]] }
0x10e0   : > { %v9732_v8 = vpop.eup %9731  ;;  %vm7874_vm15 = vweird.f32 %v9730_v14  ;;  %v7880_v50 = vor.u32 1.1754944e-38, %v7879_v52  ;;  %v7892_v2 = vand.u32 2147483647, %v7671_v51  ;;  %v7894_v35 = vand.u32 2147483648, %v7671_v51  ;;  %v8021_v5 = vpop.f32.mrf.mxu0 }
0x10e1   : > { %v8038_v46 = vmul.f32 %v8018_v59, %v7924_v27  ;;  %v7857_v23 = vadd.f32 %v9726_v61, %v7856_v1  ;;  %v7870_v20 = vsub.f32 1.0, %v7869_v29  ;;  %v7884_v7 = vmul.f32 %v9732_v8, %v7671_v51  ;;  %vm7875_vm4 = vmor %vm7873_vm2, %vm7874_vm15 }
0x10e2   : > { %vm7889_vm5 = vweird.f32 %v9732_v8  ;;  %vm7888_vm6 = vweird.f32 %v7671_v51  ;;  %vm7893_vm8 = vcmp.eq.f32.partialorder %v7892_v2, 8.507059e+37  ;;  %v7895_v19 = vor.u32 1.1754944e-38, %v7894_v35 }
0x10e3   : > { %8147 = vmatmul.f32.gmra.mxu2 %v8038_v46  ;;  %v7861_v47 = vsel %vm7860_vm14, %v9726_v61, %v7857_v23  ;;  %v7871_v15 = vmul.f32 %v9730_v14, %v7870_v20  ;;  %v7885_v44 = vsub.f32 1.0, %v7884_v7  ;;  %vm7890_vm7 = vmor %vm7888_vm6, %vm7889_vm5  ;;  %v7907_v33 = vand.u32 2147483647, %v13736_v26 }
0x10e4   : > { %v7866_v62 = vsel %vm7863_vm0, %v7865_v28, %v7861_v47  ;;  %v7909_v32 = vand.u32 2147483648, %v13736_v26  ;;  %vm7903_vm10 = vweird.f32 %v13736_v26 }
0x10e5   : > { %v7925_v21 = vmul.f32 %v7866_v62, %v13667_v37  ;;  %v7872_v13 = vadd.f32 %v9730_v14, %v7871_v15  ;;  %v9734_v4 = vpop.eup %9733  ;;  %v7886_v42 = vmul.f32 %v9732_v8, %v7885_v44  ;;  %vm7908_vm12 = vcmp.eq.f32.partialorder %v7907_v33, 8.507059e+37 }
0x10e6   : > { %v7899_v43 = vmul.f32 %v9734_v4, %v13736_v26  ;;  %vm7904_vm9 = vweird.f32 %v9734_v4  ;;  %v7910_v40 = vor.u32 1.1754944e-38, %v7909_v32 }
0x10e7   : > { %v7876_v0 = vsel %vm7875_vm4, %v9730_v14, %v7872_v13  ;;  %v8039_v60 = vmul.f32 %v7980_v3, %v7925_v21  ;;  %v7887_v36 = vadd.f32 %v9732_v8, %v7886_v42  ;;  %vm7905_vm11 = vmor %vm7903_vm10, %vm7904_vm9  ;;  %v7983_v51 = vpop.f32.mrf.mxu3 }
0x10e8   : > { %v7881_v10 = vsel %vm7878_vm3, %v7880_v50, %v7876_v0  ;;  %v7900_v37 = vsub.f32 1.0, %v7899_v43  ;;  %v8024_v48 = vpop.f32.mrf.mxu0 }
0x10e9   : > { %v7926_v9 = vmul.f32 %v7881_v10, %v13679_v58  ;;  %8109 = vmatmul.f32.gmra.mxu1 %v8039_v60  ;;  %v7891_v55 = vsel %vm7890_vm7, %v9732_v8, %v7887_v36 }
0x10ea   : > { %v7901_v56 = vmul.f32 %v9734_v4, %v7900_v37  ;;  %v7896_v61 = vsel %vm7893_vm8, %v7895_v19, %v7891_v55 }
0x10eb   : > { %v8040_v17 = vmul.f32 %v8021_v5, %v7926_v9  ;;  %v7927_v41 = vmul.f32 %v7896_v61, %v13691_v49  ;;  %v8157_v49 = vperm.slane %v13749_v18, 3 }
0x10ec   : > { %v7902_v58 = vadd.f32 %v9734_v4, %v7901_v56 }
0x10ed   : > { %8150 = vmatmul.f32.gmra.mxu2 %v8040_v17  ;;  %v8041_v54 = vmul.f32 %v7983_v51, %v7927_v41 }
0x10ee   : > { %v7906_v31 = vsel %vm7905_vm11, %v9734_v4, %v7902_v58 }
0x10ef   : > { %v7911_v45 = vsel %vm7908_vm12, %v7910_v40, %v7906_v31 }
0x10f0   : > { %v7928_v63 = vmul.f32 %v7911_v45, %v13704_v25 }
0x10f1   : > { %8112 = vmatmul.f32.gmra.mxu1 %v8041_v54 }
0x10f2   : > { %v8042_v27 = vmul.f32 %v8024_v48, %v7928_v63 }
0x10f5   : > { %8153 = vmatmul.f32.gmra.mxu2 %v8042_v27 }
0x1112   : > { %v8092_v14 = vpop.f32.mrf.mxu1 }
0x111e   : > { %v8133_v59 = vpop.f32.mrf.mxu2 }
0x111f   : > { %v8134_v22 = vadd.f32 %v8133_v59, %v8092_v14 }
0x1121   : > { %v8158_v53 = vmul.f32 %v8157_v49, %v8134_v22 }
0x1123   : > { %v8166_v26 = vadd.f32 %v8158_v53, %v13387_v38 }
0x1125   : > { %v8174_v46 = vsel %vm1192_vm1, %v8166_v26, 0.0 }
0x1126   : > { %8175 = vadd.xlane.f32.xlu1 %v8174_v46 }
0x113a   : > { %v8095_v1 = vpop.f32.mrf.mxu1 }
0x1142   : > { %v8098_v20 = vpop.f32.mrf.mxu1 }
0x1146   : > { %v8136_v29 = vpop.f32.mrf.mxu2 }
0x1147   : > { %v8137_v25 = vadd.f32 %v8136_v29, %v8095_v1 }
0x1149   : > { %v8159_v23 = vmul.f32 %v8157_v49, %v8137_v25 }
0x114a   : > { %v8101_v7 = vpop.f32.mrf.mxu1 }
0x114b   : > { %v8167_v57 = vadd.f32 %v8159_v23, %v13398_v12 }
0x114d   : > { %v8177_v8 = vsel %vm1192_vm1, %v8167_v57, 0.0 }
0x114e   : > { %v8139_v28 = vpop.f32.mrf.mxu2  ;;  %8178 = vadd.xlane.f32.xlu0 %v8177_v8 }
0x114f   : > { %v8140_v52 = vadd.f32 %v8139_v28, %v8098_v20 }
0x1151   : > { %v8160_v47 = vmul.f32 %v8157_v49, %v8140_v52 }
0x1153   : > { %v8168_v15 = vadd.f32 %v8160_v47, %v13407_v11 }
0x1154   : > { %v8104_v12 = vpop.f32.mrf.mxu1 }
0x1155   : > { %v8180_v38 = vsel %vm1192_vm1, %v8168_v15, 0.0 }
0x1156   : > { %v8142_v62 = vpop.f32.mrf.mxu2  ;;  %8181 = vadd.xlane.f32.xlu2 %v8180_v38 }
0x1157   : > { %v8143_v3 = vadd.f32 %v8142_v62, %v8101_v7 }
0x1159   : > { %v8161_v21 = vmul.f32 %v8157_v49, %v8143_v3 }
0x115b   : > { %v8169_v13 = vadd.f32 %v8161_v21, %v13416_v6  ;;  %v8375_v21 = vld [vmem:[%s14052_s2 + $0x38] sm:$0xff] }
0x115c   : > { %v8107_v0 = vpop.f32.mrf.mxu1  ;;  %8412 = vmatpush.msra.mxu3 %v8375_v21 }
0x115d   : > { %v8183_v44 = vsel %vm1192_vm1, %v8169_v13, 0.0 }
0x115e   : > { %8184 = vadd.xlane.f32.xlu1 %v8183_v44  ;;  %v8145_v4 = vpop.f32.mrf.mxu2  ;;  %v8373_v44 = vld [vmem:[%s14052_s2 + $0x28] sm:$0xff] }
0x115f   : > { %v8146_v50 = vadd.f32 %v8145_v4, %v8104_v12  ;;  %v8372_v12 = vld [vmem:[%s14052_s2 + $0x20] sm:$0xff]  ;;  %v8371_v4 = vld [vmem:[%s14052_s2 + $0x18] sm:$0xff] }
0x1161   : > { %v8162_v2 = vmul.f32 %v8157_v49, %v8146_v50  ;;  %v8370_v50 = vld [vmem:[%s14052_s2 + $0x10] sm:$0xff] }
0x1163   : > { %v8170_v35 = vadd.f32 %v8162_v2, %v13426_v34 }
0x1165   : > { %v8186_v11 = vsel %vm1192_vm1, %v8170_v35, 0.0 }
0x1166   : > { %v8148_v60 = vpop.f32.mrf.mxu2  ;;  %8187 = vadd.xlane.f32.xlu0 %v8186_v11  ;;  %v8110_v10 = vpop.f32.mrf.mxu1  ;;  %v8369_v11 = vld [vmem:[%s14052_s2 + $0x8] sm:$0xff] }
0x1167   : > { %v8149_v42 = vadd.f32 %v8148_v60, %v8107_v0  ;;  %v8368_v60 = vld [vmem:[%s14052_s2] sm:$0xff] }
0x1169   : > { %v8163_v43 = vmul.f32 %v8157_v49, %v8149_v42 }
0x116b   : > { %v8171_v5 = vadd.f32 %v8163_v43, %v13436_v16 }
0x116d   : > { %v8189_v6 = vsel %vm1192_vm1, %v8171_v5, 0.0 }
0x116e   : > { %8190 = vadd.xlane.f32.xlu2 %v8189_v6  ;;  %v8113_v55 = vpop.f32.mrf.mxu1 }
0x1170   : > { %v8151_v9 = vpop.f32.mrf.mxu2 }
0x1171   : > { %v8152_v36 = vadd.f32 %v8151_v9, %v8110_v10 }
0x1173   : > { %v8164_v37 = vmul.f32 %v8157_v49, %v8152_v36 }
0x1175   : > { %v8172_v19 = vadd.f32 %v8164_v37, %v13446_v30 }
0x1177   : > { %v8192_v34 = vsel %vm1192_vm1, %v8172_v19, 0.0 }
0x1178   : > { %8193 = vadd.xlane.f32.xlu0 %v8192_v34  ;;  %v8154_v33 = vpop.f32.mrf.mxu2 }
0x1179   : > { %v8155_v56 = vadd.f32 %v8154_v33, %v8113_v55  ;;  %v13829_v55 = vperm.slane %v13749_v18, 4 }
0x117b   : > { %v8165_v41 = vmul.f32 %v8157_v49, %v8155_v56 }
0x117d   : > { %v8173_v30 = vadd.f32 %v8165_v41, %v13454_v39 }
0x117f   : > { %v8195_v40 = vsel %vm1192_vm1, %v8173_v30, 0.0 }
0x1199   : > { %v8176_v32 = vpop.xlane.xlu1 %8175 }
0x119a   : > { %v8198_v17 = vmul.f32 %v8176_v32, %v14042_v24  ;;  %v13826_v32 = vperm.slane %v13749_v18, 5 }
0x119c   : > { %v13767_v61 = vsub.f32 %v8166_v26, %v8198_v17 }
0x119e   : > { %v8214_v16 = vmul.f32 %v13767_v61, %v13767_v61 }
0x11a0   : > { %v8222_v58 = vsel %vm1192_vm1, %v8214_v16, 0.0 }
0x11a1   : > { %8223 = vadd.xlane.f32.xlu1 %v8222_v58 }
0x11a9   : > { %8196 = vadd.xlane.f32.xlu1 %v8195_v40 }
0x11c1   : > { %v8179_v51 = vpop.xlane.xlu0 %8178 }
0x11c2   : > { %v8199_v31 = vmul.f32 %v8179_v51, %v14042_v24 }
0x11c4   : > { %v13775_v54 = vsub.f32 %v8167_v57, %v8199_v31 }
0x11c6   : > { %v8215_v45 = vmul.f32 %v13775_v54, %v13775_v54 }
0x11c8   : > { %v8225_v63 = vsel %vm1192_vm1, %v8215_v45, 0.0 }
0x11c9   : > { %v8182_v48 = vpop.xlane.xlu2 %8181  ;;  %8226 = vadd.xlane.f32.xlu2 %v8225_v63 }
0x11ca   : > { %v8200_v27 = vmul.f32 %v8182_v48, %v14042_v24 }
0x11cc   : > { %v13781_v49 = vsub.f32 %v8168_v15, %v8200_v27 }
0x11ce   : > { %v8216_v39 = vmul.f32 %v13781_v49, %v13781_v49 }
0x11d0   : > { %v8228_v14 = vsel %vm1192_vm1, %v8216_v39, 0.0 }
0x11d1   : > { %v8185_v59 = vpop.xlane.xlu1 %8184  ;;  %8229 = vadd.xlane.f32.xlu0 %v8228_v14 }
0x11d2   : > { %v8201_v22 = vmul.f32 %v8185_v59, %v14042_v24 }
0x11d4   : > { %v13787_v53 = vsub.f32 %v8169_v13, %v8201_v22  ;;  %v8374_v13 = vld [vmem:[%s14052_s2 + $0x30] sm:$0xff]  ;;  %s14054_s2 = sshll.u32 %s14056_s0, 3 }
0x11d5   : > { %8413 = vmatpush.msra.mxu3 %v8374_v13  ;;  %s1092_s3 = scalar_lea.vmem %s9992_s6, %s14054_s2 }
0x11d6   : > { %v8217_v26 = vmul.f32 %v13787_v53, %v13787_v53 }
0x11d7   : > { %8414 = vmatpush.msra.mxu3 %v8373_v44 }
0x11d8   : > { %v8231_v46 = vsel %vm1192_vm1, %v8217_v26, 0.0 }
0x11d9   : > { %8232 = vadd.xlane.f32.xlu2 %v8231_v46  ;;  %v8188_v1 = vpop.xlane.xlu0 %8187  ;;  %8415 = vmatpush.msra.mxu3 %v8372_v12 }
0x11da   : > { %v8202_v29 = vmul.f32 %v8188_v1, %v14042_v24 }
0x11db   : > { %8416 = vmatpush.msra.mxu3 %v8371_v4 }
0x11dc   : > { %v13793_v25 = vsub.f32 %v8170_v35, %v8202_v29 }
0x11dd   : > { %8417 = vmatpush.msra.mxu3 %v8370_v50 }
0x11de   : > { %v8218_v23 = vmul.f32 %v13793_v25, %v13793_v25 }
0x11df   : > { %8418 = vmatpush.msra.mxu3 %v8369_v11 }
0x11e0   : > { %v8234_v20 = vsel %vm1192_vm1, %v8218_v23, 0.0 }
0x11e1   : > { %v8191_v57 = vpop.xlane.xlu2 %8190  ;;  %8235 = vadd.xlane.f32.xlu1 %v8234_v20  ;;  %8419 = vmatpush.msra.mxu3 %v8368_v60 }
0x11e2   : > { %v8203_v8 = vmul.f32 %v8191_v57, %v14042_v24 }
0x11e4   : > { %v13799_v28 = vsub.f32 %v8171_v5, %v8203_v8 }
0x11e6   : > { %v8219_v52 = vmul.f32 %v13799_v28, %v13799_v28 }
0x11e8   : > { %v8237_v47 = vsel %vm1192_vm1, %v8219_v52, 0.0 }
0x11e9   : > { %8238 = vadd.xlane.f32.xlu0 %v8237_v47 }
0x11eb   : > { %v8194_v15 = vpop.xlane.xlu0 %8193 }
0x11ec   : > { %v8204_v7 = vmul.f32 %v8194_v15, %v14042_v24 }
0x11ee   : > { %v13805_v38 = vsub.f32 %v8172_v19, %v8204_v7 }
0x11f0   : > { %v8220_v62 = vmul.f32 %v13805_v38, %v13805_v38 }
0x11f2   : > { %v8240_v3 = vsel %vm1192_vm1, %v8220_v62, 0.0 }
0x11f3   : > { %8241 = vadd.xlane.f32.xlu2 %v8240_v3 }
0x1214   : > { %v8224_v2 = vpop.xlane.xlu1 %8223 }
0x1215   : > { %v8246_v35 = vmul.f32 %v8224_v2, %v14042_v24 }
0x1217   : > { %v8254_v0 = vadd.f32 1e-06, %v8246_v35 }
0x1219   : > { %9735 = vrsqrt.f32 %v8254_v0  ;;  %vm8268_vm14 = vweird.f32 %v8254_v0 }
0x121c   : > { %v8197_v42 = vpop.xlane.xlu1 %8196 }
0x121d   : > { %v8205_v43 = vmul.f32 %v8197_v42, %v14042_v24 }
0x121f   : > { %v9736_v5 = vpop.eup %9735  ;;  %v13820_v6 = vsub.f32 %v8173_v30, %v8205_v43 }
0x1220   : > { %v8263_v10 = vmul.f32 %v9736_v5, %v8254_v0  ;;  %vm8269_vm13 = vweird.f32 %v9736_v5 }
0x1221   : > { %v8221_v9 = vmul.f32 %v13820_v6, %v13820_v6  ;;  %vm8270_vm0 = vmor %vm8268_vm14, %vm8269_vm13 }
0x1222   : > { %v8264_v36 = vmul.f32 %v9736_v5, %v8263_v10 }
0x1223   : > { %v8243_v37 = vsel %vm1192_vm1, %v8221_v9, 0.0 }
0x1224   : > { %v8265_v19 = vmul.f32 0.5, %v8264_v36  ;;  %8244 = vadd.xlane.f32.xlu1 %v8243_v37 }
0x1226   : > { %v8266_v34 = vsub.f32 1.5, %v8265_v19 }
0x1228   : > { %v8267_v33 = vmul.f32 %v9736_v5, %v8266_v34 }
0x122a   : > { %v8271_v17 = vsel %vm8270_vm0, %v9736_v5, %v8267_v33 }
0x122b   : > { %v8342_v56 = vmul.f32 %v8271_v17, %v13767_v61 }
0x122d   : > { %v8351_v16 = vmul.f32 %v13826_v32, %v8342_v56 }
0x122f   : > { %v8360_v41 = vadd.f32 %v13829_v55, %v8351_v16 }
0x1231   : > { %9039 = vmatmul.msk.f32.vlgmr.msra.gmra.mxu3 %vm1192_vm1, %v8360_v41 }
0x123c   : > { %v8227_v58 = vpop.xlane.xlu2 %8226 }
0x123d   : > { %v8247_v30 = vmul.f32 %v8227_v58, %v14042_v24 }
0x123f   : > { %v8255_v40 = vadd.f32 1e-06, %v8247_v30 }
0x1241   : > { %9737 = vrsqrt.f32 %v8255_v40  ;;  %vm8278_vm2 = vweird.f32 %v8255_v40 }
0x1244   : > { %v8230_v51 = vpop.xlane.xlu0 %8229 }
0x1245   : > { %v8248_v31 = vmul.f32 %v8230_v51, %v14042_v24 }
0x1247   : > { %v9738_v45 = vpop.eup %9737  ;;  %v8256_v63 = vadd.f32 1e-06, %v8248_v31 }
0x1248   : > { %v8273_v18 = vmul.f32 %v9738_v45, %v8255_v40  ;;  %vm8279_vm15 = vweird.f32 %v9738_v45 }
0x1249   : > { %9739 = vrsqrt.f32 %v8256_v63  ;;  %vm8280_vm3 = vmor %vm8278_vm2, %vm8279_vm15  ;;  %vm8288_vm5 = vweird.f32 %v8256_v63 }
0x124a   : > { %v8274_v48 = vmul.f32 %v9738_v45, %v8273_v18 }
0x124c   : > { %v8275_v61 = vmul.f32 0.5, %v8274_v48  ;;  %v8233_v27 = vpop.xlane.xlu2 %8232 }
0x124d   : > { %v8249_v39 = vmul.f32 %v8233_v27, %v14042_v24 }
0x124e   : > { %v8276_v14 = vsub.f32 1.5, %v8275_v61 }
0x124f   : > { %v9740_v59 = vpop.eup %9739  ;;  %v8257_v22 = vadd.f32 1e-06, %v8249_v39 }
0x1250   : > { %v8277_v26 = vmul.f32 %v9738_v45, %v8276_v14  ;;  %v8283_v46 = vmul.f32 %v9740_v59, %v8256_v63  ;;  %vm8289_vm4 = vweird.f32 %v9740_v59 }
0x1251   : > { %9741 = vrsqrt.f32 %v8257_v22  ;;  %vm8290_vm6 = vmor %vm8288_vm5, %vm8289_vm4  ;;  %vm8298_vm8 = vweird.f32 %v8257_v22 }
0x1252   : > { %v8281_v1 = vsel %vm8280_vm3, %v9738_v45, %v8277_v26  ;;  %v8284_v29 = vmul.f32 %v9740_v59, %v8283_v46 }
0x1253   : > { %v8343_v23 = vmul.f32 %v8281_v1, %v13775_v54 }
0x1254   : > { %v8285_v20 = vmul.f32 0.5, %v8284_v29  ;;  %v8236_v52 = vpop.xlane.xlu1 %8235 }
0x1255   : > { %v8352_v57 = vmul.f32 %v13826_v32, %v8343_v23  ;;  %v8250_v15 = vmul.f32 %v8236_v52, %v14042_v24 }
0x1256   : > { %v8286_v8 = vsub.f32 1.5, %v8285_v20 }
0x1257   : > { %v9742_v47 = vpop.eup %9741  ;;  %v8361_v7 = vadd.f32 %v13829_v55, %v8352_v57  ;;  %v8258_v21 = vadd.f32 1e-06, %v8250_v15 }
0x1258   : > { %v8287_v62 = vmul.f32 %v9740_v59, %v8286_v8  ;;  %v8293_v3 = vmul.f32 %v9742_v47, %v8257_v22  ;;  %vm8299_vm7 = vweird.f32 %v9742_v47 }
0x1259   : > { %9040 = vmatmul.msk.f32.gmra.mxu3 %vm1192_vm1, %v8361_v7  ;;  %9743 = vrsqrt.f32 %v8258_v21  ;;  %vm8300_vm9 = vmor %vm8298_vm8, %vm8299_vm7  ;;  %vm8308_vm11 = vweird.f32 %v8258_v21 }
0x125a   : > { %v8291_v13 = vsel %vm8290_vm6, %v9740_v59, %v8287_v62  ;;  %v8294_v54 = vmul.f32 %v9742_v47, %v8293_v3 }
0x125b   : > { %v8344_v44 = vmul.f32 %v8291_v13, %v13781_v49  ;;  %v9220_v13 = vld [vmem:[%s14053_s1] ss:$0 sm:$0xff] }
0x125c   : > { %v8295_v12 = vmul.f32 0.5, %v8294_v54  ;;  %v8239_v2 = vpop.xlane.xlu0 %8238 }
0x125d   : > { %v8353_v4 = vmul.f32 %v13826_v32, %v8344_v44  ;;  %v8251_v35 = vmul.f32 %v8239_v2, %v14042_v24 }
0x125e   : > { %v8296_v50 = vsub.f32 1.5, %v8295_v12 }
0x125f   : > { %v8362_v11 = vadd.f32 %v13829_v55, %v8353_v4  ;;  %v9744_v60 = vpop.eup %9743  ;;  %v8259_v42 = vadd.f32 1e-06, %v8251_v35 }
0x1260   : > { %v8297_v0 = vmul.f32 %v9742_v47, %v8296_v50  ;;  %v8303_v49 = vmul.f32 %v9744_v60, %v8258_v21  ;;  %vm8309_vm10 = vweird.f32 %v9744_v60 }
0x1261   : > { %9041 = vmatmul.msk.f32.gmra.mxu3 %vm1192_vm1, %v8362_v11  ;;  %9745 = vrsqrt.f32 %v8259_v42  ;;  %vm8310_vm12 = vmor %vm8308_vm11, %vm8309_vm10  ;;  %vm8318_vm14 = vweird.f32 %v8259_v42 }
0x1262   : > { %v8301_v43 = vsel %vm8300_vm9, %v9742_v47, %v8297_v0  ;;  %v8304_v10 = vmul.f32 %v9744_v60, %v8303_v49 }
0x1263   : > { %v8345_v5 = vmul.f32 %v8301_v43, %v13787_v53 }
0x1264   : > { %v8305_v36 = vmul.f32 0.5, %v8304_v10 }
0x1265   : > { %v8354_v9 = vmul.f32 %v13826_v32, %v8345_v5 }
0x1266   : > { %v8306_v19 = vsub.f32 1.5, %v8305_v36  ;;  %v8242_v56 = vpop.xlane.xlu2 %8241 }
0x1267   : > { %v8363_v37 = vadd.f32 %v13829_v55, %v8354_v9  ;;  %v9746_v34 = vpop.eup %9745  ;;  %v8252_v16 = vmul.f32 %v8242_v56, %v14042_v24 }
0x1268   : > { %v8307_v33 = vmul.f32 %v9744_v60, %v8306_v19  ;;  %v8313_v17 = vmul.f32 %v9746_v34, %v8259_v42  ;;  %vm8319_vm13 = vweird.f32 %v9746_v34 }
0x1269   : > { %9042 = vmatmul.msk.f32.gmra.mxu3 %vm1192_vm1, %v8363_v37  ;;  %v8260_v30 = vadd.f32 1e-06, %v8252_v16  ;;  %vm8320_vm0 = vmor %vm8318_vm14, %vm8319_vm13 }
0x126a   : > { %v8311_v53 = vsel %vm8310_vm12, %v9744_v60, %v8307_v33  ;;  %v8314_v41 = vmul.f32 %v9746_v34, %v8313_v17 }
0x126b   : > { %v8346_v58 = vmul.f32 %v8311_v53, %v13793_v25  ;;  %9747 = vrsqrt.f32 %v8260_v30  ;;  %vm8328_vm2 = vweird.f32 %v8260_v30 }
0x126c   : > { %v8315_v40 = vmul.f32 0.5, %v8314_v41 }
0x126d   : > { %v8355_v51 = vmul.f32 %v13826_v32, %v8346_v58 }
0x126e   : > { %v8316_v31 = vsub.f32 1.5, %v8315_v40 }
0x126f   : > { %v8364_v45 = vadd.f32 %v13829_v55, %v8355_v51 }
0x1270   : > { %v8317_v63 = vmul.f32 %v9746_v34, %v8316_v31 }
0x1271   : > { %9043 = vmatmul.msk.f32.gmra.mxu3 %vm1192_vm1, %v8364_v45  ;;  %v9748_v48 = vpop.eup %9747 }
0x1272   : > { %v8321_v18 = vsel %vm8320_vm0, %v9746_v34, %v8317_v63  ;;  %v8323_v27 = vmul.f32 %v9748_v48, %v8260_v30  ;;  %vm8329_vm15 = vweird.f32 %v9748_v48 }
0x1273   : > { %v8347_v61 = vmul.f32 %v8321_v18, %v13799_v28  ;;  %vm8330_vm3 = vmor %vm8328_vm2, %vm8329_vm15 }
0x1274   : > { %v8324_v39 = vmul.f32 %v9748_v48, %v8323_v27 }
0x1275   : > { %v8356_v25 = vmul.f32 %v13826_v32, %v8347_v61 }
0x1276   : > { %v8325_v59 = vmul.f32 0.5, %v8324_v39 }
0x1277   : > { %v8365_v14 = vadd.f32 %v13829_v55, %v8356_v25 }
0x1278   : > { %v8326_v22 = vsub.f32 1.5, %v8325_v59 }
0x1279   : > { %9044 = vmatmul.msk.f32.gmra.mxu3 %vm1192_vm1, %v8365_v14 }
0x127a   : > { %v8327_v26 = vmul.f32 %v9748_v48, %v8326_v22 }
0x127c   : > { %v8331_v46 = vsel %vm8330_vm3, %v9748_v48, %v8327_v26 }
0x127d   : > { %v8348_v1 = vmul.f32 %v8331_v46, %v13805_v38 }
0x127f   : > { %v8357_v29 = vmul.f32 %v13826_v32, %v8348_v1 }
0x1281   : > { %v8366_v28 = vadd.f32 %v13829_v55, %v8357_v29 }
0x1283   : > { %9045 = vmatmul.msk.f32.gmra.mxu3 %vm1192_vm1, %v8366_v28 }
0x1297   : > { %v8245_v23 = vpop.xlane.xlu1 %8244 }
0x1298   : > { %v8253_v20 = vmul.f32 %v8245_v23, %v14042_v24 }
0x129a   : > { %v8261_v57 = vadd.f32 1e-06, %v8253_v20 }
0x129c   : > { %9749 = vrsqrt.f32 %v8261_v57  ;;  %vm8338_vm5 = vweird.f32 %v8261_v57 }
0x12a2   : > { %v9750_v8 = vpop.eup %9749 }
0x12a3   : > { %v8333_v52 = vmul.f32 %v9750_v8, %v8261_v57  ;;  %vm8339_vm4 = vweird.f32 %v9750_v8 }
0x12a4   : > { %vm8340_vm6 = vmor %vm8338_vm5, %vm8339_vm4 }
0x12a5   : > { %v8334_v47 = vmul.f32 %v9750_v8, %v8333_v52 }
0x12a7   : > { %v8335_v15 = vmul.f32 0.5, %v8334_v47 }
0x12a9   : > { %v8336_v7 = vsub.f32 1.5, %v8335_v15 }
0x12ab   : > { %v8337_v38 = vmul.f32 %v9750_v8, %v8336_v7 }
0x12ad   : > { %v8341_v62 = vsel %vm8340_vm6, %v9750_v8, %v8337_v38 }
0x12ae   : > { %v8349_v3 = vmul.f32 %v8341_v62, %v13820_v6 }
0x12b0   : > { %v8358_v21 = vmul.f32 %v13826_v32, %v8349_v3 }
0x12b2   : > { %v8367_v24 = vadd.f32 %v13829_v55, %v8358_v21 }
0x12b4   : > { %v8421_v54 = vpop.f32.mrf.mxu3  ;;  %9046 = vmatmul.msk.f32.gmra.mxu3 %vm1192_vm1, %v8367_v24 }
0x12b5   : > { %v8422_v44 = vadd.f32 %v9220_v13, %v8421_v54 }
0x12b7   : > { %8445 = vst [vmem:[%s1092_s3] sm:$0xff] %v8422_v44 }
0x12dc   : > { %v8424_v12 = vpop.f32.mrf.mxu3 }
0x12dd   : > { %v8425_v4 = vadd.f32 %v9220_v13, %v8424_v12 }
0x12df   : > { %8446 = vst [vmem:[%s1092_s3 + $0x8] sm:$0xff] %v8425_v4 }
0x12e4   : > { %v8427_v50 = vpop.f32.mrf.mxu3 }
0x12e5   : > { %v8428_v2 = vadd.f32 %v9220_v13, %v8427_v50 }
0x12e7   : > { %8447 = vst [vmem:[%s1092_s3 + $0x10] sm:$0xff] %v8428_v2 }
0x12ec   : > { %v8430_v35 = vpop.f32.mrf.mxu3 }
0x12ed   : > { %v8431_v6 = vadd.f32 %v9220_v13, %v8430_v35 }
0x12ef   : > { %8448 = vst [vmem:[%s1092_s3 + $0x18] sm:$0xff] %v8431_v6 }
0x12f4   : > { %v8433_v32 = vpop.f32.mrf.mxu3 }
0x12f5   : > { %v8434_v11 = vadd.f32 %v9220_v13, %v8433_v32 }
0x12f7   : > { %8449 = vst [vmem:[%s1092_s3 + $0x20] sm:$0xff] %v8434_v11 }
0x12fc   : > { %v8436_v55 = vpop.f32.mrf.mxu3 }
0x12fd   : > { %v8437_v0 = vadd.f32 %v9220_v13, %v8436_v55 }
0x12ff   : > { %8450 = vst [vmem:[%s1092_s3 + $0x28] sm:$0xff] %v8437_v0 }
0x1306   : > { %v8439_v60 = vpop.f32.mrf.mxu3 }
0x1307   : > { %v8440_v42 = vadd.f32 %v9220_v13, %v8439_v60 }
0x1309   : > { %8451 = vst [vmem:[%s1092_s3 + $0x30] sm:$0xff] %v8440_v42 }
0x1337   : > { %v8442_v43 = vpop.f32.mrf.mxu3 }
0x1338   : > { %v8443_v49 = vadd.f32 %v9220_v13, %v8442_v43 }
0x133a   : > { %8452 = vst [vmem:[%s1092_s3 + $0x38] sm:$0xff] %v8443_v49 }
0x133b PF: > { %s81_s22 = sadd.s32 1, %s9768_s22  }
0x133c   : > { %p78_p5 = scmp.ge.s32.totalorder %s81_s22, 4  }
0x133e   :  { %80 = sbr.rel (!%p78_p5) target bundleno = 64 (0x40), region = 228 }

</bundles_post_ra>
